<compile_context>
chip_gen: v5e
topology: v5e:2x2
jax: 0.10.0
libtpu: 0.0.40
codegen_flags: <defaults>
</compile_context>

<pallas_src>
import jax
import jax.numpy as jnp
from jax.experimental import pallas as pl
from jax.experimental.pallas import tpu as pltpu


# ----------------------------------------------------------------------------
# Fused kernel: conv1 + ReLU + conv2 + ReLU + flatten + fc1 + ReLU + out
# ----------------------------------------------------------------------------
def _dqn_fused_kernel(p_ref, w1_ref, b1_ref, w2_ref, b2_ref, wr_ref, fb_ref,
                      ow_ref, ob_ref, o_ref):
    f32 = jnp.float32

    # conv1 (+bias, ReLU) for all 16 conv2-taps x 128 (padded) conv2 positions
    # in a single lane-dense MXU matmul: (16, 256) @ (256, 2048) -> (16, 2048).
    a1 = jnp.dot(w1_ref[...], p_ref[...], preferred_element_type=f32) + b1_ref[...]
    a1 = jnp.maximum(a1, 0.0)

    # conv2 (+bias, ReLU): sum over the 16 (kh2, kw2) taps.  Each tap is a
    # 128-aligned lane slice of a1 and a (32, 16) @ (16, 128) matmul.
    acc = jnp.zeros((32, 128), f32)
    for t in range(16):
        acc = acc + jnp.dot(w2_ref[t], a1[:, t * 128:(t + 1) * 128],
                            preferred_element_type=f32)
    y2 = jnp.maximum(acc + b2_ref[...], 0.0)      # (32, 128); cols >= 81 are
                                                  # padding and hit zero weights

    # fc1 (+bias, ReLU).  PyTorch's channel-major flatten is absorbed into the
    # trace-time layout of wr: wr[c] is the (128, 256) weight slab for conv2
    # output channel c (rows >= 81 are zero).
    h = fb_ref[...]                               # (1, 256)
    for c in range(32):
        h = h + jnp.dot(y2[c:c + 1, :], wr_ref[c], preferred_element_type=f32)
    h = jnp.maximum(h, 0.0)

    # output head: (1, 256) @ (256, 3) + bias
    o_ref[...] = (jnp.dot(h, ow_ref[...], preferred_element_type=f32)
                  + ob_ref[...]).astype(o_ref.dtype)


def _dqn_fused_call(patches, kp):
    vmem = pl.BlockSpec(memory_space=pltpu.MemorySpace.VMEM)
    return pl.pallas_call(
        _dqn_fused_kernel,
        out_shape=jax.ShapeDtypeStruct((1, 3), jnp.float32),
        in_specs=[vmem] * 9,
        out_specs=vmem,
        compiler_params=pltpu.CompilerParams(
            vmem_limit_bytes=32 * 1024 * 1024),
        cost_estimate=pl.CostEstimate(flops=21_000_000, transcendentals=0,
                                      bytes_accessed=7_000_000),
    )(patches, kp["w1"], kp["b1"], kp["w2"], kp["b2"], kp["wr"], kp["fb"],
      kp["ow"], kp["ob"])


# ----------------------------------------------------------------------------
# Input-side im2col (pure XLA data movement, static strided slices, no gathers)
# ----------------------------------------------------------------------------
def _double_im2col(x):
    """x: (4, 84, 84) -> (256, 2048) conv1 patch matrix, one 128-lane-padded
    column block per conv2 tap:

      out[ci*64 + kh1*8 + kw1, (kh2*4 + kw2)*128 + oh2*9 + ow2]
        = x[ci, 8*oh2 + 4*kh2 + kh1, 8*ow2 + 4*kw2 + kw1]
    """
    # conv1 im2col over the full 20x20 conv1 output grid -> (256, 20, 20)
    slabs = []
    for kh1 in range(8):
        for kw1 in range(8):
            slabs.append(jax.lax.slice(x, (0, kh1, kw1),
                                       (4, kh1 + 77, kw1 + 77), (1, 4, 4)))
    p1 = jnp.stack(slabs, axis=1).reshape(256, 20, 20)

    # conv2 receptive-field positions (stride 2, k=4) over that grid
    taps = []
    for kh2 in range(4):
        for kw2 in range(4):
            taps.append(jax.lax.slice(p1, (0, kh2, kw2),
                                      (256, kh2 + 17, kw2 + 17), (1, 2, 2)))
    p2 = jnp.stack(taps, axis=1).reshape(256, 16, 81)
    p2 = jnp.pad(p2, ((0, 0), (0, 0), (0, 47)))   # 81 -> 128 (lane aligned)
    return p2.reshape(256, 16 * 128)


# ----------------------------------------------------------------------------
# Parameters (PyTorch default-init style bounds) + trace-time rearrangement
# ----------------------------------------------------------------------------
def init_params(key):
    def uniform(key, shape, fan_in):
        bound = 1.0 / jnp.sqrt(jnp.float32(fan_in))
        return jax.random.uniform(key, shape, jnp.float32, -bound, bound)

    ks = jax.random.split(key, 8)
    return {
        "conv1_w": uniform(ks[0], (16, 4, 8, 8), 4 * 8 * 8),
        "conv1_b": uniform(ks[1], (16,), 4 * 8 * 8),
        "conv2_w": uniform(ks[2], (32, 16, 4, 4), 16 * 4 * 4),
        "conv2_b": uniform(ks[3], (32,), 16 * 4 * 4),
        "fc1_w":   uniform(ks[4], (256, 2592), 2592),
        "fc1_b":   uniform(ks[5], (256,), 2592),
        "out_w":   uniform(ks[6], (3, 256), 256),
        "out_b":   uniform(ks[7], (3,), 256),
    }


def prepare_params(params):
    """One-time rearrangement of PyTorch-layout weights into kernel layouts."""
    w1 = params["conv1_w"].reshape(16, 256)                   # (out, ci*64+kh*8+kw)
    b1 = params["conv1_b"].reshape(16, 1)
    w2 = params["conv2_w"].transpose(2, 3, 0, 1).reshape(16, 32, 16)  # [tap, co, ci]
    b2 = params["conv2_b"].reshape(32, 1)
    # fc1 weight as per-conv2-channel slabs wr[c, p, o] = fc1_w[o, c*81 + p],
    # zero-padded along p to 128 so padded conv2 positions contribute nothing.
    wr = params["fc1_w"].reshape(256, 32, 81).transpose(1, 2, 0)      # (32, 81, 256)
    wr = jnp.pad(wr, ((0, 0), (0, 47), (0, 0)))                       # (32, 128, 256)
    fb = params["fc1_b"].reshape(1, 256)
    ow = params["out_w"].T                                            # (256, 3)
    ob = params["out_b"].reshape(1, 3)
    return {"w1": w1, "b1": b1, "w2": w2, "b2": b2, "wr": wr,
            "fb": fb, "ow": ow, "ob": ob}


# ----------------------------------------------------------------------------
# Forward pass (mirrors _network.forward exactly)
# ----------------------------------------------------------------------------
def network_forward(kparams, t):
    # t: (1, 4, 84, 84) f32 NCHW.  The reference module's t.flatten()
    # collapses the batch dim, so batch must be 1.
    assert t.shape[0] == 1, "reference module's t.flatten() requires batch=1"
    x = t[0]                                   # (4, 84, 84)
    patches = _double_im2col(x)                # (256, 2048)
    q = _dqn_fused_call(patches, kparams)      # (1, 3)
    return q.reshape(3)


# Pure-JAX/XLA reference of the PyTorch module (for runtime verification).
def reference_forward(params, t):
    hi = jax.lax.Precision.HIGHEST
    y = jax.lax.conv_general_dilated(t, params["conv1_w"], (4, 4), "VALID",
                                     dimension_numbers=("NCHW", "OIHW", "NCHW"),
                                     precision=hi)
    y = jax.nn.relu(y + params["conv1_b"][None, :, None, None])
    y = jax.lax.conv_general_dilated(y, params["conv2_w"], (2, 2), "VALID",
                                     dimension_numbers=("NCHW", "OIHW", "NCHW"),
                                     precision=hi)
    y = jax.nn.relu(y + params["conv2_b"][None, :, None, None])
    flat = y.reshape(-1)                       # PyTorch flatten (batch=1)
    h = jax.nn.relu(jnp.dot(params["fc1_w"], flat, precision=hi) + params["fc1_b"])
    return jnp.dot(params["out_w"], h, precision=hi) + params["out_b"]


if __name__ == "__main__":
    key = jax.random.PRNGKey(0)
    pkey, xkey = jax.random.split(key)
    params = init_params(pkey)
    kparams = prepare_params(params)

    # input implied by the module: batch=1, 4 stacked frames, 84x84
    t = jax.random.normal(xkey, (1, 4, 84, 84), jnp.float32)

    fwd = jax.jit(network_forward)
    q_values = fwd(kparams, t)
    jax.block_until_ready(q_values)

    assert q_values.shape == (3,)
    assert q_values.dtype == jnp.float32

    # verify against the pure-JAX reference of the PyTorch module
    q_ref = jax.jit(reference_forward)(params, t)
    jax.block_until_ready(q_ref)
    assert jnp.allclose(q_values, q_ref, atol=2e-2, rtol=2e-2), (q_values, q_ref)

    print("KERNEL_OK")
</pallas_src>

<mosaic_0001>
module attributes {stable_mosaic.version = 11 : i64} {
  func.func @_dqn_fused_kernel(%arg0: memref<256x2048xf32, #tpu.memory_space<vmem>>, %arg1: memref<16x256xf32, #tpu.memory_space<vmem>>, %arg2: memref<16x1xf32, #tpu.memory_space<vmem>>, %arg3: memref<16x32x16xf32, #tpu.memory_space<vmem>>, %arg4: memref<32x1xf32, #tpu.memory_space<vmem>>, %arg5: memref<32x128x256xf32, #tpu.memory_space<vmem>>, %arg6: memref<1x256xf32, #tpu.memory_space<vmem>>, %arg7: memref<256x3xf32, #tpu.memory_space<vmem>>, %arg8: memref<1x3xf32, #tpu.memory_space<vmem>>, %arg9: memref<1x3xf32, #tpu.memory_space<vmem>>) attributes {dimension_semantics = [], scalar_prefetch = 0 : i64, scratch_operands = 0 : i64, tpu.core_type = #tpu.core_type<tc>} {
    %c0 = arith.constant 0 : index
    %c0_0 = arith.constant 0 : index
    %0 = vector.load %arg1[%c0, %c0_0] : memref<16x256xf32, #tpu.memory_space<vmem>>, vector<16x256xf32>
    %c0_1 = arith.constant 0 : index
    %c0_2 = arith.constant 0 : index
    %1 = vector.load %arg0[%c0_1, %c0_2] : memref<256x2048xf32, #tpu.memory_space<vmem>>, vector<256x2048xf32>
    %cst = arith.constant dense<0.000000e+00> : vector<16x2048xf32>
    %2 = tpu.matmul %0, %1, %cst {dimension_numbers = #tpu.dot_dimension_numbers<[1], [0], [0], [1], [0, 0, 1, 1], [], []>} : vector<16x256xf32>, vector<256x2048xf32>, vector<16x2048xf32> -> vector<16x2048xf32>
    %c0_3 = arith.constant 0 : index
    %c0_4 = arith.constant 0 : index
    %3 = vector.load %arg2[%c0_3, %c0_4] : memref<16x1xf32, #tpu.memory_space<vmem>>, vector<16x1xf32>
    %4 = vector.broadcast %3 : vector<16x1xf32> to vector<16x2048xf32>
    %5 = arith.addf %2, %4 : vector<16x2048xf32>
    %cst_5 = arith.constant 0.000000e+00 : f32
    %6 = vector.broadcast %cst_5 : f32 to vector<16x2048xf32>
    %7 = arith.maximumf %5, %6 : vector<16x2048xf32>
    %cst_6 = arith.constant 0.000000e+00 : f32
    %8 = vector.broadcast %cst_6 : f32 to vector<32x128xf32>
    %c0_7 = arith.constant 0 : index
    %c0_8 = arith.constant 0 : index
    %c0_9 = arith.constant 0 : index
    %9 = vector.load %arg3[%c0_7, %c0_8, %c0_9] : memref<16x32x16xf32, #tpu.memory_space<vmem>>, vector<1x32x16xf32>
    %10 = vector.shape_cast %9 : vector<1x32x16xf32> to vector<32x16xf32>
    %11 = vector.extract_strided_slice %7 {offsets = [0, 0], sizes = [16, 128], strides = [1, 1]} : vector<16x2048xf32> to vector<16x128xf32>
    %cst_10 = arith.constant dense<0.000000e+00> : vector<32x128xf32>
    %12 = tpu.matmul %10, %11, %cst_10 {dimension_numbers = #tpu.dot_dimension_numbers<[1], [0], [0], [1], [0, 0, 1, 1], [], []>} : vector<32x16xf32>, vector<16x128xf32>, vector<32x128xf32> -> vector<32x128xf32>
    %13 = arith.addf %8, %12 : vector<32x128xf32>
    %c1 = arith.constant 1 : index
    %c0_11 = arith.constant 0 : index
    %c0_12 = arith.constant 0 : index
    %14 = vector.load %arg3[%c1, %c0_11, %c0_12] : memref<16x32x16xf32, #tpu.memory_space<vmem>>, vector<1x32x16xf32>
    %15 = vector.shape_cast %14 : vector<1x32x16xf32> to vector<32x16xf32>
    %16 = vector.extract_strided_slice %7 {offsets = [0, 128], sizes = [16, 128], strides = [1, 1]} : vector<16x2048xf32> to vector<16x128xf32>
    %cst_13 = arith.constant dense<0.000000e+00> : vector<32x128xf32>
    %17 = tpu.matmul %15, %16, %cst_13 {dimension_numbers = #tpu.dot_dimension_numbers<[1], [0], [0], [1], [0, 0, 1, 1], [], []>} : vector<32x16xf32>, vector<16x128xf32>, vector<32x128xf32> -> vector<32x128xf32>
    %18 = arith.addf %13, %17 : vector<32x128xf32>
    %c2 = arith.constant 2 : index
    %c0_14 = arith.constant 0 : index
    %c0_15 = arith.constant 0 : index
    %19 = vector.load %arg3[%c2, %c0_14, %c0_15] : memref<16x32x16xf32, #tpu.memory_space<vmem>>, vector<1x32x16xf32>
    %20 = vector.shape_cast %19 : vector<1x32x16xf32> to vector<32x16xf32>
    %21 = vector.extract_strided_slice %7 {offsets = [0, 256], sizes = [16, 128], strides = [1, 1]} : vector<16x2048xf32> to vector<16x128xf32>
    %cst_16 = arith.constant dense<0.000000e+00> : vector<32x128xf32>
    %22 = tpu.matmul %20, %21, %cst_16 {dimension_numbers = #tpu.dot_dimension_numbers<[1], [0], [0], [1], [0, 0, 1, 1], [], []>} : vector<32x16xf32>, vector<16x128xf32>, vector<32x128xf32> -> vector<32x128xf32>
    %23 = arith.addf %18, %22 : vector<32x128xf32>
    %c3 = arith.constant 3 : index
    %c0_17 = arith.constant 0 : index
    %c0_18 = arith.constant 0 : index
    %24 = vector.load %arg3[%c3, %c0_17, %c0_18] : memref<16x32x16xf32, #tpu.memory_space<vmem>>, vector<1x32x16xf32>
    %25 = vector.shape_cast %24 : vector<1x32x16xf32> to vector<32x16xf32>
    %26 = vector.extract_strided_slice %7 {offsets = [0, 384], sizes = [16, 128], strides = [1, 1]} : vector<16x2048xf32> to vector<16x128xf32>
    %cst_19 = arith.constant dense<0.000000e+00> : vector<32x128xf32>
    %27 = tpu.matmul %25, %26, %cst_19 {dimension_numbers = #tpu.dot_dimension_numbers<[1], [0], [0], [1], [0, 0, 1, 1], [], []>} : vector<32x16xf32>, vector<16x128xf32>, vector<32x128xf32> -> vector<32x128xf32>
    %28 = arith.addf %23, %27 : vector<32x128xf32>
    %c4 = arith.constant 4 : index
    %c0_20 = arith.constant 0 : index
    %c0_21 = arith.constant 0 : index
    %29 = vector.load %arg3[%c4, %c0_20, %c0_21] : memref<16x32x16xf32, #tpu.memory_space<vmem>>, vector<1x32x16xf32>
    %30 = vector.shape_cast %29 : vector<1x32x16xf32> to vector<32x16xf32>
    %31 = vector.extract_strided_slice %7 {offsets = [0, 512], sizes = [16, 128], strides = [1, 1]} : vector<16x2048xf32> to vector<16x128xf32>
    %cst_22 = arith.constant dense<0.000000e+00> : vector<32x128xf32>
    %32 = tpu.matmul %30, %31, %cst_22 {dimension_numbers = #tpu.dot_dimension_numbers<[1], [0], [0], [1], [0, 0, 1, 1], [], []>} : vector<32x16xf32>, vector<16x128xf32>, vector<32x128xf32> -> vector<32x128xf32>
    %33 = arith.addf %28, %32 : vector<32x128xf32>
    %c5 = arith.constant 5 : index
    %c0_23 = arith.constant 0 : index
    %c0_24 = arith.constant 0 : index
    %34 = vector.load %arg3[%c5, %c0_23, %c0_24] : memref<16x32x16xf32, #tpu.memory_space<vmem>>, vector<1x32x16xf32>
    %35 = vector.shape_cast %34 : vector<1x32x16xf32> to vector<32x16xf32>
    %36 = vector.extract_strided_slice %7 {offsets = [0, 640], sizes = [16, 128], strides = [1, 1]} : vector<16x2048xf32> to vector<16x128xf32>
    %cst_25 = arith.constant dense<0.000000e+00> : vector<32x128xf32>
    %37 = tpu.matmul %35, %36, %cst_25 {dimension_numbers = #tpu.dot_dimension_numbers<[1], [0], [0], [1], [0, 0, 1, 1], [], []>} : vector<32x16xf32>, vector<16x128xf32>, vector<32x128xf32> -> vector<32x128xf32>
    %38 = arith.addf %33, %37 : vector<32x128xf32>
    %c6 = arith.constant 6 : index
    %c0_26 = arith.constant 0 : index
    %c0_27 = arith.constant 0 : index
    %39 = vector.load %arg3[%c6, %c0_26, %c0_27] : memref<16x32x16xf32, #tpu.memory_space<vmem>>, vector<1x32x16xf32>
    %40 = vector.shape_cast %39 : vector<1x32x16xf32> to vector<32x16xf32>
    %41 = vector.extract_strided_slice %7 {offsets = [0, 768], sizes = [16, 128], strides = [1, 1]} : vector<16x2048xf32> to vector<16x128xf32>
    %cst_28 = arith.constant dense<0.000000e+00> : vector<32x128xf32>
    %42 = tpu.matmul %40, %41, %cst_28 {dimension_numbers = #tpu.dot_dimension_numbers<[1], [0], [0], [1], [0, 0, 1, 1], [], []>} : vector<32x16xf32>, vector<16x128xf32>, vector<32x128xf32> -> vector<32x128xf32>
    %43 = arith.addf %38, %42 : vector<32x128xf32>
    %c7 = arith.constant 7 : index
    %c0_29 = arith.constant 0 : index
    %c0_30 = arith.constant 0 : index
    %44 = vector.load %arg3[%c7, %c0_29, %c0_30] : memref<16x32x16xf32, #tpu.memory_space<vmem>>, vector<1x32x16xf32>
    %45 = vector.shape_cast %44 : vector<1x32x16xf32> to vector<32x16xf32>
    %46 = vector.extract_strided_slice %7 {offsets = [0, 896], sizes = [16, 128], strides = [1, 1]} : vector<16x2048xf32> to vector<16x128xf32>
    %cst_31 = arith.constant dense<0.000000e+00> : vector<32x128xf32>
    %47 = tpu.matmul %45, %46, %cst_31 {dimension_numbers = #tpu.dot_dimension_numbers<[1], [0], [0], [1], [0, 0, 1, 1], [], []>} : vector<32x16xf32>, vector<16x128xf32>, vector<32x128xf32> -> vector<32x128xf32>
    %48 = arith.addf %43, %47 : vector<32x128xf32>
    %c8 = arith.constant 8 : index
    %c0_32 = arith.constant 0 : index
    %c0_33 = arith.constant 0 : index
    %49 = vector.load %arg3[%c8, %c0_32, %c0_33] : memref<16x32x16xf32, #tpu.memory_space<vmem>>, vector<1x32x16xf32>
    %50 = vector.shape_cast %49 : vector<1x32x16xf32> to vector<32x16xf32>
    %51 = vector.extract_strided_slice %7 {offsets = [0, 1024], sizes = [16, 128], strides = [1, 1]} : vector<16x2048xf32> to vector<16x128xf32>
    %cst_34 = arith.constant dense<0.000000e+00> : vector<32x128xf32>
    %52 = tpu.matmul %50, %51, %cst_34 {dimension_numbers = #tpu.dot_dimension_numbers<[1], [0], [0], [1], [0, 0, 1, 1], [], []>} : vector<32x16xf32>, vector<16x128xf32>, vector<32x128xf32> -> vector<32x128xf32>
    %53 = arith.addf %48, %52 : vector<32x128xf32>
    %c9 = arith.constant 9 : index
    %c0_35 = arith.constant 0 : index
    %c0_36 = arith.constant 0 : index
    %54 = vector.load %arg3[%c9, %c0_35, %c0_36] : memref<16x32x16xf32, #tpu.memory_space<vmem>>, vector<1x32x16xf32>
    %55 = vector.shape_cast %54 : vector<1x32x16xf32> to vector<32x16xf32>
    %56 = vector.extract_strided_slice %7 {offsets = [0, 1152], sizes = [16, 128], strides = [1, 1]} : vector<16x2048xf32> to vector<16x128xf32>
    %cst_37 = arith.constant dense<0.000000e+00> : vector<32x128xf32>
    %57 = tpu.matmul %55, %56, %cst_37 {dimension_numbers = #tpu.dot_dimension_numbers<[1], [0], [0], [1], [0, 0, 1, 1], [], []>} : vector<32x16xf32>, vector<16x128xf32>, vector<32x128xf32> -> vector<32x128xf32>
    %58 = arith.addf %53, %57 : vector<32x128xf32>
    %c10 = arith.constant 10 : index
    %c0_38 = arith.constant 0 : index
    %c0_39 = arith.constant 0 : index
    %59 = vector.load %arg3[%c10, %c0_38, %c0_39] : memref<16x32x16xf32, #tpu.memory_space<vmem>>, vector<1x32x16xf32>
    %60 = vector.shape_cast %59 : vector<1x32x16xf32> to vector<32x16xf32>
    %61 = vector.extract_strided_slice %7 {offsets = [0, 1280], sizes = [16, 128], strides = [1, 1]} : vector<16x2048xf32> to vector<16x128xf32>
    %cst_40 = arith.constant dense<0.000000e+00> : vector<32x128xf32>
    %62 = tpu.matmul %60, %61, %cst_40 {dimension_numbers = #tpu.dot_dimension_numbers<[1], [0], [0], [1], [0, 0, 1, 1], [], []>} : vector<32x16xf32>, vector<16x128xf32>, vector<32x128xf32> -> vector<32x128xf32>
    %63 = arith.addf %58, %62 : vector<32x128xf32>
    %c11 = arith.constant 11 : index
    %c0_41 = arith.constant 0 : index
    %c0_42 = arith.constant 0 : index
    %64 = vector.load %arg3[%c11, %c0_41, %c0_42] : memref<16x32x16xf32, #tpu.memory_space<vmem>>, vector<1x32x16xf32>
    %65 = vector.shape_cast %64 : vector<1x32x16xf32> to vector<32x16xf32>
    %66 = vector.extract_strided_slice %7 {offsets = [0, 1408], sizes = [16, 128], strides = [1, 1]} : vector<16x2048xf32> to vector<16x128xf32>
    %cst_43 = arith.constant dense<0.000000e+00> : vector<32x128xf32>
    %67 = tpu.matmul %65, %66, %cst_43 {dimension_numbers = #tpu.dot_dimension_numbers<[1], [0], [0], [1], [0, 0, 1, 1], [], []>} : vector<32x16xf32>, vector<16x128xf32>, vector<32x128xf32> -> vector<32x128xf32>
    %68 = arith.addf %63, %67 : vector<32x128xf32>
    %c12 = arith.constant 12 : index
    %c0_44 = arith.constant 0 : index
    %c0_45 = arith.constant 0 : index
    %69 = vector.load %arg3[%c12, %c0_44, %c0_45] : memref<16x32x16xf32, #tpu.memory_space<vmem>>, vector<1x32x16xf32>
    %70 = vector.shape_cast %69 : vector<1x32x16xf32> to vector<32x16xf32>
    %71 = vector.extract_strided_slice %7 {offsets = [0, 1536], sizes = [16, 128], strides = [1, 1]} : vector<16x2048xf32> to vector<16x128xf32>
    %cst_46 = arith.constant dense<0.000000e+00> : vector<32x128xf32>
    %72 = tpu.matmul %70, %71, %cst_46 {dimension_numbers = #tpu.dot_dimension_numbers<[1], [0], [0], [1], [0, 0, 1, 1], [], []>} : vector<32x16xf32>, vector<16x128xf32>, vector<32x128xf32> -> vector<32x128xf32>
    %73 = arith.addf %68, %72 : vector<32x128xf32>
    %c13 = arith.constant 13 : index
    %c0_47 = arith.constant 0 : index
    %c0_48 = arith.constant 0 : index
    %74 = vector.load %arg3[%c13, %c0_47, %c0_48] : memref<16x32x16xf32, #tpu.memory_space<vmem>>, vector<1x32x16xf32>
    %75 = vector.shape_cast %74 : vector<1x32x16xf32> to vector<32x16xf32>
    %76 = vector.extract_strided_slice %7 {offsets = [0, 1664], sizes = [16, 128], strides = [1, 1]} : vector<16x2048xf32> to vector<16x128xf32>
    %cst_49 = arith.constant dense<0.000000e+00> : vector<32x128xf32>
    %77 = tpu.matmul %75, %76, %cst_49 {dimension_numbers = #tpu.dot_dimension_numbers<[1], [0], [0], [1], [0, 0, 1, 1], [], []>} : vector<32x16xf32>, vector<16x128xf32>, vector<32x128xf32> -> vector<32x128xf32>
    %78 = arith.addf %73, %77 : vector<32x128xf32>
    %c14 = arith.constant 14 : index
    %c0_50 = arith.constant 0 : index
    %c0_51 = arith.constant 0 : index
    %79 = vector.load %arg3[%c14, %c0_50, %c0_51] : memref<16x32x16xf32, #tpu.memory_space<vmem>>, vector<1x32x16xf32>
    %80 = vector.shape_cast %79 : vector<1x32x16xf32> to vector<32x16xf32>
    %81 = vector.extract_strided_slice %7 {offsets = [0, 1792], sizes = [16, 128], strides = [1, 1]} : vector<16x2048xf32> to vector<16x128xf32>
    %cst_52 = arith.constant dense<0.000000e+00> : vector<32x128xf32>
    %82 = tpu.matmul %80, %81, %cst_52 {dimension_numbers = #tpu.dot_dimension_numbers<[1], [0], [0], [1], [0, 0, 1, 1], [], []>} : vector<32x16xf32>, vector<16x128xf32>, vector<32x128xf32> -> vector<32x128xf32>
    %83 = arith.addf %78, %82 : vector<32x128xf32>
    %c15 = arith.constant 15 : index
    %c0_53 = arith.constant 0 : index
    %c0_54 = arith.constant 0 : index
    %84 = vector.load %arg3[%c15, %c0_53, %c0_54] : memref<16x32x16xf32, #tpu.memory_space<vmem>>, vector<1x32x16xf32>
    %85 = vector.shape_cast %84 : vector<1x32x16xf32> to vector<32x16xf32>
    %86 = vector.extract_strided_slice %7 {offsets = [0, 1920], sizes = [16, 128], strides = [1, 1]} : vector<16x2048xf32> to vector<16x128xf32>
    %cst_55 = arith.constant dense<0.000000e+00> : vector<32x128xf32>
    %87 = tpu.matmul %85, %86, %cst_55 {dimension_numbers = #tpu.dot_dimension_numbers<[1], [0], [0], [1], [0, 0, 1, 1], [], []>} : vector<32x16xf32>, vector<16x128xf32>, vector<32x128xf32> -> vector<32x128xf32>
    %88 = arith.addf %83, %87 : vector<32x128xf32>
    %c0_56 = arith.constant 0 : index
    %c0_57 = arith.constant 0 : index
    %89 = vector.load %arg4[%c0_56, %c0_57] : memref<32x1xf32, #tpu.memory_space<vmem>>, vector<32x1xf32>
    %90 = vector.broadcast %89 : vector<32x1xf32> to vector<32x128xf32>
    %91 = arith.addf %88, %90 : vector<32x128xf32>
    %cst_58 = arith.constant 0.000000e+00 : f32
    %92 = vector.broadcast %cst_58 : f32 to vector<32x128xf32>
    %93 = arith.maximumf %91, %92 : vector<32x128xf32>
    %c0_59 = arith.constant 0 : index
    %c0_60 = arith.constant 0 : index
    %94 = vector.load %arg6[%c0_59, %c0_60] : memref<1x256xf32, #tpu.memory_space<vmem>>, vector<1x256xf32>
    %95 = vector.extract_strided_slice %93 {offsets = [0, 0], sizes = [1, 128], strides = [1, 1]} : vector<32x128xf32> to vector<1x128xf32>
    %c0_61 = arith.constant 0 : index
    %c0_62 = arith.constant 0 : index
    %c0_63 = arith.constant 0 : index
    %96 = vector.load %arg5[%c0_61, %c0_62, %c0_63] : memref<32x128x256xf32, #tpu.memory_space<vmem>>, vector<1x128x256xf32>
    %97 = vector.shape_cast %96 : vector<1x128x256xf32> to vector<128x256xf32>
    %cst_64 = arith.constant dense<0.000000e+00> : vector<1x256xf32>
    %98 = tpu.matmul %95, %97, %cst_64 {dimension_numbers = #tpu.dot_dimension_numbers<[1], [0], [0], [1], [0, 0, 1, 1], [], []>} : vector<1x128xf32>, vector<128x256xf32>, vector<1x256xf32> -> vector<1x256xf32>
    %99 = arith.addf %94, %98 : vector<1x256xf32>
    %100 = vector.extract_strided_slice %93 {offsets = [1, 0], sizes = [1, 128], strides = [1, 1]} : vector<32x128xf32> to vector<1x128xf32>
    %c1_65 = arith.constant 1 : index
    %c0_66 = arith.constant 0 : index
    %c0_67 = arith.constant 0 : index
    %101 = vector.load %arg5[%c1_65, %c0_66, %c0_67] : memref<32x128x256xf32, #tpu.memory_space<vmem>>, vector<1x128x256xf32>
    %102 = vector.shape_cast %101 : vector<1x128x256xf32> to vector<128x256xf32>
    %cst_68 = arith.constant dense<0.000000e+00> : vector<1x256xf32>
    %103 = tpu.matmul %100, %102, %cst_68 {dimension_numbers = #tpu.dot_dimension_numbers<[1], [0], [0], [1], [0, 0, 1, 1], [], []>} : vector<1x128xf32>, vector<128x256xf32>, vector<1x256xf32> -> vector<1x256xf32>
    %104 = arith.addf %99, %103 : vector<1x256xf32>
    %105 = vector.extract_strided_slice %93 {offsets = [2, 0], sizes = [1, 128], strides = [1, 1]} : vector<32x128xf32> to vector<1x128xf32>
    %c2_69 = arith.constant 2 : index
    %c0_70 = arith.constant 0 : index
    %c0_71 = arith.constant 0 : index
    %106 = vector.load %arg5[%c2_69, %c0_70, %c0_71] : memref<32x128x256xf32, #tpu.memory_space<vmem>>, vector<1x128x256xf32>
    %107 = vector.shape_cast %106 : vector<1x128x256xf32> to vector<128x256xf32>
    %cst_72 = arith.constant dense<0.000000e+00> : vector<1x256xf32>
    %108 = tpu.matmul %105, %107, %cst_72 {dimension_numbers = #tpu.dot_dimension_numbers<[1], [0], [0], [1], [0, 0, 1, 1], [], []>} : vector<1x128xf32>, vector<128x256xf32>, vector<1x256xf32> -> vector<1x256xf32>
    %109 = arith.addf %104, %108 : vector<1x256xf32>
    %110 = vector.extract_strided_slice %93 {offsets = [3, 0], sizes = [1, 128], strides = [1, 1]} : vector<32x128xf32> to vector<1x128xf32>
    %c3_73 = arith.constant 3 : index
    %c0_74 = arith.constant 0 : index
    %c0_75 = arith.constant 0 : index
    %111 = vector.load %arg5[%c3_73, %c0_74, %c0_75] : memref<32x128x256xf32, #tpu.memory_space<vmem>>, vector<1x128x256xf32>
    %112 = vector.shape_cast %111 : vector<1x128x256xf32> to vector<128x256xf32>
    %cst_76 = arith.constant dense<0.000000e+00> : vector<1x256xf32>
    %113 = tpu.matmul %110, %112, %cst_76 {dimension_numbers = #tpu.dot_dimension_numbers<[1], [0], [0], [1], [0, 0, 1, 1], [], []>} : vector<1x128xf32>, vector<128x256xf32>, vector<1x256xf32> -> vector<1x256xf32>
    %114 = arith.addf %109, %113 : vector<1x256xf32>
    %115 = vector.extract_strided_slice %93 {offsets = [4, 0], sizes = [1, 128], strides = [1, 1]} : vector<32x128xf32> to vector<1x128xf32>
    %c4_77 = arith.constant 4 : index
    %c0_78 = arith.constant 0 : index
    %c0_79 = arith.constant 0 : index
    %116 = vector.load %arg5[%c4_77, %c0_78, %c0_79] : memref<32x128x256xf32, #tpu.memory_space<vmem>>, vector<1x128x256xf32>
    %117 = vector.shape_cast %116 : vector<1x128x256xf32> to vector<128x256xf32>
    %cst_80 = arith.constant dense<0.000000e+00> : vector<1x256xf32>
    %118 = tpu.matmul %115, %117, %cst_80 {dimension_numbers = #tpu.dot_dimension_numbers<[1], [0], [0], [1], [0, 0, 1, 1], [], []>} : vector<1x128xf32>, vector<128x256xf32>, vector<1x256xf32> -> vector<1x256xf32>
    %119 = arith.addf %114, %118 : vector<1x256xf32>
    %120 = vector.extract_strided_slice %93 {offsets = [5, 0], sizes = [1, 128], strides = [1, 1]} : vector<32x128xf32> to vector<1x128xf32>
    %c5_81 = arith.constant 5 : index
    %c0_82 = arith.constant 0 : index
    %c0_83 = arith.constant 0 : index
    %121 = vector.load %arg5[%c5_81, %c0_82, %c0_83] : memref<32x128x256xf32, #tpu.memory_space<vmem>>, vector<1x128x256xf32>
    %122 = vector.shape_cast %121 : vector<1x128x256xf32> to vector<128x256xf32>
    %cst_84 = arith.constant dense<0.000000e+00> : vector<1x256xf32>
    %123 = tpu.matmul %120, %122, %cst_84 {dimension_numbers = #tpu.dot_dimension_numbers<[1], [0], [0], [1], [0, 0, 1, 1], [], []>} : vector<1x128xf32>, vector<128x256xf32>, vector<1x256xf32> -> vector<1x256xf32>
    %124 = arith.addf %119, %123 : vector<1x256xf32>
    %125 = vector.extract_strided_slice %93 {offsets = [6, 0], sizes = [1, 128], strides = [1, 1]} : vector<32x128xf32> to vector<1x128xf32>
    %c6_85 = arith.constant 6 : index
    %c0_86 = arith.constant 0 : index
    %c0_87 = arith.constant 0 : index
    %126 = vector.load %arg5[%c6_85, %c0_86, %c0_87] : memref<32x128x256xf32, #tpu.memory_space<vmem>>, vector<1x128x256xf32>
    %127 = vector.shape_cast %126 : vector<1x128x256xf32> to vector<128x256xf32>
    %cst_88 = arith.constant dense<0.000000e+00> : vector<1x256xf32>
    %128 = tpu.matmul %125, %127, %cst_88 {dimension_numbers = #tpu.dot_dimension_numbers<[1], [0], [0], [1], [0, 0, 1, 1], [], []>} : vector<1x128xf32>, vector<128x256xf32>, vector<1x256xf32> -> vector<1x256xf32>
    %129 = arith.addf %124, %128 : vector<1x256xf32>
    %130 = vector.extract_strided_slice %93 {offsets = [7, 0], sizes = [1, 128], strides = [1, 1]} : vector<32x128xf32> to vector<1x128xf32>
    %c7_89 = arith.constant 7 : index
    %c0_90 = arith.constant 0 : index
    %c0_91 = arith.constant 0 : index
    %131 = vector.load %arg5[%c7_89, %c0_90, %c0_91] : memref<32x128x256xf32, #tpu.memory_space<vmem>>, vector<1x128x256xf32>
    %132 = vector.shape_cast %131 : vector<1x128x256xf32> to vector<128x256xf32>
    %cst_92 = arith.constant dense<0.000000e+00> : vector<1x256xf32>
    %133 = tpu.matmul %130, %132, %cst_92 {dimension_numbers = #tpu.dot_dimension_numbers<[1], [0], [0], [1], [0, 0, 1, 1], [], []>} : vector<1x128xf32>, vector<128x256xf32>, vector<1x256xf32> -> vector<1x256xf32>
    %134 = arith.addf %129, %133 : vector<1x256xf32>
    %135 = vector.extract_strided_slice %93 {offsets = [8, 0], sizes = [1, 128], strides = [1, 1]} : vector<32x128xf32> to vector<1x128xf32>
    %c8_93 = arith.constant 8 : index
    %c0_94 = arith.constant 0 : index
    %c0_95 = arith.constant 0 : index
    %136 = vector.load %arg5[%c8_93, %c0_94, %c0_95] : memref<32x128x256xf32, #tpu.memory_space<vmem>>, vector<1x128x256xf32>
    %137 = vector.shape_cast %136 : vector<1x128x256xf32> to vector<128x256xf32>
    %cst_96 = arith.constant dense<0.000000e+00> : vector<1x256xf32>
    %138 = tpu.matmul %135, %137, %cst_96 {dimension_numbers = #tpu.dot_dimension_numbers<[1], [0], [0], [1], [0, 0, 1, 1], [], []>} : vector<1x128xf32>, vector<128x256xf32>, vector<1x256xf32> -> vector<1x256xf32>
    %139 = arith.addf %134, %138 : vector<1x256xf32>
    %140 = vector.extract_strided_slice %93 {offsets = [9, 0], sizes = [1, 128], strides = [1, 1]} : vector<32x128xf32> to vector<1x128xf32>
    %c9_97 = arith.constant 9 : index
    %c0_98 = arith.constant 0 : index
    %c0_99 = arith.constant 0 : index
    %141 = vector.load %arg5[%c9_97, %c0_98, %c0_99] : memref<32x128x256xf32, #tpu.memory_space<vmem>>, vector<1x128x256xf32>
    %142 = vector.shape_cast %141 : vector<1x128x256xf32> to vector<128x256xf32>
    %cst_100 = arith.constant dense<0.000000e+00> : vector<1x256xf32>
    %143 = tpu.matmul %140, %142, %cst_100 {dimension_numbers = #tpu.dot_dimension_numbers<[1], [0], [0], [1], [0, 0, 1, 1], [], []>} : vector<1x128xf32>, vector<128x256xf32>, vector<1x256xf32> -> vector<1x256xf32>
    %144 = arith.addf %139, %143 : vector<1x256xf32>
    %145 = vector.extract_strided_slice %93 {offsets = [10, 0], sizes = [1, 128], strides = [1, 1]} : vector<32x128xf32> to vector<1x128xf32>
    %c10_101 = arith.constant 10 : index
    %c0_102 = arith.constant 0 : index
    %c0_103 = arith.constant 0 : index
    %146 = vector.load %arg5[%c10_101, %c0_102, %c0_103] : memref<32x128x256xf32, #tpu.memory_space<vmem>>, vector<1x128x256xf32>
    %147 = vector.shape_cast %146 : vector<1x128x256xf32> to vector<128x256xf32>
    %cst_104 = arith.constant dense<0.000000e+00> : vector<1x256xf32>
    %148 = tpu.matmul %145, %147, %cst_104 {dimension_numbers = #tpu.dot_dimension_numbers<[1], [0], [0], [1], [0, 0, 1, 1], [], []>} : vector<1x128xf32>, vector<128x256xf32>, vector<1x256xf32> -> vector<1x256xf32>
    %149 = arith.addf %144, %148 : vector<1x256xf32>
    %150 = vector.extract_strided_slice %93 {offsets = [11, 0], sizes = [1, 128], strides = [1, 1]} : vector<32x128xf32> to vector<1x128xf32>
    %c11_105 = arith.constant 11 : index
    %c0_106 = arith.constant 0 : index
    %c0_107 = arith.constant 0 : index
    %151 = vector.load %arg5[%c11_105, %c0_106, %c0_107] : memref<32x128x256xf32, #tpu.memory_space<vmem>>, vector<1x128x256xf32>
    %152 = vector.shape_cast %151 : vector<1x128x256xf32> to vector<128x256xf32>
    %cst_108 = arith.constant dense<0.000000e+00> : vector<1x256xf32>
    %153 = tpu.matmul %150, %152, %cst_108 {dimension_numbers = #tpu.dot_dimension_numbers<[1], [0], [0], [1], [0, 0, 1, 1], [], []>} : vector<1x128xf32>, vector<128x256xf32>, vector<1x256xf32> -> vector<1x256xf32>
    %154 = arith.addf %149, %153 : vector<1x256xf32>
    %155 = vector.extract_strided_slice %93 {offsets = [12, 0], sizes = [1, 128], strides = [1, 1]} : vector<32x128xf32> to vector<1x128xf32>
    %c12_109 = arith.constant 12 : index
    %c0_110 = arith.constant 0 : index
    %c0_111 = arith.constant 0 : index
    %156 = vector.load %arg5[%c12_109, %c0_110, %c0_111] : memref<32x128x256xf32, #tpu.memory_space<vmem>>, vector<1x128x256xf32>
    %157 = vector.shape_cast %156 : vector<1x128x256xf32> to vector<128x256xf32>
    %cst_112 = arith.constant dense<0.000000e+00> : vector<1x256xf32>
    %158 = tpu.matmul %155, %157, %cst_112 {dimension_numbers = #tpu.dot_dimension_numbers<[1], [0], [0], [1], [0, 0, 1, 1], [], []>} : vector<1x128xf32>, vector<128x256xf32>, vector<1x256xf32> -> vector<1x256xf32>
    %159 = arith.addf %154, %158 : vector<1x256xf32>
    %160 = vector.extract_strided_slice %93 {offsets = [13, 0], sizes = [1, 128], strides = [1, 1]} : vector<32x128xf32> to vector<1x128xf32>
    %c13_113 = arith.constant 13 : index
    %c0_114 = arith.constant 0 : index
    %c0_115 = arith.constant 0 : index
    %161 = vector.load %arg5[%c13_113, %c0_114, %c0_115] : memref<32x128x256xf32, #tpu.memory_space<vmem>>, vector<1x128x256xf32>
    %162 = vector.shape_cast %161 : vector<1x128x256xf32> to vector<128x256xf32>
    %cst_116 = arith.constant dense<0.000000e+00> : vector<1x256xf32>
    %163 = tpu.matmul %160, %162, %cst_116 {dimension_numbers = #tpu.dot_dimension_numbers<[1], [0], [0], [1], [0, 0, 1, 1], [], []>} : vector<1x128xf32>, vector<128x256xf32>, vector<1x256xf32> -> vector<1x256xf32>
    %164 = arith.addf %159, %163 : vector<1x256xf32>
    %165 = vector.extract_strided_slice %93 {offsets = [14, 0], sizes = [1, 128], strides = [1, 1]} : vector<32x128xf32> to vector<1x128xf32>
    %c14_117 = arith.constant 14 : index
    %c0_118 = arith.constant 0 : index
    %c0_119 = arith.constant 0 : index
    %166 = vector.load %arg5[%c14_117, %c0_118, %c0_119] : memref<32x128x256xf32, #tpu.memory_space<vmem>>, vector<1x128x256xf32>
    %167 = vector.shape_cast %166 : vector<1x128x256xf32> to vector<128x256xf32>
    %cst_120 = arith.constant dense<0.000000e+00> : vector<1x256xf32>
    %168 = tpu.matmul %165, %167, %cst_120 {dimension_numbers = #tpu.dot_dimension_numbers<[1], [0], [0], [1], [0, 0, 1, 1], [], []>} : vector<1x128xf32>, vector<128x256xf32>, vector<1x256xf32> -> vector<1x256xf32>
    %169 = arith.addf %164, %168 : vector<1x256xf32>
    %170 = vector.extract_strided_slice %93 {offsets = [15, 0], sizes = [1, 128], strides = [1, 1]} : vector<32x128xf32> to vector<1x128xf32>
    %c15_121 = arith.constant 15 : index
    %c0_122 = arith.constant 0 : index
    %c0_123 = arith.constant 0 : index
    %171 = vector.load %arg5[%c15_121, %c0_122, %c0_123] : memref<32x128x256xf32, #tpu.memory_space<vmem>>, vector<1x128x256xf32>
    %172 = vector.shape_cast %171 : vector<1x128x256xf32> to vector<128x256xf32>
    %cst_124 = arith.constant dense<0.000000e+00> : vector<1x256xf32>
    %173 = tpu.matmul %170, %172, %cst_124 {dimension_numbers = #tpu.dot_dimension_numbers<[1], [0], [0], [1], [0, 0, 1, 1], [], []>} : vector<1x128xf32>, vector<128x256xf32>, vector<1x256xf32> -> vector<1x256xf32>
    %174 = arith.addf %169, %173 : vector<1x256xf32>
    %175 = vector.extract_strided_slice %93 {offsets = [16, 0], sizes = [1, 128], strides = [1, 1]} : vector<32x128xf32> to vector<1x128xf32>
    %c16 = arith.constant 16 : index
    %c0_125 = arith.constant 0 : index
    %c0_126 = arith.constant 0 : index
    %176 = vector.load %arg5[%c16, %c0_125, %c0_126] : memref<32x128x256xf32, #tpu.memory_space<vmem>>, vector<1x128x256xf32>
    %177 = vector.shape_cast %176 : vector<1x128x256xf32> to vector<128x256xf32>
    %cst_127 = arith.constant dense<0.000000e+00> : vector<1x256xf32>
    %178 = tpu.matmul %175, %177, %cst_127 {dimension_numbers = #tpu.dot_dimension_numbers<[1], [0], [0], [1], [0, 0, 1, 1], [], []>} : vector<1x128xf32>, vector<128x256xf32>, vector<1x256xf32> -> vector<1x256xf32>
    %179 = arith.addf %174, %178 : vector<1x256xf32>
    %180 = vector.extract_strided_slice %93 {offsets = [17, 0], sizes = [1, 128], strides = [1, 1]} : vector<32x128xf32> to vector<1x128xf32>
    %c17 = arith.constant 17 : index
    %c0_128 = arith.constant 0 : index
    %c0_129 = arith.constant 0 : index
    %181 = vector.load %arg5[%c17, %c0_128, %c0_129] : memref<32x128x256xf32, #tpu.memory_space<vmem>>, vector<1x128x256xf32>
    %182 = vector.shape_cast %181 : vector<1x128x256xf32> to vector<128x256xf32>
    %cst_130 = arith.constant dense<0.000000e+00> : vector<1x256xf32>
    %183 = tpu.matmul %180, %182, %cst_130 {dimension_numbers = #tpu.dot_dimension_numbers<[1], [0], [0], [1], [0, 0, 1, 1], [], []>} : vector<1x128xf32>, vector<128x256xf32>, vector<1x256xf32> -> vector<1x256xf32>
    %184 = arith.addf %179, %183 : vector<1x256xf32>
    %185 = vector.extract_strided_slice %93 {offsets = [18, 0], sizes = [1, 128], strides = [1, 1]} : vector<32x128xf32> to vector<1x128xf32>
    %c18 = arith.constant 18 : index
    %c0_131 = arith.constant 0 : index
    %c0_132 = arith.constant 0 : index
    %186 = vector.load %arg5[%c18, %c0_131, %c0_132] : memref<32x128x256xf32, #tpu.memory_space<vmem>>, vector<1x128x256xf32>
    %187 = vector.shape_cast %186 : vector<1x128x256xf32> to vector<128x256xf32>
    %cst_133 = arith.constant dense<0.000000e+00> : vector<1x256xf32>
    %188 = tpu.matmul %185, %187, %cst_133 {dimension_numbers = #tpu.dot_dimension_numbers<[1], [0], [0], [1], [0, 0, 1, 1], [], []>} : vector<1x128xf32>, vector<128x256xf32>, vector<1x256xf32> -> vector<1x256xf32>
    %189 = arith.addf %184, %188 : vector<1x256xf32>
    %190 = vector.extract_strided_slice %93 {offsets = [19, 0], sizes = [1, 128], strides = [1, 1]} : vector<32x128xf32> to vector<1x128xf32>
    %c19 = arith.constant 19 : index
    %c0_134 = arith.constant 0 : index
    %c0_135 = arith.constant 0 : index
    %191 = vector.load %arg5[%c19, %c0_134, %c0_135] : memref<32x128x256xf32, #tpu.memory_space<vmem>>, vector<1x128x256xf32>
    %192 = vector.shape_cast %191 : vector<1x128x256xf32> to vector<128x256xf32>
    %cst_136 = arith.constant dense<0.000000e+00> : vector<1x256xf32>
    %193 = tpu.matmul %190, %192, %cst_136 {dimension_numbers = #tpu.dot_dimension_numbers<[1], [0], [0], [1], [0, 0, 1, 1], [], []>} : vector<1x128xf32>, vector<128x256xf32>, vector<1x256xf32> -> vector<1x256xf32>
    %194 = arith.addf %189, %193 : vector<1x256xf32>
    %195 = vector.extract_strided_slice %93 {offsets = [20, 0], sizes = [1, 128], strides = [1, 1]} : vector<32x128xf32> to vector<1x128xf32>
    %c20 = arith.constant 20 : index
    %c0_137 = arith.constant 0 : index
    %c0_138 = arith.constant 0 : index
    %196 = vector.load %arg5[%c20, %c0_137, %c0_138] : memref<32x128x256xf32, #tpu.memory_space<vmem>>, vector<1x128x256xf32>
    %197 = vector.shape_cast %196 : vector<1x128x256xf32> to vector<128x256xf32>
    %cst_139 = arith.constant dense<0.000000e+00> : vector<1x256xf32>
    %198 = tpu.matmul %195, %197, %cst_139 {dimension_numbers = #tpu.dot_dimension_numbers<[1], [0], [0], [1], [0, 0, 1, 1], [], []>} : vector<1x128xf32>, vector<128x256xf32>, vector<1x256xf32> -> vector<1x256xf32>
    %199 = arith.addf %194, %198 : vector<1x256xf32>
    %200 = vector.extract_strided_slice %93 {offsets = [21, 0], sizes = [1, 128], strides = [1, 1]} : vector<32x128xf32> to vector<1x128xf32>
    %c21 = arith.constant 21 : index
    %c0_140 = arith.constant 0 : index
    %c0_141 = arith.constant 0 : index
    %201 = vector.load %arg5[%c21, %c0_140, %c0_141] : memref<32x128x256xf32, #tpu.memory_space<vmem>>, vector<1x128x256xf32>
    %202 = vector.shape_cast %201 : vector<1x128x256xf32> to vector<128x256xf32>
    %cst_142 = arith.constant dense<0.000000e+00> : vector<1x256xf32>
    %203 = tpu.matmul %200, %202, %cst_142 {dimension_numbers = #tpu.dot_dimension_numbers<[1], [0], [0], [1], [0, 0, 1, 1], [], []>} : vector<1x128xf32>, vector<128x256xf32>, vector<1x256xf32> -> vector<1x256xf32>
    %204 = arith.addf %199, %203 : vector<1x256xf32>
    %205 = vector.extract_strided_slice %93 {offsets = [22, 0], sizes = [1, 128], strides = [1, 1]} : vector<32x128xf32> to vector<1x128xf32>
    %c22 = arith.constant 22 : index
    %c0_143 = arith.constant 0 : index
    %c0_144 = arith.constant 0 : index
    %206 = vector.load %arg5[%c22, %c0_143, %c0_144] : memref<32x128x256xf32, #tpu.memory_space<vmem>>, vector<1x128x256xf32>
    %207 = vector.shape_cast %206 : vector<1x128x256xf32> to vector<128x256xf32>
    %cst_145 = arith.constant dense<0.000000e+00> : vector<1x256xf32>
    %208 = tpu.matmul %205, %207, %cst_145 {dimension_numbers = #tpu.dot_dimension_numbers<[1], [0], [0], [1], [0, 0, 1, 1], [], []>} : vector<1x128xf32>, vector<128x256xf32>, vector<1x256xf32> -> vector<1x256xf32>
    %209 = arith.addf %204, %208 : vector<1x256xf32>
    %210 = vector.extract_strided_slice %93 {offsets = [23, 0], sizes = [1, 128], strides = [1, 1]} : vector<32x128xf32> to vector<1x128xf32>
    %c23 = arith.constant 23 : index
    %c0_146 = arith.constant 0 : index
    %c0_147 = arith.constant 0 : index
    %211 = vector.load %arg5[%c23, %c0_146, %c0_147] : memref<32x128x256xf32, #tpu.memory_space<vmem>>, vector<1x128x256xf32>
    %212 = vector.shape_cast %211 : vector<1x128x256xf32> to vector<128x256xf32>
    %cst_148 = arith.constant dense<0.000000e+00> : vector<1x256xf32>
    %213 = tpu.matmul %210, %212, %cst_148 {dimension_numbers = #tpu.dot_dimension_numbers<[1], [0], [0], [1], [0, 0, 1, 1], [], []>} : vector<1x128xf32>, vector<128x256xf32>, vector<1x256xf32> -> vector<1x256xf32>
    %214 = arith.addf %209, %213 : vector<1x256xf32>
    %215 = vector.extract_strided_slice %93 {offsets = [24, 0], sizes = [1, 128], strides = [1, 1]} : vector<32x128xf32> to vector<1x128xf32>
    %c24 = arith.constant 24 : index
    %c0_149 = arith.constant 0 : index
    %c0_150 = arith.constant 0 : index
    %216 = vector.load %arg5[%c24, %c0_149, %c0_150] : memref<32x128x256xf32, #tpu.memory_space<vmem>>, vector<1x128x256xf32>
    %217 = vector.shape_cast %216 : vector<1x128x256xf32> to vector<128x256xf32>
    %cst_151 = arith.constant dense<0.000000e+00> : vector<1x256xf32>
    %218 = tpu.matmul %215, %217, %cst_151 {dimension_numbers = #tpu.dot_dimension_numbers<[1], [0], [0], [1], [0, 0, 1, 1], [], []>} : vector<1x128xf32>, vector<128x256xf32>, vector<1x256xf32> -> vector<1x256xf32>
    %219 = arith.addf %214, %218 : vector<1x256xf32>
    %220 = vector.extract_strided_slice %93 {offsets = [25, 0], sizes = [1, 128], strides = [1, 1]} : vector<32x128xf32> to vector<1x128xf32>
    %c25 = arith.constant 25 : index
    %c0_152 = arith.constant 0 : index
    %c0_153 = arith.constant 0 : index
    %221 = vector.load %arg5[%c25, %c0_152, %c0_153] : memref<32x128x256xf32, #tpu.memory_space<vmem>>, vector<1x128x256xf32>
    %222 = vector.shape_cast %221 : vector<1x128x256xf32> to vector<128x256xf32>
    %cst_154 = arith.constant dense<0.000000e+00> : vector<1x256xf32>
    %223 = tpu.matmul %220, %222, %cst_154 {dimension_numbers = #tpu.dot_dimension_numbers<[1], [0], [0], [1], [0, 0, 1, 1], [], []>} : vector<1x128xf32>, vector<128x256xf32>, vector<1x256xf32> -> vector<1x256xf32>
    %224 = arith.addf %219, %223 : vector<1x256xf32>
    %225 = vector.extract_strided_slice %93 {offsets = [26, 0], sizes = [1, 128], strides = [1, 1]} : vector<32x128xf32> to vector<1x128xf32>
    %c26 = arith.constant 26 : index
    %c0_155 = arith.constant 0 : index
    %c0_156 = arith.constant 0 : index
    %226 = vector.load %arg5[%c26, %c0_155, %c0_156] : memref<32x128x256xf32, #tpu.memory_space<vmem>>, vector<1x128x256xf32>
    %227 = vector.shape_cast %226 : vector<1x128x256xf32> to vector<128x256xf32>
    %cst_157 = arith.constant dense<0.000000e+00> : vector<1x256xf32>
    %228 = tpu.matmul %225, %227, %cst_157 {dimension_numbers = #tpu.dot_dimension_numbers<[1], [0], [0], [1], [0, 0, 1, 1], [], []>} : vector<1x128xf32>, vector<128x256xf32>, vector<1x256xf32> -> vector<1x256xf32>
    %229 = arith.addf %224, %228 : vector<1x256xf32>
    %230 = vector.extract_strided_slice %93 {offsets = [27, 0], sizes = [1, 128], strides = [1, 1]} : vector<32x128xf32> to vector<1x128xf32>
    %c27 = arith.constant 27 : index
    %c0_158 = arith.constant 0 : index
    %c0_159 = arith.constant 0 : index
    %231 = vector.load %arg5[%c27, %c0_158, %c0_159] : memref<32x128x256xf32, #tpu.memory_space<vmem>>, vector<1x128x256xf32>
    %232 = vector.shape_cast %231 : vector<1x128x256xf32> to vector<128x256xf32>
    %cst_160 = arith.constant dense<0.000000e+00> : vector<1x256xf32>
    %233 = tpu.matmul %230, %232, %cst_160 {dimension_numbers = #tpu.dot_dimension_numbers<[1], [0], [0], [1], [0, 0, 1, 1], [], []>} : vector<1x128xf32>, vector<128x256xf32>, vector<1x256xf32> -> vector<1x256xf32>
    %234 = arith.addf %229, %233 : vector<1x256xf32>
    %235 = vector.extract_strided_slice %93 {offsets = [28, 0], sizes = [1, 128], strides = [1, 1]} : vector<32x128xf32> to vector<1x128xf32>
    %c28 = arith.constant 28 : index
    %c0_161 = arith.constant 0 : index
    %c0_162 = arith.constant 0 : index
    %236 = vector.load %arg5[%c28, %c0_161, %c0_162] : memref<32x128x256xf32, #tpu.memory_space<vmem>>, vector<1x128x256xf32>
    %237 = vector.shape_cast %236 : vector<1x128x256xf32> to vector<128x256xf32>
    %cst_163 = arith.constant dense<0.000000e+00> : vector<1x256xf32>
    %238 = tpu.matmul %235, %237, %cst_163 {dimension_numbers = #tpu.dot_dimension_numbers<[1], [0], [0], [1], [0, 0, 1, 1], [], []>} : vector<1x128xf32>, vector<128x256xf32>, vector<1x256xf32> -> vector<1x256xf32>
    %239 = arith.addf %234, %238 : vector<1x256xf32>
    %240 = vector.extract_strided_slice %93 {offsets = [29, 0], sizes = [1, 128], strides = [1, 1]} : vector<32x128xf32> to vector<1x128xf32>
    %c29 = arith.constant 29 : index
    %c0_164 = arith.constant 0 : index
    %c0_165 = arith.constant 0 : index
    %241 = vector.load %arg5[%c29, %c0_164, %c0_165] : memref<32x128x256xf32, #tpu.memory_space<vmem>>, vector<1x128x256xf32>
    %242 = vector.shape_cast %241 : vector<1x128x256xf32> to vector<128x256xf32>
    %cst_166 = arith.constant dense<0.000000e+00> : vector<1x256xf32>
    %243 = tpu.matmul %240, %242, %cst_166 {dimension_numbers = #tpu.dot_dimension_numbers<[1], [0], [0], [1], [0, 0, 1, 1], [], []>} : vector<1x128xf32>, vector<128x256xf32>, vector<1x256xf32> -> vector<1x256xf32>
    %244 = arith.addf %239, %243 : vector<1x256xf32>
    %245 = vector.extract_strided_slice %93 {offsets = [30, 0], sizes = [1, 128], strides = [1, 1]} : vector<32x128xf32> to vector<1x128xf32>
    %c30 = arith.constant 30 : index
    %c0_167 = arith.constant 0 : index
    %c0_168 = arith.constant 0 : index
    %246 = vector.load %arg5[%c30, %c0_167, %c0_168] : memref<32x128x256xf32, #tpu.memory_space<vmem>>, vector<1x128x256xf32>
    %247 = vector.shape_cast %246 : vector<1x128x256xf32> to vector<128x256xf32>
    %cst_169 = arith.constant dense<0.000000e+00> : vector<1x256xf32>
    %248 = tpu.matmul %245, %247, %cst_169 {dimension_numbers = #tpu.dot_dimension_numbers<[1], [0], [0], [1], [0, 0, 1, 1], [], []>} : vector<1x128xf32>, vector<128x256xf32>, vector<1x256xf32> -> vector<1x256xf32>
    %249 = arith.addf %244, %248 : vector<1x256xf32>
    %250 = vector.extract_strided_slice %93 {offsets = [31, 0], sizes = [1, 128], strides = [1, 1]} : vector<32x128xf32> to vector<1x128xf32>
    %c31 = arith.constant 31 : index
    %c0_170 = arith.constant 0 : index
    %c0_171 = arith.constant 0 : index
    %251 = vector.load %arg5[%c31, %c0_170, %c0_171] : memref<32x128x256xf32, #tpu.memory_space<vmem>>, vector<1x128x256xf32>
    %252 = vector.shape_cast %251 : vector<1x128x256xf32> to vector<128x256xf32>
    %cst_172 = arith.constant dense<0.000000e+00> : vector<1x256xf32>
    %253 = tpu.matmul %250, %252, %cst_172 {dimension_numbers = #tpu.dot_dimension_numbers<[1], [0], [0], [1], [0, 0, 1, 1], [], []>} : vector<1x128xf32>, vector<128x256xf32>, vector<1x256xf32> -> vector<1x256xf32>
    %254 = arith.addf %249, %253 : vector<1x256xf32>
    %cst_173 = arith.constant 0.000000e+00 : f32
    %255 = vector.broadcast %cst_173 : f32 to vector<1x256xf32>
    %256 = arith.maximumf %254, %255 : vector<1x256xf32>
    %c0_174 = arith.constant 0 : index
    %c0_175 = arith.constant 0 : index
    %257 = vector.load %arg7[%c0_174, %c0_175] : memref<256x3xf32, #tpu.memory_space<vmem>>, vector<256x3xf32>
    %cst_176 = arith.constant dense<0.000000e+00> : vector<1x3xf32>
    %258 = tpu.matmul %256, %257, %cst_176 {dimension_numbers = #tpu.dot_dimension_numbers<[1], [0], [0], [1], [0, 0, 1, 1], [], []>} : vector<1x256xf32>, vector<256x3xf32>, vector<1x3xf32> -> vector<1x3xf32>
    %c0_177 = arith.constant 0 : index
    %c0_178 = arith.constant 0 : index
    %259 = vector.load %arg8[%c0_177, %c0_178] : memref<1x3xf32, #tpu.memory_space<vmem>>, vector<1x3xf32>
    %260 = arith.addf %258, %259 : vector<1x3xf32>
    %c0_179 = arith.constant 0 : index
    %c0_180 = arith.constant 0 : index
    %261 = vector.load %arg9[%c0_179, %c0_180] : memref<1x3xf32, #tpu.memory_space<vmem>>, vector<1x3xf32>
    tpu.vector_store %arg9[%c0_179, %c0_180], %260 {strides = array<i32>} : memref<1x3xf32, #tpu.memory_space<vmem>>, vector<1x3xf32>,
    return
  }
}

</mosaic_0001>

<bundles_post_ra>
// kernel: network_forward.1
= control target key start
LH: loop header
LB: loop body
LE: loop exit
PB: predicated region body
PF: predicated region fallthrough
CT: control target
= control target key end

     0   :  { %s11513_s0 = inlined_call_operand.vmem [shape: f32[256,2048], index: 0, kind: input, shape index: {}]   ;;  %s11514_s1 = inlined_call_operand.vmem [shape: f32[16,256], index: 1, kind: input, shape index: {}]   ;;  %s11515_s2 = inlined_call_operand.vmem [shape: f32[16,1], index: 2, kind: input, shape index: {}]   ;;  %s11516_s3 = inlined_call_operand.vmem [shape: f32[16,32,16], index: 3, kind: input, shape index: {}]   ;;  %s11517_s4 = inlined_call_operand.vmem [shape: f32[32,1], index: 4, kind: input, shape index: {}]   ;;  %s11518_s5 = inlined_call_operand.vmem [shape: f32[32,128,256], index: 5, kind: input, shape index: {}]   ;;  %s11519_s6 = inlined_call_operand.vmem [shape: f32[1,256], index: 6, kind: input, shape index: {}]   ;;  %s11520_s7 = inlined_call_operand.vmem [shape: f32[256,3], index: 7, kind: input, shape index: {}]   ;;  %s11521_s8 = inlined_call_operand.vmem [shape: f32[1,3], index: 8, kind: input, shape index: {}]   ;;  %s11522_s9 = inlined_call_operand.hbm [shape: f32[1,3], index: 9, kind: output, shape index: {}]  }
   0x1   :  { %v277_v0 = vld [vmem:[%s11513_s0 + $0x780] sm:$0xff]  ;;  %v278_v2 = vld [vmem:[%s11513_s0 + $0x788] sm:$0xff] }
   0x2   :  { %v533_v1 = vld [vmem:[%s11513_s0 + $0xf80] sm:$0xff]  ;;  %561 = vmatpush.msra.mxu0 %v277_v0  ;;  %v534_v3 = vld [vmem:[%s11513_s0 + $0xf88] sm:$0xff]  ;;  %607 = vmatpush.msra.mxu2 %v278_v2  ;;  %v279_v0 = vld [vmem:[%s11513_s0 + $0x790] sm:$0xff] }
   0x3   :  { %584 = vmatpush.msra.mxu1 %v533_v1  ;;  %v261_v4 = vld [vmem:[%s11513_s0 + $0x700] sm:$0xff]  ;;  %630 = vmatpush.msra.mxu3 %v534_v3  ;;  %v262_v6 = vld [vmem:[%s11513_s0 + $0x708] sm:$0xff]  ;;  %v535_v1 = vld [vmem:[%s11513_s0 + $0xf90] sm:$0xff] }
   0x4   :  { %v517_v5 = vld [vmem:[%s11513_s0 + $0xf00] sm:$0xff]  ;;  %v518_v7 = vld [vmem:[%s11513_s0 + $0xf08] sm:$0xff]  ;;  %562 = vmatpush.msra.mxu0 %v261_v4  ;;  %608 = vmatpush.msra.mxu2 %v262_v6  ;;  %v280_v2 = vld [vmem:[%s11513_s0 + $0x798] sm:$0xff] }
   0x5   :  { %v245_v8 = vld [vmem:[%s11513_s0 + $0x680] sm:$0xff]  ;;  %585 = vmatpush.msra.mxu1 %v517_v5  ;;  %v246_v10 = vld [vmem:[%s11513_s0 + $0x688] sm:$0xff]  ;;  %631 = vmatpush.msra.mxu3 %v518_v7  ;;  %v536_v3 = vld [vmem:[%s11513_s0 + $0xf98] sm:$0xff] }
   0x6   :  { %v501_v9 = vld [vmem:[%s11513_s0 + $0xe80] sm:$0xff]  ;;  %v502_v11 = vld [vmem:[%s11513_s0 + $0xe88] sm:$0xff]  ;;  %563 = vmatpush.msra.mxu0 %v245_v8  ;;  %609 = vmatpush.msra.mxu2 %v246_v10  ;;  %v263_v4 = vld [vmem:[%s11513_s0 + $0x710] sm:$0xff] }
   0x7   :  { %v229_v12 = vld [vmem:[%s11513_s0 + $0x600] sm:$0xff]  ;;  %586 = vmatpush.msra.mxu1 %v501_v9  ;;  %v230_v14 = vld [vmem:[%s11513_s0 + $0x608] sm:$0xff]  ;;  %632 = vmatpush.msra.mxu3 %v502_v11  ;;  %v519_v5 = vld [vmem:[%s11513_s0 + $0xf10] sm:$0xff] }
   0x8   :  { %v485_v13 = vld [vmem:[%s11513_s0 + $0xe00] sm:$0xff]  ;;  %v486_v15 = vld [vmem:[%s11513_s0 + $0xe08] sm:$0xff]  ;;  %564 = vmatpush.msra.mxu0 %v229_v12  ;;  %610 = vmatpush.msra.mxu2 %v230_v14  ;;  %v264_v6 = vld [vmem:[%s11513_s0 + $0x718] sm:$0xff] }
   0x9   :  { %v213_v16 = vld [vmem:[%s11513_s0 + $0x580] sm:$0xff]  ;;  %587 = vmatpush.msra.mxu1 %v485_v13  ;;  %v214_v18 = vld [vmem:[%s11513_s0 + $0x588] sm:$0xff]  ;;  %633 = vmatpush.msra.mxu3 %v486_v15  ;;  %v520_v7 = vld [vmem:[%s11513_s0 + $0xf18] sm:$0xff] }
   0xa   :  { %v469_v17 = vld [vmem:[%s11513_s0 + $0xd80] sm:$0xff]  ;;  %v470_v19 = vld [vmem:[%s11513_s0 + $0xd88] sm:$0xff]  ;;  %565 = vmatpush.msra.mxu0 %v213_v16  ;;  %611 = vmatpush.msra.mxu2 %v214_v18  ;;  %v247_v8 = vld [vmem:[%s11513_s0 + $0x690] sm:$0xff] }
   0xb   :  { %v197_v20 = vld [vmem:[%s11513_s0 + $0x500] sm:$0xff]  ;;  %588 = vmatpush.msra.mxu1 %v469_v17  ;;  %v198_v22 = vld [vmem:[%s11513_s0 + $0x508] sm:$0xff]  ;;  %634 = vmatpush.msra.mxu3 %v470_v19  ;;  %v503_v9 = vld [vmem:[%s11513_s0 + $0xe90] sm:$0xff] }
   0xc   :  { %v453_v21 = vld [vmem:[%s11513_s0 + $0xd00] sm:$0xff]  ;;  %v454_v23 = vld [vmem:[%s11513_s0 + $0xd08] sm:$0xff]  ;;  %566 = vmatpush.msra.mxu0 %v197_v20  ;;  %612 = vmatpush.msra.mxu2 %v198_v22  ;;  %v248_v10 = vld [vmem:[%s11513_s0 + $0x698] sm:$0xff] }
   0xd   :  { %v181_v24 = vld [vmem:[%s11513_s0 + $0x480] sm:$0xff]  ;;  %589 = vmatpush.msra.mxu1 %v453_v21  ;;  %v182_v26 = vld [vmem:[%s11513_s0 + $0x488] sm:$0xff]  ;;  %635 = vmatpush.msra.mxu3 %v454_v23  ;;  %v504_v11 = vld [vmem:[%s11513_s0 + $0xe98] sm:$0xff] }
   0xe   :  { %v437_v25 = vld [vmem:[%s11513_s0 + $0xc80] sm:$0xff]  ;;  %v438_v27 = vld [vmem:[%s11513_s0 + $0xc88] sm:$0xff]  ;;  %567 = vmatpush.msra.mxu0 %v181_v24  ;;  %613 = vmatpush.msra.mxu2 %v182_v26  ;;  %v231_v12 = vld [vmem:[%s11513_s0 + $0x610] sm:$0xff] }
   0xf   :  { %v165_v28 = vld [vmem:[%s11513_s0 + $0x400] sm:$0xff]  ;;  %590 = vmatpush.msra.mxu1 %v437_v25  ;;  %v166_v30 = vld [vmem:[%s11513_s0 + $0x408] sm:$0xff]  ;;  %636 = vmatpush.msra.mxu3 %v438_v27  ;;  %v487_v13 = vld [vmem:[%s11513_s0 + $0xe10] sm:$0xff] }
  0x10   :  { %v421_v29 = vld [vmem:[%s11513_s0 + $0xc00] sm:$0xff]  ;;  %v422_v31 = vld [vmem:[%s11513_s0 + $0xc08] sm:$0xff]  ;;  %568 = vmatpush.msra.mxu0 %v165_v28  ;;  %614 = vmatpush.msra.mxu2 %v166_v30  ;;  %v232_v14 = vld [vmem:[%s11513_s0 + $0x618] sm:$0xff] }
  0x11   :  { %v149_v32 = vld [vmem:[%s11513_s0 + $0x380] sm:$0xff]  ;;  %591 = vmatpush.msra.mxu1 %v421_v29  ;;  %v150_v34 = vld [vmem:[%s11513_s0 + $0x388] sm:$0xff]  ;;  %637 = vmatpush.msra.mxu3 %v422_v31  ;;  %v488_v15 = vld [vmem:[%s11513_s0 + $0xe18] sm:$0xff] }
  0x12   :  { %v405_v33 = vld [vmem:[%s11513_s0 + $0xb80] sm:$0xff]  ;;  %v406_v35 = vld [vmem:[%s11513_s0 + $0xb88] sm:$0xff]  ;;  %569 = vmatpush.msra.mxu0 %v149_v32  ;;  %615 = vmatpush.msra.mxu2 %v150_v34  ;;  %v215_v16 = vld [vmem:[%s11513_s0 + $0x590] sm:$0xff] }
  0x13   :  { %v133_v36 = vld [vmem:[%s11513_s0 + $0x300] sm:$0xff]  ;;  %592 = vmatpush.msra.mxu1 %v405_v33  ;;  %v134_v38 = vld [vmem:[%s11513_s0 + $0x308] sm:$0xff]  ;;  %638 = vmatpush.msra.mxu3 %v406_v35  ;;  %v471_v17 = vld [vmem:[%s11513_s0 + $0xd90] sm:$0xff] }
  0x14   :  { %v389_v37 = vld [vmem:[%s11513_s0 + $0xb00] sm:$0xff]  ;;  %v390_v39 = vld [vmem:[%s11513_s0 + $0xb08] sm:$0xff]  ;;  %570 = vmatpush.msra.mxu0 %v133_v36  ;;  %616 = vmatpush.msra.mxu2 %v134_v38  ;;  %v216_v18 = vld [vmem:[%s11513_s0 + $0x598] sm:$0xff] }
  0x15   :  { %v117_v40 = vld [vmem:[%s11513_s0 + $0x280] sm:$0xff]  ;;  %593 = vmatpush.msra.mxu1 %v389_v37  ;;  %v118_v42 = vld [vmem:[%s11513_s0 + $0x288] sm:$0xff]  ;;  %639 = vmatpush.msra.mxu3 %v390_v39  ;;  %v472_v19 = vld [vmem:[%s11513_s0 + $0xd98] sm:$0xff] }
  0x16   :  { %v373_v41 = vld [vmem:[%s11513_s0 + $0xa80] sm:$0xff]  ;;  %v374_v43 = vld [vmem:[%s11513_s0 + $0xa88] sm:$0xff]  ;;  %571 = vmatpush.msra.mxu0 %v117_v40  ;;  %617 = vmatpush.msra.mxu2 %v118_v42  ;;  %v199_v20 = vld [vmem:[%s11513_s0 + $0x510] sm:$0xff] }
  0x17   :  { %v101_v44 = vld [vmem:[%s11513_s0 + $0x200] sm:$0xff]  ;;  %594 = vmatpush.msra.mxu1 %v373_v41  ;;  %v102_v46 = vld [vmem:[%s11513_s0 + $0x208] sm:$0xff]  ;;  %640 = vmatpush.msra.mxu3 %v374_v43  ;;  %v455_v21 = vld [vmem:[%s11513_s0 + $0xd10] sm:$0xff] }
  0x18   :  { %v357_v45 = vld [vmem:[%s11513_s0 + $0xa00] sm:$0xff]  ;;  %v358_v47 = vld [vmem:[%s11513_s0 + $0xa08] sm:$0xff]  ;;  %572 = vmatpush.msra.mxu0 %v101_v44  ;;  %618 = vmatpush.msra.mxu2 %v102_v46  ;;  %v200_v22 = vld [vmem:[%s11513_s0 + $0x518] sm:$0xff] }
  0x19   :  { %v85_v48 = vld [vmem:[%s11513_s0 + $0x180] sm:$0xff]  ;;  %595 = vmatpush.msra.mxu1 %v357_v45  ;;  %v86_v50 = vld [vmem:[%s11513_s0 + $0x188] sm:$0xff]  ;;  %641 = vmatpush.msra.mxu3 %v358_v47  ;;  %v456_v23 = vld [vmem:[%s11513_s0 + $0xd18] sm:$0xff] }
  0x1a   :  { %v341_v49 = vld [vmem:[%s11513_s0 + $0x980] sm:$0xff]  ;;  %v342_v51 = vld [vmem:[%s11513_s0 + $0x988] sm:$0xff]  ;;  %573 = vmatpush.msra.mxu0 %v85_v48  ;;  %619 = vmatpush.msra.mxu2 %v86_v50  ;;  %v183_v24 = vld [vmem:[%s11513_s0 + $0x490] sm:$0xff] }
  0x1b   :  { %v69_v52 = vld [vmem:[%s11513_s0 + $0x100] sm:$0xff]  ;;  %596 = vmatpush.msra.mxu1 %v341_v49  ;;  %v70_v54 = vld [vmem:[%s11513_s0 + $0x108] sm:$0xff]  ;;  %642 = vmatpush.msra.mxu3 %v342_v51  ;;  %v439_v25 = vld [vmem:[%s11513_s0 + $0xc90] sm:$0xff] }
  0x1c   :  { %v325_v53 = vld [vmem:[%s11513_s0 + $0x900] sm:$0xff]  ;;  %v326_v55 = vld [vmem:[%s11513_s0 + $0x908] sm:$0xff]  ;;  %574 = vmatpush.msra.mxu0 %v69_v52  ;;  %620 = vmatpush.msra.mxu2 %v70_v54  ;;  %v184_v26 = vld [vmem:[%s11513_s0 + $0x498] sm:$0xff] }
  0x1d   :  { %v53_v56 = vld [vmem:[%s11513_s0 + $0x80] sm:$0xff]  ;;  %597 = vmatpush.msra.mxu1 %v325_v53  ;;  %v54_v58 = vld [vmem:[%s11513_s0 + $0x88] sm:$0xff]  ;;  %643 = vmatpush.msra.mxu3 %v326_v55  ;;  %v440_v27 = vld [vmem:[%s11513_s0 + $0xc98] sm:$0xff] }
  0x1e   :  { %v309_v57 = vld [vmem:[%s11513_s0 + $0x880] sm:$0xff]  ;;  %v310_v59 = vld [vmem:[%s11513_s0 + $0x888] sm:$0xff]  ;;  %575 = vmatpush.msra.mxu0 %v53_v56  ;;  %621 = vmatpush.msra.mxu2 %v54_v58  ;;  %v167_v28 = vld [vmem:[%s11513_s0 + $0x410] sm:$0xff] }
  0x1f   :  { %v37_v60 = vld [vmem:[%s11513_s0] sm:$0xff]  ;;  %598 = vmatpush.msra.mxu1 %v309_v57  ;;  %v38_v62 = vld [vmem:[%s11513_s0 + $0x8] sm:$0xff]  ;;  %644 = vmatpush.msra.mxu3 %v310_v59  ;;  %v423_v29 = vld [vmem:[%s11513_s0 + $0xc10] sm:$0xff] }
  0x20   :  { %v293_v61 = vld [vmem:[%s11513_s0 + $0x800] sm:$0xff]  ;;  %v294_v63 = vld [vmem:[%s11513_s0 + $0x808] sm:$0xff]  ;;  %576 = vmatpush.msra.mxu0 %v37_v60  ;;  %622 = vmatpush.msra.mxu2 %v38_v62  ;;  %v168_v30 = vld [vmem:[%s11513_s0 + $0x418] sm:$0xff] }
  0x21   :  { %599 = vmatpush.msra.mxu1 %v293_v61  ;;  %645 = vmatpush.msra.mxu3 %v294_v63  ;;  %v424_v31 = vld [vmem:[%s11513_s0 + $0xc18] sm:$0xff]  ;;  %v151_v32 = vld [vmem:[%s11513_s0 + $0x390] sm:$0xff] }
  0x22   :  { %653 = vmatpush.msrb.mxu0 %v279_v0  ;;  %699 = vmatpush.msrb.mxu2 %v280_v2  ;;  %v407_v33 = vld [vmem:[%s11513_s0 + $0xb90] sm:$0xff]  ;;  %v152_v34 = vld [vmem:[%s11513_s0 + $0x398] sm:$0xff] }
  0x23   :  { %676 = vmatpush.msrb.mxu1 %v535_v1  ;;  %722 = vmatpush.msrb.mxu3 %v536_v3  ;;  %v408_v35 = vld [vmem:[%s11513_s0 + $0xb98] sm:$0xff]  ;;  %v135_v36 = vld [vmem:[%s11513_s0 + $0x310] sm:$0xff] }
  0x24   :  { %654 = vmatpush.msrb.mxu0 %v263_v4  ;;  %700 = vmatpush.msrb.mxu2 %v264_v6  ;;  %v391_v37 = vld [vmem:[%s11513_s0 + $0xb10] sm:$0xff]  ;;  %v136_v38 = vld [vmem:[%s11513_s0 + $0x318] sm:$0xff] }
  0x25   :  { %677 = vmatpush.msrb.mxu1 %v519_v5  ;;  %723 = vmatpush.msrb.mxu3 %v520_v7  ;;  %v392_v39 = vld [vmem:[%s11513_s0 + $0xb18] sm:$0xff]  ;;  %v119_v40 = vld [vmem:[%s11513_s0 + $0x290] sm:$0xff] }
  0x26   :  { %655 = vmatpush.msrb.mxu0 %v247_v8  ;;  %701 = vmatpush.msrb.mxu2 %v248_v10  ;;  %v375_v41 = vld [vmem:[%s11513_s0 + $0xa90] sm:$0xff]  ;;  %v120_v42 = vld [vmem:[%s11513_s0 + $0x298] sm:$0xff] }
  0x27   :  { %678 = vmatpush.msrb.mxu1 %v503_v9  ;;  %724 = vmatpush.msrb.mxu3 %v504_v11  ;;  %v376_v43 = vld [vmem:[%s11513_s0 + $0xa98] sm:$0xff]  ;;  %v103_v44 = vld [vmem:[%s11513_s0 + $0x210] sm:$0xff] }
  0x28   :  { %656 = vmatpush.msrb.mxu0 %v231_v12  ;;  %702 = vmatpush.msrb.mxu2 %v232_v14  ;;  %v359_v45 = vld [vmem:[%s11513_s0 + $0xa10] sm:$0xff]  ;;  %v104_v46 = vld [vmem:[%s11513_s0 + $0x218] sm:$0xff] }
  0x29   :  { %679 = vmatpush.msrb.mxu1 %v487_v13  ;;  %725 = vmatpush.msrb.mxu3 %v488_v15  ;;  %v360_v47 = vld [vmem:[%s11513_s0 + $0xa18] sm:$0xff]  ;;  %v87_v48 = vld [vmem:[%s11513_s0 + $0x190] sm:$0xff] }
  0x2a   :  { %657 = vmatpush.msrb.mxu0 %v215_v16  ;;  %703 = vmatpush.msrb.mxu2 %v216_v18  ;;  %v343_v49 = vld [vmem:[%s11513_s0 + $0x990] sm:$0xff]  ;;  %v88_v50 = vld [vmem:[%s11513_s0 + $0x198] sm:$0xff] }
  0x2b   :  { %680 = vmatpush.msrb.mxu1 %v471_v17  ;;  %726 = vmatpush.msrb.mxu3 %v472_v19  ;;  %v344_v51 = vld [vmem:[%s11513_s0 + $0x998] sm:$0xff]  ;;  %v71_v52 = vld [vmem:[%s11513_s0 + $0x110] sm:$0xff] }
  0x2c   :  { %658 = vmatpush.msrb.mxu0 %v199_v20  ;;  %704 = vmatpush.msrb.mxu2 %v200_v22  ;;  %v327_v53 = vld [vmem:[%s11513_s0 + $0x910] sm:$0xff]  ;;  %v72_v54 = vld [vmem:[%s11513_s0 + $0x118] sm:$0xff] }
  0x2d   :  { %681 = vmatpush.msrb.mxu1 %v455_v21  ;;  %727 = vmatpush.msrb.mxu3 %v456_v23  ;;  %v328_v55 = vld [vmem:[%s11513_s0 + $0x918] sm:$0xff]  ;;  %v55_v56 = vld [vmem:[%s11513_s0 + $0x90] sm:$0xff] }
  0x2e   :  { %659 = vmatpush.msrb.mxu0 %v183_v24  ;;  %705 = vmatpush.msrb.mxu2 %v184_v26  ;;  %v311_v57 = vld [vmem:[%s11513_s0 + $0x890] sm:$0xff]  ;;  %v56_v58 = vld [vmem:[%s11513_s0 + $0x98] sm:$0xff] }
  0x2f   :  { %682 = vmatpush.msrb.mxu1 %v439_v25  ;;  %728 = vmatpush.msrb.mxu3 %v440_v27  ;;  %v312_v59 = vld [vmem:[%s11513_s0 + $0x898] sm:$0xff]  ;;  %v39_v60 = vld [vmem:[%s11513_s0 + $0x10] sm:$0xff] }
  0x30   :  { %660 = vmatpush.msrb.mxu0 %v167_v28  ;;  %706 = vmatpush.msrb.mxu2 %v168_v30  ;;  %v295_v61 = vld [vmem:[%s11513_s0 + $0x810] sm:$0xff] }
  0x31   :  { %683 = vmatpush.msrb.mxu1 %v423_v29  ;;  %729 = vmatpush.msrb.mxu3 %v424_v31 }
  0x32   :  { %661 = vmatpush.msrb.mxu0 %v151_v32  ;;  %707 = vmatpush.msrb.mxu2 %v152_v34 }
  0x33   :  { %684 = vmatpush.msrb.mxu1 %v407_v33  ;;  %730 = vmatpush.msrb.mxu3 %v408_v35 }
  0x34   :  { %662 = vmatpush.msrb.mxu0 %v135_v36  ;;  %708 = vmatpush.msrb.mxu2 %v136_v38 }
  0x35   :  { %685 = vmatpush.msrb.mxu1 %v391_v37  ;;  %731 = vmatpush.msrb.mxu3 %v392_v39 }
  0x36   :  { %663 = vmatpush.msrb.mxu0 %v119_v40  ;;  %709 = vmatpush.msrb.mxu2 %v120_v42 }
  0x37   :  { %686 = vmatpush.msrb.mxu1 %v375_v41  ;;  %732 = vmatpush.msrb.mxu3 %v376_v43 }
  0x38   :  { %664 = vmatpush.msrb.mxu0 %v103_v44  ;;  %710 = vmatpush.msrb.mxu2 %v104_v46 }
  0x39   :  { %687 = vmatpush.msrb.mxu1 %v359_v45  ;;  %733 = vmatpush.msrb.mxu3 %v360_v47 }
  0x3a   :  { %665 = vmatpush.msrb.mxu0 %v87_v48  ;;  %711 = vmatpush.msrb.mxu2 %v88_v50 }
  0x3b   :  { %688 = vmatpush.msrb.mxu1 %v343_v49  ;;  %734 = vmatpush.msrb.mxu3 %v344_v51 }
  0x3c   :  { %666 = vmatpush.msrb.mxu0 %v71_v52  ;;  %712 = vmatpush.msrb.mxu2 %v72_v54 }
  0x3d   :  { %689 = vmatpush.msrb.mxu1 %v327_v53  ;;  %735 = vmatpush.msrb.mxu3 %v328_v55 }
  0x3e   :  { %14 = vsyncpa [#allocation3], 0  ;;  %667 = vmatpush.msrb.mxu0 %v55_v56  ;;  %v40_v62 = vld [vmem:[%s11513_s0 + $0x18] sm:$0xff]  ;;  %713 = vmatpush.msrb.mxu2 %v56_v58  ;;  %v6433_v0 = vld [vmem:[%s11514_s1] sm:$0xff]  ;;  %v5994_v19 = vmov 0   ;;  %vm1338_vm0 = vcmask 130048  }
  0x3f   :  { %690 = vmatpush.msrb.mxu1 %v311_v57  ;;  %v296_v63 = vld [vmem:[%s11513_s0 + $0x818] sm:$0xff]  ;;  %736 = vmatpush.msrb.mxu3 %v312_v59  ;;  %v6438_v1 = vld [vmem:[%s11514_s1 + $0x8] sm:$0xff]  ;;  %v281_v2 = vld [vmem:[%s11513_s0 + $0x7a0] sm:$0xff]  ;;  %vm2229_vm1 = vcmask 1040384   ;;  %s5995_s24 = smov [#allocation2]   ;;  %s4830_s27 = sshll.u32 %s11522_s9, 4  ;;  %s4831_s27 = int_to_ptr.hbm [resolvable:$true] %s4830_s27 }
  0x40   :  { %668 = vmatpush.msrb.mxu0 %v39_v60  ;;  %714 = vmatpush.msrb.mxu2 %v40_v62  ;;  %v537_v3 = vld [vmem:[%s11513_s0 + $0xfa0] sm:$0xff]  ;;  %v282_v4 = vld [vmem:[%s11513_s0 + $0x7a8] sm:$0xff]  ;;  %v6598_v53 = vld [vmem:[%s11514_s1 + $0x10] sm:$0xff]  ;;  %vm4821_vm2 = vcmask 16384  }
  0x41   :  { %691 = vmatpush.msrb.mxu1 %v295_v61  ;;  %737 = vmatpush.msrb.mxu3 %v296_v63  ;;  %v538_v5 = vld [vmem:[%s11513_s0 + $0xfa8] sm:$0xff]  ;;  %v265_v6 = vld [vmem:[%s11513_s0 + $0x720] sm:$0xff]  ;;  %v6603_v54 = vld [vmem:[%s11514_s1 + $0x18] sm:$0xff] }
  0x42   :  { %577 = vmatmul.f32.vlgmr.msra.gmra.mxu0 %v6433_v0  ;;  %600 = vmatmul.f32.vlgmr.msra.gmra.mxu1 %v6438_v1  ;;  %v521_v7 = vld [vmem:[%s11513_s0 + $0xf20] sm:$0xff]  ;;  %v266_v8 = vld [vmem:[%s11513_s0 + $0x728] sm:$0xff] }
  0x43   :  { %623 = vmatmul.f32.vlgmr.msra.gmra.mxu2 %v6433_v0  ;;  %646 = vmatmul.f32.vlgmr.msra.gmra.mxu3 %v6438_v1  ;;  %v522_v9 = vld [vmem:[%s11513_s0 + $0xf28] sm:$0xff]  ;;  %v249_v10 = vld [vmem:[%s11513_s0 + $0x6a0] sm:$0xff] }
  0x44   :  { %745 = vmatpush.msra.mxu0 %v281_v2  ;;  %768 = vmatpush.msra.mxu1 %v537_v3  ;;  %v505_v11 = vld [vmem:[%s11513_s0 + $0xea0] sm:$0xff]  ;;  %v250_v12 = vld [vmem:[%s11513_s0 + $0x6a8] sm:$0xff] }
  0x45   :  { %791 = vmatpush.msra.mxu2 %v282_v4  ;;  %814 = vmatpush.msra.mxu3 %v538_v5  ;;  %v506_v13 = vld [vmem:[%s11513_s0 + $0xea8] sm:$0xff]  ;;  %v233_v14 = vld [vmem:[%s11513_s0 + $0x620] sm:$0xff] }
  0x46   :  { %746 = vmatpush.msra.mxu0 %v265_v6  ;;  %769 = vmatpush.msra.mxu1 %v521_v7  ;;  %v489_v15 = vld [vmem:[%s11513_s0 + $0xe20] sm:$0xff]  ;;  %v234_v16 = vld [vmem:[%s11513_s0 + $0x628] sm:$0xff] }
  0x47   :  { %792 = vmatpush.msra.mxu2 %v266_v8  ;;  %815 = vmatpush.msra.mxu3 %v522_v9  ;;  %v490_v17 = vld [vmem:[%s11513_s0 + $0xe28] sm:$0xff]  ;;  %v217_v20 = vld [vmem:[%s11513_s0 + $0x5a0] sm:$0xff]  ;;  %v283_v9 = vld [vmem:[%s11513_s0 + $0x7b0] sm:$0xff] }
  0x48   :  { %747 = vmatpush.msra.mxu0 %v249_v10  ;;  %770 = vmatpush.msra.mxu1 %v505_v11  ;;  %v550_v18 = vld [vmem:[%s11515_s2 + $0x8] sm:$0xff]  ;;  %v473_v21 = vld [vmem:[%s11513_s0 + $0xda0] sm:$0xff]  ;;  %v539_v10 = vld [vmem:[%s11513_s0 + $0xfb0] sm:$0xff] }
  0x49   :  { %793 = vmatpush.msra.mxu2 %v250_v12  ;;  %816 = vmatpush.msra.mxu3 %v506_v13  ;;  %v218_v22 = vld [vmem:[%s11513_s0 + $0x5a8] sm:$0xff]  ;;  %v201_v24 = vld [vmem:[%s11513_s0 + $0x520] sm:$0xff]  ;;  %v284_v11 = vld [vmem:[%s11513_s0 + $0x7b8] sm:$0xff] }
  0x4a   :  { %5961 = vset.pattern.permute.xlu0 %v5994_v19  ;;  %748 = vmatpush.msra.mxu0 %v233_v14  ;;  %v474_v23 = vld [vmem:[%s11513_s0 + $0xda8] sm:$0xff]  ;;  %v457_v25 = vld [vmem:[%s11513_s0 + $0xd20] sm:$0xff]  ;;  %v540_v12 = vld [vmem:[%s11513_s0 + $0xfb8] sm:$0xff] }
  0x4b   :  { %771 = vmatpush.msra.mxu1 %v489_v15  ;;  %794 = vmatpush.msra.mxu2 %v234_v16  ;;  %v202_v26 = vld [vmem:[%s11513_s0 + $0x528] sm:$0xff]  ;;  %v185_v28 = vld [vmem:[%s11513_s0 + $0x4a0] sm:$0xff]  ;;  %v267_v13 = vld [vmem:[%s11513_s0 + $0x730] sm:$0xff] }
  0x4c   :  { %817 = vmatpush.msra.mxu3 %v490_v17  ;;  %558 = vperm.xlu0 %5961, %v550_v18   ;;  %v458_v27 = vld [vmem:[%s11513_s0 + $0xd28] sm:$0xff]  ;;  %v441_v29 = vld [vmem:[%s11513_s0 + $0xca0] sm:$0xff]  ;;  %v523_v14 = vld [vmem:[%s11513_s0 + $0xf30] sm:$0xff] }
  0x4d   :  { %749 = vmatpush.msra.mxu0 %v217_v20  ;;  %772 = vmatpush.msra.mxu1 %v473_v21  ;;  %v186_v30 = vld [vmem:[%s11513_s0 + $0x4a8] sm:$0xff]  ;;  %v169_v32 = vld [vmem:[%s11513_s0 + $0x420] sm:$0xff]  ;;  %v268_v15 = vld [vmem:[%s11513_s0 + $0x738] sm:$0xff] }
  0x4e   :  { %795 = vmatpush.msra.mxu2 %v218_v22  ;;  %818 = vmatpush.msra.mxu3 %v474_v23  ;;  %v442_v31 = vld [vmem:[%s11513_s0 + $0xca8] sm:$0xff]  ;;  %v425_v33 = vld [vmem:[%s11513_s0 + $0xc20] sm:$0xff]  ;;  %v524_v16 = vld [vmem:[%s11513_s0 + $0xf38] sm:$0xff] }
  0x4f   :  { %750 = vmatpush.msra.mxu0 %v201_v24  ;;  %773 = vmatpush.msra.mxu1 %v457_v25  ;;  %v170_v34 = vld [vmem:[%s11513_s0 + $0x428] sm:$0xff]  ;;  %v549_v36 = vld [vmem:[%s11515_s2] sm:$0xff]  ;;  %v251_v17 = vld [vmem:[%s11513_s0 + $0x6b0] sm:$0xff] }
  0x50   :  { %796 = vmatpush.msra.mxu2 %v202_v26  ;;  %819 = vmatpush.msra.mxu3 %v458_v27  ;;  %v426_v35 = vld [vmem:[%s11513_s0 + $0xc28] sm:$0xff]  ;;  %v153_v37 = vld [vmem:[%s11513_s0 + $0x3a0] sm:$0xff]  ;;  %v507_v18 = vld [vmem:[%s11513_s0 + $0xeb0] sm:$0xff] }
  0x51   :  { %751 = vmatpush.msra.mxu0 %v185_v28  ;;  %774 = vmatpush.msra.mxu1 %v441_v29  ;;  %v409_v38 = vld [vmem:[%s11513_s0 + $0xba0] sm:$0xff]  ;;  %v154_v39 = vld [vmem:[%s11513_s0 + $0x3a8] sm:$0xff]  ;;  %v252_v20 = vld [vmem:[%s11513_s0 + $0x6b8] sm:$0xff] }
  0x52   :  { %797 = vmatpush.msra.mxu2 %v186_v30  ;;  %820 = vmatpush.msra.mxu3 %v442_v31  ;;  %v410_v40 = vld [vmem:[%s11513_s0 + $0xba8] sm:$0xff]  ;;  %v137_v41 = vld [vmem:[%s11513_s0 + $0x320] sm:$0xff]  ;;  %v508_v21 = vld [vmem:[%s11513_s0 + $0xeb8] sm:$0xff] }
  0x53   :  { %752 = vmatpush.msra.mxu0 %v169_v32  ;;  %775 = vmatpush.msra.mxu1 %v425_v33  ;;  %v393_v42 = vld [vmem:[%s11513_s0 + $0xb20] sm:$0xff]  ;;  %v138_v43 = vld [vmem:[%s11513_s0 + $0x328] sm:$0xff]  ;;  %v235_v22 = vld [vmem:[%s11513_s0 + $0x630] sm:$0xff] }
  0x54   :  { %798 = vmatpush.msra.mxu2 %v170_v34  ;;  %821 = vmatpush.msra.mxu3 %v426_v35  ;;  %v394_v44 = vld [vmem:[%s11513_s0 + $0xb28] sm:$0xff]  ;;  %v121_v45 = vld [vmem:[%s11513_s0 + $0x2a0] sm:$0xff]  ;;  %v491_v23 = vld [vmem:[%s11513_s0 + $0xe30] sm:$0xff] }
  0x55   :  { %553 = vperm.xlu0 %5961, %v549_v36   ;;  %753 = vmatpush.msra.mxu0 %v153_v37  ;;  %v377_v46 = vld [vmem:[%s11513_s0 + $0xaa0] sm:$0xff]  ;;  %v122_v47 = vld [vmem:[%s11513_s0 + $0x2a8] sm:$0xff]  ;;  %v236_v24 = vld [vmem:[%s11513_s0 + $0x638] sm:$0xff] }
  0x56   :  { %776 = vmatpush.msra.mxu1 %v409_v38  ;;  %799 = vmatpush.msra.mxu2 %v154_v39  ;;  %v378_v48 = vld [vmem:[%s11513_s0 + $0xaa8] sm:$0xff]  ;;  %v105_v49 = vld [vmem:[%s11513_s0 + $0x220] sm:$0xff]  ;;  %v492_v25 = vld [vmem:[%s11513_s0 + $0xe38] sm:$0xff] }
  0x57   :  { %822 = vmatpush.msra.mxu3 %v410_v40  ;;  %754 = vmatpush.msra.mxu0 %v137_v41  ;;  %v361_v50 = vld [vmem:[%s11513_s0 + $0xa20] sm:$0xff]  ;;  %v106_v51 = vld [vmem:[%s11513_s0 + $0x228] sm:$0xff]  ;;  %v219_v26 = vld [vmem:[%s11513_s0 + $0x5b0] sm:$0xff] }
  0x58   :  { %777 = vmatpush.msra.mxu1 %v393_v42  ;;  %800 = vmatpush.msra.mxu2 %v138_v43  ;;  %v362_v52 = vld [vmem:[%s11513_s0 + $0xa28] sm:$0xff]  ;;  %v89_v55 = vld [vmem:[%s11513_s0 + $0x1a0] sm:$0xff]  ;;  %v475_v27 = vld [vmem:[%s11513_s0 + $0xdb0] sm:$0xff] }
  0x59   :  { %823 = vmatpush.msra.mxu3 %v394_v44  ;;  %755 = vmatpush.msra.mxu0 %v121_v45  ;;  %v345_v56 = vld [vmem:[%s11513_s0 + $0x9a0] sm:$0xff]  ;;  %v90_v57 = vld [vmem:[%s11513_s0 + $0x1a8] sm:$0xff]  ;;  %v220_v28 = vld [vmem:[%s11513_s0 + $0x5b8] sm:$0xff] }
  0x5a   :  { %778 = vmatpush.msra.mxu1 %v377_v46  ;;  %801 = vmatpush.msra.mxu2 %v122_v47  ;;  %v346_v58 = vld [vmem:[%s11513_s0 + $0x9a8] sm:$0xff]  ;;  %v73_v59 = vld [vmem:[%s11513_s0 + $0x120] sm:$0xff]  ;;  %v476_v29 = vld [vmem:[%s11513_s0 + $0xdb8] sm:$0xff] }
  0x5b   :  { %824 = vmatpush.msra.mxu3 %v378_v48  ;;  %756 = vmatpush.msra.mxu0 %v105_v49  ;;  %v329_v60 = vld [vmem:[%s11513_s0 + $0x920] sm:$0xff]  ;;  %v74_v61 = vld [vmem:[%s11513_s0 + $0x128] sm:$0xff]  ;;  %v203_v30 = vld [vmem:[%s11513_s0 + $0x530] sm:$0xff] }
  0x5c   :  { %779 = vmatpush.msra.mxu1 %v361_v50  ;;  %802 = vmatpush.msra.mxu2 %v106_v51  ;;  %v330_v62 = vld [vmem:[%s11513_s0 + $0x928] sm:$0xff]  ;;  %v57_v63 = vld [vmem:[%s11513_s0 + $0xa0] sm:$0xff]  ;;  %v459_v31 = vld [vmem:[%s11513_s0 + $0xd30] sm:$0xff] }
  0x5d   :  { %825 = vmatpush.msra.mxu3 %v362_v52  ;;  %580 = vmatmul.f32.gmra.mxu0 %v6598_v53  ;;  %v313_v2 = vld [vmem:[%s11513_s0 + $0x8a0] sm:$0xff]  ;;  %v58_v3 = vld [vmem:[%s11513_s0 + $0xa8] sm:$0xff]  ;;  %v204_v32 = vld [vmem:[%s11513_s0 + $0x538] sm:$0xff] }
  0x5e   :  { %603 = vmatmul.f32.gmra.mxu1 %v6603_v54  ;;  %626 = vmatmul.f32.gmra.mxu2 %v6598_v53  ;;  %v314_v4 = vld [vmem:[%s11513_s0 + $0x8a8] sm:$0xff]  ;;  %v41_v5 = vld [vmem:[%s11513_s0 + $0x20] sm:$0xff]  ;;  %v460_v33 = vld [vmem:[%s11513_s0 + $0xd38] sm:$0xff] }
  0x5f   :  { %649 = vmatmul.f32.gmra.mxu3 %v6603_v54  ;;  %757 = vmatpush.msra.mxu0 %v89_v55  ;;  %v297_v6 = vld [vmem:[%s11513_s0 + $0x820] sm:$0xff]  ;;  %v42_v7 = vld [vmem:[%s11513_s0 + $0x28] sm:$0xff]  ;;  %v187_v34 = vld [vmem:[%s11513_s0 + $0x4b0] sm:$0xff] }
  0x60   :  { %780 = vmatpush.msra.mxu1 %v345_v56  ;;  %803 = vmatpush.msra.mxu2 %v90_v57  ;;  %v298_v8 = vld [vmem:[%s11513_s0 + $0x828] sm:$0xff]  ;;  %v443_v35 = vld [vmem:[%s11513_s0 + $0xcb0] sm:$0xff]  ;;  %v188_v36 = vld [vmem:[%s11513_s0 + $0x4b8] sm:$0xff] }
  0x61   :  { %826 = vmatpush.msra.mxu3 %v346_v58  ;;  %758 = vmatpush.msra.mxu0 %v73_v59  ;;  %v444_v37 = vld [vmem:[%s11513_s0 + $0xcb8] sm:$0xff]  ;;  %v171_v38 = vld [vmem:[%s11513_s0 + $0x430] sm:$0xff] }
  0x62   :  { %781 = vmatpush.msra.mxu1 %v329_v60  ;;  %804 = vmatpush.msra.mxu2 %v74_v61  ;;  %v427_v39 = vld [vmem:[%s11513_s0 + $0xc30] sm:$0xff]  ;;  %v172_v40 = vld [vmem:[%s11513_s0 + $0x438] sm:$0xff] }
  0x63   :  { %827 = vmatpush.msra.mxu3 %v330_v62  ;;  %759 = vmatpush.msra.mxu0 %v57_v63  ;;  %v428_v41 = vld [vmem:[%s11513_s0 + $0xc38] sm:$0xff]  ;;  %v155_v42 = vld [vmem:[%s11513_s0 + $0x3b0] sm:$0xff] }
  0x64   :  { %782 = vmatpush.msra.mxu1 %v313_v2  ;;  %805 = vmatpush.msra.mxu2 %v58_v3  ;;  %v411_v43 = vld [vmem:[%s11513_s0 + $0xbb0] sm:$0xff]  ;;  %v156_v44 = vld [vmem:[%s11513_s0 + $0x3b8] sm:$0xff] }
  0x65   :  { %828 = vmatpush.msra.mxu3 %v314_v4  ;;  %760 = vmatpush.msra.mxu0 %v41_v5  ;;  %v412_v45 = vld [vmem:[%s11513_s0 + $0xbb8] sm:$0xff]  ;;  %v139_v46 = vld [vmem:[%s11513_s0 + $0x330] sm:$0xff] }
  0x66   :  { %783 = vmatpush.msra.mxu1 %v297_v6  ;;  %806 = vmatpush.msra.mxu2 %v42_v7  ;;  %v395_v47 = vld [vmem:[%s11513_s0 + $0xb30] sm:$0xff]  ;;  %v140_v48 = vld [vmem:[%s11513_s0 + $0x338] sm:$0xff] }
  0x67   :  { %829 = vmatpush.msra.mxu3 %v298_v8  ;;  %669 = vmatmul.f32.vlgmr.msrb.gmra.mxu0 %v6433_v0  ;;  %v396_v49 = vld [vmem:[%s11513_s0 + $0xb38] sm:$0xff]  ;;  %v123_v50 = vld [vmem:[%s11513_s0 + $0x2b0] sm:$0xff] }
  0x68   :  { %692 = vmatmul.f32.vlgmr.msrb.gmra.mxu1 %v6438_v1  ;;  %715 = vmatmul.f32.vlgmr.msrb.gmra.mxu2 %v6433_v0  ;;  %v379_v51 = vld [vmem:[%s11513_s0 + $0xab0] sm:$0xff]  ;;  %v124_v52 = vld [vmem:[%s11513_s0 + $0x2b8] sm:$0xff] }
  0x69   :  { %738 = vmatmul.f32.vlgmr.msrb.gmra.mxu3 %v6438_v1  ;;  %837 = vmatpush.msrb.mxu0 %v283_v9  ;;  %v380_v55 = vld [vmem:[%s11513_s0 + $0xab8] sm:$0xff]  ;;  %v107_v56 = vld [vmem:[%s11513_s0 + $0x230] sm:$0xff] }
  0x6a   :  { %860 = vmatpush.msrb.mxu1 %v539_v10  ;;  %883 = vmatpush.msrb.mxu2 %v284_v11  ;;  %v363_v57 = vld [vmem:[%s11513_s0 + $0xa30] sm:$0xff]  ;;  %v108_v58 = vld [vmem:[%s11513_s0 + $0x238] sm:$0xff] }
  0x6b   :  { %906 = vmatpush.msrb.mxu3 %v540_v12  ;;  %838 = vmatpush.msrb.mxu0 %v267_v13  ;;  %v364_v59 = vld [vmem:[%s11513_s0 + $0xa38] sm:$0xff]  ;;  %v91_v60 = vld [vmem:[%s11513_s0 + $0x1b0] sm:$0xff] }
  0x6c   :  { %861 = vmatpush.msrb.mxu1 %v523_v14  ;;  %884 = vmatpush.msrb.mxu2 %v268_v15  ;;  %v347_v61 = vld [vmem:[%s11513_s0 + $0x9b0] sm:$0xff]  ;;  %v92_v62 = vld [vmem:[%s11513_s0 + $0x1b8] sm:$0xff]  ;;  %v285_v14 = vld [vmem:[%s11513_s0 + $0x7c0] sm:$0xff] }
  0x6d   :  { %907 = vmatpush.msrb.mxu3 %v524_v16  ;;  %839 = vmatpush.msrb.mxu0 %v251_v17  ;;  %v348_v63 = vld [vmem:[%s11513_s0 + $0x9b8] sm:$0xff]  ;;  %v75_v2 = vld [vmem:[%s11513_s0 + $0x130] sm:$0xff]  ;;  %v541_v15 = vld [vmem:[%s11513_s0 + $0xfc0] sm:$0xff] }
  0x6e   :  { %862 = vmatpush.msrb.mxu1 %v507_v18  ;;  %885 = vmatpush.msrb.mxu2 %v252_v20  ;;  %v331_v3 = vld [vmem:[%s11513_s0 + $0x930] sm:$0xff]  ;;  %v76_v4 = vld [vmem:[%s11513_s0 + $0x138] sm:$0xff]  ;;  %v286_v16 = vld [vmem:[%s11513_s0 + $0x7c8] sm:$0xff] }
  0x6f   :  { %908 = vmatpush.msrb.mxu3 %v508_v21  ;;  %840 = vmatpush.msrb.mxu0 %v235_v22  ;;  %v332_v5 = vld [vmem:[%s11513_s0 + $0x938] sm:$0xff]  ;;  %v59_v6 = vld [vmem:[%s11513_s0 + $0xb0] sm:$0xff]  ;;  %v542_v17 = vld [vmem:[%s11513_s0 + $0xfc8] sm:$0xff] }
  0x70   :  { %863 = vmatpush.msrb.mxu1 %v491_v23  ;;  %886 = vmatpush.msrb.mxu2 %v236_v24  ;;  %v315_v7 = vld [vmem:[%s11513_s0 + $0x8b0] sm:$0xff]  ;;  %v60_v8 = vld [vmem:[%s11513_s0 + $0xb8] sm:$0xff]  ;;  %v269_v18 = vld [vmem:[%s11513_s0 + $0x740] sm:$0xff] }
  0x71   :  { %909 = vmatpush.msrb.mxu3 %v492_v25  ;;  %841 = vmatpush.msrb.mxu0 %v219_v26  ;;  %v316_v9 = vld [vmem:[%s11513_s0 + $0x8b8] sm:$0xff]  ;;  %v43_v10 = vld [vmem:[%s11513_s0 + $0x30] sm:$0xff]  ;;  %v525_v20 = vld [vmem:[%s11513_s0 + $0xf40] sm:$0xff] }
  0x72   :  { %864 = vmatpush.msrb.mxu1 %v475_v27  ;;  %887 = vmatpush.msrb.mxu2 %v220_v28  ;;  %v299_v11 = vld [vmem:[%s11513_s0 + $0x830] sm:$0xff]  ;;  %v44_v12 = vld [vmem:[%s11513_s0 + $0x38] sm:$0xff]  ;;  %v270_v21 = vld [vmem:[%s11513_s0 + $0x748] sm:$0xff] }
  0x73   :  { %910 = vmatpush.msrb.mxu3 %v476_v29  ;;  %718 = vmatmul.f32.gmra.mxu2 %v6598_v53  ;;  %v300_v13 = vld [vmem:[%s11513_s0 + $0x838] sm:$0xff]  ;;  %v526_v22 = vld [vmem:[%s11513_s0 + $0xf48] sm:$0xff]  ;;  %v253_v23 = vld [vmem:[%s11513_s0 + $0x6c0] sm:$0xff] }
  0x74   :  { %842 = vmatpush.msrb.mxu0 %v203_v30  ;;  %865 = vmatpush.msrb.mxu1 %v459_v31  ;;  %v509_v24 = vld [vmem:[%s11513_s0 + $0xec0] sm:$0xff]  ;;  %v254_v25 = vld [vmem:[%s11513_s0 + $0x6c8] sm:$0xff] }
  0x75   :  { %888 = vmatpush.msrb.mxu2 %v204_v32  ;;  %911 = vmatpush.msrb.mxu3 %v460_v33  ;;  %v510_v26 = vld [vmem:[%s11513_s0 + $0xec8] sm:$0xff]  ;;  %v237_v27 = vld [vmem:[%s11513_s0 + $0x640] sm:$0xff] }
  0x76   :  { %741 = vmatmul.f32.gmra.mxu3 %v6603_v54  ;;  %843 = vmatpush.msrb.mxu0 %v187_v34  ;;  %v493_v28 = vld [vmem:[%s11513_s0 + $0xe40] sm:$0xff]  ;;  %v238_v29 = vld [vmem:[%s11513_s0 + $0x648] sm:$0xff] }
  0x77   :  { %866 = vmatpush.msrb.mxu1 %v443_v35  ;;  %889 = vmatpush.msrb.mxu2 %v188_v36  ;;  %v494_v30 = vld [vmem:[%s11513_s0 + $0xe48] sm:$0xff]  ;;  %v221_v31 = vld [vmem:[%s11513_s0 + $0x5c0] sm:$0xff] }
  0x78   :  { %912 = vmatpush.msrb.mxu3 %v444_v37  ;;  %844 = vmatpush.msrb.mxu0 %v171_v38  ;;  %v477_v32 = vld [vmem:[%s11513_s0 + $0xdc0] sm:$0xff]  ;;  %v222_v33 = vld [vmem:[%s11513_s0 + $0x5c8] sm:$0xff] }
  0x79   :  { %867 = vmatpush.msrb.mxu1 %v427_v39  ;;  %890 = vmatpush.msrb.mxu2 %v172_v40  ;;  %v478_v34 = vld [vmem:[%s11513_s0 + $0xdc8] sm:$0xff]  ;;  %v205_v35 = vld [vmem:[%s11513_s0 + $0x540] sm:$0xff] }
  0x7a   :  { %913 = vmatpush.msrb.mxu3 %v428_v41  ;;  %672 = vmatmul.f32.gmra.mxu0 %v6598_v53  ;;  %v461_v36 = vld [vmem:[%s11513_s0 + $0xd40] sm:$0xff]  ;;  %v206_v37 = vld [vmem:[%s11513_s0 + $0x548] sm:$0xff] }
  0x7b   :  { %845 = vmatpush.msrb.mxu0 %v155_v42  ;;  %868 = vmatpush.msrb.mxu1 %v411_v43  ;;  %v462_v38 = vld [vmem:[%s11513_s0 + $0xd48] sm:$0xff]  ;;  %v189_v39 = vld [vmem:[%s11513_s0 + $0x4c0] sm:$0xff] }
  0x7c   :  { %891 = vmatpush.msrb.mxu2 %v156_v44  ;;  %914 = vmatpush.msrb.mxu3 %v412_v45  ;;  %v445_v40 = vld [vmem:[%s11513_s0 + $0xcc0] sm:$0xff]  ;;  %v190_v41 = vld [vmem:[%s11513_s0 + $0x4c8] sm:$0xff] }
  0x7d   :  { %695 = vmatmul.f32.gmra.mxu1 %v6603_v54  ;;  %807 = vmatmul.f32.vlgmr.msra.gmra.mxu2 %v6433_v0  ;;  %v446_v42 = vld [vmem:[%s11513_s0 + $0xcc8] sm:$0xff]  ;;  %v173_v43 = vld [vmem:[%s11513_s0 + $0x440] sm:$0xff] }
  0x7e   :  { %846 = vmatpush.msrb.mxu0 %v139_v46  ;;  %869 = vmatpush.msrb.mxu1 %v395_v47  ;;  %v429_v44 = vld [vmem:[%s11513_s0 + $0xc40] sm:$0xff]  ;;  %v174_v45 = vld [vmem:[%s11513_s0 + $0x448] sm:$0xff] }
  0x7f   :  { %892 = vmatpush.msrb.mxu2 %v140_v48  ;;  %915 = vmatpush.msrb.mxu3 %v396_v49  ;;  %v430_v46 = vld [vmem:[%s11513_s0 + $0xc48] sm:$0xff]  ;;  %v157_v47 = vld [vmem:[%s11513_s0 + $0x3c0] sm:$0xff] }
  0x80   :  { %830 = vmatmul.f32.vlgmr.msra.gmra.mxu3 %v6438_v1  ;;  %847 = vmatpush.msrb.mxu0 %v123_v50  ;;  %v413_v48 = vld [vmem:[%s11513_s0 + $0xbc0] sm:$0xff]  ;;  %v158_v49 = vld [vmem:[%s11513_s0 + $0x3c8] sm:$0xff] }
  0x81   :  { %870 = vmatpush.msrb.mxu1 %v379_v51  ;;  %893 = vmatpush.msrb.mxu2 %v124_v52  ;;  %v414_v50 = vld [vmem:[%s11513_s0 + $0xbc8] sm:$0xff]  ;;  %v141_v51 = vld [vmem:[%s11513_s0 + $0x340] sm:$0xff] }
  0x82   :  { %916 = vmatpush.msrb.mxu3 %v380_v55  ;;  %848 = vmatpush.msrb.mxu0 %v107_v56  ;;  %v397_v52 = vld [vmem:[%s11513_s0 + $0xb40] sm:$0xff]  ;;  %v142_v55 = vld [vmem:[%s11513_s0 + $0x348] sm:$0xff] }
  0x83   :  { %871 = vmatpush.msrb.mxu1 %v363_v57  ;;  %894 = vmatpush.msrb.mxu2 %v108_v58  ;;  %v398_v56 = vld [vmem:[%s11513_s0 + $0xb48] sm:$0xff]  ;;  %v125_v57 = vld [vmem:[%s11513_s0 + $0x2c0] sm:$0xff] }
  0x84   :  { %917 = vmatpush.msrb.mxu3 %v364_v59  ;;  %761 = vmatmul.f32.vlgmr.msra.gmra.mxu0 %v6433_v0  ;;  %v381_v58 = vld [vmem:[%s11513_s0 + $0xac0] sm:$0xff]  ;;  %v126_v59 = vld [vmem:[%s11513_s0 + $0x2c8] sm:$0xff] }
  0x85   :  { %849 = vmatpush.msrb.mxu0 %v91_v60  ;;  %872 = vmatpush.msrb.mxu1 %v347_v61  ;;  %v382_v60 = vld [vmem:[%s11513_s0 + $0xac8] sm:$0xff]  ;;  %v109_v61 = vld [vmem:[%s11513_s0 + $0x240] sm:$0xff] }
  0x86   :  { %895 = vmatpush.msrb.mxu2 %v92_v62  ;;  %918 = vmatpush.msrb.mxu3 %v348_v63  ;;  %v365_v62 = vld [vmem:[%s11513_s0 + $0xa40] sm:$0xff]  ;;  %v110_v63 = vld [vmem:[%s11513_s0 + $0x248] sm:$0xff] }
  0x87   :  { %784 = vmatmul.f32.vlgmr.msra.gmra.mxu1 %v6438_v1  ;;  %810 = vmatmul.f32.gmra.mxu2 %v6598_v53 }
  0x88   :  { %850 = vmatpush.msrb.mxu0 %v75_v2  ;;  %873 = vmatpush.msrb.mxu1 %v331_v3  ;;  %v366_v2 = vld [vmem:[%s11513_s0 + $0xa48] sm:$0xff]  ;;  %v93_v3 = vld [vmem:[%s11513_s0 + $0x1c0] sm:$0xff] }
  0x89   :  { %896 = vmatpush.msrb.mxu2 %v76_v4  ;;  %919 = vmatpush.msrb.mxu3 %v332_v5  ;;  %v349_v4 = vld [vmem:[%s11513_s0 + $0x9c0] sm:$0xff]  ;;  %v94_v5 = vld [vmem:[%s11513_s0 + $0x1c8] sm:$0xff] }
  0x8a   :  { %833 = vmatmul.f32.gmra.mxu3 %v6603_v54  ;;  %851 = vmatpush.msrb.mxu0 %v59_v6  ;;  %v350_v6 = vld [vmem:[%s11513_s0 + $0x9c8] sm:$0xff] }
  0x8b   :  { %874 = vmatpush.msrb.mxu1 %v315_v7  ;;  %897 = vmatpush.msrb.mxu2 %v60_v8  ;;  %v77_v7 = vld [vmem:[%s11513_s0 + $0x140] sm:$0xff] }
  0x8c   :  { %920 = vmatpush.msrb.mxu3 %v316_v9  ;;  %852 = vmatpush.msrb.mxu0 %v43_v10  ;;  %v333_v8 = vld [vmem:[%s11513_s0 + $0x940] sm:$0xff]  ;;  %v78_v9 = vld [vmem:[%s11513_s0 + $0x148] sm:$0xff] }
  0x8d   :  { %875 = vmatpush.msrb.mxu1 %v299_v11  ;;  %898 = vmatpush.msrb.mxu2 %v44_v12  ;;  %v334_v10 = vld [vmem:[%s11513_s0 + $0x948] sm:$0xff]  ;;  %v61_v11 = vld [vmem:[%s11513_s0 + $0xc0] sm:$0xff] }
  0x8e   :  { %921 = vmatpush.msrb.mxu3 %v300_v13  ;;  %764 = vmatmul.f32.gmra.mxu0 %v6598_v53  ;;  %v317_v12 = vld [vmem:[%s11513_s0 + $0x8c0] sm:$0xff]  ;;  %v62_v13 = vld [vmem:[%s11513_s0 + $0xc8] sm:$0xff] }
  0x8f   :  { %929 = vmatpush.msra.mxu0 %v285_v14  ;;  %952 = vmatpush.msra.mxu1 %v541_v15  ;;  %v318_v14 = vld [vmem:[%s11513_s0 + $0x8c8] sm:$0xff]  ;;  %v45_v15 = vld [vmem:[%s11513_s0 + $0x40] sm:$0xff] }
  0x90   :  { %975 = vmatpush.msra.mxu2 %v286_v16  ;;  %998 = vmatpush.msra.mxu3 %v542_v17  ;;  %v301_v16 = vld [vmem:[%s11513_s0 + $0x840] sm:$0xff]  ;;  %v46_v17 = vld [vmem:[%s11513_s0 + $0x48] sm:$0xff] }
  0x91   :  { %787 = vmatmul.f32.gmra.mxu1 %v6603_v54  ;;  %899 = vmatmul.f32.vlgmr.msrb.gmra.mxu2 %v6433_v0 }
  0x92   :  { %930 = vmatpush.msra.mxu0 %v269_v18  ;;  %953 = vmatpush.msra.mxu1 %v525_v20  ;;  %v302_v18 = vld [vmem:[%s11513_s0 + $0x848] sm:$0xff]  ;;  %v287_v20 = vld [vmem:[%s11513_s0 + $0x7d0] sm:$0xff] }
  0x93   :  { %976 = vmatpush.msra.mxu2 %v270_v21  ;;  %999 = vmatpush.msra.mxu3 %v526_v22  ;;  %v543_v21 = vld [vmem:[%s11513_s0 + $0xfd0] sm:$0xff]  ;;  %v288_v22 = vld [vmem:[%s11513_s0 + $0x7d8] sm:$0xff] }
  0x94   :  { %922 = vmatmul.f32.vlgmr.msrb.gmra.mxu3 %v6438_v1  ;;  %931 = vmatpush.msra.mxu0 %v253_v23  ;;  %v544_v23 = vld [vmem:[%s11513_s0 + $0xfd8] sm:$0xff] }
  0x95   :  { %954 = vmatpush.msra.mxu1 %v509_v24  ;;  %977 = vmatpush.msra.mxu2 %v254_v25  ;;  %v271_v24 = vld [vmem:[%s11513_s0 + $0x750] sm:$0xff] }
  0x96   :  { %1000 = vmatpush.msra.mxu3 %v510_v26  ;;  %932 = vmatpush.msra.mxu0 %v237_v27  ;;  %v527_v25 = vld [vmem:[%s11513_s0 + $0xf50] sm:$0xff]  ;;  %v272_v26 = vld [vmem:[%s11513_s0 + $0x758] sm:$0xff] }
  0x97   :  { %955 = vmatpush.msra.mxu1 %v493_v28  ;;  %978 = vmatpush.msra.mxu2 %v238_v29  ;;  %v255_v27 = vld [vmem:[%s11513_s0 + $0x6d0] sm:$0xff]  ;;  %v256_v29 = vld [vmem:[%s11513_s0 + $0x6d8] sm:$0xff] }
  0x98   :  { %1001 = vmatpush.msra.mxu3 %v494_v30  ;;  %853 = vmatmul.f32.vlgmr.msrb.gmra.mxu0 %v6433_v0  ;;  %v511_v28 = vld [vmem:[%s11513_s0 + $0xed0] sm:$0xff]  ;;  %v512_v30 = vld [vmem:[%s11513_s0 + $0xed8] sm:$0xff] }
  0x99   :  { %933 = vmatpush.msra.mxu0 %v221_v31  ;;  %956 = vmatpush.msra.mxu1 %v477_v32  ;;  %v239_v31 = vld [vmem:[%s11513_s0 + $0x650] sm:$0xff]  ;;  %v240_v32 = vld [vmem:[%s11513_s0 + $0x658] sm:$0xff] }
  0x9a   :  { %979 = vmatpush.msra.mxu2 %v222_v33  ;;  %1002 = vmatpush.msra.mxu3 %v478_v34  ;;  %v496_v33 = vld [vmem:[%s11513_s0 + $0xe58] sm:$0xff]  ;;  %v223_v34 = vld [vmem:[%s11513_s0 + $0x5d0] sm:$0xff] }
  0x9b   :  { %876 = vmatmul.f32.vlgmr.msrb.gmra.mxu1 %v6438_v1  ;;  %902 = vmatmul.f32.gmra.mxu2 %v6598_v53 }
  0x9c   :  { %934 = vmatpush.msra.mxu0 %v205_v35  ;;  %957 = vmatpush.msra.mxu1 %v461_v36  ;;  %v479_v35 = vld [vmem:[%s11513_s0 + $0xdd0] sm:$0xff]  ;;  %v224_v36 = vld [vmem:[%s11513_s0 + $0x5d8] sm:$0xff] }
  0x9d   :  { %980 = vmatpush.msra.mxu2 %v206_v37  ;;  %1003 = vmatpush.msra.mxu3 %v462_v38  ;;  %v480_v37 = vld [vmem:[%s11513_s0 + $0xdd8] sm:$0xff]  ;;  %v207_v38 = vld [vmem:[%s11513_s0 + $0x550] sm:$0xff] }
  0x9e   :  { %925 = vmatmul.f32.gmra.mxu3 %v6603_v54  ;;  %935 = vmatpush.msra.mxu0 %v189_v39  ;;  %v463_v39 = vld [vmem:[%s11513_s0 + $0xd50] sm:$0xff] }
  0x9f   :  { %958 = vmatpush.msra.mxu1 %v445_v40  ;;  %981 = vmatpush.msra.mxu2 %v190_v41  ;;  %v208_v40 = vld [vmem:[%s11513_s0 + $0x558] sm:$0xff] }
  0xa0   :  { %1004 = vmatpush.msra.mxu3 %v446_v42  ;;  %936 = vmatpush.msra.mxu0 %v173_v43  ;;  %v464_v41 = vld [vmem:[%s11513_s0 + $0xd58] sm:$0xff]  ;;  %v191_v42 = vld [vmem:[%s11513_s0 + $0x4d0] sm:$0xff] }
  0xa1   :  { %959 = vmatpush.msra.mxu1 %v429_v44  ;;  %982 = vmatpush.msra.mxu2 %v174_v45  ;;  %v447_v43 = vld [vmem:[%s11513_s0 + $0xcd0] sm:$0xff]  ;;  %v192_v44 = vld [vmem:[%s11513_s0 + $0x4d8] sm:$0xff] }
  0xa2   :  { %1005 = vmatpush.msra.mxu3 %v430_v46  ;;  %856 = vmatmul.f32.gmra.mxu0 %v6598_v53  ;;  %v448_v45 = vld [vmem:[%s11513_s0 + $0xcd8] sm:$0xff]  ;;  %v175_v46 = vld [vmem:[%s11513_s0 + $0x450] sm:$0xff] }
  0xa3   :  { %937 = vmatpush.msra.mxu0 %v157_v47  ;;  %960 = vmatpush.msra.mxu1 %v413_v48  ;;  %v431_v47 = vld [vmem:[%s11513_s0 + $0xc50] sm:$0xff]  ;;  %v176_v48 = vld [vmem:[%s11513_s0 + $0x458] sm:$0xff] }
  0xa4   :  { %983 = vmatpush.msra.mxu2 %v158_v49  ;;  %1006 = vmatpush.msra.mxu3 %v414_v50  ;;  %v432_v49 = vld [vmem:[%s11513_s0 + $0xc58] sm:$0xff]  ;;  %v159_v50 = vld [vmem:[%s11513_s0 + $0x3d0] sm:$0xff] }
  0xa5   :  { %879 = vmatmul.f32.gmra.mxu1 %v6603_v54  ;;  %938 = vmatpush.msra.mxu0 %v141_v51  ;;  %v415_v51 = vld [vmem:[%s11513_s0 + $0xbd0] sm:$0xff] }
  0xa6   :  { %961 = vmatpush.msra.mxu1 %v397_v52  ;;  %984 = vmatpush.msra.mxu2 %v142_v55  ;;  %v160_v52 = vld [vmem:[%s11513_s0 + $0x3d8] sm:$0xff] }
  0xa7   :  { %1007 = vmatpush.msra.mxu3 %v398_v56  ;;  %939 = vmatpush.msra.mxu0 %v125_v57  ;;  %v416_v55 = vld [vmem:[%s11513_s0 + $0xbd8] sm:$0xff]  ;;  %v143_v56 = vld [vmem:[%s11513_s0 + $0x350] sm:$0xff] }
  0xa8   :  { %962 = vmatpush.msra.mxu1 %v381_v58  ;;  %985 = vmatpush.msra.mxu2 %v126_v59  ;;  %v399_v57 = vld [vmem:[%s11513_s0 + $0xb50] sm:$0xff]  ;;  %v144_v58 = vld [vmem:[%s11513_s0 + $0x358] sm:$0xff] }
  0xa9   :  { %1008 = vmatpush.msra.mxu3 %v382_v60  ;;  %940 = vmatpush.msra.mxu0 %v109_v61  ;;  %v400_v59 = vld [vmem:[%s11513_s0 + $0xb58] sm:$0xff]  ;;  %v127_v60 = vld [vmem:[%s11513_s0 + $0x2d0] sm:$0xff] }
  0xaa   :  { %963 = vmatpush.msra.mxu1 %v365_v62  ;;  %986 = vmatpush.msra.mxu2 %v110_v63  ;;  %v383_v61 = vld [vmem:[%s11513_s0 + $0xad0] sm:$0xff]  ;;  %v128_v62 = vld [vmem:[%s11513_s0 + $0x2d8] sm:$0xff] }
  0xab   :  { %1009 = vmatpush.msra.mxu3 %v366_v2  ;;  %941 = vmatpush.msra.mxu0 %v93_v3  ;;  %v384_v63 = vld [vmem:[%s11513_s0 + $0xad8] sm:$0xff]  ;;  %v111_v2 = vld [vmem:[%s11513_s0 + $0x250] sm:$0xff] }
  0xac   :  { %964 = vmatpush.msra.mxu1 %v349_v4  ;;  %987 = vmatpush.msra.mxu2 %v94_v5  ;;  %v367_v3 = vld [vmem:[%s11513_s0 + $0xa50] sm:$0xff]  ;;  %v112_v4 = vld [vmem:[%s11513_s0 + $0x258] sm:$0xff] }
  0xad   :  { %1010 = vmatpush.msra.mxu3 %v350_v6  ;;  %942 = vmatpush.msra.mxu0 %v77_v7  ;;  %v368_v5 = vld [vmem:[%s11513_s0 + $0xa58] sm:$0xff]  ;;  %v95_v6 = vld [vmem:[%s11513_s0 + $0x1d0] sm:$0xff] }
  0xae   :  { %965 = vmatpush.msra.mxu1 %v333_v8  ;;  %988 = vmatpush.msra.mxu2 %v78_v9  ;;  %v351_v7 = vld [vmem:[%s11513_s0 + $0x9d0] sm:$0xff]  ;;  %v96_v8 = vld [vmem:[%s11513_s0 + $0x1d8] sm:$0xff] }
  0xaf   :  { %1011 = vmatpush.msra.mxu3 %v334_v10  ;;  %943 = vmatpush.msra.mxu0 %v61_v11  ;;  %v352_v9 = vld [vmem:[%s11513_s0 + $0x9d8] sm:$0xff]  ;;  %v79_v10 = vld [vmem:[%s11513_s0 + $0x150] sm:$0xff] }
  0xb0   :  { %966 = vmatpush.msra.mxu1 %v317_v12  ;;  %989 = vmatpush.msra.mxu2 %v62_v13  ;;  %v335_v11 = vld [vmem:[%s11513_s0 + $0x950] sm:$0xff]  ;;  %v80_v12 = vld [vmem:[%s11513_s0 + $0x158] sm:$0xff] }
  0xb1   :  { %1012 = vmatpush.msra.mxu3 %v318_v14  ;;  %944 = vmatpush.msra.mxu0 %v45_v15  ;;  %v336_v13 = vld [vmem:[%s11513_s0 + $0x958] sm:$0xff]  ;;  %v63_v14 = vld [vmem:[%s11513_s0 + $0xd0] sm:$0xff] }
  0xb2   :  { %967 = vmatpush.msra.mxu1 %v301_v16  ;;  %990 = vmatpush.msra.mxu2 %v46_v17  ;;  %v319_v15 = vld [vmem:[%s11513_s0 + $0x8d0] sm:$0xff]  ;;  %v64_v16 = vld [vmem:[%s11513_s0 + $0xd8] sm:$0xff] }
  0xb3   :  { %1013 = vmatpush.msra.mxu3 %v302_v18  ;;  %945 = vmatmul.f32.vlgmr.msra.gmra.mxu0 %v6433_v0  ;;  %v320_v17 = vld [vmem:[%s11513_s0 + $0x8d8] sm:$0xff]  ;;  %v47_v18 = vld [vmem:[%s11513_s0 + $0x50] sm:$0xff] }
  0xb4   :  { %991 = vmatmul.f32.vlgmr.msra.gmra.mxu2 %v6433_v0  ;;  %1021 = vmatpush.msrb.mxu0 %v287_v20  ;;  %v528_v0 = vld [vmem:[%s11513_s0 + $0xf58] sm:$0xff]  ;;  %v303_v20 = vld [vmem:[%s11513_s0 + $0x850] sm:$0xff] }
  0xb5   :  { %1044 = vmatpush.msrb.mxu1 %v543_v21  ;;  %1067 = vmatpush.msrb.mxu2 %v288_v22  ;;  %v48_v21 = vld [vmem:[%s11513_s0 + $0x58] sm:$0xff] }
  0xb6   :  { %1090 = vmatpush.msrb.mxu3 %v544_v23  ;;  %968 = vmatmul.f32.vlgmr.msra.gmra.mxu1 %v6438_v1  ;;  %v304_v22 = vld [vmem:[%s11513_s0 + $0x858] sm:$0xff]  ;;  %v289_v23 = vld [vmem:[%s11513_s0 + $0x7e0] sm:$0xff] }
  0xb7   :  { %1014 = vmatmul.f32.vlgmr.msra.gmra.mxu3 %v6438_v1  ;;  %1022 = vmatpush.msrb.mxu0 %v271_v24  ;;  %v495_v1 = vld [vmem:[%s11513_s0 + $0xe50] sm:$0xff]  ;;  %v545_v24 = vld [vmem:[%s11513_s0 + $0xfe0] sm:$0xff] }
  0xb8   :  { %1045 = vmatpush.msrb.mxu1 %v527_v25  ;;  %1068 = vmatpush.msrb.mxu2 %v272_v26  ;;  %v290_v25 = vld [vmem:[%s11513_s0 + $0x7e8] sm:$0xff]  ;;  %v7277_v26 = vld [vmem:[%s11514_s1] sm:$0xff] }
  0xb9   :  { %1091 = vmatpush.msrb.mxu3 %v528_v0  ;;  %1023 = vmatpush.msrb.mxu0 %v255_v27  ;;  %v546_v0 = vld [vmem:[%s11513_s0 + $0xfe8] sm:$0xff]  ;;  %v273_v27 = vld [vmem:[%s11513_s0 + $0x760] sm:$0xff] }
  0xba   :  { %1046 = vmatpush.msrb.mxu1 %v511_v28  ;;  %1069 = vmatpush.msrb.mxu2 %v256_v29  ;;  %v529_v28 = vld [vmem:[%s11513_s0 + $0xf60] sm:$0xff]  ;;  %v274_v29 = vld [vmem:[%s11513_s0 + $0x768] sm:$0xff] }
  0xbb   :  { %1092 = vmatpush.msrb.mxu3 %v512_v30  ;;  %1024 = vmatpush.msrb.mxu0 %v239_v31  ;;  %v7296_v30 = vld [vmem:[%s11514_s1 + $0x8] sm:$0xff] }
  0xbc   :  { %1047 = vmatpush.msrb.mxu1 %v495_v1  ;;  %1070 = vmatpush.msrb.mxu2 %v240_v32  ;;  %v530_v31 = vld [vmem:[%s11513_s0 + $0xf68] sm:$0xff]  ;;  %v257_v1 = vld [vmem:[%s11513_s0 + $0x6e0] sm:$0xff] }
  0xbd   :  { %1093 = vmatpush.msrb.mxu3 %v496_v33  ;;  %948 = vmatmul.f32.gmra.mxu0 %v6598_v53  ;;  %v513_v32 = vld [vmem:[%s11513_s0 + $0xee0] sm:$0xff]  ;;  %v258_v33 = vld [vmem:[%s11513_s0 + $0x6e8] sm:$0xff] }
  0xbe   :  { %994 = vmatmul.f32.gmra.mxu2 %v6598_v53  ;;  %1025 = vmatpush.msrb.mxu0 %v223_v34  ;;  %v514_v34 = vld [vmem:[%s11513_s0 + $0xee8] sm:$0xff] }
  0xbf   :  { %1048 = vmatpush.msrb.mxu1 %v479_v35  ;;  %1071 = vmatpush.msrb.mxu2 %v224_v36  ;;  %v241_v35 = vld [vmem:[%s11513_s0 + $0x660] sm:$0xff] }
  0xc0   :  { %1094 = vmatpush.msrb.mxu3 %v480_v37  ;;  %971 = vmatmul.f32.gmra.mxu1 %v6603_v54  ;;  %v497_v36 = vld [vmem:[%s11513_s0 + $0xe60] sm:$0xff]  ;;  %v242_v37 = vld [vmem:[%s11513_s0 + $0x668] sm:$0xff] }
  0xc1   :  { %1017 = vmatmul.f32.gmra.mxu3 %v6603_v54  ;;  %1026 = vmatpush.msrb.mxu0 %v207_v38  ;;  %v498_v38 = vld [vmem:[%s11513_s0 + $0xe68] sm:$0xff] }
  0xc2   :  { %1049 = vmatpush.msrb.mxu1 %v463_v39  ;;  %1072 = vmatpush.msrb.mxu2 %v208_v40  ;;  %v225_v39 = vld [vmem:[%s11513_s0 + $0x5e0] sm:$0xff]  ;;  %v7330_v40 = vpop.f32.mrf.mxu0 }
  0xc3   :  { %1095 = vmatpush.msrb.mxu3 %v464_v41  ;;  %1027 = vmatpush.msrb.mxu0 %v191_v42  ;;  %v481_v41 = vld [vmem:[%s11513_s0 + $0xde0] sm:$0xff]  ;;  %v226_v42 = vld [vmem:[%s11513_s0 + $0x5e8] sm:$0xff] }
  0xc4   :  { %1050 = vmatpush.msrb.mxu1 %v447_v43  ;;  %1073 = vmatpush.msrb.mxu2 %v192_v44  ;;  %v482_v44 = vld [vmem:[%s11513_s0 + $0xde8] sm:$0xff] }
  0xc5   :  { %1096 = vmatpush.msrb.mxu3 %v448_v45  ;;  %1028 = vmatpush.msrb.mxu0 %v175_v46  ;;  %v209_v45 = vld [vmem:[%s11513_s0 + $0x560] sm:$0xff] }
  0xc6   :  { %1051 = vmatpush.msrb.mxu1 %v431_v47  ;;  %1074 = vmatpush.msrb.mxu2 %v176_v48  ;;  %v7338_v43 = vpop.f32.mrf.mxu2  ;;  %v465_v46 = vld [vmem:[%s11513_s0 + $0xd60] sm:$0xff]  ;;  %v210_v47 = vld [vmem:[%s11513_s0 + $0x568] sm:$0xff]  ;;  %v7354_v48 = vpop.f32.mrf.mxu1 }
  0xc7   :  { %1097 = vmatpush.msrb.mxu3 %v432_v49  ;;  %1029 = vmatpush.msrb.mxu0 %v159_v50  ;;  %v193_v49 = vld [vmem:[%s11513_s0 + $0x4e0] sm:$0xff]  ;;  %v7363_v50 = vpop.f32.mrf.mxu3 }
  0xc8   :  { %1052 = vmatpush.msrb.mxu1 %v415_v51  ;;  %1075 = vmatpush.msrb.mxu2 %v160_v52  ;;  %v7368_v51 = vld [vmem:[%s11514_s1 + $0x18] sm:$0xff]  ;;  %v194_v52 = vld [vmem:[%s11513_s0 + $0x4e8] sm:$0xff] }
  0xc9   :  { %1098 = vmatpush.msrb.mxu3 %v416_v55  ;;  %1030 = vmatpush.msrb.mxu0 %v143_v56  ;;  %v450_v55 = vld [vmem:[%s11513_s0 + $0xce8] sm:$0xff]  ;;  %v177_v56 = vld [vmem:[%s11513_s0 + $0x460] sm:$0xff] }
  0xca   :  { %1053 = vmatpush.msrb.mxu1 %v399_v57  ;;  %1076 = vmatpush.msrb.mxu2 %v144_v58  ;;  %v433_v57 = vld [vmem:[%s11513_s0 + $0xc60] sm:$0xff]  ;;  %v178_v58 = vld [vmem:[%s11513_s0 + $0x468] sm:$0xff] }
  0xcb   :  { %1099 = vmatpush.msrb.mxu3 %v400_v59  ;;  %1031 = vmatpush.msrb.mxu0 %v127_v60  ;;  %v434_v59 = vld [vmem:[%s11513_s0 + $0xc68] sm:$0xff]  ;;  %v161_v60 = vld [vmem:[%s11513_s0 + $0x3e0] sm:$0xff] }
  0xcc   :  { %1054 = vmatpush.msrb.mxu1 %v383_v61  ;;  %1077 = vmatpush.msrb.mxu2 %v128_v62  ;;  %v417_v62 = vld [vmem:[%s11513_s0 + $0xbe0] sm:$0xff] }
  0xcd   :  { %1100 = vmatpush.msrb.mxu3 %v384_v63  ;;  %1032 = vmatpush.msrb.mxu0 %v111_v2  ;;  %v162_v63 = vld [vmem:[%s11513_s0 + $0x3e8] sm:$0xff] }
  0xce   :  { %1055 = vmatpush.msrb.mxu1 %v367_v3  ;;  %1078 = vmatpush.msrb.mxu2 %v112_v4  ;;  %v418_v3 = vld [vmem:[%s11513_s0 + $0xbe8] sm:$0xff]  ;;  %v145_v4 = vld [vmem:[%s11513_s0 + $0x360] sm:$0xff] }
  0xcf   :  { %1101 = vmatpush.msrb.mxu3 %v368_v5  ;;  %1033 = vmatpush.msrb.mxu0 %v95_v6  ;;  %v401_v5 = vld [vmem:[%s11513_s0 + $0xb60] sm:$0xff]  ;;  %v146_v6 = vld [vmem:[%s11513_s0 + $0x368] sm:$0xff] }
  0xd0   :  { %1056 = vmatpush.msrb.mxu1 %v351_v7  ;;  %1079 = vmatpush.msrb.mxu2 %v96_v8  ;;  %v402_v7 = vld [vmem:[%s11513_s0 + $0xb68] sm:$0xff]  ;;  %v129_v8 = vld [vmem:[%s11513_s0 + $0x2e0] sm:$0xff] }
  0xd1   :  { %1102 = vmatpush.msrb.mxu3 %v352_v9  ;;  %1034 = vmatpush.msrb.mxu0 %v79_v10  ;;  %v385_v10 = vld [vmem:[%s11513_s0 + $0xae0] sm:$0xff] }
  0xd2   :  { %1057 = vmatpush.msrb.mxu1 %v335_v11  ;;  %1080 = vmatpush.msrb.mxu2 %v80_v12  ;;  %v130_v11 = vld [vmem:[%s11513_s0 + $0x2e8] sm:$0xff] }
  0xd3   :  { %1103 = vmatpush.msrb.mxu3 %v336_v13  ;;  %1035 = vmatpush.msrb.mxu0 %v63_v14  ;;  %v386_v13 = vld [vmem:[%s11513_s0 + $0xae8] sm:$0xff]  ;;  %v113_v14 = vld [vmem:[%s11513_s0 + $0x260] sm:$0xff] }
  0xd4   :  { %1058 = vmatpush.msrb.mxu1 %v319_v15  ;;  %1081 = vmatpush.msrb.mxu2 %v64_v16  ;;  %v369_v15 = vld [vmem:[%s11513_s0 + $0xa60] sm:$0xff]  ;;  %v114_v16 = vld [vmem:[%s11513_s0 + $0x268] sm:$0xff] }
  0xd5   :  { %1104 = vmatpush.msrb.mxu3 %v320_v17  ;;  %1036 = vmatpush.msrb.mxu0 %v47_v18  ;;  %v370_v17 = vld [vmem:[%s11513_s0 + $0xa68] sm:$0xff]  ;;  %v97_v18 = vld [vmem:[%s11513_s0 + $0x1e0] sm:$0xff] }
  0xd6   :  { %1059 = vmatpush.msrb.mxu1 %v303_v20  ;;  %1082 = vmatpush.msrb.mxu2 %v48_v21  ;;  %v353_v20 = vld [vmem:[%s11513_s0 + $0x9e0] sm:$0xff]  ;;  %v98_v21 = vld [vmem:[%s11513_s0 + $0x1e8] sm:$0xff] }
  0xd7   :  { %1105 = vmatpush.msrb.mxu3 %v304_v22  ;;  %1037 = vmatmul.f32.vlgmr.msrb.gmra.mxu0 %v7277_v26  ;;  %v354_v22 = vld [vmem:[%s11513_s0 + $0x9e8] sm:$0xff] }
  0xd8   :  { %1083 = vmatmul.f32.vlgmr.msrb.gmra.mxu2 %v7277_v26  ;;  %1113 = vmatpush.msra.mxu0 %v289_v23  ;;  %v81_v23 = vld [vmem:[%s11513_s0 + $0x160] sm:$0xff] }
  0xd9   :  { %1136 = vmatpush.msra.mxu1 %v545_v24  ;;  %1159 = vmatpush.msra.mxu2 %v290_v25  ;;  %v337_v25 = vld [vmem:[%s11513_s0 + $0x960] sm:$0xff] }
  0xda   :  { %1182 = vmatpush.msra.mxu3 %v546_v0  ;;  %1060 = vmatmul.f32.vlgmr.msrb.gmra.mxu1 %v7296_v30  ;;  %v7395_v61 = vpop.f32.mrf.mxu0  ;;  %v82_v0 = vld [vmem:[%s11513_s0 + $0x168] sm:$0xff] }
  0xdb   :  { %1106 = vmatmul.f32.vlgmr.msrb.gmra.mxu3 %v7296_v30  ;;  %1114 = vmatpush.msra.mxu0 %v273_v27  ;;  %v7423_v9 = vpop.f32.mrf.mxu1 }
  0xdc   :  { %1137 = vmatpush.msra.mxu1 %v529_v28  ;;  %1160 = vmatpush.msra.mxu2 %v274_v29  ;;  %v338_v28 = vld [vmem:[%s11513_s0 + $0x968] sm:$0xff]  ;;  %v65_v29 = vld [vmem:[%s11513_s0 + $0xe0] sm:$0xff] }
  0xdd   :  { %1183 = vmatpush.msra.mxu3 %v530_v31  ;;  %1115 = vmatpush.msra.mxu0 %v257_v1  ;;  %v321_v31 = vld [vmem:[%s11513_s0 + $0x8e0] sm:$0xff]  ;;  %v66_v1 = vld [vmem:[%s11513_s0 + $0xe8] sm:$0xff] }
  0xde   :  { %1138 = vmatpush.msra.mxu1 %v513_v32  ;;  %1161 = vmatpush.msra.mxu2 %v258_v33  ;;  %v322_v32 = vld [vmem:[%s11513_s0 + $0x8e8] sm:$0xff]  ;;  %v49_v33 = vld [vmem:[%s11513_s0 + $0x60] sm:$0xff] }
  0xdf   :  { %1184 = vmatpush.msra.mxu3 %v514_v34  ;;  %1116 = vmatpush.msra.mxu0 %v241_v35  ;;  %v305_v35 = vld [vmem:[%s11513_s0 + $0x860] sm:$0xff] }
  0xe0   :  { %1139 = vmatpush.msra.mxu1 %v497_v36  ;;  %1162 = vmatpush.msra.mxu2 %v242_v37  ;;  %v50_v36 = vld [vmem:[%s11513_s0 + $0x68] sm:$0xff] }
  0xe1   :  { %1185 = vmatpush.msra.mxu3 %v498_v38  ;;  %1040 = vmatmul.f32.gmra.mxu0 %v6598_v53  ;;  %v7403_v2 = vpop.f32.mrf.mxu2  ;;  %v306_v38 = vld [vmem:[%s11513_s0 + $0x868] sm:$0xff] }
  0xe2   :  { %1086 = vmatmul.f32.gmra.mxu2 %v6598_v53  ;;  %1117 = vmatpush.msra.mxu0 %v225_v39  ;;  %v466_v53 = vld [vmem:[%s11513_s0 + $0xd68] sm:$0xff]  ;;  %v7431_v12 = vpop.f32.mrf.mxu3  ;;  %v291_v39 = vld [vmem:[%s11513_s0 + $0x7f0] sm:$0xff] }
  0xe3   :  { %1140 = vmatpush.msra.mxu1 %v481_v41  ;;  %1163 = vmatpush.msra.mxu2 %v226_v42  ;;  %v547_v41 = vld [vmem:[%s11513_s0 + $0xff0] sm:$0xff]  ;;  %v292_v42 = vld [vmem:[%s11513_s0 + $0x7f8] sm:$0xff] }
  0xe4   :  { %1186 = vmatpush.msra.mxu3 %v482_v44  ;;  %1063 = vmatmul.f32.gmra.mxu1 %v6603_v54  ;;  %v449_v54 = vld [vmem:[%s11513_s0 + $0xce0] sm:$0xff]  ;;  %v7463_v24 = vpop.f32.mrf.mxu0 }
  0xe5   :  { %1109 = vmatmul.f32.gmra.mxu3 %v7368_v51  ;;  %1118 = vmatpush.msra.mxu0 %v209_v45  ;;  %v7491_v34 = vpop.f32.mrf.mxu1  ;;  %v548_v45 = vld [vmem:[%s11513_s0 + $0xff8] sm:$0xff] }
  0xe6   :  { %1141 = vmatpush.msra.mxu1 %v465_v46  ;;  %1164 = vmatpush.msra.mxu2 %v210_v47  ;;  %v275_v46 = vld [vmem:[%s11513_s0 + $0x770] sm:$0xff] }
  0xe7   :  { %1187 = vmatpush.msra.mxu3 %v466_v53  ;;  %1119 = vmatpush.msra.mxu0 %v193_v49  ;;  %v531_v47 = vld [vmem:[%s11513_s0 + $0xf70] sm:$0xff]  ;;  %v276_v53 = vld [vmem:[%s11513_s0 + $0x778] sm:$0xff] }
  0xe8   :  { %1142 = vmatpush.msra.mxu1 %v449_v54  ;;  %1165 = vmatpush.msra.mxu2 %v194_v52  ;;  %v532_v54 = vld [vmem:[%s11513_s0 + $0xf78] sm:$0xff]  ;;  %v259_v52 = vld [vmem:[%s11513_s0 + $0x6f0] sm:$0xff] }
  0xe9   :  { %1188 = vmatpush.msra.mxu3 %v450_v55  ;;  %1120 = vmatpush.msra.mxu0 %v177_v56  ;;  %v515_v56 = vld [vmem:[%s11513_s0 + $0xef0] sm:$0xff] }
  0xea   :  { %1143 = vmatpush.msra.mxu1 %v433_v57  ;;  %1166 = vmatpush.msra.mxu2 %v178_v58  ;;  %v260_v57 = vld [vmem:[%s11513_s0 + $0x6f8] sm:$0xff] }
  0xeb   :  { %1189 = vmatpush.msra.mxu3 %v434_v59  ;;  %1121 = vmatpush.msra.mxu0 %v161_v60  ;;  %v7471_v27 = vpop.f32.mrf.mxu2  ;;  %v516_v58 = vld [vmem:[%s11513_s0 + $0xef8] sm:$0xff]  ;;  %v243_v59 = vld [vmem:[%s11513_s0 + $0x670] sm:$0xff] }
  0xec   :  { %1144 = vmatpush.msra.mxu1 %v417_v62  ;;  %1167 = vmatpush.msra.mxu2 %v162_v63  ;;  %v7499_v37 = vpop.f32.mrf.mxu3  ;;  %v499_v60 = vld [vmem:[%s11513_s0 + $0xe70] sm:$0xff]  ;;  %v244_v62 = vld [vmem:[%s11513_s0 + $0x678] sm:$0xff] }
  0xed   :  { %1190 = vmatpush.msra.mxu3 %v418_v3  ;;  %1122 = vmatpush.msra.mxu0 %v145_v4  ;;  %v500_v3 = vld [vmem:[%s11513_s0 + $0xe78] sm:$0xff]  ;;  %v227_v4 = vld [vmem:[%s11513_s0 + $0x5f0] sm:$0xff] }
  0xee   :  { %1145 = vmatpush.msra.mxu1 %v401_v5  ;;  %1168 = vmatpush.msra.mxu2 %v146_v6  ;;  %v483_v5 = vld [vmem:[%s11513_s0 + $0xdf0] sm:$0xff]  ;;  %v228_v6 = vld [vmem:[%s11513_s0 + $0x5f8] sm:$0xff] }
  0xef   :  { %1191 = vmatpush.msra.mxu3 %v402_v7  ;;  %1123 = vmatpush.msra.mxu0 %v129_v8  ;;  %v7578_v8 = vld [vmem:[%s11514_s1 + $0x10] sm:$0xff] }
  0xf0   :  { %1146 = vmatpush.msra.mxu1 %v385_v10  ;;  %1169 = vmatpush.msra.mxu2 %v130_v11  ;;  %v484_v10 = vld [vmem:[%s11513_s0 + $0xdf8] sm:$0xff]  ;;  %v211_v11 = vld [vmem:[%s11513_s0 + $0x570] sm:$0xff] }
  0xf1   :  { %1192 = vmatpush.msra.mxu3 %v386_v13  ;;  %1124 = vmatpush.msra.mxu0 %v113_v14  ;;  %v467_v13 = vld [vmem:[%s11513_s0 + $0xd70] sm:$0xff]  ;;  %v212_v14 = vld [vmem:[%s11513_s0 + $0x578] sm:$0xff] }
  0xf2   :  { %1147 = vmatpush.msra.mxu1 %v369_v15  ;;  %1170 = vmatpush.msra.mxu2 %v114_v16  ;;  %v468_v16 = vld [vmem:[%s11513_s0 + $0xd78] sm:$0xff] }
  0xf3   :  { %1193 = vmatpush.msra.mxu3 %v370_v17  ;;  %1125 = vmatpush.msra.mxu0 %v97_v18  ;;  %v195_v17 = vld [vmem:[%s11513_s0 + $0x4f0] sm:$0xff] }
  0xf4   :  { %1148 = vmatpush.msra.mxu1 %v353_v20  ;;  %1171 = vmatpush.msra.mxu2 %v98_v21  ;;  %v451_v20 = vld [vmem:[%s11513_s0 + $0xcf0] sm:$0xff]  ;;  %v196_v21 = vld [vmem:[%s11513_s0 + $0x4f8] sm:$0xff] }
  0xf5   :  { %1194 = vmatpush.msra.mxu3 %v354_v22  ;;  %1126 = vmatpush.msra.mxu0 %v81_v23  ;;  %v452_v22 = vld [vmem:[%s11513_s0 + $0xcf8] sm:$0xff]  ;;  %v179_v23 = vld [vmem:[%s11513_s0 + $0x470] sm:$0xff] }
  0xf6   :  { %1149 = vmatpush.msra.mxu1 %v337_v25  ;;  %1172 = vmatpush.msra.mxu2 %v82_v0  ;;  %v7529_v49 = vpop.f32.mrf.mxu2  ;;  %v7618_v25 = vpop.permute.xlu0 %558  ;;  %v435_v0 = vld [vmem:[%s11513_s0 + $0xc70] sm:$0xff] }
  0xf7   :  { %1195 = vmatpush.msra.mxu3 %v338_v28  ;;  %1127 = vmatpush.msra.mxu0 %v65_v29  ;;  %v7513_v44 = vpop.f32.mrf.mxu0  ;;  %v180_v28 = vld [vmem:[%s11513_s0 + $0x478] sm:$0xff] }
  0xf8   :  { %1150 = vmatpush.msra.mxu1 %v321_v31  ;;  %1173 = vmatpush.msra.mxu2 %v66_v1  ;;  %v436_v31 = vld [vmem:[%s11513_s0 + $0xc78] sm:$0xff]  ;;  %v163_v1 = vld [vmem:[%s11513_s0 + $0x3f0] sm:$0xff] }
  0xf9   :  { %1196 = vmatpush.msra.mxu3 %v322_v32  ;;  %1128 = vmatpush.msra.mxu0 %v49_v33  ;;  %v7559_v63 = vpop.f32.mrf.mxu3  ;;  %v419_v32 = vld [vmem:[%s11513_s0 + $0xbf0] sm:$0xff]  ;;  %v164_v33 = vld [vmem:[%s11513_s0 + $0x3f8] sm:$0xff] }
  0xfa   :  { %1151 = vmatpush.msra.mxu1 %v305_v35  ;;  %1174 = vmatpush.msra.mxu2 %v50_v36  ;;  %v7538_v55 = vpop.f32.mrf.mxu1  ;;  %v420_v35 = vld [vmem:[%s11513_s0 + $0xbf8] sm:$0xff]  ;;  %v147_v36 = vld [vmem:[%s11513_s0 + $0x370] sm:$0xff] }
  0xfb   :  { %1197 = vmatpush.msra.mxu3 %v306_v38  ;;  %1129 = vmatmul.f32.vlgmr.msra.gmra.mxu0 %v7277_v26 }
  0xfc   :  { %1175 = vmatmul.f32.vlgmr.msra.gmra.mxu2 %v7277_v26  ;;  %1205 = vmatpush.msrb.mxu0 %v291_v39  ;;  %v403_v39 = vld [vmem:[%s11513_s0 + $0xb70] sm:$0xff] }
  0xfd   :  { %1228 = vmatpush.msrb.mxu1 %v547_v41  ;;  %1251 = vmatpush.msrb.mxu2 %v292_v42  ;;  %v148_v41 = vld [vmem:[%s11513_s0 + $0x378] sm:$0xff] }
  0xfe   :  { %1274 = vmatpush.msrb.mxu3 %v548_v45  ;;  %1152 = vmatmul.f32.vlgmr.msra.gmra.mxu1 %v7296_v30  ;;  %v404_v42 = vld [vmem:[%s11513_s0 + $0xb78] sm:$0xff]  ;;  %v131_v45 = vld [vmem:[%s11513_s0 + $0x2f0] sm:$0xff] }
  0xff   :  { %1198 = vmatmul.f32.vlgmr.msra.gmra.mxu3 %v7296_v30  ;;  %1206 = vmatpush.msrb.mxu0 %v275_v46  ;;  %v387_v46 = vld [vmem:[%s11513_s0 + $0xaf0] sm:$0xff] }
 0x100   :  { %1229 = vmatpush.msrb.mxu1 %v531_v47  ;;  %1252 = vmatpush.msrb.mxu2 %v276_v53  ;;  %v7594_v15 = vpop.f32.mrf.mxu2  ;;  %v132_v47 = vld [vmem:[%s11513_s0 + $0x2f8] sm:$0xff] }
 0x101   :  { %1275 = vmatpush.msrb.mxu3 %v532_v54  ;;  %1207 = vmatpush.msrb.mxu0 %v259_v52  ;;  %v7573_v7 = vpop.f32.mrf.mxu0  ;;  %v388_v54 = vld [vmem:[%s11513_s0 + $0xaf8] sm:$0xff]  ;;  %v115_v52 = vld [vmem:[%s11513_s0 + $0x270] sm:$0xff] }
 0x102   :  { %1230 = vmatpush.msrb.mxu1 %v515_v56  ;;  %1253 = vmatpush.msrb.mxu2 %v260_v57  ;;  %v371_v57 = vld [vmem:[%s11513_s0 + $0xa70] sm:$0xff] }
 0x103   :  { %1276 = vmatpush.msrb.mxu3 %v516_v58  ;;  %1208 = vmatpush.msrb.mxu0 %v243_v59  ;;  %v7626_v29 = vpop.f32.mrf.mxu3  ;;  %v116_v58 = vld [vmem:[%s11513_s0 + $0x278] sm:$0xff] }
 0x104   :  { %1231 = vmatpush.msrb.mxu1 %v499_v60  ;;  %1254 = vmatpush.msrb.mxu2 %v244_v62  ;;  %v7603_v18 = vpop.f32.mrf.mxu1  ;;  %v372_v59 = vld [vmem:[%s11513_s0 + $0xa78] sm:$0xff]  ;;  %v99_v60 = vld [vmem:[%s11513_s0 + $0x1f0] sm:$0xff]  ;;  %v7686_v62 = vpop.permute.xlu0 %553 }
 0x105   :  { %1277 = vmatpush.msrb.mxu3 %v500_v3  ;;  %1132 = vmatmul.f32.gmra.mxu0 %v7578_v8  ;;  %v355_v3 = vld [vmem:[%s11513_s0 + $0x9f0] sm:$0xff] }
 0x106   :  { %1178 = vmatmul.f32.gmra.mxu2 %v7578_v8  ;;  %1209 = vmatpush.msrb.mxu0 %v227_v4  ;;  %v100_v4 = vld [vmem:[%s11513_s0 + $0x1f8] sm:$0xff] }
 0x107   :  { %1232 = vmatpush.msrb.mxu1 %v483_v5  ;;  %1255 = vmatpush.msrb.mxu2 %v228_v6  ;;  %v628_v6 = vadd.f32 %v7403_v2, %v7618_v25  ;;  %v84_v2 = vld [vmem:[%s11513_s0 + $0x178] sm:$0xff] }
 0x108   :  { %1278 = vmatpush.msrb.mxu3 %v484_v10  ;;  %1155 = vmatmul.f32.gmra.mxu1 %v7368_v51  ;;  %v356_v10 = vld [vmem:[%s11513_s0 + $0x9f8] sm:$0xff] }
 0x109   :  { %1201 = vmatmul.f32.gmra.mxu3 %v7368_v51  ;;  %1210 = vmatpush.msrb.mxu0 %v211_v11  ;;  %v83_v11 = vld [vmem:[%s11513_s0 + $0x170] sm:$0xff] }
 0x10a   :  { %1233 = vmatpush.msrb.mxu1 %v467_v13  ;;  %1256 = vmatpush.msrb.mxu2 %v212_v14  ;;  %v7664_v53 = vpop.f32.mrf.mxu2  ;;  %v582_v13 = vadd.f32 %v7395_v61, %v7618_v25  ;;  %v339_v14 = vld [vmem:[%s11513_s0 + $0x970] sm:$0xff]  ;;  %v340_v61 = vld [vmem:[%s11513_s0 + $0x978] sm:$0xff] }
 0x10b   :  { %1279 = vmatpush.msrb.mxu3 %v468_v16  ;;  %1211 = vmatpush.msrb.mxu0 %v195_v17  ;;  %v765_v38 = vpop.f32.mrf.mxu0  ;;  %v579_v16 = vadd.f32 %v7330_v40, %v7686_v62  ;;  %v625_v17 = vadd.f32 %v7338_v43, %v7686_v62  ;;  %v323_v40 = vld [vmem:[%s11513_s0 + $0x8f0] sm:$0xff]  ;;  %v68_v43 = vld [vmem:[%s11513_s0 + $0xf8] sm:$0xff] }
 0x10c   :  { %1234 = vmatpush.msrb.mxu1 %v451_v20  ;;  %1257 = vmatpush.msrb.mxu2 %v196_v21  ;;  %v67_v20 = vld [vmem:[%s11513_s0 + $0xf0] sm:$0xff] }
 0x10d   :  { %1280 = vmatpush.msrb.mxu3 %v452_v22  ;;  %1212 = vmatpush.msrb.mxu0 %v179_v23  ;;  %v7694_v5 = vpop.f32.mrf.mxu3  ;;  %v674_v22 = vadd.f32 %v7513_v44, %v7618_v25  ;;  %v651_v23 = vadd.f32 %v7431_v12, %v628_v6  ;;  %v324_v44 = vld [vmem:[%s11513_s0 + $0x8f8] sm:$0xff]  ;;  %v307_v12 = vld [vmem:[%s11513_s0 + $0x870] sm:$0xff] }
 0x10e   :  { %1235 = vmatpush.msrb.mxu1 %v435_v0  ;;  %1258 = vmatpush.msrb.mxu2 %v180_v28  ;;  %v7672_v56 = vpop.f32.mrf.mxu1  ;;  %v720_v0 = vadd.f32 %v7529_v49, %v7618_v25  ;;  %v51_v28 = vld [vmem:[%s11513_s0 + $0x70] sm:$0xff]  ;;  %v52_v49 = vld [vmem:[%s11513_s0 + $0x78] sm:$0xff] }
 0x10f   :  { %1281 = vmatpush.msrb.mxu3 %v436_v31  ;;  %1213 = vmatpush.msrb.mxu0 %v163_v1  ;;  %v766_v31 = vadd.f32 %v765_v38, %v7618_v25  ;;  %v605_v1 = vadd.f32 %v7423_v9, %v582_v13  ;;  %v308_v9 = vld [vmem:[%s11513_s0 + $0x878] sm:$0xff] }
 0x110   :  { %1236 = vmatpush.msrb.mxu1 %v419_v32  ;;  %1259 = vmatpush.msrb.mxu2 %v164_v33  ;;  %v602_v33 = vadd.f32 %v7354_v48, %v579_v16  ;;  %v812_v48 = vadd.f32 %v7664_v53, %v7618_v25 }
 0x111   :  { %1282 = vmatpush.msrb.mxu3 %v420_v35  ;;  %1214 = vmatpush.msrb.mxu0 %v147_v36  ;;  %v648_v35 = vadd.f32 %v7363_v50, %v625_v17  ;;  %v671_v36 = vadd.f32 %v7463_v24, %v7686_v62  ;;  %v1314_v50 = vmax.f32 %v651_v23, 0.0  ;;  %v717_v24 = vadd.f32 %v7471_v27, %v7686_v62  ;;  %v4842_v23 = vld [vmem:[%s11516_s3 + $0x38] sm:$0xff] }
 0x112   :  { %1237 = vmatpush.msrb.mxu1 %v403_v39  ;;  %1260 = vmatpush.msrb.mxu2 %v148_v41  ;;  %v697_v39 = vadd.f32 %v7538_v55, %v674_v22  ;;  %v763_v41 = vadd.f32 %v7573_v7, %v7686_v62  ;;  %v809_v55 = vadd.f32 %v7594_v15, %v7686_v62 }
 0x113   :  { %1283 = vmatpush.msrb.mxu3 %v404_v42  ;;  %1215 = vmatpush.msrb.mxu0 %v131_v45  ;;  %v743_v42 = vadd.f32 %v7559_v63, %v720_v0  ;;  %v789_v45 = vadd.f32 %v7672_v56, %v766_v31  ;;  %v694_v27 = vadd.f32 %v7491_v34, %v671_v36  ;;  %v1330_v0 = vld [vmem:[%s11516_s3 + $0x8] sm:$0xff] }
 0x114   :  { %1238 = vmatpush.msrb.mxu1 %v387_v46  ;;  %1261 = vmatpush.msrb.mxu2 %v132_v47  ;;  %v7749_v32 = vpop.f32.mrf.mxu2  ;;  %v1313_v46 = vmax.f32 %v605_v1, 0.0  ;;  %v1298_v47 = vmax.f32 %v648_v35, 0.0  ;;  %v1315_v53 = vmax.f32 %v697_v39, 0.0  ;;  %v786_v63 = vadd.f32 %v7603_v18, %v763_v41  ;;  %v4859_v39 = vld [vmem:[%s11516_s3 + $0x60] sm:$0xff] }
 0x115   :  { %1284 = vmatpush.msrb.mxu3 %v388_v54  ;;  %1216 = vmatpush.msrb.mxu0 %v115_v52  ;;  %v7722_v21 = vpop.f32.mrf.mxu0  ;;  %v835_v54 = vadd.f32 %v7694_v5, %v812_v48  ;;  %v1297_v52 = vmax.f32 %v602_v33, 0.0  ;;  %v740_v15 = vadd.f32 %v7499_v37, %v717_v24  ;;  %v1316_v56 = vmax.f32 %v743_v42, 0.0  ;;  %v4851_v33 = vld [vmem:[%s11516_s3 + $0x40] sm:$0xff] }
 0x116   :  { %1239 = vmatpush.msrb.mxu1 %v371_v57  ;;  %1262 = vmatpush.msrb.mxu2 %v116_v58  ;;  %v1317_v57 = vmax.f32 %v789_v45, 0.0  ;;  %v1299_v34 = vmax.f32 %v694_v27, 0.0  ;;  %v1301_v18 = vmax.f32 %v786_v63, 0.0  ;;  %v4860_v63 = vld [vmem:[%s11516_s3 + $0x68] sm:$0xff] }
 0x117   :  { %1285 = vmatpush.msrb.mxu3 %v372_v59  ;;  %1217 = vmatpush.msrb.mxu0 %v99_v60  ;;  %v923_v7 = vpop.f32.mrf.mxu3  ;;  %v1318_v59 = vmax.f32 %v835_v54, 0.0 }
 0x118   :  { %1240 = vmatpush.msrb.mxu1 %v355_v3  ;;  %1263 = vmatpush.msrb.mxu2 %v100_v4  ;;  %v7758_v38 = vpop.f32.mrf.mxu1  ;;  %v1300_v3 = vmax.f32 %v740_v15, 0.0  ;;  %v4853_v15 = vld [vmem:[%s11516_s3 + $0x50] sm:$0xff] }
 0x119   :  { %1286 = vmatpush.msrb.mxu3 %v356_v10  ;;  %1218 = vmatpush.msrb.mxu0 %v83_v11  ;;  %v901_v11 = vadd.f32 %v7749_v32, %v7686_v62  ;;  %v4867_v32 = vld [vmem:[%s11516_s3 + $0x80] sm:$0xff] }
 0x11a   :  { %1241 = vmatpush.msrb.mxu1 %v339_v14  ;;  %1264 = vmatpush.msrb.mxu2 %v84_v2  ;;  %v4841_v2 = vld [vmem:[%s11516_s3 + $0x30] sm:$0xff] }
 0x11b   :  { %1287 = vmatpush.msrb.mxu3 %v340_v61  ;;  %1219 = vmatpush.msrb.mxu0 %v67_v20  ;;  %v924_v17 = vadd.f32 %v923_v7, %v901_v11  ;;  %v4852_v7 = vld [vmem:[%s11516_s3 + $0x48] sm:$0xff]  ;;  %v4891_v11 = vld [vmem:[%s11516_s3 + $0xe0] sm:$0xff] }
 0x11c   :  { %1242 = vmatpush.msrb.mxu1 %v323_v40  ;;  %1265 = vmatpush.msrb.mxu2 %v68_v43  ;;  %v4840_v43 = vld [vmem:[%s11516_s3 + $0x28] sm:$0xff] }
 0x11d   :  { %1288 = vmatpush.msrb.mxu3 %v324_v44  ;;  %1220 = vmatpush.msrb.mxu0 %v51_v28  ;;  %v1304_v22 = vmax.f32 %v924_v17, 0.0  ;;  %v1332_v28 = vld [vmem:[%s11516_s3 + $0x18] sm:$0xff] }
 0x11e   :  { %1243 = vmatpush.msrb.mxu1 %v307_v12  ;;  %1266 = vmatpush.msrb.mxu2 %v52_v49  ;;  %v903_v60 = vpop.f32.mrf.mxu2 }
 0x11f   :  { %1289 = vmatpush.msrb.mxu3 %v308_v9  ;;  %1221 = vmatmul.f32.vlgmr.msrb.gmra.mxu0 %v7277_v26  ;;  %v857_v58 = vpop.f32.mrf.mxu0 }
 0x120   :  { %1267 = vmatmul.f32.vlgmr.msrb.gmra.mxu2 %v7277_v26  ;;  %1365 = vmatpush.msra.mxu0 %v1314_v50  ;;  %v832_v26 = vadd.f32 %v7626_v29, %v809_v55  ;;  %v858_v37 = vadd.f32 %v857_v58, %v7618_v25  ;;  %v904_v29 = vadd.f32 %v903_v60, %v7618_v25 }
 0x121   :  { %5955 = vmatpush.msra.mxu2 %v1314_v50  ;;  %1406 = vmatpush.msra.mxu1 %v1313_v46  ;;  %v926_v10 = vpop.f32.mrf.mxu3 }
 0x122   :  { %5957 = vmatpush.msra.mxu3 %v1313_v46  ;;  %1244 = vmatmul.f32.vlgmr.msrb.gmra.mxu1 %v7296_v30  ;;  %v880_v4 = vpop.f32.mrf.mxu1  ;;  %v1302_v5 = vmax.f32 %v832_v26, 0.0  ;;  %v927_v14 = vadd.f32 %v926_v10, %v904_v29  ;;  %v4868_v46 = vld [vmem:[%s11516_s3 + $0x88] sm:$0xff]  ;;  %v4870_v26 = vld [vmem:[%s11516_s3 + $0x98] sm:$0xff]  ;;  %v4907_v10 = vld [vmem:[%s11516_s3 + $0x120] sm:$0xff] }
 0x123   :  { %1290 = vmatmul.f32.vlgmr.msrb.gmra.mxu3 %v7296_v30  ;;  %1366 = vmatpush.msra.mxu0 %v1298_v47  ;;  %v855_v30 = vadd.f32 %v7722_v21, %v7686_v62  ;;  %v881_v6 = vadd.f32 %v880_v4, %v858_v37  ;;  %v4862_v37 = vld [vmem:[%s11516_s3 + $0x78] sm:$0xff]  ;;  %v4883_v4 = vld [vmem:[%s11516_s3 + $0xc0] sm:$0xff] }
 0x124   :  { %5956 = vmatpush.msra.mxu2 %v1298_v47  ;;  %1407 = vmatpush.msra.mxu1 %v1297_v52  ;;  %v1320_v20 = vmax.f32 %v927_v14, 0.0 }
 0x125   :  { %5958 = vmatpush.msra.mxu3 %v1297_v52  ;;  %1552 = vmatpush.msrb.mxu0 %v1317_v57  ;;  %v878_v13 = vadd.f32 %v7758_v38, %v855_v30  ;;  %v1319_v16 = vmax.f32 %v881_v6, 0.0  ;;  %v4875_v38 = vld [vmem:[%s11516_s3 + $0xa0] sm:$0xff]  ;;  %v4869_v52 = vld [vmem:[%s11516_s3 + $0x90] sm:$0xff] }
 0x126   :  { %1452 = vmatpush.msrb.mxu2 %v1315_v53  ;;  %1602 = vmatpush.msrb.mxu1 %v1318_v59  ;;  %v4876_v53 = vld [vmem:[%s11516_s3 + $0xa8] sm:$0xff]  ;;  %v4861_v57 = vld [vmem:[%s11516_s3 + $0x70] sm:$0xff]  ;;  %v4878_v59 = vld [vmem:[%s11516_s3 + $0xb8] sm:$0xff] }
 0x127   :  { %1502 = vmatpush.msrb.mxu3 %v1316_v56  ;;  %1224 = vmatmul.f32.gmra.mxu0 %v7578_v8  ;;  %v1303_v61 = vmax.f32 %v878_v13, 0.0  ;;  %v4877_v56 = vld [vmem:[%s11516_s3 + $0xb0] sm:$0xff] }
 0x128   :  { %1453 = vmatpush.msrb.mxu2 %v1299_v34  ;;  %1553 = vmatpush.msrb.mxu0 %v1301_v18  ;;  %v4854_v34 = vld [vmem:[%s11516_s3 + $0x58] sm:$0xff] }
 0x129   :  { %1503 = vmatpush.msrb.mxu3 %v1300_v3  ;;  %1270 = vmatmul.f32.gmra.mxu2 %v7578_v8  ;;  %v4839_v8 = vld [vmem:[%s11516_s3 + $0x20] sm:$0xff] }
 0x12a   :  { %1247 = vmatmul.f32.gmra.mxu1 %v7368_v51  ;;  %5962 = vset.pattern.permute.xlu1 %v5994_v19  ;;  %v4899_v3 = vld [vmem:[%s11516_s3 + $0x100] sm:$0xff] }
 0x12b   :  { %1293 = vmatmul.f32.gmra.mxu3 %v7368_v51  ;;  %1603 = vmatpush.msrb.mxu1 %v1302_v5  ;;  %v1329_v51 = vld [vmem:[%s11516_s3] sm:$0xff] }
 0x12c   :  { %5963 = vset.pattern.permute.xlu2 %v5994_v19  ;;  %v1331_v19 = vld [vmem:[%s11516_s3 + $0x10] sm:$0xff] }
 0x12f   :  { %4843 = vmatmul.msk.f32.vlgmr.msra.gmra.mxu0 %vm1338_vm0, %v4839_v8 }
 0x130   :  { %v946_v21 = vpop.f32.mrf.mxu0 }
 0x131   :  { %4845 = vmatmul.msk.f32.vlgmr.msra.gmra.mxu2 %vm1338_vm0, %v4841_v2  ;;  %v947_v31 = vadd.f32 %v946_v21, %v7686_v62  ;;  %v4908_v21 = vld [vmem:[%s11516_s3 + $0x128] sm:$0xff] }
 0x132   :  { %1652 = vmatpush.msra.mxu2 %v1319_v16  ;;  %4847 = vmatmul.msk.f32.vlgmr.msra.gmra.mxu1 %vm1338_vm0, %v1329_v51  ;;  %v4900_v16 = vld [vmem:[%s11516_s3 + $0x108] sm:$0xff] }
 0x133   :  { %4849 = vmatmul.msk.f32.vlgmr.msra.gmra.mxu3 %vm1338_vm0, %v1331_v19  ;;  %v969_v40 = vpop.f32.mrf.mxu1 }
 0x134   :  { %1653 = vmatpush.msra.mxu2 %v1303_v61  ;;  %1702 = vmatpush.msra.mxu3 %v1320_v20  ;;  %v970_v36 = vadd.f32 %v969_v40, %v947_v31  ;;  %v4884_v61 = vld [vmem:[%s11516_s3 + $0xc8] sm:$0xff]  ;;  %v4885_v31 = vld [vmem:[%s11516_s3 + $0xd0] sm:$0xff] }
 0x136   :  { %1703 = vmatpush.msra.mxu3 %v1304_v22  ;;  %v1305_v24 = vmax.f32 %v970_v36, 0.0  ;;  %v4892_v22 = vld [vmem:[%s11516_s3 + $0xe8] sm:$0xff] }
 0x137   :  { %4844 = vmatmul.msk.f32.gmra.mxu0 %vm1338_vm0, %v4840_v43  ;;  %v992_v44 = vpop.f32.mrf.mxu2 }
 0x138   :  { %v993_v48 = vadd.f32 %v992_v44, %v7686_v62  ;;  %v4901_v44 = vld [vmem:[%s11516_s3 + $0x110] sm:$0xff] }
 0x139   :  { %4846 = vmatmul.msk.f32.gmra.mxu2 %vm1338_vm0, %v4842_v23 }
 0x13a   :  { %4848 = vmatmul.msk.f32.gmra.mxu1 %vm1338_vm0, %v1330_v0  ;;  %v949_v1 = vpop.f32.mrf.mxu0  ;;  %v1015_v12 = vpop.f32.mrf.mxu3 }
 0x13b   :  { %4850 = vmatmul.msk.f32.gmra.mxu3 %vm1338_vm0, %v1332_v28  ;;  %v950_v49 = vadd.f32 %v949_v1, %v7618_v25  ;;  %v1016_v55 = vadd.f32 %v1015_v12, %v993_v48  ;;  %v4909_v1 = vld [vmem:[%s11516_s3 + $0x130] sm:$0xff] }
 0x13c   :  { %v4893_v12 = vld [vmem:[%s11516_s3 + $0xf0] sm:$0xff] }
 0x13d   :  { %v972_v35 = vpop.f32.mrf.mxu1  ;;  %v1306_v54 = vmax.f32 %v1016_v55, 0.0 }
 0x13e   :  { %v973_v9 = vadd.f32 %v972_v35, %v950_v49  ;;  %v4902_v49 = vld [vmem:[%s11516_s3 + $0x118] sm:$0xff] }
 0x13f   :  { %4871 = vmatmul.msk.f32.vlgmr.msrb.gmra.mxu0 %vm1338_vm0, %v4867_v32  ;;  %v4886_v32 = vld [vmem:[%s11516_s3 + $0xd8] sm:$0xff] }
 0x140   :  { %v1321_v41 = vmax.f32 %v973_v9, 0.0  ;;  %v4894_v35 = vld [vmem:[%s11516_s3 + $0xf8] sm:$0xff] }
 0x141   :  { %4855 = vmatmul.msk.f32.vlgmr.msrb.gmra.mxu2 %vm1338_vm0, %v4851_v33  ;;  %v995_v50 = vpop.f32.mrf.mxu2  ;;  %v4910_v33 = vld [vmem:[%s11516_s3 + $0x138] sm:$0xff] }
 0x142   :  { %4879 = vmatmul.msk.f32.vlgmr.msrb.gmra.mxu1 %vm1338_vm0, %v4875_v38  ;;  %v996_v42 = vadd.f32 %v995_v50, %v7618_v25  ;;  %1752 = vmatpush.msra.mxu0 %v1321_v41  ;;  %v4915_v38 = vld [vmem:[%s11516_s3 + $0x140] sm:$0xff] }
 0x143   :  { %4863 = vmatmul.msk.f32.vlgmr.msrb.gmra.mxu3 %vm1338_vm0, %v4859_v39  ;;  %v4923_v41 = vld [vmem:[%s11516_s3 + $0x160] sm:$0xff] }
 0x144   :  { %v1018_v45 = vpop.f32.mrf.mxu3  ;;  %1753 = vmatpush.msra.mxu0 %v1305_v24 }
 0x145   :  { %v1019_v47 = vadd.f32 %v1018_v45, %v996_v42 }
 0x147   :  { %v1322_v27 = vmax.f32 %v1019_v47, 0.0  ;;  %4872 = vmatmul.msk.f32.gmra.mxu0 %vm1338_vm0, %v4868_v46  ;;  %v4916_v46 = vld [vmem:[%s11516_s3 + $0x148] sm:$0xff] }
 0x149   :  { %4856 = vmatmul.msk.f32.gmra.mxu2 %vm1338_vm0, %v4852_v7  ;;  %1802 = vmatpush.msra.mxu1 %v1322_v27  ;;  %v4924_v27 = vld [vmem:[%s11516_s3 + $0x168] sm:$0xff] }
 0x14a   :  { %4880 = vmatmul.msk.f32.gmra.mxu1 %vm1338_vm0, %v4876_v53 }
 0x14b   :  { %4864 = vmatmul.msk.f32.gmra.mxu3 %vm1338_vm0, %v4860_v63  ;;  %1803 = vmatpush.msra.mxu1 %v1306_v54 }
 0x14f   :  { %4873 = vmatmul.msk.f32.gmra.mxu0 %vm1338_vm0, %v4869_v52 }
 0x151   :  { %4857 = vmatmul.msk.f32.gmra.mxu2 %vm1338_vm0, %v4853_v15  ;;  %v4931_v15 = vld [vmem:[%s11516_s3 + $0x180] sm:$0xff] }
 0x152   :  { %4881 = vmatmul.msk.f32.gmra.mxu1 %vm1338_vm0, %v4877_v56 }
 0x153   :  { %4865 = vmatmul.msk.f32.gmra.mxu3 %vm1338_vm0, %v4861_v57 }
 0x154   :  { %v1038_v58 = vpop.f32.mrf.mxu0 }
 0x155   :  { %v1039_v29 = vadd.f32 %v1038_v58, %v7686_v62 }
 0x157   :  { %v1061_v18 = vpop.f32.mrf.mxu1  ;;  %4874 = vmatmul.msk.f32.gmra.mxu0 %vm1338_vm0, %v4870_v26  ;;  %v4917_v26 = vld [vmem:[%s11516_s3 + $0x150] sm:$0xff] }
 0x158   :  { %v1062_v8 = vadd.f32 %v1061_v18, %v1039_v29  ;;  %v4925_v18 = vld [vmem:[%s11516_s3 + $0x170] sm:$0xff] }
 0x159   :  { %4858 = vmatmul.msk.f32.gmra.mxu2 %vm1338_vm0, %v4854_v34 }
 0x15a   :  { %4882 = vmatmul.msk.f32.gmra.mxu1 %vm1338_vm0, %v4878_v59  ;;  %v1307_v20 = vmax.f32 %v1062_v8, 0.0 }
 0x15b   :  { %4866 = vmatmul.msk.f32.gmra.mxu3 %vm1338_vm0, %v4862_v37  ;;  %v1084_v60 = vpop.f32.mrf.mxu2  ;;  %v4939_v37 = vld [vmem:[%s11516_s3 + $0x1a0] sm:$0xff] }
 0x15c   :  { %v1085_v17 = vadd.f32 %v1084_v60, %v7686_v62  ;;  %v4932_v60 = vld [vmem:[%s11516_s3 + $0x188] sm:$0xff] }
 0x15e   :  { %v1041_v5 = vpop.f32.mrf.mxu0  ;;  %v1107_v30 = vpop.f32.mrf.mxu3 }
 0x15f   :  { %v1042_v6 = vadd.f32 %v1041_v5, %v7618_v25  ;;  %4903 = vmatmul.msk.f32.vlgmr.msra.gmra.mxu0 %vm1338_vm0, %v4899_v3  ;;  %v1108_v43 = vadd.f32 %v1107_v30, %v1085_v17  ;;  %v4918_v3 = vld [vmem:[%s11516_s3 + $0x158] sm:$0xff]  ;;  %v4940_v5 = vld [vmem:[%s11516_s3 + $0x1a8] sm:$0xff]  ;;  %v4933_v30 = vld [vmem:[%s11516_s3 + $0x190] sm:$0xff] }
 0x161   :  { %4887 = vmatmul.msk.f32.vlgmr.msra.gmra.mxu2 %vm1338_vm0, %v4883_v4  ;;  %v1064_v13 = vpop.f32.mrf.mxu1  ;;  %v1308_v28 = vmax.f32 %v1108_v43, 0.0  ;;  %v4926_v4 = vld [vmem:[%s11516_s3 + $0x178] sm:$0xff] }
 0x162   :  { %v1065_v14 = vadd.f32 %v1064_v13, %v1042_v6  ;;  %4911 = vmatmul.msk.f32.vlgmr.msra.gmra.mxu1 %vm1338_vm0, %v4907_v10  ;;  %v2121_v10 = vld [vmem:[%s11517_s4] sm:$0xff]  ;;  %v4934_v13 = vld [vmem:[%s11516_s3 + $0x198] sm:$0xff] }
 0x163   :  { %4895 = vmatmul.msk.f32.vlgmr.msra.gmra.mxu3 %vm1338_vm0, %v4891_v11  ;;  %2127 = vperm.xlu1 %5962, %v2121_v10   ;;  %v4941_v11 = vld [vmem:[%s11516_s3 + $0x1b0] sm:$0xff]  ;;  %v2185_v10 = vld [vmem:[%s11518_s5 + $0xf8] sm:$0xff] }
 0x164   :  { %v1323_v2 = vmax.f32 %v1065_v14, 0.0 }
 0x165   :  { %v1087_v51 = vpop.f32.mrf.mxu2 }
 0x166   :  { %v1088_v19 = vadd.f32 %v1087_v51, %v7618_v25  ;;  %1852 = vmatpush.msrb.mxu2 %v1323_v2 }
 0x167   :  { %4904 = vmatmul.msk.f32.gmra.mxu0 %vm1338_vm0, %v4900_v16 }
 0x168   :  { %v1110_v40 = vpop.f32.mrf.mxu3  ;;  %1853 = vmatpush.msrb.mxu2 %v1307_v20  ;;  %v4942_v20 = vld [vmem:[%s11516_s3 + $0x1b8] sm:$0xff] }
 0x169   :  { %4888 = vmatmul.msk.f32.gmra.mxu2 %vm1338_vm0, %v4884_v61  ;;  %v1111_v23 = vadd.f32 %v1110_v40, %v1088_v19 }
 0x16a   :  { %4912 = vmatmul.msk.f32.gmra.mxu1 %vm1338_vm0, %v4908_v21  ;;  %v2122_v21 = vld [vmem:[%s11517_s4 + $0x8] sm:$0xff] }
 0x16b   :  { %4896 = vmatmul.msk.f32.gmra.mxu3 %vm1338_vm0, %v4892_v22  ;;  %v1324_v0 = vmax.f32 %v1111_v23, 0.0  ;;  %2132 = vperm.xlu1 %5962, %v2122_v21   ;;  %v4992_v21 = vld [vmem:[%s11518_s5 + $0x1e8] sm:$0xff] }
 0x16d   :  { %1902 = vmatpush.msrb.mxu3 %v1324_v0 }
 0x16f   :  { %1903 = vmatpush.msrb.mxu3 %v1308_v28  ;;  %4905 = vmatmul.msk.f32.gmra.mxu0 %vm1338_vm0, %v4901_v44  ;;  %v4947_v44 = vld [vmem:[%s11516_s3 + $0x1c0] sm:$0xff] }
 0x171   :  { %4889 = vmatmul.msk.f32.gmra.mxu2 %vm1338_vm0, %v4885_v31 }
 0x172   :  { %4913 = vmatmul.msk.f32.gmra.mxu1 %vm1338_vm0, %v4909_v1 }
 0x173   :  { %4897 = vmatmul.msk.f32.gmra.mxu3 %vm1338_vm0, %v4893_v12 }
 0x177   :  { %4906 = vmatmul.msk.f32.gmra.mxu0 %vm1338_vm0, %v4902_v49 }
 0x178   :  { %v1130_v36 = vpop.f32.mrf.mxu0 }
 0x179   :  { %4890 = vmatmul.msk.f32.gmra.mxu2 %vm1338_vm0, %v4886_v32  ;;  %v1131_v48 = vadd.f32 %v1130_v36, %v7686_v62 }
 0x17a   :  { %4914 = vmatmul.msk.f32.gmra.mxu1 %vm1338_vm0, %v4910_v33  ;;  %v4955_v33 = vld [vmem:[%s11516_s3 + $0x1e0] sm:$0xff] }
 0x17b   :  { %4898 = vmatmul.msk.f32.gmra.mxu3 %vm1338_vm0, %v4894_v35  ;;  %v1153_v9 = vpop.f32.mrf.mxu1  ;;  %v4948_v35 = vld [vmem:[%s11516_s3 + $0x1c8] sm:$0xff] }
 0x17c   :  { %v1154_v55 = vadd.f32 %v1153_v9, %v1131_v48  ;;  %v4949_v48 = vld [vmem:[%s11516_s3 + $0x1d0] sm:$0xff] }
 0x17e   :  { %v1309_v54 = vmax.f32 %v1154_v55, 0.0  ;;  %v4950_v55 = vld [vmem:[%s11516_s3 + $0x1d8] sm:$0xff] }
 0x17f   :  { %v1176_v39 = vpop.f32.mrf.mxu2 }
 0x180   :  { %v1177_v53 = vadd.f32 %v1176_v39, %v7686_v62 }
 0x181   :  { %4919 = vmatmul.msk.f32.vlgmr.msrb.gmra.mxu2 %vm1338_vm0, %v4915_v38 }
 0x182   :  { %v1133_v50 = vpop.f32.mrf.mxu0  ;;  %v1199_v24 = vpop.f32.mrf.mxu3 }
 0x183   :  { %4927 = vmatmul.msk.f32.vlgmr.msrb.gmra.mxu3 %vm1338_vm0, %v4923_v41  ;;  %v1134_v42 = vadd.f32 %v1133_v50, %v7618_v25  ;;  %v1200_v57 = vadd.f32 %v1199_v24, %v1177_v53  ;;  %v4956_v41 = vld [vmem:[%s11516_s3 + $0x1e8] sm:$0xff] }
 0x185   :  { %v1156_v45 = vpop.f32.mrf.mxu1  ;;  %v1310_v59 = vmax.f32 %v1200_v57, 0.0 }
 0x186   :  { %v1157_v7 = vadd.f32 %v1156_v45, %v1134_v42 }
 0x188   :  { %v1325_v47 = vmax.f32 %v1157_v7, 0.0 }
 0x189   :  { %4920 = vmatmul.msk.f32.gmra.mxu2 %vm1338_vm0, %v4916_v46  ;;  %v1179_v63 = vpop.f32.mrf.mxu2  ;;  %v4957_v46 = vld [vmem:[%s11516_s3 + $0x1f0] sm:$0xff] }
 0x18a   :  { %v1180_v52 = vadd.f32 %v1179_v63, %v7618_v25  ;;  %1952 = vmatpush.msrb.mxu0 %v1325_v47  ;;  %v4958_v63 = vld [vmem:[%s11516_s3 + $0x1f8] sm:$0xff] }
 0x18b   :  { %4928 = vmatmul.msk.f32.gmra.mxu3 %vm1338_vm0, %v4924_v27 }
 0x18c   :  { %v1202_v56 = vpop.f32.mrf.mxu3  ;;  %1953 = vmatpush.msrb.mxu0 %v1309_v54 }
 0x18d   :  { %v1203_v58 = vadd.f32 %v1202_v56, %v1180_v52  ;;  %4935 = vmatmul.msk.f32.vlgmr.msrb.gmra.mxu0 %vm1338_vm0, %v4931_v15  ;;  %v2123_v56 = vld [vmem:[%s11517_s4 + $0x10] sm:$0xff] }
 0x18e   :  { %2137 = vperm.xlu2 %5963, %v2123_v56  }
 0x18f   :  { %v1326_v34 = vmax.f32 %v1203_v58, 0.0 }
 0x191   :  { %4921 = vmatmul.msk.f32.gmra.mxu2 %vm1338_vm0, %v4917_v26  ;;  %2002 = vmatpush.msrb.mxu1 %v1326_v34 }
 0x193   :  { %4929 = vmatmul.msk.f32.gmra.mxu3 %vm1338_vm0, %v4925_v18  ;;  %2003 = vmatpush.msrb.mxu1 %v1310_v59  ;;  %v2124_v18 = vld [vmem:[%s11517_s4 + $0x18] sm:$0xff]  ;;  %s4828_s4 = sshll.u32 %s5995_s24, 4  ;;  %s4829_s4 = int_to_ptr.vmem [resolvable:$true] %s4828_s4 }
 0x194   :  { %4943 = vmatmul.msk.f32.vlgmr.msrb.gmra.mxu1 %vm1338_vm0, %v4939_v37 }
 0x195   :  { %4936 = vmatmul.msk.f32.gmra.mxu0 %vm1338_vm0, %v4932_v60  ;;  %2206 = vmatpush.msra.mxu1 %v2185_v10 }
 0x196   :  { %2142 = vperm.xlu2 %5963, %v2124_v18   ;;  %v2168_v18 = vld [vmem:[%s11518_s5 + $0x70] sm:$0xff] }
 0x199   :  { %4922 = vmatmul.msk.f32.gmra.mxu2 %vm1338_vm0, %v4918_v3 }
 0x19b   :  { %4930 = vmatmul.msk.f32.gmra.mxu3 %vm1338_vm0, %v4926_v4 }
 0x19c   :  { %v1222_v29 = vpop.f32.mrf.mxu0  ;;  %4944 = vmatmul.msk.f32.gmra.mxu1 %vm1338_vm0, %v4940_v5 }
 0x19d   :  { %4937 = vmatmul.msk.f32.gmra.mxu0 %vm1338_vm0, %v4933_v30  ;;  %v1223_v8 = vadd.f32 %v1222_v29, %v7686_v62 }
 0x19f   :  { %v1245_v6 = vpop.f32.mrf.mxu1 }
 0x1a0   :  { %v1246_v51 = vadd.f32 %v1245_v6, %v1223_v8  ;;  %v2184_v6 = vld [vmem:[%s11518_s5 + $0xf0] sm:$0xff] }
 0x1a1   :  { %2186 = vmatpush.msra.mxu0 %v2184_v6  ;;  %v4993_v8 = vld [vmem:[%s11518_s5 + $0x1f0] sm:$0xff]  ;;  %v4980_v6 = vld [vmem:[%s11518_s5 + $0x188] sm:$0xff] }
 0x1a2   :  { %v1311_v23 = vmax.f32 %v1246_v51, 0.0  ;;  %v2180_v51 = vld [vmem:[%s11518_s5 + $0xd0] sm:$0xff] }
 0x1a3   :  { %v1268_v14 = vpop.f32.mrf.mxu2 }
 0x1a4   :  { %v1225_v2 = vpop.f32.mrf.mxu0  ;;  %4945 = vmatmul.msk.f32.gmra.mxu1 %vm1338_vm0, %v4941_v11  ;;  %v1269_v40 = vadd.f32 %v1268_v14, %v7686_v62  ;;  %v2183_v14 = vld [vmem:[%s11518_s5 + $0xe8] sm:$0xff] }
 0x1a5   :  { %v1226_v16 = vadd.f32 %v1225_v2, %v7618_v25  ;;  %4938 = vmatmul.msk.f32.gmra.mxu0 %vm1338_vm0, %v4934_v13  ;;  %v2182_v13 = vld [vmem:[%s11518_s5 + $0xe0] sm:$0xff]  ;;  %v4994_v2 = vld [vmem:[%s11518_s5 + $0x1f8] sm:$0xff]  ;;  %2207 = vmatpush.msra.mxu1 %v2183_v14  ;;  %v2167_v14 = vld [vmem:[%s11518_s5 + $0x68] sm:$0xff] }
 0x1a6   :  { %v1291_v17 = vpop.f32.mrf.mxu3  ;;  %2187 = vmatpush.msra.mxu0 %v2182_v13  ;;  %v2166_v13 = vld [vmem:[%s11518_s5 + $0x60] sm:$0xff] }
 0x1a7   :  { %v1248_v61 = vpop.f32.mrf.mxu1  ;;  %v1292_v1 = vadd.f32 %v1291_v17, %v1269_v40  ;;  %v2179_v40 = vld [vmem:[%s11518_s5 + $0xc8] sm:$0xff] }
 0x1a8   :  { %v1249_v19 = vadd.f32 %v1248_v61, %v1226_v16  ;;  %2188 = vmatpush.msra.mxu0 %v2180_v51 }
 0x1a9   :  { %v1312_v32 = vmax.f32 %v1292_v1, 0.0 }
 0x1aa   :  { %v1327_v22 = vmax.f32 %v1249_v19, 0.0  ;;  %v2181_v19 = vld [vmem:[%s11518_s5 + $0xd8] sm:$0xff] }
 0x1ab   :  { %2208 = vmatpush.msra.mxu1 %v2181_v19 }
 0x1ac   :  { %v1271_v43 = vpop.f32.mrf.mxu2  ;;  %2052 = vmatpush.msra.mxu2 %v1327_v22  ;;  %4946 = vmatmul.msk.f32.gmra.mxu1 %vm1338_vm0, %v4942_v20  ;;  %v8042_v28 = vpop.f32.mrf.mxu0  ;;  %v4991_v20 = vld [vmem:[%s11518_s5 + $0x1e0] sm:$0xff] }
 0x1ad   :  { %v1272_v0 = vadd.f32 %v1271_v43, %v7618_v25  ;;  %v2178_v22 = vld [vmem:[%s11518_s5 + $0xc0] sm:$0xff]  ;;  %v4989_v43 = vld [vmem:[%s11518_s5 + $0x1d0] sm:$0xff]  ;;  %2209 = vmatpush.msra.mxu1 %v2179_v40 }
 0x1ae   :  { %v1294_v31 = vpop.f32.mrf.mxu3  ;;  %2053 = vmatpush.msra.mxu2 %v1311_v23  ;;  %v4990_v23 = vld [vmem:[%s11518_s5 + $0x1d8] sm:$0xff]  ;;  %2189 = vmatpush.msra.mxu0 %v2178_v22  ;;  %v4975_v22 = vld [vmem:[%s11518_s5 + $0x160] sm:$0xff] }
 0x1af   :  { %v1295_v12 = vadd.f32 %v1294_v31, %v1272_v0  ;;  %4951 = vmatmul.msk.f32.vlgmr.msra.gmra.mxu2 %vm1338_vm0, %v4947_v44  ;;  %v8045_v62 = vpop.f32.mrf.mxu1  ;;  %v2176_v0 = vld [vmem:[%s11518_s5 + $0xb0] sm:$0xff]  ;;  %v2162_v40 = vld [vmem:[%s11518_s5 + $0x40] sm:$0xff] }
 0x1b0   :  { %2269 = vmatpush.msrb.mxu2 %v4993_v8  ;;  %2190 = vmatpush.msra.mxu0 %v2176_v0  ;;  %v4977_v8 = vld [vmem:[%s11518_s5 + $0x170] sm:$0xff] }
 0x1b1   :  { %v1328_v49 = vmax.f32 %v1295_v12, 0.0  ;;  %v2177_v12 = vld [vmem:[%s11518_s5 + $0xb8] sm:$0xff]  ;;  %v4973_v0 = vld [vmem:[%s11518_s5 + $0x150] sm:$0xff] }
 0x1b2   :  { %2270 = vmatpush.msrb.mxu2 %v4991_v20  ;;  %2210 = vmatpush.msra.mxu1 %v2177_v12  ;;  %v2164_v20 = vld [vmem:[%s11518_s5 + $0x50] sm:$0xff]  ;;  %v2161_v12 = vld [vmem:[%s11518_s5 + $0x38] sm:$0xff] }
 0x1b3   :  { %2102 = vmatpush.msra.mxu3 %v1328_v49  ;;  %v4987_v49 = vld [vmem:[%s11518_s5 + $0x1c0] sm:$0xff] }
 0x1b4   :  { %v1374_v25 = vpop.f32.mrf.mxu2  ;;  %v1371_v36 = vpop.f32.mrf.mxu0  ;;  %2271 = vmatpush.msrb.mxu2 %v4989_v43  ;;  %v2163_v43 = vld [vmem:[%s11518_s5 + $0x48] sm:$0xff] }
 0x1b5   :  { %2103 = vmatpush.msra.mxu3 %v1312_v32  ;;  %v4988_v32 = vld [vmem:[%s11518_s5 + $0x1c8] sm:$0xff] }
 0x1b6   :  { %v1415_v9 = vpop.f32.mrf.mxu3  ;;  %4959 = vmatmul.msk.f32.vlgmr.msra.gmra.mxu3 %vm1338_vm0, %v4955_v33  ;;  %2272 = vmatpush.msrb.mxu2 %v4987_v49  ;;  %v4971_v49 = vld [vmem:[%s11518_s5 + $0x140] sm:$0xff] }
 0x1b7   :  { %4952 = vmatmul.msk.f32.gmra.mxu2 %vm1338_vm0, %v4948_v35  ;;  %v1412_v38 = vpop.f32.mrf.mxu1  ;;  %v1416_v11 = vadd.f32 %v1415_v9, %v1374_v25  ;;  %2289 = vmatpush.msrb.mxu3 %v4994_v2  ;;  %v2174_v9 = vld [vmem:[%s11518_s5 + $0xa0] sm:$0xff]  ;;  %v4978_v2 = vld [vmem:[%s11518_s5 + $0x178] sm:$0xff] }
 0x1b8   :  { %v1413_v59 = vadd.f32 %v1412_v38, %v1371_v36  ;;  %v2175_v38 = vld [vmem:[%s11518_s5 + $0xa8] sm:$0xff]  ;;  %2191 = vmatpush.msra.mxu0 %v2174_v9  ;;  %v4969_v9 = vld [vmem:[%s11518_s5 + $0x130] sm:$0xff] }
 0x1b9   :  { %2290 = vmatpush.msrb.mxu3 %v4992_v21  ;;  %2211 = vmatpush.msra.mxu1 %v2175_v38  ;;  %v2165_v21 = vld [vmem:[%s11518_s5 + $0x58] sm:$0xff] }
 0x1ba   :  { %v4970_v38 = vld [vmem:[%s11518_s5 + $0x138] sm:$0xff] }
 0x1bb   :  { %2291 = vmatpush.msrb.mxu3 %v4990_v23 }
 0x1bc   :  { %v8055_v39 = vpop.f32.mrf.mxu2  ;;  %v8063_v50 = vpop.f32.mrf.mxu0 }
 0x1bd   :  { %2292 = vmatpush.msrb.mxu3 %v4988_v32  ;;  %v4972_v32 = vld [vmem:[%s11518_s5 + $0x148] sm:$0xff] }
 0x1be   :  { %v8065_v24 = vpop.f32.mrf.mxu3  ;;  %4960 = vmatmul.msk.f32.gmra.mxu3 %vm1338_vm0, %v4956_v41  ;;  %v4985_v41 = vld [vmem:[%s11518_s5 + $0x1b0] sm:$0xff] }
 0x1bf   :  { %4953 = vmatmul.msk.f32.gmra.mxu2 %vm1338_vm0, %v4949_v48  ;;  %v8069_v42 = vpop.f32.mrf.mxu1  ;;  %v1419_v33 = vadd.f32 %v8065_v24, %v8055_v39  ;;  %v4986_v39 = vld [vmem:[%s11518_s5 + $0x1b8] sm:$0xff] }
 0x1c0   :  { %2273 = vmatpush.msrb.mxu2 %v4985_v41  ;;  %2293 = vmatpush.msrb.mxu3 %v4986_v39 }
 0x1c4   :  { %v8071_v45 = vpop.f32.mrf.mxu2  ;;  %v1558_v7 = vpop.f32.mrf.mxu0 }
 0x1c6   :  { %v8079_v47 = vpop.f32.mrf.mxu3  ;;  %4961 = vmatmul.msk.f32.gmra.mxu3 %vm1338_vm0, %v4957_v46 }
 0x1c7   :  { %4954 = vmatmul.msk.f32.gmra.mxu2 %vm1338_vm0, %v4950_v55  ;;  %v1608_v27 = vpop.f32.mrf.mxu1 }
 0x1cc   :  { %v1458_v53 = vpop.f32.mrf.mxu2  ;;  %v8086_v54 = vpop.f32.mrf.mxu0 }
 0x1cd   :  { %v1468_v60 = vadd.f32 %v1458_v53, %v1413_v59  ;;  %v4983_v53 = vld [vmem:[%s11518_s5 + $0x1a0] sm:$0xff] }
 0x1ce   :  { %v1508_v52 = vpop.f32.mrf.mxu3  ;;  %4962 = vmatmul.msk.f32.gmra.mxu3 %vm1338_vm0, %v4958_v63  ;;  %v4984_v63 = vld [vmem:[%s11518_s5 + $0x1a8] sm:$0xff]  ;;  %2274 = vmatpush.msrb.mxu2 %v4983_v53  ;;  %v2154_v53 = vld [vmem:[%s11518_s5] sm:$0xff] }
 0x1cf   :  { %v8089_v15 = vpop.f32.mrf.mxu1  ;;  %v1518_v5 = vadd.f32 %v1508_v52, %v1468_v60  ;;  %v2171_v52 = vld [vmem:[%s11518_s5 + $0x88] sm:$0xff]  ;;  %2294 = vmatpush.msrb.mxu3 %v4984_v63  ;;  %v2169_v60 = vld [vmem:[%s11518_s5 + $0x78] sm:$0xff] }
 0x1d0   :  { %v2155_v63 = vld [vmem:[%s11518_s5 + $0x8] sm:$0xff] }
 0x1d1   :  { %v1568_v16 = vadd.f32 %v1558_v7, %v1518_v5  ;;  %v2172_v7 = vld [vmem:[%s11518_s5 + $0x90] sm:$0xff]  ;;  %v4979_v5 = vld [vmem:[%s11518_s5 + $0x180] sm:$0xff] }
 0x1d2   :  { %2192 = vmatpush.msra.mxu0 %v2172_v7 }
 0x1d3   :  { %v1618_v44 = vadd.f32 %v1608_v27, %v1568_v16  ;;  %v2173_v27 = vld [vmem:[%s11518_s5 + $0x98] sm:$0xff] }
 0x1d4   :  { %v1461_v57 = vpop.f32.mrf.mxu2  ;;  %v8094_v26 = vpop.f32.mrf.mxu0  ;;  %2212 = vmatpush.msra.mxu1 %v2173_v27  ;;  %v4968_v27 = vld [vmem:[%s11518_s5 + $0x128] sm:$0xff] }
 0x1d5   :  { %v1469_v17 = vadd.f32 %v1461_v57, %v1416_v11  ;;  %v4981_v57 = vld [vmem:[%s11518_s5 + $0x190] sm:$0xff] }
 0x1d6   :  { %v1511_v58 = vpop.f32.mrf.mxu3  ;;  %2213 = vmatpush.msra.mxu1 %v2171_v52  ;;  %2275 = vmatpush.msrb.mxu2 %v4981_v57  ;;  %v4965_v52 = vld [vmem:[%s11518_s5 + $0x110] sm:$0xff] }
 0x1d7   :  { %v8096_v34 = vpop.f32.mrf.mxu1  ;;  %v1519_v31 = vadd.f32 %v1511_v58, %v1469_v17  ;;  %v4982_v58 = vld [vmem:[%s11518_s5 + $0x198] sm:$0xff]  ;;  %v5025_v57 = vld [vmem:[%s11518_s5 + $0x2f0] sm:$0xff] }
 0x1d8   :  { %2295 = vmatpush.msrb.mxu3 %v4982_v58  ;;  %2214 = vmatpush.msra.mxu1 %v2169_v60  ;;  %v5026_v58 = vld [vmem:[%s11518_s5 + $0x2f8] sm:$0xff] }
 0x1d9   :  { %v1569_v48 = vadd.f32 %v8086_v54, %v1519_v31  ;;  %v2170_v54 = vld [vmem:[%s11518_s5 + $0x80] sm:$0xff]  ;;  %2276 = vmatpush.msrb.mxu2 %v4979_v5  ;;  %v2160_v31 = vld [vmem:[%s11518_s5 + $0x30] sm:$0xff] }
 0x1da   :  { %2193 = vmatpush.msra.mxu0 %v2170_v54  ;;  %2296 = vmatpush.msrb.mxu3 %v4980_v6  ;;  %v5023_v5 = vld [vmem:[%s11518_s5 + $0x2e0] sm:$0xff]  ;;  %v5024_v6 = vld [vmem:[%s11518_s5 + $0x2e8] sm:$0xff] }
 0x1db   :  { %v1619_v59 = vadd.f32 %v8089_v15, %v1569_v48  ;;  %2215 = vmatpush.msra.mxu1 %v2167_v14  ;;  %2277 = vmatpush.msrb.mxu2 %v4977_v8  ;;  %v5055_v8 = vld [vmem:[%s11518_s5 + $0x3e0] sm:$0xff] }
 0x1dc   :  { %v1464_v37 = vpop.f32.mrf.mxu2  ;;  %v8103_v4 = vpop.f32.mrf.mxu0  ;;  %2194 = vmatpush.msra.mxu0 %v2168_v18  ;;  %2297 = vmatpush.msrb.mxu3 %v4978_v2  ;;  %v4963_v18 = vld [vmem:[%s11518_s5 + $0x100] sm:$0xff]  ;;  %v5056_v2 = vld [vmem:[%s11518_s5 + $0x3e8] sm:$0xff] }
 0x1dd   :  { %v1470_v24 = vadd.f32 %v1464_v37, %v1419_v33  ;;  %2216 = vmatpush.msra.mxu1 %v2165_v21  ;;  %2278 = vmatpush.msrb.mxu2 %v4975_v22  ;;  %v5018_v21 = vld [vmem:[%s11518_s5 + $0x2b8] sm:$0xff]  ;;  %v5051_v22 = vld [vmem:[%s11518_s5 + $0x3c0] sm:$0xff] }
 0x1de   :  { %v8101_v3 = vpop.f32.mrf.mxu3  ;;  %2195 = vmatpush.msra.mxu0 %v2166_v13  ;;  %v5022_v13 = vld [vmem:[%s11518_s5 + $0x2d8] sm:$0xff] }
 0x1df   :  { %v8105_v30 = vpop.f32.mrf.mxu1  ;;  %v1520_v37 = vadd.f32 %v8101_v3, %v1470_v24  ;;  %2217 = vmatpush.msra.mxu1 %v2163_v43  ;;  %2279 = vmatpush.msrb.mxu2 %v4973_v0  ;;  %v2156_v24 = vld [vmem:[%s11518_s5 + $0x10] sm:$0xff]  ;;  %v5015_v43 = vld [vmem:[%s11518_s5 + $0x2a0] sm:$0xff] }
 0x1e0   :  { %2196 = vmatpush.msra.mxu0 %v2164_v20  ;;  %v5017_v20 = vld [vmem:[%s11518_s5 + $0x2b0] sm:$0xff] }
 0x1e1   :  { %v1570_v16 = vadd.f32 %v8094_v26, %v1520_v37  ;;  %v4976_v26 = vld [vmem:[%s11518_s5 + $0x168] sm:$0xff]  ;;  %2218 = vmatpush.msra.mxu1 %v2161_v12  ;;  %2280 = vmatpush.msrb.mxu2 %v4971_v49  ;;  %v1410_v12 = vadd.f32 %v8045_v62, %v8042_v28  ;;  %v5045_v62 = vld [vmem:[%s11518_s5 + $0x390] sm:$0xff] }
 0x1e2   :  { %2298 = vmatpush.msrb.mxu3 %v4976_v26  ;;  %2197 = vmatpush.msra.mxu0 %v2162_v40  ;;  %v5052_v26 = vld [vmem:[%s11518_s5 + $0x3c8] sm:$0xff] }
 0x1e3   :  { %2281 = vmatpush.msrb.mxu2 %v4969_v9  ;;  %v5012_v28 = vld [vmem:[%s11518_s5 + $0x288] sm:$0xff]  ;;  %v5009_v9 = vld [vmem:[%s11518_s5 + $0x270] sm:$0xff] }
 0x1e4   :  { %v8107_v29 = vpop.f32.mrf.mxu2  ;;  %v1758_v1 = vpop.f32.mrf.mxu0  ;;  %2198 = vmatpush.msra.mxu0 %v2160_v31  ;;  %v5050_v31 = vld [vmem:[%s11518_s5 + $0x3b8] sm:$0xff] }
 0x1e6   :  { %v8127_v61 = vpop.f32.mrf.mxu3 }
 0x1e7   :  { %v1808_v36 = vpop.f32.mrf.mxu1 }
 0x1ec   :  { %v1658_v25 = vpop.f32.mrf.mxu2  ;;  %v1761_v3 = vpop.f32.mrf.mxu0 }
 0x1ed   :  { %v1668_v35 = vadd.f32 %v1658_v25, %v1618_v44  ;;  %v4974_v44 = vld [vmem:[%s11518_s5 + $0x158] sm:$0xff] }
 0x1ee   :  { %v1708_v46 = vpop.f32.mrf.mxu3  ;;  %2299 = vmatpush.msrb.mxu3 %v4974_v44  ;;  %v5049_v44 = vld [vmem:[%s11518_s5 + $0x3b0] sm:$0xff] }
 0x1ef   :  { %v1718_v55 = vadd.f32 %v1708_v46, %v1668_v35  ;;  %v1811_v51 = vpop.f32.mrf.mxu1  ;;  %v2158_v35 = vld [vmem:[%s11518_s5 + $0x20] sm:$0xff]  ;;  %v2157_v46 = vld [vmem:[%s11518_s5 + $0x18] sm:$0xff] }
 0x1f0   :  { %2300 = vmatpush.msrb.mxu3 %v4972_v32  ;;  %2199 = vmatpush.msra.mxu0 %v2158_v35  ;;  %v5047_v32 = vld [vmem:[%s11518_s5 + $0x3a0] sm:$0xff] }
 0x1f1   :  { %v1768_v56 = vadd.f32 %v1758_v1, %v1718_v55  ;;  %v1620_v1 = vadd.f32 %v8096_v34, %v1570_v16  ;;  %v4967_v55 = vld [vmem:[%s11518_s5 + $0x120] sm:$0xff] }
 0x1f2   :  { %2301 = vmatpush.msrb.mxu3 %v4970_v38  ;;  %2200 = vmatpush.msra.mxu0 %v2156_v24  ;;  %v5019_v16 = vld [vmem:[%s11518_s5 + $0x2c0] sm:$0xff]  ;;  %v5010_v38 = vld [vmem:[%s11518_s5 + $0x278] sm:$0xff] }
 0x1f3   :  { %v8218_v10 = vadd.f32 %v1808_v36, %v1768_v56  ;;  %v2159_v36 = vld [vmem:[%s11518_s5 + $0x28] sm:$0xff]  ;;  %2282 = vmatpush.msrb.mxu2 %v4967_v55  ;;  %v4966_v56 = vld [vmem:[%s11518_s5 + $0x118] sm:$0xff]  ;;  %v5011_v35 = vld [vmem:[%s11518_s5 + $0x280] sm:$0xff] }
 0x1f4   :  { %v1661_v11 = vpop.f32.mrf.mxu2  ;;  %v1764_v39 = vpop.f32.mrf.mxu0  ;;  %2219 = vmatpush.msra.mxu1 %v2159_v36  ;;  %2302 = vmatpush.msrb.mxu3 %v4968_v27  ;;  %v5046_v36 = vld [vmem:[%s11518_s5 + $0x398] sm:$0xff] }
 0x1f5   :  { %v1669_v15 = vadd.f32 %v1661_v11, %v1619_v59  ;;  %2201 = vmatpush.msra.mxu0 %v2154_v53  ;;  %v4964_v59 = vld [vmem:[%s11518_s5 + $0x108] sm:$0xff]  ;;  %2283 = vmatpush.msrb.mxu2 %v4965_v52  ;;  %v5057_v11 = vld [vmem:[%s11518_s5 + $0x3f0] sm:$0xff]  ;;  %v5042_v27 = vld [vmem:[%s11518_s5 + $0x378] sm:$0xff] }
 0x1f6   :  { %v1711_v17 = vpop.f32.mrf.mxu3  ;;  %2220 = vmatpush.msra.mxu1 %v2157_v46  ;;  %2303 = vmatpush.msrb.mxu3 %v4966_v56  ;;  %v5007_v46 = vld [vmem:[%s11518_s5 + $0x260] sm:$0xff]  ;;  %v5005_v53 = vld [vmem:[%s11518_s5 + $0x250] sm:$0xff]  ;;  %v5040_v56 = vld [vmem:[%s11518_s5 + $0x368] sm:$0xff] }
 0x1f7   :  { %v1719_v19 = vadd.f32 %v1711_v17, %v1669_v15  ;;  %v1814_v7 = vpop.f32.mrf.mxu1  ;;  %2350 = vmatpush.msrb.mxu0 %v5025_v57  ;;  %v5058_v15 = vld [vmem:[%s11518_s5 + $0x3f8] sm:$0xff]  ;;  %2284 = vmatpush.msrb.mxu2 %v4963_v18  ;;  %v5020_v17 = vld [vmem:[%s11518_s5 + $0x2c8] sm:$0xff]  ;;  %v5039_v52 = vld [vmem:[%s11518_s5 + $0x360] sm:$0xff] }
 0x1f8   :  { %2221 = vmatpush.msra.mxu1 %v2155_v63  ;;  %2304 = vmatpush.msrb.mxu3 %v4964_v59  ;;  %v5037_v18 = vld [vmem:[%s11518_s5 + $0x350] sm:$0xff]  ;;  %v5038_v59 = vld [vmem:[%s11518_s5 + $0x358] sm:$0xff] }
 0x1f9   :  { %v1769_v23 = vadd.f32 %v1761_v3, %v1719_v19  ;;  %v5021_v3 = vld [vmem:[%s11518_s5 + $0x2d0] sm:$0xff]  ;;  %2351 = vmatpush.msrb.mxu0 %v5023_v5  ;;  %2431 = vmatpush.msra.mxu2 %v5057_v11  ;;  %v5054_v19 = vld [vmem:[%s11518_s5 + $0x3d8] sm:$0xff] }
 0x1fa   :  { %2370 = vmatpush.msrb.mxu1 %v5026_v58  ;;  %2451 = vmatpush.msra.mxu3 %v5058_v15  ;;  %v5003_v58 = vld [vmem:[%s11518_s5 + $0x240] sm:$0xff]  ;;  %v5002_v11 = vld [vmem:[%s11518_s5 + $0x238] sm:$0xff] }
 0x1fb   :  { %v8270_v25 = vadd.f32 %v1811_v51, %v1769_v23  ;;  %2352 = vmatpush.msrb.mxu0 %v5021_v3  ;;  %v5053_v51 = vld [vmem:[%s11518_s5 + $0x3d0] sm:$0xff]  ;;  %2432 = vmatpush.msra.mxu2 %v5055_v8  ;;  %v5016_v23 = vld [vmem:[%s11518_s5 + $0x2a8] sm:$0xff]  ;;  %v5035_v15 = vld [vmem:[%s11518_s5 + $0x340] sm:$0xff] }
 0x1fc   :  { %v1664_v33 = vpop.f32.mrf.mxu2  ;;  %2371 = vmatpush.msrb.mxu1 %v5024_v6  ;;  %2452 = vmatpush.msra.mxu3 %v5056_v2  ;;  %v5001_v6 = vld [vmem:[%s11518_s5 + $0x230] sm:$0xff]  ;;  %v4999_v8 = vld [vmem:[%s11518_s5 + $0x220] sm:$0xff]  ;;  %v5000_v2 = vld [vmem:[%s11518_s5 + $0x228] sm:$0xff] }
 0x1fd   :  { %v1670_v34 = vadd.f32 %v1664_v33, %v1620_v1  ;;  %2353 = vmatpush.msrb.mxu0 %v5019_v16  ;;  %2433 = vmatpush.msra.mxu2 %v5053_v51  ;;  %v5013_v1 = vld [vmem:[%s11518_s5 + $0x290] sm:$0xff]  ;;  %v5048_v33 = vld [vmem:[%s11518_s5 + $0x3a8] sm:$0xff] }
 0x1fe   :  { %v1714_v41 = vpop.f32.mrf.mxu3  ;;  %2372 = vmatpush.msrb.mxu1 %v5022_v13  ;;  %2453 = vmatpush.msra.mxu3 %v5054_v19  ;;  %v5033_v16 = vld [vmem:[%s11518_s5 + $0x330] sm:$0xff] }
 0x1ff   :  { %v1720_v48 = vadd.f32 %v1714_v41, %v1670_v34  ;;  %2354 = vmatpush.msrb.mxu0 %v5017_v20  ;;  %2434 = vmatpush.msra.mxu2 %v5051_v22  ;;  %v1467_v41 = vadd.f32 %v8071_v45, %v1410_v12  ;;  %v5008_v45 = vld [vmem:[%s11518_s5 + $0x268] sm:$0xff]  ;;  %v4997_v19 = vld [vmem:[%s11518_s5 + $0x210] sm:$0xff]  ;;  %v4998_v20 = vld [vmem:[%s11518_s5 + $0x218] sm:$0xff] }
 0x200   :  { %2373 = vmatpush.msrb.mxu1 %v5020_v17  ;;  %2454 = vmatpush.msra.mxu3 %v5052_v26  ;;  %v4995_v26 = vld [vmem:[%s11518_s5 + $0x200] sm:$0xff] }
 0x201   :  { %v1770_v54 = vadd.f32 %v1764_v39, %v1720_v48  ;;  %2355 = vmatpush.msrb.mxu0 %v5015_v43  ;;  %2435 = vmatpush.msra.mxu2 %v5049_v44  ;;  %v5043_v39 = vld [vmem:[%s11518_s5 + $0x380] sm:$0xff]  ;;  %v5044_v48 = vld [vmem:[%s11518_s5 + $0x388] sm:$0xff]  ;;  %v1517_v63 = vadd.f32 %v8079_v47, %v1467_v41  ;;  %v2128_v41 = vpop.permute.xlu1 %2127 }
 0x202   :  { %2374 = vmatpush.msrb.mxu1 %v5018_v21  ;;  %2455 = vmatpush.msra.mxu3 %v5050_v31  ;;  %v5004_v47 = vld [vmem:[%s11518_s5 + $0x248] sm:$0xff]  ;;  %v5031_v21 = vld [vmem:[%s11518_s5 + $0x320] sm:$0xff] }
 0x203   :  { %v8320_v37 = vadd.f32 %v1814_v7, %v1770_v54  ;;  %2356 = vmatpush.msrb.mxu0 %v5013_v1  ;;  %2436 = vmatpush.msra.mxu2 %v5047_v32  ;;  %v5041_v7 = vld [vmem:[%s11518_s5 + $0x370] sm:$0xff]  ;;  %v1567_v5 = vadd.f32 %v8063_v50, %v1517_v63  ;;  %v5036_v50 = vld [vmem:[%s11518_s5 + $0x348] sm:$0xff]  ;;  %v5027_v44 = vld [vmem:[%s11518_s5 + $0x300] sm:$0xff] }
 0x204   :  { %v8322_v60 = vpop.f32.mrf.mxu2  ;;  %2375 = vmatpush.msrb.mxu1 %v5016_v23  ;;  %2456 = vmatpush.msra.mxu3 %v5048_v33  ;;  %v5029_v23 = vld [vmem:[%s11518_s5 + $0x310] sm:$0xff] }
 0x205   :  { %2357 = vmatpush.msrb.mxu0 %v5011_v35  ;;  %2437 = vmatpush.msra.mxu2 %v5045_v62  ;;  %v1617_v17 = vadd.f32 %v8069_v42, %v1567_v5  ;;  %v5032_v42 = vld [vmem:[%s11518_s5 + $0x328] sm:$0xff]  ;;  %v5117_v63 = vld [vmem:[%s11518_s5 + $0x5d0] sm:$0xff]  ;;  %v5079_v5 = vld [vmem:[%s11518_s5 + $0x4a0] sm:$0xff] }
 0x206   :  { %v8342_v14 = vpop.f32.mrf.mxu3  ;;  %2457 = vmatpush.msra.mxu3 %v5046_v36 }
 0x207   :  { %2358 = vmatpush.msrb.mxu0 %v5009_v9  ;;  %2438 = vmatpush.msra.mxu2 %v5043_v39  ;;  %v1667_v43 = vadd.f32 %v8107_v29, %v1617_v17  ;;  %v5028_v29 = vld [vmem:[%s11518_s5 + $0x308] sm:$0xff]  ;;  %v5110_v17 = vld [vmem:[%s11518_s5 + $0x598] sm:$0xff] }
 0x208   :  { %2458 = vmatpush.msra.mxu3 %v5044_v48  ;;  %v5088_v48 = vld [vmem:[%s11518_s5 + $0x4e8] sm:$0xff] }
 0x209   :  { %2359 = vmatpush.msrb.mxu0 %v5007_v46  ;;  %2439 = vmatpush.msra.mxu2 %v5041_v7  ;;  %v1717_v31 = vadd.f32 %v8127_v61, %v1667_v43  ;;  %v5122_v46 = vld [vmem:[%s11518_s5 + $0x5f8] sm:$0xff]  ;;  %v5119_v7 = vld [vmem:[%s11518_s5 + $0x5e0] sm:$0xff] }
 0x20a   :  { %2459 = vmatpush.msra.mxu3 %v5042_v27  ;;  %v5120_v27 = vld [vmem:[%s11518_s5 + $0x5e8] sm:$0xff]  ;;  %v5106_v43 = vld [vmem:[%s11518_s5 + $0x578] sm:$0xff] }
 0x20b   :  { %2360 = vmatpush.msrb.mxu0 %v5005_v53  ;;  %2440 = vmatpush.msra.mxu2 %v5039_v52  ;;  %v1767_v1 = vadd.f32 %v8103_v4, %v1717_v31  ;;  %v5089_v4 = vld [vmem:[%s11518_s5 + $0x4f0] sm:$0xff]  ;;  %v5083_v53 = vld [vmem:[%s11518_s5 + $0x4c0] sm:$0xff] }
 0x20c   :  { %v1858_v40 = vpop.f32.mrf.mxu2  ;;  %2460 = vmatpush.msra.mxu3 %v5040_v56  ;;  %v5081_v56 = vld [vmem:[%s11518_s5 + $0x4b0] sm:$0xff]  ;;  %v5067_v31 = vld [vmem:[%s11518_s5 + $0x440] sm:$0xff] }
 0x20d   :  { %v1868_v0 = vadd.f32 %v1858_v40, %v8218_v10  ;;  %v5014_v10 = vld [vmem:[%s11518_s5 + $0x298] sm:$0xff]  ;;  %2361 = vmatpush.msrb.mxu0 %v5003_v58  ;;  %2441 = vmatpush.msra.mxu2 %v5037_v18  ;;  %v4996_v40 = vld [vmem:[%s11518_s5 + $0x208] sm:$0xff] }
 0x20e   :  { %v1908_v49 = vpop.f32.mrf.mxu3  ;;  %2376 = vmatpush.msrb.mxu1 %v5014_v10  ;;  %2461 = vmatpush.msra.mxu3 %v5038_v59  ;;  %v1817_v10 = vadd.f32 %v8105_v30, %v1767_v1  ;;  %v5090_v30 = vld [vmem:[%s11518_s5 + $0x4f8] sm:$0xff]  ;;  %v5116_v18 = vld [vmem:[%s11518_s5 + $0x5c8] sm:$0xff] }
 0x20f   :  { %v8401_v34 = vadd.f32 %v1908_v49, %v1868_v0  ;;  %2362 = vmatpush.msrb.mxu0 %v5001_v6  ;;  %2442 = vmatpush.msra.mxu2 %v5035_v15  ;;  %v5030_v0 = vld [vmem:[%s11518_s5 + $0x318] sm:$0xff]  ;;  %v1955_v49 = vpop.f32.mrf.mxu0  ;;  %v5080_v6 = vld [vmem:[%s11518_s5 + $0x4a8] sm:$0xff] }
 0x210   :  { %2377 = vmatpush.msrb.mxu1 %v5012_v28  ;;  %2462 = vmatpush.msra.mxu3 %v5036_v50  ;;  %v1867_v12 = vadd.f32 %v8322_v60, %v1817_v10  ;;  %v5082_v58 = vld [vmem:[%s11518_s5 + $0x4b8] sm:$0xff]  ;;  %v5068_v1 = vld [vmem:[%s11518_s5 + $0x448] sm:$0xff]  ;;  %v5101_v10 = vld [vmem:[%s11518_s5 + $0x550] sm:$0xff] }
 0x211   :  { %2363 = vmatpush.msrb.mxu0 %v4999_v8  ;;  %2443 = vmatpush.msra.mxu2 %v5033_v16  ;;  %v2005_v33 = vpop.f32.mrf.mxu1  ;;  %v5114_v15 = vld [vmem:[%s11518_s5 + $0x5b8] sm:$0xff]  ;;  %v5112_v8 = vld [vmem:[%s11518_s5 + $0x5a8] sm:$0xff] }
 0x212   :  { %2378 = vmatpush.msrb.mxu1 %v5010_v38  ;;  %v1917_v32 = vadd.f32 %v8342_v14, %v1867_v12  ;;  %v5087_v14 = vld [vmem:[%s11518_s5 + $0x4e0] sm:$0xff]  ;;  %v5078_v50 = vld [vmem:[%s11518_s5 + $0x498] sm:$0xff]  ;;  %v5076_v16 = vld [vmem:[%s11518_s5 + $0x488] sm:$0xff] }
 0x213   :  { %2364 = vmatpush.msrb.mxu0 %v4997_v19  ;;  %2444 = vmatpush.msra.mxu2 %v5031_v21  ;;  %v5074_v19 = vld [vmem:[%s11518_s5 + $0x478] sm:$0xff]  ;;  %v5108_v21 = vld [vmem:[%s11518_s5 + $0x588] sm:$0xff] }
 0x214   :  { %v1861_v24 = vpop.f32.mrf.mxu2  ;;  %2379 = vmatpush.msrb.mxu1 %v5008_v45  ;;  %v1967_v35 = vadd.f32 %v1955_v49, %v1917_v32  ;;  %v5085_v45 = vld [vmem:[%s11518_s5 + $0x4d0] sm:$0xff]  ;;  %v5102_v12 = vld [vmem:[%s11518_s5 + $0x558] sm:$0xff] }
 0x215   :  { %v1869_v55 = vadd.f32 %v1861_v24, %v8270_v25  ;;  %v5006_v25 = vld [vmem:[%s11518_s5 + $0x258] sm:$0xff]  ;;  %2365 = vmatpush.msrb.mxu0 %v4995_v26  ;;  %2445 = vmatpush.msra.mxu2 %v5029_v23  ;;  %v5121_v24 = vld [vmem:[%s11518_s5 + $0x5f0] sm:$0xff]  ;;  %v5072_v26 = vld [vmem:[%s11518_s5 + $0x468] sm:$0xff] }
 0x216   :  { %v1911_v54 = vpop.f32.mrf.mxu3  ;;  %2380 = vmatpush.msrb.mxu1 %v5006_v25  ;;  %v2017_v62 = vadd.f32 %v2005_v33, %v1967_v35  ;;  %v5084_v25 = vld [vmem:[%s11518_s5 + $0x4c8] sm:$0xff]  ;;  %v5069_v23 = vld [vmem:[%s11518_s5 + $0x450] sm:$0xff]  ;;  %v5066_v32 = vld [vmem:[%s11518_s5 + $0x438] sm:$0xff] }
 0x217   :  { %v8454_v57 = vadd.f32 %v1911_v54, %v1869_v55  ;;  %2446 = vmatpush.msra.mxu2 %v5027_v44  ;;  %v5086_v55 = vld [vmem:[%s11518_s5 + $0x4d8] sm:$0xff]  ;;  %v5103_v44 = vld [vmem:[%s11518_s5 + $0x560] sm:$0xff]  ;;  %v5065_v49 = vld [vmem:[%s11518_s5 + $0x430] sm:$0xff] }
 0x218   :  { %2381 = vmatpush.msrb.mxu1 %v5004_v47  ;;  %v5118_v54 = vld [vmem:[%s11518_s5 + $0x5d8] sm:$0xff]  ;;  %v5115_v47 = vld [vmem:[%s11518_s5 + $0x5c0] sm:$0xff]  ;;  %v5100_v35 = vld [vmem:[%s11518_s5 + $0x548] sm:$0xff] }
 0x219   :  { %v5099_v33 = vld [vmem:[%s11518_s5 + $0x540] sm:$0xff] }
 0x21a   :  { %2382 = vmatpush.msrb.mxu1 %v5002_v11  ;;  %v5113_v11 = vld [vmem:[%s11518_s5 + $0x5b0] sm:$0xff] }
 0x21c   :  { %v1864_v3 = vpop.f32.mrf.mxu2  ;;  %2383 = vmatpush.msrb.mxu1 %v5000_v2  ;;  %v5075_v2 = vld [vmem:[%s11518_s5 + $0x480] sm:$0xff] }
 0x21d   :  { %v1870_v13 = vadd.f32 %v1864_v3, %v8320_v37  ;;  %v5034_v37 = vld [vmem:[%s11518_s5 + $0x338] sm:$0xff]  ;;  %v5077_v3 = vld [vmem:[%s11518_s5 + $0x490] sm:$0xff] }
 0x21e   :  { %v1914_v51 = vpop.f32.mrf.mxu3  ;;  %2463 = vmatpush.msra.mxu3 %v5034_v37  ;;  %2384 = vmatpush.msrb.mxu1 %v4998_v20  ;;  %v5109_v37 = vld [vmem:[%s11518_s5 + $0x590] sm:$0xff]  ;;  %v5107_v20 = vld [vmem:[%s11518_s5 + $0x580] sm:$0xff] }
 0x21f   :  { %v8504_v22 = vadd.f32 %v1914_v51, %v1870_v13  ;;  %v5111_v13 = vld [vmem:[%s11518_s5 + $0x5a0] sm:$0xff]  ;;  %v5073_v51 = vld [vmem:[%s11518_s5 + $0x470] sm:$0xff] }
 0x220   :  { %2464 = vmatpush.msra.mxu3 %v5032_v42  ;;  %2385 = vmatpush.msrb.mxu1 %v4996_v40  ;;  %v5071_v42 = vld [vmem:[%s11518_s5 + $0x460] sm:$0xff]  ;;  %v5105_v40 = vld [vmem:[%s11518_s5 + $0x570] sm:$0xff] }
 0x222   :  { %2465 = vmatpush.msra.mxu3 %v5030_v0  ;;  %v5070_v0 = vld [vmem:[%s11518_s5 + $0x458] sm:$0xff] }
 0x224   :  { %2466 = vmatpush.msra.mxu3 %v5028_v29  ;;  %v5104_v29 = vld [vmem:[%s11518_s5 + $0x568] sm:$0xff] }
 0x232   :  { %v2055_v28 = vpop.f32.mrf.mxu2 }
 0x233   :  { %v2067_v36 = vadd.f32 %v2055_v28, %v2017_v62  ;;  %v5063_v28 = vld [vmem:[%s11518_s5 + $0x420] sm:$0xff]  ;;  %v5064_v62 = vld [vmem:[%s11518_s5 + $0x428] sm:$0xff] }
 0x239   :  { %v2105_v9 = vpop.f32.mrf.mxu3 }
 0x23a   :  { %v2117_v38 = vadd.f32 %v2105_v9, %v2067_v36  ;;  %v5097_v36 = vld [vmem:[%s11518_s5 + $0x530] sm:$0xff]  ;;  %v5098_v9 = vld [vmem:[%s11518_s5 + $0x538] sm:$0xff] }
 0x23c   :  { %v2145_v61 = vadd.f32 %v2128_v41, %v2117_v38  ;;  %v5061_v38 = vld [vmem:[%s11518_s5 + $0x410] sm:$0xff]  ;;  %v5062_v41 = vld [vmem:[%s11518_s5 + $0x418] sm:$0xff] }
 0x23e   :  { %v8533_v39 = vmax.f32 %v2145_v61, 0.0  ;;  %v5095_v61 = vld [vmem:[%s11518_s5 + $0x520] sm:$0xff] }
 0x240   :  { %2202 = vmatmul.f32.vlgmr.msra.gmra.mxu0 %v8533_v39  ;;  %2222 = vmatmul.f32.vlgmr.msra.gmra.mxu1 %v8533_v39  ;;  %v2267_v60 = vrot.slane %v8533_v39, 1  ;;  %v2348_v52 = vrot.slane %v8533_v39, 2  ;;  %v2429_v59 = vrot.slane %v8533_v39, 3 }
 0x241   :  { %2512 = vmatpush.msra.mxu0 %v5089_v4  ;;  %2532 = vmatpush.msra.mxu1 %v5090_v30  ;;  %v5096_v4 = vld [vmem:[%s11518_s5 + $0x528] sm:$0xff]  ;;  %v5059_v30 = vld [vmem:[%s11518_s5 + $0x400] sm:$0xff] }
 0x242   :  { %2285 = vmatmul.f32.vlgmr.msrb.gmra.mxu2 %v2267_v60  ;;  %2305 = vmatmul.f32.vlgmr.msrb.gmra.mxu3 %v2267_v60  ;;  %v5060_v60 = vld [vmem:[%s11518_s5 + $0x408] sm:$0xff] }
 0x243   :  { %2513 = vmatpush.msra.mxu0 %v5087_v14  ;;  %2533 = vmatpush.msra.mxu1 %v5088_v48  ;;  %v5093_v14 = vld [vmem:[%s11518_s5 + $0x510] sm:$0xff]  ;;  %v5094_v48 = vld [vmem:[%s11518_s5 + $0x518] sm:$0xff] }
 0x244   :  { %2593 = vmatpush.msrb.mxu2 %v5121_v24  ;;  %2613 = vmatpush.msrb.mxu3 %v5122_v46  ;;  %v2510_v24 = vrot.slane %v8533_v39, 4  ;;  %v5153_v46 = vld [vmem:[%s11518_s5 + $0x6f0] sm:$0xff] }
 0x245   :  { %2514 = vmatpush.msra.mxu0 %v5085_v45  ;;  %2534 = vmatpush.msra.mxu1 %v5086_v55  ;;  %v5154_v45 = vld [vmem:[%s11518_s5 + $0x6f8] sm:$0xff]  ;;  %v5091_v55 = vld [vmem:[%s11518_s5 + $0x500] sm:$0xff] }
 0x246   :  { %2594 = vmatpush.msrb.mxu2 %v5119_v7  ;;  %2614 = vmatpush.msrb.mxu3 %v5120_v27  ;;  %v5092_v7 = vld [vmem:[%s11518_s5 + $0x508] sm:$0xff]  ;;  %v2591_v27 = vrot.slane %v8533_v39, 5 }
 0x247   :  { %2515 = vmatpush.msra.mxu0 %v5083_v53  ;;  %2535 = vmatpush.msra.mxu1 %v5084_v25  ;;  %v5151_v53 = vld [vmem:[%s11518_s5 + $0x6e0] sm:$0xff]  ;;  %v5152_v25 = vld [vmem:[%s11518_s5 + $0x6e8] sm:$0xff] }
 0x248   :  { %2595 = vmatpush.msrb.mxu2 %v5117_v63  ;;  %2615 = vmatpush.msrb.mxu3 %v5118_v54  ;;  %v5185_v63 = vld [vmem:[%s11518_s5 + $0x7f0] sm:$0xff]  ;;  %v5186_v54 = vld [vmem:[%s11518_s5 + $0x7f8] sm:$0xff] }
 0x249   :  { %2366 = vmatmul.f32.vlgmr.msrb.gmra.mxu0 %v2348_v52  ;;  %2386 = vmatmul.f32.vlgmr.msrb.gmra.mxu1 %v2348_v52  ;;  %v5149_v52 = vld [vmem:[%s11518_s5 + $0x6d0] sm:$0xff] }
 0x24a   :  { %2516 = vmatpush.msra.mxu0 %v5081_v56  ;;  %2536 = vmatpush.msra.mxu1 %v5082_v58  ;;  %v5150_v56 = vld [vmem:[%s11518_s5 + $0x6d8] sm:$0xff]  ;;  %v5183_v58 = vld [vmem:[%s11518_s5 + $0x7e0] sm:$0xff] }
 0x24b   :  { %2596 = vmatpush.msrb.mxu2 %v5115_v47  ;;  %2616 = vmatpush.msrb.mxu3 %v5116_v18  ;;  %v5184_v47 = vld [vmem:[%s11518_s5 + $0x7e8] sm:$0xff]  ;;  %v5147_v18 = vld [vmem:[%s11518_s5 + $0x6c0] sm:$0xff] }
 0x24c   :  { %2447 = vmatmul.f32.vlgmr.msra.gmra.mxu2 %v2429_v59  ;;  %2467 = vmatmul.f32.vlgmr.msra.gmra.mxu3 %v2429_v59  ;;  %v5148_v59 = vld [vmem:[%s11518_s5 + $0x6c8] sm:$0xff] }
 0x24d   :  { %2517 = vmatpush.msra.mxu0 %v5079_v5  ;;  %2537 = vmatpush.msra.mxu1 %v5080_v6  ;;  %v5181_v5 = vld [vmem:[%s11518_s5 + $0x7d0] sm:$0xff]  ;;  %v5182_v6 = vld [vmem:[%s11518_s5 + $0x7d8] sm:$0xff] }
 0x24e   :  { %2597 = vmatpush.msrb.mxu2 %v5113_v11  ;;  %2617 = vmatpush.msrb.mxu3 %v5114_v15  ;;  %v5145_v11 = vld [vmem:[%s11518_s5 + $0x6b0] sm:$0xff]  ;;  %v5146_v15 = vld [vmem:[%s11518_s5 + $0x6b8] sm:$0xff] }
 0x24f   :  { %2518 = vmatpush.msra.mxu0 %v5077_v3  ;;  %2538 = vmatpush.msra.mxu1 %v5078_v50  ;;  %v5179_v3 = vld [vmem:[%s11518_s5 + $0x7c0] sm:$0xff]  ;;  %v5180_v50 = vld [vmem:[%s11518_s5 + $0x7c8] sm:$0xff] }
 0x250   :  { %2598 = vmatpush.msrb.mxu2 %v5111_v13  ;;  %2618 = vmatpush.msrb.mxu3 %v5112_v8  ;;  %v5143_v13 = vld [vmem:[%s11518_s5 + $0x6a0] sm:$0xff]  ;;  %v5144_v8 = vld [vmem:[%s11518_s5 + $0x6a8] sm:$0xff] }
 0x251   :  { %2519 = vmatpush.msra.mxu0 %v5075_v2  ;;  %2539 = vmatpush.msra.mxu1 %v5076_v16  ;;  %v5177_v2 = vld [vmem:[%s11518_s5 + $0x7b0] sm:$0xff]  ;;  %v5178_v16 = vld [vmem:[%s11518_s5 + $0x7b8] sm:$0xff] }
 0x252   :  { %2599 = vmatpush.msrb.mxu2 %v5109_v37  ;;  %2619 = vmatpush.msrb.mxu3 %v5110_v17  ;;  %v5141_v37 = vld [vmem:[%s11518_s5 + $0x690] sm:$0xff]  ;;  %v5142_v17 = vld [vmem:[%s11518_s5 + $0x698] sm:$0xff] }
 0x253   :  { %2520 = vmatpush.msra.mxu0 %v5073_v51  ;;  %2540 = vmatpush.msra.mxu1 %v5074_v19  ;;  %v5175_v51 = vld [vmem:[%s11518_s5 + $0x7a0] sm:$0xff]  ;;  %v5176_v19 = vld [vmem:[%s11518_s5 + $0x7a8] sm:$0xff] }
 0x254   :  { %2600 = vmatpush.msrb.mxu2 %v5107_v20  ;;  %2620 = vmatpush.msrb.mxu3 %v5108_v21  ;;  %v5139_v20 = vld [vmem:[%s11518_s5 + $0x680] sm:$0xff]  ;;  %v5140_v21 = vld [vmem:[%s11518_s5 + $0x688] sm:$0xff] }
 0x255   :  { %2521 = vmatpush.msra.mxu0 %v5071_v42  ;;  %2541 = vmatpush.msra.mxu1 %v5072_v26  ;;  %v5173_v42 = vld [vmem:[%s11518_s5 + $0x790] sm:$0xff]  ;;  %v5174_v26 = vld [vmem:[%s11518_s5 + $0x798] sm:$0xff] }
 0x256   :  { %2601 = vmatpush.msrb.mxu2 %v5105_v40  ;;  %2621 = vmatpush.msrb.mxu3 %v5106_v43  ;;  %v5137_v40 = vld [vmem:[%s11518_s5 + $0x670] sm:$0xff]  ;;  %v5138_v43 = vld [vmem:[%s11518_s5 + $0x678] sm:$0xff] }
 0x257   :  { %2522 = vmatpush.msra.mxu0 %v5069_v23  ;;  %2542 = vmatpush.msra.mxu1 %v5070_v0  ;;  %v5171_v23 = vld [vmem:[%s11518_s5 + $0x780] sm:$0xff]  ;;  %v5172_v0 = vld [vmem:[%s11518_s5 + $0x788] sm:$0xff] }
 0x258   :  { %2602 = vmatpush.msrb.mxu2 %v5103_v44  ;;  %2622 = vmatpush.msrb.mxu3 %v5104_v29  ;;  %v5135_v44 = vld [vmem:[%s11518_s5 + $0x660] sm:$0xff]  ;;  %v5136_v29 = vld [vmem:[%s11518_s5 + $0x668] sm:$0xff] }
 0x259   :  { %2523 = vmatpush.msra.mxu0 %v5067_v31  ;;  %2543 = vmatpush.msra.mxu1 %v5068_v1  ;;  %v5169_v31 = vld [vmem:[%s11518_s5 + $0x770] sm:$0xff]  ;;  %v5170_v1 = vld [vmem:[%s11518_s5 + $0x778] sm:$0xff] }
 0x25a   :  { %2603 = vmatpush.msrb.mxu2 %v5101_v10  ;;  %2623 = vmatpush.msrb.mxu3 %v5102_v12  ;;  %v5133_v10 = vld [vmem:[%s11518_s5 + $0x650] sm:$0xff]  ;;  %v5134_v12 = vld [vmem:[%s11518_s5 + $0x658] sm:$0xff] }
 0x25b   :  { %2524 = vmatpush.msra.mxu0 %v5065_v49  ;;  %2544 = vmatpush.msra.mxu1 %v5066_v32  ;;  %v5167_v49 = vld [vmem:[%s11518_s5 + $0x760] sm:$0xff]  ;;  %v5168_v32 = vld [vmem:[%s11518_s5 + $0x768] sm:$0xff] }
 0x25c   :  { %2604 = vmatpush.msrb.mxu2 %v5099_v33  ;;  %2624 = vmatpush.msrb.mxu3 %v5100_v35  ;;  %v5131_v33 = vld [vmem:[%s11518_s5 + $0x640] sm:$0xff]  ;;  %v5132_v35 = vld [vmem:[%s11518_s5 + $0x648] sm:$0xff] }
 0x25d   :  { %2525 = vmatpush.msra.mxu0 %v5063_v28  ;;  %2545 = vmatpush.msra.mxu1 %v5064_v62  ;;  %v5165_v28 = vld [vmem:[%s11518_s5 + $0x750] sm:$0xff]  ;;  %v5166_v62 = vld [vmem:[%s11518_s5 + $0x758] sm:$0xff] }
 0x25e   :  { %2605 = vmatpush.msrb.mxu2 %v5097_v36  ;;  %2625 = vmatpush.msrb.mxu3 %v5098_v9  ;;  %v5129_v36 = vld [vmem:[%s11518_s5 + $0x630] sm:$0xff]  ;;  %v5130_v9 = vld [vmem:[%s11518_s5 + $0x638] sm:$0xff] }
 0x25f   :  { %2526 = vmatpush.msra.mxu0 %v5061_v38  ;;  %2546 = vmatpush.msra.mxu1 %v5062_v41  ;;  %v5163_v38 = vld [vmem:[%s11518_s5 + $0x740] sm:$0xff]  ;;  %v5164_v41 = vld [vmem:[%s11518_s5 + $0x748] sm:$0xff] }
 0x260   :  { %2606 = vmatpush.msrb.mxu2 %v5095_v61  ;;  %2626 = vmatpush.msrb.mxu3 %v5096_v4  ;;  %v5127_v61 = vld [vmem:[%s11518_s5 + $0x620] sm:$0xff]  ;;  %v5128_v4 = vld [vmem:[%s11518_s5 + $0x628] sm:$0xff] }
 0x261   :  { %2527 = vmatpush.msra.mxu0 %v5059_v30  ;;  %2547 = vmatpush.msra.mxu1 %v5060_v60  ;;  %v5161_v30 = vld [vmem:[%s11518_s5 + $0x730] sm:$0xff]  ;;  %v5162_v60 = vld [vmem:[%s11518_s5 + $0x738] sm:$0xff] }
 0x262   :  { %2607 = vmatpush.msrb.mxu2 %v5093_v14  ;;  %2627 = vmatpush.msrb.mxu3 %v5094_v48  ;;  %v5125_v14 = vld [vmem:[%s11518_s5 + $0x610] sm:$0xff]  ;;  %v5126_v48 = vld [vmem:[%s11518_s5 + $0x618] sm:$0xff] }
 0x263   :  { %2528 = vmatmul.f32.vlgmr.msra.gmra.mxu0 %v2510_v24  ;;  %2548 = vmatmul.f32.vlgmr.msra.gmra.mxu1 %v2510_v24  ;;  %v5159_v24 = vld [vmem:[%s11518_s5 + $0x720] sm:$0xff] }
 0x264   :  { %2674 = vmatpush.msrb.mxu0 %v5153_v46  ;;  %2694 = vmatpush.msrb.mxu1 %v5154_v45  ;;  %v5160_v46 = vld [vmem:[%s11518_s5 + $0x728] sm:$0xff]  ;;  %v5123_v45 = vld [vmem:[%s11518_s5 + $0x600] sm:$0xff] }
 0x265   :  { %2608 = vmatpush.msrb.mxu2 %v5091_v55  ;;  %2628 = vmatpush.msrb.mxu3 %v5092_v7  ;;  %v5124_v55 = vld [vmem:[%s11518_s5 + $0x608] sm:$0xff]  ;;  %v5157_v7 = vld [vmem:[%s11518_s5 + $0x710] sm:$0xff] }
 0x266   :  { %2609 = vmatmul.f32.vlgmr.msrb.gmra.mxu2 %v2591_v27  ;;  %2629 = vmatmul.f32.vlgmr.msrb.gmra.mxu3 %v2591_v27  ;;  %v5158_v27 = vld [vmem:[%s11518_s5 + $0x718] sm:$0xff] }
 0x267   :  { %2675 = vmatpush.msrb.mxu0 %v5151_v53  ;;  %2695 = vmatpush.msrb.mxu1 %v5152_v25  ;;  %v2672_v53 = vrot.slane %v8533_v39, 6  ;;  %v5217_v25 = vld [vmem:[%s11518_s5 + $0x8f0] sm:$0xff] }
 0x268   :  { %2755 = vmatpush.msra.mxu2 %v5185_v63  ;;  %2775 = vmatpush.msra.mxu3 %v5186_v54  ;;  %v5218_v63 = vld [vmem:[%s11518_s5 + $0x8f8] sm:$0xff]  ;;  %v5155_v54 = vld [vmem:[%s11518_s5 + $0x700] sm:$0xff] }
 0x269   :  { %2676 = vmatpush.msrb.mxu0 %v5149_v52  ;;  %2696 = vmatpush.msrb.mxu1 %v5150_v56  ;;  %v5156_v52 = vld [vmem:[%s11518_s5 + $0x708] sm:$0xff]  ;;  %v2753_v56 = vrot.slane %v8533_v39, 7  ;;  %v5213_v39 = vld [vmem:[%s11518_s5 + $0x8d0] sm:$0xff] }
 0x26a   :  { %2756 = vmatpush.msra.mxu2 %v5183_v58  ;;  %2776 = vmatpush.msra.mxu3 %v5184_v47  ;;  %v5215_v58 = vld [vmem:[%s11518_s5 + $0x8e0] sm:$0xff]  ;;  %v5216_v47 = vld [vmem:[%s11518_s5 + $0x8e8] sm:$0xff] }
 0x26b   :  { %2677 = vmatpush.msrb.mxu0 %v5147_v18  ;;  %2697 = vmatpush.msrb.mxu1 %v5148_v59  ;;  %v5249_v18 = vld [vmem:[%s11518_s5 + $0x9f0] sm:$0xff]  ;;  %v5250_v59 = vld [vmem:[%s11518_s5 + $0x9f8] sm:$0xff] }
 0x26c   :  { %2757 = vmatpush.msra.mxu2 %v5181_v5  ;;  %2777 = vmatpush.msra.mxu3 %v5182_v6  ;;  %v5214_v5 = vld [vmem:[%s11518_s5 + $0x8d8] sm:$0xff]  ;;  %v5247_v6 = vld [vmem:[%s11518_s5 + $0x9e0] sm:$0xff] }
 0x26d   :  { %2678 = vmatpush.msrb.mxu0 %v5145_v11  ;;  %2698 = vmatpush.msrb.mxu1 %v5146_v15  ;;  %v5248_v11 = vld [vmem:[%s11518_s5 + $0x9e8] sm:$0xff]  ;;  %v5211_v15 = vld [vmem:[%s11518_s5 + $0x8c0] sm:$0xff] }
 0x26e   :  { %2758 = vmatpush.msra.mxu2 %v5179_v3  ;;  %2778 = vmatpush.msra.mxu3 %v5180_v50  ;;  %v5212_v3 = vld [vmem:[%s11518_s5 + $0x8c8] sm:$0xff]  ;;  %v5245_v50 = vld [vmem:[%s11518_s5 + $0x9d0] sm:$0xff] }
 0x26f   :  { %2679 = vmatpush.msrb.mxu0 %v5143_v13  ;;  %2699 = vmatpush.msrb.mxu1 %v5144_v8  ;;  %v5246_v13 = vld [vmem:[%s11518_s5 + $0x9d8] sm:$0xff]  ;;  %v5209_v8 = vld [vmem:[%s11518_s5 + $0x8b0] sm:$0xff] }
 0x270   :  { %2759 = vmatpush.msra.mxu2 %v5177_v2  ;;  %2779 = vmatpush.msra.mxu3 %v5178_v16  ;;  %v5210_v2 = vld [vmem:[%s11518_s5 + $0x8b8] sm:$0xff]  ;;  %v5243_v16 = vld [vmem:[%s11518_s5 + $0x9c0] sm:$0xff] }
 0x271   :  { %2680 = vmatpush.msrb.mxu0 %v5141_v37  ;;  %2700 = vmatpush.msrb.mxu1 %v5142_v17  ;;  %v5244_v37 = vld [vmem:[%s11518_s5 + $0x9c8] sm:$0xff]  ;;  %v5207_v17 = vld [vmem:[%s11518_s5 + $0x8a0] sm:$0xff] }
 0x272   :  { %2760 = vmatpush.msra.mxu2 %v5175_v51  ;;  %2780 = vmatpush.msra.mxu3 %v5176_v19  ;;  %v5208_v51 = vld [vmem:[%s11518_s5 + $0x8a8] sm:$0xff]  ;;  %v5241_v19 = vld [vmem:[%s11518_s5 + $0x9b0] sm:$0xff] }
 0x273   :  { %2681 = vmatpush.msrb.mxu0 %v5139_v20  ;;  %2701 = vmatpush.msrb.mxu1 %v5140_v21  ;;  %v5242_v20 = vld [vmem:[%s11518_s5 + $0x9b8] sm:$0xff]  ;;  %v5205_v21 = vld [vmem:[%s11518_s5 + $0x890] sm:$0xff] }
 0x274   :  { %2761 = vmatpush.msra.mxu2 %v5173_v42  ;;  %2781 = vmatpush.msra.mxu3 %v5174_v26  ;;  %v5206_v42 = vld [vmem:[%s11518_s5 + $0x898] sm:$0xff]  ;;  %v5239_v26 = vld [vmem:[%s11518_s5 + $0x9a0] sm:$0xff] }
 0x275   :  { %2682 = vmatpush.msrb.mxu0 %v5137_v40  ;;  %2702 = vmatpush.msrb.mxu1 %v5138_v43  ;;  %v5240_v40 = vld [vmem:[%s11518_s5 + $0x9a8] sm:$0xff]  ;;  %v5203_v43 = vld [vmem:[%s11518_s5 + $0x880] sm:$0xff] }
 0x276   :  { %2762 = vmatpush.msra.mxu2 %v5171_v23  ;;  %2782 = vmatpush.msra.mxu3 %v5172_v0  ;;  %v5204_v23 = vld [vmem:[%s11518_s5 + $0x888] sm:$0xff]  ;;  %v1958_v0 = vpop.f32.mrf.mxu0 }
 0x277   :  { %2683 = vmatpush.msrb.mxu0 %v5135_v44  ;;  %2703 = vmatpush.msrb.mxu1 %v5136_v29  ;;  %v5237_v44 = vld [vmem:[%s11518_s5 + $0x990] sm:$0xff]  ;;  %v5238_v29 = vld [vmem:[%s11518_s5 + $0x998] sm:$0xff] }
 0x278   :  { %2763 = vmatpush.msra.mxu2 %v5169_v31  ;;  %2783 = vmatpush.msra.mxu3 %v5170_v1  ;;  %v5201_v31 = vld [vmem:[%s11518_s5 + $0x870] sm:$0xff]  ;;  %v5202_v1 = vld [vmem:[%s11518_s5 + $0x878] sm:$0xff] }
 0x279   :  { %2684 = vmatpush.msrb.mxu0 %v5133_v10  ;;  %2704 = vmatpush.msrb.mxu1 %v5134_v12  ;;  %v2008_v10 = vpop.f32.mrf.mxu1  ;;  %v5235_v12 = vld [vmem:[%s11518_s5 + $0x980] sm:$0xff] }
 0x27a   :  { %2764 = vmatpush.msra.mxu2 %v5167_v49  ;;  %2784 = vmatpush.msra.mxu3 %v5168_v32  ;;  %v5236_v49 = vld [vmem:[%s11518_s5 + $0x988] sm:$0xff]  ;;  %v1968_v32 = vadd.f32 %v1958_v0, %v8401_v34  ;;  %v5234_v34 = vld [vmem:[%s11518_s5 + $0x978] sm:$0xff]  ;;  %v5273_v0 = vld [vmem:[%s11518_s5 + $0xab0] sm:$0xff] }
 0x27b   :  { %2685 = vmatpush.msrb.mxu0 %v5131_v33  ;;  %2705 = vmatpush.msrb.mxu1 %v5132_v35  ;;  %v5199_v33 = vld [vmem:[%s11518_s5 + $0x860] sm:$0xff]  ;;  %v5200_v35 = vld [vmem:[%s11518_s5 + $0x868] sm:$0xff] }
 0x27c   :  { %2765 = vmatpush.msra.mxu2 %v5165_v28  ;;  %2785 = vmatpush.msra.mxu3 %v5166_v62  ;;  %v2058_v28 = vpop.f32.mrf.mxu2  ;;  %v5233_v62 = vld [vmem:[%s11518_s5 + $0x970] sm:$0xff] }
 0x27d   :  { %2686 = vmatpush.msrb.mxu0 %v5129_v36  ;;  %2706 = vmatpush.msrb.mxu1 %v5130_v9  ;;  %v2018_v36 = vadd.f32 %v2008_v10, %v1968_v32  ;;  %v5197_v9 = vld [vmem:[%s11518_s5 + $0x850] sm:$0xff]  ;;  %v5272_v10 = vld [vmem:[%s11518_s5 + $0xaa8] sm:$0xff] }
 0x27e   :  { %2766 = vmatpush.msra.mxu2 %v5163_v38  ;;  %2786 = vmatpush.msra.mxu3 %v5164_v41  ;;  %v5198_v38 = vld [vmem:[%s11518_s5 + $0x858] sm:$0xff]  ;;  %v2108_v41 = vpop.f32.mrf.mxu3  ;;  %v5269_v32 = vld [vmem:[%s11518_s5 + $0xa90] sm:$0xff] }
 0x27f   :  { %2687 = vmatpush.msrb.mxu0 %v5127_v61  ;;  %2707 = vmatpush.msrb.mxu1 %v5128_v4  ;;  %v5231_v61 = vld [vmem:[%s11518_s5 + $0x960] sm:$0xff]  ;;  %v5232_v4 = vld [vmem:[%s11518_s5 + $0x968] sm:$0xff] }
 0x280   :  { %2767 = vmatpush.msra.mxu2 %v5161_v30  ;;  %2787 = vmatpush.msra.mxu3 %v5162_v60  ;;  %v2068_v30 = vadd.f32 %v2058_v28, %v2018_v36  ;;  %v5195_v60 = vld [vmem:[%s11518_s5 + $0x840] sm:$0xff]  ;;  %v5304_v28 = vld [vmem:[%s11518_s5 + $0xba8] sm:$0xff]  ;;  %v5301_v36 = vld [vmem:[%s11518_s5 + $0xb90] sm:$0xff] }
 0x281   :  { %2688 = vmatpush.msrb.mxu0 %v5125_v14  ;;  %2708 = vmatpush.msrb.mxu1 %v5126_v48  ;;  %v5196_v14 = vld [vmem:[%s11518_s5 + $0x848] sm:$0xff]  ;;  %v5229_v48 = vld [vmem:[%s11518_s5 + $0x950] sm:$0xff] }
 0x282   :  { %2768 = vmatpush.msra.mxu2 %v5159_v24  ;;  %2788 = vmatpush.msra.mxu3 %v5160_v46  ;;  %v5230_v24 = vld [vmem:[%s11518_s5 + $0x958] sm:$0xff]  ;;  %v2118_v46 = vadd.f32 %v2108_v41, %v2068_v30  ;;  %v5263_v30 = vld [vmem:[%s11518_s5 + $0xa60] sm:$0xff] }
 0x283   :  { %2689 = vmatpush.msrb.mxu0 %v5123_v45  ;;  %2709 = vmatpush.msrb.mxu1 %v5124_v55  ;;  %v5193_v45 = vld [vmem:[%s11518_s5 + $0x830] sm:$0xff]  ;;  %v5194_v55 = vld [vmem:[%s11518_s5 + $0x838] sm:$0xff] }
 0x284   :  { %2769 = vmatpush.msra.mxu2 %v5157_v7  ;;  %2789 = vmatpush.msra.mxu3 %v5158_v27  ;;  %v5227_v7 = vld [vmem:[%s11518_s5 + $0x940] sm:$0xff]  ;;  %v5228_v27 = vld [vmem:[%s11518_s5 + $0x948] sm:$0xff]  ;;  %v5266_v41 = vld [vmem:[%s11518_s5 + $0xa78] sm:$0xff] }
 0x285   :  { %2690 = vmatmul.f32.vlgmr.msrb.gmra.mxu0 %v2672_v53  ;;  %2710 = vmatmul.f32.vlgmr.msrb.gmra.mxu1 %v2672_v53  ;;  %v5191_v53 = vld [vmem:[%s11518_s5 + $0x820] sm:$0xff] }
 0x286   :  { %2834 = vmatpush.msra.mxu0 %v5217_v25  ;;  %2854 = vmatpush.msra.mxu1 %v5218_v63  ;;  %v5192_v25 = vld [vmem:[%s11518_s5 + $0x828] sm:$0xff]  ;;  %v2133_v63 = vpop.permute.xlu1 %2132 }
 0x287   :  { %2770 = vmatpush.msra.mxu2 %v5155_v54  ;;  %2790 = vmatpush.msra.mxu3 %v5156_v52  ;;  %v5225_v54 = vld [vmem:[%s11518_s5 + $0x930] sm:$0xff]  ;;  %v5226_v52 = vld [vmem:[%s11518_s5 + $0x938] sm:$0xff] }
 0x288   :  { %2771 = vmatmul.f32.vlgmr.msra.gmra.mxu2 %v2753_v56  ;;  %2791 = vmatmul.f32.vlgmr.msra.gmra.mxu3 %v2753_v56  ;;  %v2146_v56 = vadd.f32 %v2133_v63, %v2118_v46  ;;  %v5262_v46 = vld [vmem:[%s11518_s5 + $0xa58] sm:$0xff]  ;;  %v5257_v63 = vld [vmem:[%s11518_s5 + $0xa30] sm:$0xff] }
 0x289   :  { %2835 = vmatpush.msra.mxu0 %v5215_v58  ;;  %2855 = vmatpush.msra.mxu1 %v5216_v47  ;;  %v5189_v58 = vld [vmem:[%s11518_s5 + $0x810] sm:$0xff]  ;;  %v5190_v47 = vld [vmem:[%s11518_s5 + $0x818] sm:$0xff] }
 0x28a   :  { %2916 = vmatpush.msrb.mxu2 %v5249_v18  ;;  %2936 = vmatpush.msrb.mxu3 %v5250_v59  ;;  %v5223_v18 = vld [vmem:[%s11518_s5 + $0x920] sm:$0xff]  ;;  %v5224_v59 = vld [vmem:[%s11518_s5 + $0x928] sm:$0xff] }
 0x28b   :  { %2836 = vmatpush.msra.mxu0 %v5213_v39  ;;  %2856 = vmatpush.msra.mxu1 %v5214_v5  ;;  %v5187_v39 = vld [vmem:[%s11518_s5 + $0x800] sm:$0xff]  ;;  %v5188_v5 = vld [vmem:[%s11518_s5 + $0x808] sm:$0xff] }
 0x28c   :  { %2917 = vmatpush.msrb.mxu2 %v5247_v6  ;;  %2937 = vmatpush.msrb.mxu3 %v5248_v11  ;;  %v5221_v6 = vld [vmem:[%s11518_s5 + $0x910] sm:$0xff]  ;;  %v5222_v11 = vld [vmem:[%s11518_s5 + $0x918] sm:$0xff] }
 0x28d   :  { %2837 = vmatpush.msra.mxu0 %v5211_v15  ;;  %2857 = vmatpush.msra.mxu1 %v5212_v3  ;;  %v9115_v15 = vmax.f32 %v2146_v56, 0.0  ;;  %v5281_v3 = vld [vmem:[%s11518_s5 + $0xaf0] sm:$0xff]  ;;  %v5292_v56 = vld [vmem:[%s11518_s5 + $0xb48] sm:$0xff] }
 0x28e   :  { %2918 = vmatpush.msrb.mxu2 %v5245_v50  ;;  %2938 = vmatpush.msrb.mxu3 %v5246_v13  ;;  %v5282_v50 = vld [vmem:[%s11518_s5 + $0xaf8] sm:$0xff]  ;;  %v5219_v13 = vld [vmem:[%s11518_s5 + $0x900] sm:$0xff] }
 0x28f   :  { %2838 = vmatpush.msra.mxu0 %v5209_v8  ;;  %2858 = vmatpush.msra.mxu1 %v5210_v2  ;;  %v5220_v8 = vld [vmem:[%s11518_s5 + $0x908] sm:$0xff]  ;;  %v2914_v2 = vrot.slane %v9115_v15, 1 }
 0x290   :  { %2919 = vmatpush.msrb.mxu2 %v5243_v16  ;;  %2939 = vmatpush.msrb.mxu3 %v5244_v37  ;;  %v5279_v16 = vld [vmem:[%s11518_s5 + $0xae0] sm:$0xff]  ;;  %v5280_v37 = vld [vmem:[%s11518_s5 + $0xae8] sm:$0xff] }
 0x291   :  { %2839 = vmatpush.msra.mxu0 %v5207_v17  ;;  %2859 = vmatpush.msra.mxu1 %v5208_v51  ;;  %v5313_v17 = vld [vmem:[%s11518_s5 + $0xbf0] sm:$0xff]  ;;  %v5314_v51 = vld [vmem:[%s11518_s5 + $0xbf8] sm:$0xff] }
 0x292   :  { %2920 = vmatpush.msrb.mxu2 %v5241_v19  ;;  %2940 = vmatpush.msrb.mxu3 %v5242_v20  ;;  %v5277_v19 = vld [vmem:[%s11518_s5 + $0xad0] sm:$0xff]  ;;  %v5278_v20 = vld [vmem:[%s11518_s5 + $0xad8] sm:$0xff] }
 0x293   :  { %2840 = vmatpush.msra.mxu0 %v5205_v21  ;;  %2860 = vmatpush.msra.mxu1 %v5206_v42  ;;  %v5311_v21 = vld [vmem:[%s11518_s5 + $0xbe0] sm:$0xff]  ;;  %v5312_v42 = vld [vmem:[%s11518_s5 + $0xbe8] sm:$0xff] }
 0x294   :  { %2921 = vmatpush.msrb.mxu2 %v5239_v26  ;;  %2941 = vmatpush.msrb.mxu3 %v5240_v40  ;;  %v5275_v26 = vld [vmem:[%s11518_s5 + $0xac0] sm:$0xff]  ;;  %v5276_v40 = vld [vmem:[%s11518_s5 + $0xac8] sm:$0xff] }
 0x295   :  { %2841 = vmatpush.msra.mxu0 %v5203_v43  ;;  %2861 = vmatpush.msra.mxu1 %v5204_v23  ;;  %v5309_v43 = vld [vmem:[%s11518_s5 + $0xbd0] sm:$0xff]  ;;  %v5310_v23 = vld [vmem:[%s11518_s5 + $0xbd8] sm:$0xff] }
 0x296   :  { %2922 = vmatpush.msrb.mxu2 %v5237_v44  ;;  %2942 = vmatpush.msrb.mxu3 %v5238_v29  ;;  %v5274_v44 = vld [vmem:[%s11518_s5 + $0xab8] sm:$0xff]  ;;  %v5307_v29 = vld [vmem:[%s11518_s5 + $0xbc0] sm:$0xff] }
 0x297   :  { %2842 = vmatpush.msra.mxu0 %v5201_v31  ;;  %2862 = vmatpush.msra.mxu1 %v5202_v1  ;;  %v5308_v31 = vld [vmem:[%s11518_s5 + $0xbc8] sm:$0xff]  ;;  %v5271_v1 = vld [vmem:[%s11518_s5 + $0xaa0] sm:$0xff] }
 0x298   :  { %2923 = vmatpush.msrb.mxu2 %v5235_v12  ;;  %2943 = vmatpush.msrb.mxu3 %v5236_v49  ;;  %v5305_v12 = vld [vmem:[%s11518_s5 + $0xbb0] sm:$0xff]  ;;  %v5306_v49 = vld [vmem:[%s11518_s5 + $0xbb8] sm:$0xff] }
 0x299   :  { %2843 = vmatpush.msra.mxu0 %v5199_v33  ;;  %2863 = vmatpush.msra.mxu1 %v5200_v35  ;;  %v5270_v33 = vld [vmem:[%s11518_s5 + $0xa98] sm:$0xff]  ;;  %v5303_v35 = vld [vmem:[%s11518_s5 + $0xba0] sm:$0xff] }
 0x29a   :  { %2924 = vmatpush.msrb.mxu2 %v5233_v62  ;;  %2944 = vmatpush.msrb.mxu3 %v5234_v34  ;;  %v5267_v62 = vld [vmem:[%s11518_s5 + $0xa80] sm:$0xff]  ;;  %v5268_v34 = vld [vmem:[%s11518_s5 + $0xa88] sm:$0xff] }
 0x29b   :  { %2844 = vmatpush.msra.mxu0 %v5197_v9  ;;  %2864 = vmatpush.msra.mxu1 %v5198_v38  ;;  %v5302_v9 = vld [vmem:[%s11518_s5 + $0xb98] sm:$0xff]  ;;  %v5265_v38 = vld [vmem:[%s11518_s5 + $0xa70] sm:$0xff] }
 0x29c   :  { %2925 = vmatpush.msrb.mxu2 %v5231_v61  ;;  %2945 = vmatpush.msrb.mxu3 %v5232_v4  ;;  %v5299_v61 = vld [vmem:[%s11518_s5 + $0xb80] sm:$0xff]  ;;  %v5300_v4 = vld [vmem:[%s11518_s5 + $0xb88] sm:$0xff] }
 0x29d   :  { %2845 = vmatpush.msra.mxu0 %v5195_v60  ;;  %2865 = vmatpush.msra.mxu1 %v5196_v14  ;;  %v5264_v60 = vld [vmem:[%s11518_s5 + $0xa68] sm:$0xff]  ;;  %v5297_v14 = vld [vmem:[%s11518_s5 + $0xb70] sm:$0xff] }
 0x29e   :  { %2926 = vmatpush.msrb.mxu2 %v5229_v48  ;;  %2946 = vmatpush.msrb.mxu3 %v5230_v24  ;;  %v5298_v48 = vld [vmem:[%s11518_s5 + $0xb78] sm:$0xff]  ;;  %v5261_v24 = vld [vmem:[%s11518_s5 + $0xa50] sm:$0xff] }
 0x29f   :  { %2846 = vmatpush.msra.mxu0 %v5193_v45  ;;  %2866 = vmatpush.msra.mxu1 %v5194_v55  ;;  %v5295_v45 = vld [vmem:[%s11518_s5 + $0xb60] sm:$0xff]  ;;  %v5296_v55 = vld [vmem:[%s11518_s5 + $0xb68] sm:$0xff] }
 0x2a0   :  { %2927 = vmatpush.msrb.mxu2 %v5227_v7  ;;  %2947 = vmatpush.msrb.mxu3 %v5228_v27  ;;  %v5259_v7 = vld [vmem:[%s11518_s5 + $0xa40] sm:$0xff]  ;;  %v5260_v27 = vld [vmem:[%s11518_s5 + $0xa48] sm:$0xff] }
 0x2a1   :  { %2847 = vmatpush.msra.mxu0 %v5191_v53  ;;  %2867 = vmatpush.msra.mxu1 %v5192_v25  ;;  %v5293_v53 = vld [vmem:[%s11518_s5 + $0xb50] sm:$0xff]  ;;  %v5294_v25 = vld [vmem:[%s11518_s5 + $0xb58] sm:$0xff] }
 0x2a2   :  { %2928 = vmatpush.msrb.mxu2 %v5225_v54  ;;  %2948 = vmatpush.msrb.mxu3 %v5226_v52  ;;  %v5258_v54 = vld [vmem:[%s11518_s5 + $0xa38] sm:$0xff]  ;;  %v5291_v52 = vld [vmem:[%s11518_s5 + $0xb40] sm:$0xff] }
 0x2a3   :  { %2848 = vmatpush.msra.mxu0 %v5189_v58  ;;  %2868 = vmatpush.msra.mxu1 %v5190_v47  ;;  %v5255_v58 = vld [vmem:[%s11518_s5 + $0xa20] sm:$0xff]  ;;  %v5256_v47 = vld [vmem:[%s11518_s5 + $0xa28] sm:$0xff] }
 0x2a4   :  { %2929 = vmatpush.msrb.mxu2 %v5223_v18  ;;  %2949 = vmatpush.msrb.mxu3 %v5224_v59  ;;  %v5289_v18 = vld [vmem:[%s11518_s5 + $0xb30] sm:$0xff]  ;;  %v5290_v59 = vld [vmem:[%s11518_s5 + $0xb38] sm:$0xff] }
 0x2a5   :  { %2849 = vmatpush.msra.mxu0 %v5187_v39  ;;  %2869 = vmatpush.msra.mxu1 %v5188_v5  ;;  %v5253_v39 = vld [vmem:[%s11518_s5 + $0xa10] sm:$0xff]  ;;  %v5254_v5 = vld [vmem:[%s11518_s5 + $0xa18] sm:$0xff] }
 0x2a6   :  { %2930 = vmatpush.msrb.mxu2 %v5221_v6  ;;  %2950 = vmatpush.msrb.mxu3 %v5222_v11  ;;  %v5287_v6 = vld [vmem:[%s11518_s5 + $0xb20] sm:$0xff]  ;;  %v5288_v11 = vld [vmem:[%s11518_s5 + $0xb28] sm:$0xff] }
 0x2a7   :  { %2850 = vmatmul.f32.vlgmr.msra.gmra.mxu0 %v9115_v15  ;;  %2870 = vmatmul.f32.vlgmr.msra.gmra.mxu1 %v9115_v15 }
 0x2a8   :  { %2997 = vmatpush.msrb.mxu0 %v5281_v3  ;;  %3017 = vmatpush.msrb.mxu1 %v5282_v50  ;;  %v5251_v3 = vld [vmem:[%s11518_s5 + $0xa00] sm:$0xff]  ;;  %v5252_v50 = vld [vmem:[%s11518_s5 + $0xa08] sm:$0xff] }
 0x2a9   :  { %2931 = vmatpush.msrb.mxu2 %v5219_v13  ;;  %2951 = vmatpush.msrb.mxu3 %v5220_v8  ;;  %v5285_v13 = vld [vmem:[%s11518_s5 + $0xb10] sm:$0xff]  ;;  %v5286_v8 = vld [vmem:[%s11518_s5 + $0xb18] sm:$0xff] }
 0x2aa   :  { %2932 = vmatmul.f32.vlgmr.msrb.gmra.mxu2 %v2914_v2  ;;  %2952 = vmatmul.f32.vlgmr.msrb.gmra.mxu3 %v2914_v2  ;;  %v2995_v2 = vrot.slane %v9115_v15, 2 }
 0x2ab   :  { %2998 = vmatpush.msrb.mxu0 %v5279_v16  ;;  %3018 = vmatpush.msrb.mxu1 %v5280_v37  ;;  %v5345_v16 = vld [vmem:[%s11518_s5 + $0xcf0] sm:$0xff]  ;;  %v5346_v37 = vld [vmem:[%s11518_s5 + $0xcf8] sm:$0xff] }
 0x2ac   :  { %3078 = vmatpush.msra.mxu2 %v5313_v17  ;;  %3098 = vmatpush.msra.mxu3 %v5314_v51  ;;  %v5283_v17 = vld [vmem:[%s11518_s5 + $0xb00] sm:$0xff]  ;;  %v5284_v51 = vld [vmem:[%s11518_s5 + $0xb08] sm:$0xff] }
 0x2ad   :  { %2999 = vmatpush.msrb.mxu0 %v5277_v19  ;;  %3019 = vmatpush.msrb.mxu1 %v5278_v20  ;;  %v3076_v19 = vrot.slane %v9115_v15, 3  ;;  %v5343_v20 = vld [vmem:[%s11518_s5 + $0xce0] sm:$0xff] }
 0x2ae   :  { %3079 = vmatpush.msra.mxu2 %v5311_v21  ;;  %3099 = vmatpush.msra.mxu3 %v5312_v42  ;;  %v5344_v21 = vld [vmem:[%s11518_s5 + $0xce8] sm:$0xff]  ;;  %v5377_v42 = vld [vmem:[%s11518_s5 + $0xdf0] sm:$0xff] }
 0x2af   :  { %3000 = vmatpush.msrb.mxu0 %v5275_v26  ;;  %3020 = vmatpush.msrb.mxu1 %v5276_v40  ;;  %v5378_v26 = vld [vmem:[%s11518_s5 + $0xdf8] sm:$0xff]  ;;  %v5341_v40 = vld [vmem:[%s11518_s5 + $0xcd0] sm:$0xff] }
 0x2b0   :  { %3080 = vmatpush.msra.mxu2 %v5309_v43  ;;  %3100 = vmatpush.msra.mxu3 %v5310_v23  ;;  %v5342_v43 = vld [vmem:[%s11518_s5 + $0xcd8] sm:$0xff]  ;;  %v5375_v23 = vld [vmem:[%s11518_s5 + $0xde0] sm:$0xff] }
 0x2b1   :  { %3001 = vmatpush.msrb.mxu0 %v5273_v0  ;;  %3021 = vmatpush.msrb.mxu1 %v5274_v44  ;;  %v5376_v0 = vld [vmem:[%s11518_s5 + $0xde8] sm:$0xff]  ;;  %v5339_v44 = vld [vmem:[%s11518_s5 + $0xcc0] sm:$0xff] }
 0x2b2   :  { %3081 = vmatpush.msra.mxu2 %v5307_v29  ;;  %3101 = vmatpush.msra.mxu3 %v5308_v31  ;;  %v5340_v29 = vld [vmem:[%s11518_s5 + $0xcc8] sm:$0xff]  ;;  %v5373_v31 = vld [vmem:[%s11518_s5 + $0xdd0] sm:$0xff] }
 0x2b3   :  { %3002 = vmatpush.msrb.mxu0 %v5271_v1  ;;  %3022 = vmatpush.msrb.mxu1 %v5272_v10  ;;  %v5374_v1 = vld [vmem:[%s11518_s5 + $0xdd8] sm:$0xff]  ;;  %v5337_v10 = vld [vmem:[%s11518_s5 + $0xcb0] sm:$0xff] }
 0x2b4   :  { %3082 = vmatpush.msra.mxu2 %v5305_v12  ;;  %3102 = vmatpush.msra.mxu3 %v5306_v49  ;;  %v5338_v12 = vld [vmem:[%s11518_s5 + $0xcb8] sm:$0xff]  ;;  %v5371_v49 = vld [vmem:[%s11518_s5 + $0xdc0] sm:$0xff] }
 0x2b5   :  { %3003 = vmatpush.msrb.mxu0 %v5269_v32  ;;  %3023 = vmatpush.msrb.mxu1 %v5270_v33  ;;  %v5372_v32 = vld [vmem:[%s11518_s5 + $0xdc8] sm:$0xff]  ;;  %v5335_v33 = vld [vmem:[%s11518_s5 + $0xca0] sm:$0xff] }
 0x2b6   :  { %3083 = vmatpush.msra.mxu2 %v5303_v35  ;;  %3103 = vmatpush.msra.mxu3 %v5304_v28  ;;  %v5336_v35 = vld [vmem:[%s11518_s5 + $0xca8] sm:$0xff]  ;;  %v5369_v28 = vld [vmem:[%s11518_s5 + $0xdb0] sm:$0xff] }
 0x2b7   :  { %3004 = vmatpush.msrb.mxu0 %v5267_v62  ;;  %3024 = vmatpush.msrb.mxu1 %v5268_v34  ;;  %v5370_v62 = vld [vmem:[%s11518_s5 + $0xdb8] sm:$0xff]  ;;  %v5333_v34 = vld [vmem:[%s11518_s5 + $0xc90] sm:$0xff] }
 0x2b8   :  { %3084 = vmatpush.msra.mxu2 %v5301_v36  ;;  %3104 = vmatpush.msra.mxu3 %v5302_v9  ;;  %v5334_v36 = vld [vmem:[%s11518_s5 + $0xc98] sm:$0xff]  ;;  %v5367_v9 = vld [vmem:[%s11518_s5 + $0xda0] sm:$0xff] }
 0x2b9   :  { %3005 = vmatpush.msrb.mxu0 %v5265_v38  ;;  %3025 = vmatpush.msrb.mxu1 %v5266_v41  ;;  %v5368_v38 = vld [vmem:[%s11518_s5 + $0xda8] sm:$0xff]  ;;  %v5331_v41 = vld [vmem:[%s11518_s5 + $0xc80] sm:$0xff] }
 0x2ba   :  { %3085 = vmatpush.msra.mxu2 %v5299_v61  ;;  %3105 = vmatpush.msra.mxu3 %v5300_v4  ;;  %v5332_v61 = vld [vmem:[%s11518_s5 + $0xc88] sm:$0xff]  ;;  %v5365_v4 = vld [vmem:[%s11518_s5 + $0xd90] sm:$0xff] }
 0x2bb   :  { %3006 = vmatpush.msrb.mxu0 %v5263_v30  ;;  %3026 = vmatpush.msrb.mxu1 %v5264_v60  ;;  %v5366_v30 = vld [vmem:[%s11518_s5 + $0xd98] sm:$0xff]  ;;  %v5329_v60 = vld [vmem:[%s11518_s5 + $0xc70] sm:$0xff] }
 0x2bc   :  { %3086 = vmatpush.msra.mxu2 %v5297_v14  ;;  %3106 = vmatpush.msra.mxu3 %v5298_v48  ;;  %v5330_v14 = vld [vmem:[%s11518_s5 + $0xc78] sm:$0xff]  ;;  %v5363_v48 = vld [vmem:[%s11518_s5 + $0xd80] sm:$0xff] }
 0x2bd   :  { %3007 = vmatpush.msrb.mxu0 %v5261_v24  ;;  %3027 = vmatpush.msrb.mxu1 %v5262_v46  ;;  %v5364_v24 = vld [vmem:[%s11518_s5 + $0xd88] sm:$0xff]  ;;  %v5327_v46 = vld [vmem:[%s11518_s5 + $0xc60] sm:$0xff] }
 0x2be   :  { %3087 = vmatpush.msra.mxu2 %v5295_v45  ;;  %3107 = vmatpush.msra.mxu3 %v5296_v55  ;;  %v5328_v45 = vld [vmem:[%s11518_s5 + $0xc68] sm:$0xff]  ;;  %v5361_v55 = vld [vmem:[%s11518_s5 + $0xd70] sm:$0xff] }
 0x2bf   :  { %3008 = vmatpush.msrb.mxu0 %v5259_v7  ;;  %3028 = vmatpush.msrb.mxu1 %v5260_v27  ;;  %v5362_v7 = vld [vmem:[%s11518_s5 + $0xd78] sm:$0xff]  ;;  %v5325_v27 = vld [vmem:[%s11518_s5 + $0xc50] sm:$0xff] }
 0x2c0   :  { %3088 = vmatpush.msra.mxu2 %v5293_v53  ;;  %3108 = vmatpush.msra.mxu3 %v5294_v25  ;;  %v5326_v53 = vld [vmem:[%s11518_s5 + $0xc58] sm:$0xff]  ;;  %v5359_v25 = vld [vmem:[%s11518_s5 + $0xd60] sm:$0xff] }
 0x2c1   :  { %3009 = vmatpush.msrb.mxu0 %v5257_v63  ;;  %3029 = vmatpush.msrb.mxu1 %v5258_v54  ;;  %v5360_v63 = vld [vmem:[%s11518_s5 + $0xd68] sm:$0xff]  ;;  %v5323_v54 = vld [vmem:[%s11518_s5 + $0xc40] sm:$0xff] }
 0x2c2   :  { %3089 = vmatpush.msra.mxu2 %v5291_v52  ;;  %3109 = vmatpush.msra.mxu3 %v5292_v56  ;;  %v5324_v52 = vld [vmem:[%s11518_s5 + $0xc48] sm:$0xff]  ;;  %v5357_v56 = vld [vmem:[%s11518_s5 + $0xd50] sm:$0xff] }
 0x2c3   :  { %3010 = vmatpush.msrb.mxu0 %v5255_v58  ;;  %3030 = vmatpush.msrb.mxu1 %v5256_v47  ;;  %v5358_v58 = vld [vmem:[%s11518_s5 + $0xd58] sm:$0xff]  ;;  %v5321_v47 = vld [vmem:[%s11518_s5 + $0xc30] sm:$0xff] }
 0x2c4   :  { %3090 = vmatpush.msra.mxu2 %v5289_v18  ;;  %3110 = vmatpush.msra.mxu3 %v5290_v59  ;;  %v5322_v18 = vld [vmem:[%s11518_s5 + $0xc38] sm:$0xff]  ;;  %v5355_v59 = vld [vmem:[%s11518_s5 + $0xd40] sm:$0xff] }
 0x2c5   :  { %3011 = vmatpush.msrb.mxu0 %v5253_v39  ;;  %3031 = vmatpush.msrb.mxu1 %v5254_v5  ;;  %v5356_v39 = vld [vmem:[%s11518_s5 + $0xd48] sm:$0xff]  ;;  %v5319_v5 = vld [vmem:[%s11518_s5 + $0xc20] sm:$0xff] }
 0x2c6   :  { %3091 = vmatpush.msra.mxu2 %v5287_v6  ;;  %3111 = vmatpush.msra.mxu3 %v5288_v11  ;;  %v5320_v6 = vld [vmem:[%s11518_s5 + $0xc28] sm:$0xff]  ;;  %v5353_v11 = vld [vmem:[%s11518_s5 + $0xd30] sm:$0xff] }
 0x2c7   :  { %3012 = vmatpush.msrb.mxu0 %v5251_v3  ;;  %3032 = vmatpush.msrb.mxu1 %v5252_v50  ;;  %v5354_v3 = vld [vmem:[%s11518_s5 + $0xd38] sm:$0xff]  ;;  %v5317_v50 = vld [vmem:[%s11518_s5 + $0xc10] sm:$0xff] }
 0x2c8   :  { %3092 = vmatpush.msra.mxu2 %v5285_v13  ;;  %3112 = vmatpush.msra.mxu3 %v5286_v8  ;;  %v5318_v13 = vld [vmem:[%s11518_s5 + $0xc18] sm:$0xff]  ;;  %v5351_v8 = vld [vmem:[%s11518_s5 + $0xd20] sm:$0xff] }
 0x2c9   :  { %3013 = vmatmul.f32.vlgmr.msrb.gmra.mxu0 %v2995_v2  ;;  %3033 = vmatmul.f32.vlgmr.msrb.gmra.mxu1 %v2995_v2  ;;  %v5352_v2 = vld [vmem:[%s11518_s5 + $0xd28] sm:$0xff] }
 0x2ca   :  { %3159 = vmatpush.msra.mxu0 %v5345_v16  ;;  %3179 = vmatpush.msra.mxu1 %v5346_v37  ;;  %v5315_v16 = vld [vmem:[%s11518_s5 + $0xc00] sm:$0xff]  ;;  %v5316_v37 = vld [vmem:[%s11518_s5 + $0xc08] sm:$0xff] }
 0x2cb   :  { %3093 = vmatpush.msra.mxu2 %v5283_v17  ;;  %3113 = vmatpush.msra.mxu3 %v5284_v51  ;;  %v5349_v17 = vld [vmem:[%s11518_s5 + $0xd10] sm:$0xff]  ;;  %v5350_v51 = vld [vmem:[%s11518_s5 + $0xd18] sm:$0xff] }
 0x2cc   :  { %3094 = vmatmul.f32.vlgmr.msra.gmra.mxu2 %v3076_v19  ;;  %3114 = vmatmul.f32.vlgmr.msra.gmra.mxu3 %v3076_v19  ;;  %v3157_v19 = vrot.slane %v9115_v15, 4 }
 0x2cd   :  { %3160 = vmatpush.msra.mxu0 %v5343_v20  ;;  %3180 = vmatpush.msra.mxu1 %v5344_v21  ;;  %v5409_v20 = vld [vmem:[%s11518_s5 + $0xef0] sm:$0xff]  ;;  %v5410_v21 = vld [vmem:[%s11518_s5 + $0xef8] sm:$0xff] }
 0x2ce   :  { %3240 = vmatpush.msrb.mxu2 %v5377_v42  ;;  %3260 = vmatpush.msrb.mxu3 %v5378_v26  ;;  %v5347_v42 = vld [vmem:[%s11518_s5 + $0xd00] sm:$0xff]  ;;  %v5348_v26 = vld [vmem:[%s11518_s5 + $0xd08] sm:$0xff] }
 0x2cf   :  { %3161 = vmatpush.msra.mxu0 %v5341_v40  ;;  %3181 = vmatpush.msra.mxu1 %v5342_v43  ;;  %v3238_v40 = vrot.slane %v9115_v15, 5  ;;  %v5407_v43 = vld [vmem:[%s11518_s5 + $0xee0] sm:$0xff] }
 0x2d0   :  { %3241 = vmatpush.msrb.mxu2 %v5375_v23  ;;  %3261 = vmatpush.msrb.mxu3 %v5376_v0  ;;  %v5408_v23 = vld [vmem:[%s11518_s5 + $0xee8] sm:$0xff]  ;;  %v5441_v0 = vld [vmem:[%s11518_s5 + $0xff0] sm:$0xff] }
 0x2d1   :  { %3162 = vmatpush.msra.mxu0 %v5339_v44  ;;  %3182 = vmatpush.msra.mxu1 %v5340_v29  ;;  %v5442_v44 = vld [vmem:[%s11518_s5 + $0xff8] sm:$0xff]  ;;  %v5405_v29 = vld [vmem:[%s11518_s5 + $0xed0] sm:$0xff] }
 0x2d2   :  { %3242 = vmatpush.msrb.mxu2 %v5373_v31  ;;  %3262 = vmatpush.msrb.mxu3 %v5374_v1  ;;  %v5406_v31 = vld [vmem:[%s11518_s5 + $0xed8] sm:$0xff]  ;;  %v5439_v1 = vld [vmem:[%s11518_s5 + $0xfe0] sm:$0xff] }
 0x2d3   :  { %3163 = vmatpush.msra.mxu0 %v5337_v10  ;;  %3183 = vmatpush.msra.mxu1 %v5338_v12  ;;  %v5440_v10 = vld [vmem:[%s11518_s5 + $0xfe8] sm:$0xff]  ;;  %v5403_v12 = vld [vmem:[%s11518_s5 + $0xec0] sm:$0xff] }
 0x2d4   :  { %3243 = vmatpush.msrb.mxu2 %v5371_v49  ;;  %3263 = vmatpush.msrb.mxu3 %v5372_v32  ;;  %v5404_v49 = vld [vmem:[%s11518_s5 + $0xec8] sm:$0xff]  ;;  %v5437_v32 = vld [vmem:[%s11518_s5 + $0xfd0] sm:$0xff] }
 0x2d5   :  { %3164 = vmatpush.msra.mxu0 %v5335_v33  ;;  %3184 = vmatpush.msra.mxu1 %v5336_v35  ;;  %v5438_v33 = vld [vmem:[%s11518_s5 + $0xfd8] sm:$0xff]  ;;  %v5401_v35 = vld [vmem:[%s11518_s5 + $0xeb0] sm:$0xff] }
 0x2d6   :  { %3244 = vmatpush.msrb.mxu2 %v5369_v28  ;;  %3264 = vmatpush.msrb.mxu3 %v5370_v62  ;;  %v5402_v28 = vld [vmem:[%s11518_s5 + $0xeb8] sm:$0xff]  ;;  %v5435_v62 = vld [vmem:[%s11518_s5 + $0xfc0] sm:$0xff] }
 0x2d7   :  { %3165 = vmatpush.msra.mxu0 %v5333_v34  ;;  %3185 = vmatpush.msra.mxu1 %v5334_v36  ;;  %v5436_v34 = vld [vmem:[%s11518_s5 + $0xfc8] sm:$0xff]  ;;  %v5399_v36 = vld [vmem:[%s11518_s5 + $0xea0] sm:$0xff] }
 0x2d8   :  { %3245 = vmatpush.msrb.mxu2 %v5367_v9  ;;  %3265 = vmatpush.msrb.mxu3 %v5368_v38  ;;  %v5400_v9 = vld [vmem:[%s11518_s5 + $0xea8] sm:$0xff]  ;;  %v5433_v38 = vld [vmem:[%s11518_s5 + $0xfb0] sm:$0xff] }
 0x2d9   :  { %3166 = vmatpush.msra.mxu0 %v5331_v41  ;;  %3186 = vmatpush.msra.mxu1 %v5332_v61  ;;  %v5434_v41 = vld [vmem:[%s11518_s5 + $0xfb8] sm:$0xff]  ;;  %v5397_v61 = vld [vmem:[%s11518_s5 + $0xe90] sm:$0xff] }
 0x2da   :  { %3246 = vmatpush.msrb.mxu2 %v5365_v4  ;;  %3266 = vmatpush.msrb.mxu3 %v5366_v30  ;;  %v5398_v4 = vld [vmem:[%s11518_s5 + $0xe98] sm:$0xff]  ;;  %v5431_v30 = vld [vmem:[%s11518_s5 + $0xfa0] sm:$0xff] }
 0x2db   :  { %3167 = vmatpush.msra.mxu0 %v5329_v60  ;;  %3187 = vmatpush.msra.mxu1 %v5330_v14  ;;  %v5432_v60 = vld [vmem:[%s11518_s5 + $0xfa8] sm:$0xff]  ;;  %v5395_v14 = vld [vmem:[%s11518_s5 + $0xe80] sm:$0xff] }
 0x2dc   :  { %3247 = vmatpush.msrb.mxu2 %v5363_v48  ;;  %3267 = vmatpush.msrb.mxu3 %v5364_v24  ;;  %v5396_v48 = vld [vmem:[%s11518_s5 + $0xe88] sm:$0xff]  ;;  %v5429_v24 = vld [vmem:[%s11518_s5 + $0xf90] sm:$0xff] }
 0x2dd   :  { %3168 = vmatpush.msra.mxu0 %v5327_v46  ;;  %3188 = vmatpush.msra.mxu1 %v5328_v45  ;;  %v5430_v46 = vld [vmem:[%s11518_s5 + $0xf98] sm:$0xff]  ;;  %v5393_v45 = vld [vmem:[%s11518_s5 + $0xe70] sm:$0xff] }
 0x2de   :  { %3248 = vmatpush.msrb.mxu2 %v5361_v55  ;;  %3268 = vmatpush.msrb.mxu3 %v5362_v7  ;;  %v5394_v55 = vld [vmem:[%s11518_s5 + $0xe78] sm:$0xff]  ;;  %v5427_v7 = vld [vmem:[%s11518_s5 + $0xf80] sm:$0xff] }
 0x2df   :  { %3169 = vmatpush.msra.mxu0 %v5325_v27  ;;  %3189 = vmatpush.msra.mxu1 %v5326_v53  ;;  %v5428_v27 = vld [vmem:[%s11518_s5 + $0xf88] sm:$0xff]  ;;  %v5391_v53 = vld [vmem:[%s11518_s5 + $0xe60] sm:$0xff] }
 0x2e0   :  { %3249 = vmatpush.msrb.mxu2 %v5359_v25  ;;  %3269 = vmatpush.msrb.mxu3 %v5360_v63  ;;  %v5392_v25 = vld [vmem:[%s11518_s5 + $0xe68] sm:$0xff]  ;;  %v5425_v63 = vld [vmem:[%s11518_s5 + $0xf70] sm:$0xff] }
 0x2e1   :  { %3170 = vmatpush.msra.mxu0 %v5323_v54  ;;  %3190 = vmatpush.msra.mxu1 %v5324_v52  ;;  %v5426_v54 = vld [vmem:[%s11518_s5 + $0xf78] sm:$0xff]  ;;  %v5389_v52 = vld [vmem:[%s11518_s5 + $0xe50] sm:$0xff] }
 0x2e2   :  { %3250 = vmatpush.msrb.mxu2 %v5357_v56  ;;  %3270 = vmatpush.msrb.mxu3 %v5358_v58  ;;  %v5390_v56 = vld [vmem:[%s11518_s5 + $0xe58] sm:$0xff]  ;;  %v5423_v58 = vld [vmem:[%s11518_s5 + $0xf60] sm:$0xff] }
 0x2e3   :  { %3171 = vmatpush.msra.mxu0 %v5321_v47  ;;  %3191 = vmatpush.msra.mxu1 %v5322_v18  ;;  %v5424_v47 = vld [vmem:[%s11518_s5 + $0xf68] sm:$0xff]  ;;  %v5387_v18 = vld [vmem:[%s11518_s5 + $0xe40] sm:$0xff] }
 0x2e4   :  { %3251 = vmatpush.msrb.mxu2 %v5355_v59  ;;  %3271 = vmatpush.msrb.mxu3 %v5356_v39  ;;  %v5388_v59 = vld [vmem:[%s11518_s5 + $0xe48] sm:$0xff]  ;;  %v5421_v39 = vld [vmem:[%s11518_s5 + $0xf50] sm:$0xff] }
 0x2e5   :  { %3172 = vmatpush.msra.mxu0 %v5319_v5  ;;  %3192 = vmatpush.msra.mxu1 %v5320_v6  ;;  %v5422_v5 = vld [vmem:[%s11518_s5 + $0xf58] sm:$0xff]  ;;  %v5385_v6 = vld [vmem:[%s11518_s5 + $0xe30] sm:$0xff] }
 0x2e6   :  { %3252 = vmatpush.msrb.mxu2 %v5353_v11  ;;  %3272 = vmatpush.msrb.mxu3 %v5354_v3  ;;  %v5386_v11 = vld [vmem:[%s11518_s5 + $0xe38] sm:$0xff]  ;;  %v5419_v3 = vld [vmem:[%s11518_s5 + $0xf40] sm:$0xff] }
 0x2e7   :  { %3173 = vmatpush.msra.mxu0 %v5317_v50  ;;  %3193 = vmatpush.msra.mxu1 %v5318_v13  ;;  %v5420_v50 = vld [vmem:[%s11518_s5 + $0xf48] sm:$0xff]  ;;  %v5383_v13 = vld [vmem:[%s11518_s5 + $0xe20] sm:$0xff] }
 0x2e8   :  { %3253 = vmatpush.msrb.mxu2 %v5351_v8  ;;  %3273 = vmatpush.msrb.mxu3 %v5352_v2  ;;  %v5384_v8 = vld [vmem:[%s11518_s5 + $0xe28] sm:$0xff]  ;;  %v5417_v2 = vld [vmem:[%s11518_s5 + $0xf30] sm:$0xff] }
 0x2e9   :  { %3174 = vmatpush.msra.mxu0 %v5315_v16  ;;  %3194 = vmatpush.msra.mxu1 %v5316_v37  ;;  %v5418_v16 = vld [vmem:[%s11518_s5 + $0xf38] sm:$0xff]  ;;  %v5381_v37 = vld [vmem:[%s11518_s5 + $0xe10] sm:$0xff] }
 0x2ea   :  { %3254 = vmatpush.msrb.mxu2 %v5349_v17  ;;  %3274 = vmatpush.msrb.mxu3 %v5350_v51  ;;  %v5382_v17 = vld [vmem:[%s11518_s5 + $0xe18] sm:$0xff]  ;;  %v5415_v51 = vld [vmem:[%s11518_s5 + $0xf20] sm:$0xff] }
 0x2eb   :  { %3175 = vmatmul.f32.vlgmr.msra.gmra.mxu0 %v3157_v19  ;;  %3195 = vmatmul.f32.vlgmr.msra.gmra.mxu1 %v3157_v19  ;;  %v5416_v19 = vld [vmem:[%s11518_s5 + $0xf28] sm:$0xff] }
 0x2ec   :  { %3321 = vmatpush.msrb.mxu0 %v5409_v20  ;;  %3341 = vmatpush.msrb.mxu1 %v5410_v21  ;;  %v5379_v20 = vld [vmem:[%s11518_s5 + $0xe00] sm:$0xff]  ;;  %v5380_v21 = vld [vmem:[%s11518_s5 + $0xe08] sm:$0xff] }
 0x2ed   :  { %3255 = vmatpush.msrb.mxu2 %v5347_v42  ;;  %3275 = vmatpush.msrb.mxu3 %v5348_v26  ;;  %v5413_v42 = vld [vmem:[%s11518_s5 + $0xf10] sm:$0xff]  ;;  %v5414_v26 = vld [vmem:[%s11518_s5 + $0xf18] sm:$0xff] }
 0x2ee   :  { %3256 = vmatmul.f32.vlgmr.msrb.gmra.mxu2 %v3238_v40  ;;  %3276 = vmatmul.f32.vlgmr.msrb.gmra.mxu3 %v3238_v40  ;;  %v3319_v40 = vrot.slane %v9115_v15, 6 }
 0x2ef   :  { %3322 = vmatpush.msrb.mxu0 %v5407_v43  ;;  %3342 = vmatpush.msrb.mxu1 %v5408_v23  ;;  %v5473_v43 = vld [vmem:[%s11518_s5 + $0x10f0] sm:$0xff]  ;;  %v5474_v23 = vld [vmem:[%s11518_s5 + $0x10f8] sm:$0xff] }
 0x2f0   :  { %3402 = vmatpush.msra.mxu2 %v5441_v0  ;;  %3422 = vmatpush.msra.mxu3 %v5442_v44  ;;  %v5411_v0 = vld [vmem:[%s11518_s5 + $0xf00] sm:$0xff]  ;;  %v5412_v44 = vld [vmem:[%s11518_s5 + $0xf08] sm:$0xff] }
 0x2f1   :  { %3323 = vmatpush.msrb.mxu0 %v5405_v29  ;;  %3343 = vmatpush.msrb.mxu1 %v5406_v31  ;;  %v3400_v29 = vrot.slane %v9115_v15, 7  ;;  %v5471_v31 = vld [vmem:[%s11518_s5 + $0x10e0] sm:$0xff]  ;;  %v5469_v15 = vld [vmem:[%s11518_s5 + $0x10d0] sm:$0xff] }
 0x2f2   :  { %3403 = vmatpush.msra.mxu2 %v5439_v1  ;;  %3423 = vmatpush.msra.mxu3 %v5440_v10  ;;  %v5472_v1 = vld [vmem:[%s11518_s5 + $0x10e8] sm:$0xff]  ;;  %v5505_v10 = vld [vmem:[%s11518_s5 + $0x11f0] sm:$0xff] }
 0x2f3   :  { %3324 = vmatpush.msrb.mxu0 %v5403_v12  ;;  %3344 = vmatpush.msrb.mxu1 %v5404_v49  ;;  %v5506_v12 = vld [vmem:[%s11518_s5 + $0x11f8] sm:$0xff] }
 0x2f4   :  { %3404 = vmatpush.msra.mxu2 %v5437_v32  ;;  %3424 = vmatpush.msra.mxu3 %v5438_v33  ;;  %v5470_v49 = vld [vmem:[%s11518_s5 + $0x10d8] sm:$0xff]  ;;  %v5503_v32 = vld [vmem:[%s11518_s5 + $0x11e0] sm:$0xff]  ;;  %v5504_v33 = vld [vmem:[%s11518_s5 + $0x11e8] sm:$0xff] }
 0x2f5   :  { %3325 = vmatpush.msrb.mxu0 %v5401_v35  ;;  %3345 = vmatpush.msrb.mxu1 %v5402_v28  ;;  %v5467_v35 = vld [vmem:[%s11518_s5 + $0x10c0] sm:$0xff]  ;;  %v5468_v28 = vld [vmem:[%s11518_s5 + $0x10c8] sm:$0xff] }
 0x2f6   :  { %3405 = vmatpush.msra.mxu2 %v5435_v62  ;;  %3425 = vmatpush.msra.mxu3 %v5436_v34  ;;  %v5501_v62 = vld [vmem:[%s11518_s5 + $0x11d0] sm:$0xff]  ;;  %v5502_v34 = vld [vmem:[%s11518_s5 + $0x11d8] sm:$0xff] }
 0x2f7   :  { %3326 = vmatpush.msrb.mxu0 %v5399_v36  ;;  %3346 = vmatpush.msrb.mxu1 %v5400_v9  ;;  %v5465_v36 = vld [vmem:[%s11518_s5 + $0x10b0] sm:$0xff]  ;;  %v5466_v9 = vld [vmem:[%s11518_s5 + $0x10b8] sm:$0xff] }
 0x2f8   :  { %3406 = vmatpush.msra.mxu2 %v5433_v38  ;;  %3426 = vmatpush.msra.mxu3 %v5434_v41  ;;  %v5499_v38 = vld [vmem:[%s11518_s5 + $0x11c0] sm:$0xff]  ;;  %v5500_v41 = vld [vmem:[%s11518_s5 + $0x11c8] sm:$0xff] }
 0x2f9   :  { %3327 = vmatpush.msrb.mxu0 %v5397_v61  ;;  %3347 = vmatpush.msrb.mxu1 %v5398_v4  ;;  %v5463_v61 = vld [vmem:[%s11518_s5 + $0x10a0] sm:$0xff]  ;;  %v5464_v4 = vld [vmem:[%s11518_s5 + $0x10a8] sm:$0xff] }
 0x2fa   :  { %3407 = vmatpush.msra.mxu2 %v5431_v30  ;;  %3427 = vmatpush.msra.mxu3 %v5432_v60  ;;  %v5497_v30 = vld [vmem:[%s11518_s5 + $0x11b0] sm:$0xff]  ;;  %v5498_v60 = vld [vmem:[%s11518_s5 + $0x11b8] sm:$0xff] }
 0x2fb   :  { %3328 = vmatpush.msrb.mxu0 %v5395_v14  ;;  %3348 = vmatpush.msrb.mxu1 %v5396_v48  ;;  %v5461_v14 = vld [vmem:[%s11518_s5 + $0x1090] sm:$0xff]  ;;  %v5462_v48 = vld [vmem:[%s11518_s5 + $0x1098] sm:$0xff] }
 0x2fc   :  { %3408 = vmatpush.msra.mxu2 %v5429_v24  ;;  %3428 = vmatpush.msra.mxu3 %v5430_v46  ;;  %v5495_v24 = vld [vmem:[%s11518_s5 + $0x11a0] sm:$0xff]  ;;  %v5496_v46 = vld [vmem:[%s11518_s5 + $0x11a8] sm:$0xff] }
 0x2fd   :  { %3329 = vmatpush.msrb.mxu0 %v5393_v45  ;;  %3349 = vmatpush.msrb.mxu1 %v5394_v55  ;;  %v5459_v45 = vld [vmem:[%s11518_s5 + $0x1080] sm:$0xff]  ;;  %v5460_v55 = vld [vmem:[%s11518_s5 + $0x1088] sm:$0xff] }
 0x2fe   :  { %3409 = vmatpush.msra.mxu2 %v5427_v7  ;;  %3429 = vmatpush.msra.mxu3 %v5428_v27  ;;  %v1961_v7 = vpop.f32.mrf.mxu0  ;;  %v5493_v27 = vld [vmem:[%s11518_s5 + $0x1190] sm:$0xff] }
 0x2ff   :  { %3330 = vmatpush.msrb.mxu0 %v5391_v53  ;;  %3350 = vmatpush.msrb.mxu1 %v5392_v25  ;;  %v5494_v53 = vld [vmem:[%s11518_s5 + $0x1198] sm:$0xff]  ;;  %v5457_v25 = vld [vmem:[%s11518_s5 + $0x1070] sm:$0xff] }
 0x300   :  { %3410 = vmatpush.msra.mxu2 %v5425_v63  ;;  %3430 = vmatpush.msra.mxu3 %v5426_v54  ;;  %v5458_v63 = vld [vmem:[%s11518_s5 + $0x1078] sm:$0xff]  ;;  %v2011_v54 = vpop.f32.mrf.mxu1 }
 0x301   :  { %3331 = vmatpush.msrb.mxu0 %v5389_v52  ;;  %3351 = vmatpush.msrb.mxu1 %v5390_v56  ;;  %v5491_v52 = vld [vmem:[%s11518_s5 + $0x1180] sm:$0xff]  ;;  %v5492_v56 = vld [vmem:[%s11518_s5 + $0x1188] sm:$0xff] }
 0x302   :  { %3411 = vmatpush.msra.mxu2 %v5423_v58  ;;  %3431 = vmatpush.msra.mxu3 %v5424_v47  ;;  %v1969_v58 = vadd.f32 %v1961_v7, %v8454_v57  ;;  %v5455_v47 = vld [vmem:[%s11518_s5 + $0x1060] sm:$0xff]  ;;  %v5490_v57 = vld [vmem:[%s11518_s5 + $0x1178] sm:$0xff] }
 0x303   :  { %3332 = vmatpush.msrb.mxu0 %v5387_v18  ;;  %3352 = vmatpush.msrb.mxu1 %v5388_v59  ;;  %v5456_v18 = vld [vmem:[%s11518_s5 + $0x1068] sm:$0xff]  ;;  %v2061_v59 = vpop.f32.mrf.mxu2  ;;  %v5530_v7 = vld [vmem:[%s11518_s5 + $0x12b8] sm:$0xff] }
 0x304   :  { %3412 = vmatpush.msra.mxu2 %v5421_v39  ;;  %3432 = vmatpush.msra.mxu3 %v5422_v5  ;;  %v5489_v39 = vld [vmem:[%s11518_s5 + $0x1170] sm:$0xff]  ;;  %v2019_v5 = vadd.f32 %v2011_v54, %v1969_v58  ;;  %v5526_v58 = vld [vmem:[%s11518_s5 + $0x1298] sm:$0xff] }
 0x305   :  { %3333 = vmatpush.msrb.mxu0 %v5385_v6  ;;  %3353 = vmatpush.msrb.mxu1 %v5386_v11  ;;  %v5453_v6 = vld [vmem:[%s11518_s5 + $0x1050] sm:$0xff]  ;;  %v5454_v11 = vld [vmem:[%s11518_s5 + $0x1058] sm:$0xff] }
 0x306   :  { %3413 = vmatpush.msra.mxu2 %v5419_v3  ;;  %3433 = vmatpush.msra.mxu3 %v5420_v50  ;;  %v2111_v3 = vpop.f32.mrf.mxu3  ;;  %v5487_v50 = vld [vmem:[%s11518_s5 + $0x1160] sm:$0xff]  ;;  %v5561_v54 = vld [vmem:[%s11518_s5 + $0x13b0] sm:$0xff] }
 0x307   :  { %3334 = vmatpush.msrb.mxu0 %v5383_v13  ;;  %3354 = vmatpush.msrb.mxu1 %v5384_v8  ;;  %v5488_v13 = vld [vmem:[%s11518_s5 + $0x1168] sm:$0xff]  ;;  %v2069_v8 = vadd.f32 %v2061_v59, %v2019_v5  ;;  %v5523_v59 = vld [vmem:[%s11518_s5 + $0x1280] sm:$0xff]  ;;  %v5558_v5 = vld [vmem:[%s11518_s5 + $0x1398] sm:$0xff] }
 0x308   :  { %3414 = vmatpush.msra.mxu2 %v5417_v2  ;;  %3434 = vmatpush.msra.mxu3 %v5418_v16  ;;  %v5451_v2 = vld [vmem:[%s11518_s5 + $0x1040] sm:$0xff]  ;;  %v5452_v16 = vld [vmem:[%s11518_s5 + $0x1048] sm:$0xff] }
 0x309   :  { %3335 = vmatpush.msrb.mxu0 %v5381_v37  ;;  %3355 = vmatpush.msrb.mxu1 %v5382_v17  ;;  %v5485_v37 = vld [vmem:[%s11518_s5 + $0x1150] sm:$0xff]  ;;  %v5486_v17 = vld [vmem:[%s11518_s5 + $0x1158] sm:$0xff] }
 0x30a   :  { %3415 = vmatpush.msra.mxu2 %v5415_v51  ;;  %3435 = vmatpush.msra.mxu3 %v5416_v19  ;;  %v2119_v51 = vadd.f32 %v2111_v3, %v2069_v8  ;;  %v5449_v19 = vld [vmem:[%s11518_s5 + $0x1030] sm:$0xff]  ;;  %v5555_v3 = vld [vmem:[%s11518_s5 + $0x1380] sm:$0xff]  ;;  %v5520_v8 = vld [vmem:[%s11518_s5 + $0x1268] sm:$0xff] }
 0x30b   :  { %3336 = vmatpush.msrb.mxu0 %v5379_v20  ;;  %3356 = vmatpush.msrb.mxu1 %v5380_v21  ;;  %v5450_v20 = vld [vmem:[%s11518_s5 + $0x1038] sm:$0xff]  ;;  %v2138_v21 = vpop.permute.xlu2 %2137 }
 0x30c   :  { %3416 = vmatpush.msra.mxu2 %v5413_v42  ;;  %3436 = vmatpush.msra.mxu3 %v5414_v26  ;;  %v5483_v42 = vld [vmem:[%s11518_s5 + $0x1140] sm:$0xff]  ;;  %v5484_v26 = vld [vmem:[%s11518_s5 + $0x1148] sm:$0xff] }
 0x30d   :  { %3337 = vmatmul.f32.vlgmr.msrb.gmra.mxu0 %v3319_v40  ;;  %3357 = vmatmul.f32.vlgmr.msrb.gmra.mxu1 %v3319_v40  ;;  %v5447_v40 = vld [vmem:[%s11518_s5 + $0x1020] sm:$0xff] }
 0x30e   :  { %3481 = vmatpush.msra.mxu0 %v5473_v43  ;;  %3501 = vmatpush.msra.mxu1 %v5474_v23  ;;  %v5448_v43 = vld [vmem:[%s11518_s5 + $0x1028] sm:$0xff]  ;;  %v5481_v23 = vld [vmem:[%s11518_s5 + $0x1130] sm:$0xff] }
 0x30f   :  { %3417 = vmatpush.msra.mxu2 %v5411_v0  ;;  %3437 = vmatpush.msra.mxu3 %v5412_v44  ;;  %v5482_v0 = vld [vmem:[%s11518_s5 + $0x1138] sm:$0xff]  ;;  %v2147_v44 = vadd.f32 %v2138_v21, %v2119_v51  ;;  %v5551_v51 = vld [vmem:[%s11518_s5 + $0x1360] sm:$0xff]  ;;  %v5516_v21 = vld [vmem:[%s11518_s5 + $0x1248] sm:$0xff] }
 0x310   :  { %3418 = vmatmul.f32.vlgmr.msra.gmra.mxu2 %v3400_v29  ;;  %3438 = vmatmul.f32.vlgmr.msra.gmra.mxu3 %v3400_v29  ;;  %v5445_v29 = vld [vmem:[%s11518_s5 + $0x1010] sm:$0xff] }
 0x311   :  { %3482 = vmatpush.msra.mxu0 %v5471_v31  ;;  %3502 = vmatpush.msra.mxu1 %v5472_v1  ;;  %v5446_v31 = vld [vmem:[%s11518_s5 + $0x1018] sm:$0xff]  ;;  %v5479_v1 = vld [vmem:[%s11518_s5 + $0x1120] sm:$0xff] }
 0x312   :  { %3563 = vmatpush.msrb.mxu2 %v5505_v10  ;;  %3583 = vmatpush.msrb.mxu3 %v5506_v12  ;;  %v5480_v10 = vld [vmem:[%s11518_s5 + $0x1128] sm:$0xff]  ;;  %v5443_v12 = vld [vmem:[%s11518_s5 + $0x1000] sm:$0xff] }
 0x313   :  { %3483 = vmatpush.msra.mxu0 %v5469_v15  ;;  %3503 = vmatpush.msra.mxu1 %v5470_v49  ;;  %v5444_v15 = vld [vmem:[%s11518_s5 + $0x1008] sm:$0xff]  ;;  %v5477_v49 = vld [vmem:[%s11518_s5 + $0x1110] sm:$0xff] }
 0x314   :  { %3564 = vmatpush.msrb.mxu2 %v5503_v32  ;;  %3584 = vmatpush.msrb.mxu3 %v5504_v33  ;;  %v5478_v32 = vld [vmem:[%s11518_s5 + $0x1118] sm:$0xff]  ;;  %v9895_v33 = vmax.f32 %v2147_v44, 0.0  ;;  %v5511_v44 = vld [vmem:[%s11518_s5 + $0x1220] sm:$0xff] }
 0x315   :  { %3484 = vmatpush.msra.mxu0 %v5467_v35  ;;  %3504 = vmatpush.msra.mxu1 %v5468_v28  ;;  %v5537_v35 = vld [vmem:[%s11518_s5 + $0x12f0] sm:$0xff]  ;;  %v5538_v28 = vld [vmem:[%s11518_s5 + $0x12f8] sm:$0xff] }
 0x316   :  { %3565 = vmatpush.msrb.mxu2 %v5501_v62  ;;  %3585 = vmatpush.msrb.mxu3 %v5502_v34  ;;  %v5475_v62 = vld [vmem:[%s11518_s5 + $0x1100] sm:$0xff]  ;;  %v5476_v34 = vld [vmem:[%s11518_s5 + $0x1108] sm:$0xff] }
 0x317   :  { %3485 = vmatpush.msra.mxu0 %v5465_v36  ;;  %3505 = vmatpush.msra.mxu1 %v5466_v9  ;;  %v3561_v36 = vrot.slane %v9895_v33, 1  ;;  %v5535_v9 = vld [vmem:[%s11518_s5 + $0x12e0] sm:$0xff] }
 0x318   :  { %3566 = vmatpush.msrb.mxu2 %v5499_v38  ;;  %3586 = vmatpush.msrb.mxu3 %v5500_v41  ;;  %v5536_v38 = vld [vmem:[%s11518_s5 + $0x12e8] sm:$0xff]  ;;  %v5569_v41 = vld [vmem:[%s11518_s5 + $0x13f0] sm:$0xff] }
 0x319   :  { %3486 = vmatpush.msra.mxu0 %v5463_v61  ;;  %3506 = vmatpush.msra.mxu1 %v5464_v4  ;;  %v5570_v61 = vld [vmem:[%s11518_s5 + $0x13f8] sm:$0xff]  ;;  %v5533_v4 = vld [vmem:[%s11518_s5 + $0x12d0] sm:$0xff] }
 0x31a   :  { %3567 = vmatpush.msrb.mxu2 %v5497_v30  ;;  %3587 = vmatpush.msrb.mxu3 %v5498_v60  ;;  %v5534_v30 = vld [vmem:[%s11518_s5 + $0x12d8] sm:$0xff]  ;;  %v5567_v60 = vld [vmem:[%s11518_s5 + $0x13e0] sm:$0xff] }
 0x31b   :  { %3487 = vmatpush.msra.mxu0 %v5461_v14  ;;  %3507 = vmatpush.msra.mxu1 %v5462_v48  ;;  %v5568_v14 = vld [vmem:[%s11518_s5 + $0x13e8] sm:$0xff]  ;;  %v5531_v48 = vld [vmem:[%s11518_s5 + $0x12c0] sm:$0xff] }
 0x31c   :  { %3568 = vmatpush.msrb.mxu2 %v5495_v24  ;;  %3588 = vmatpush.msrb.mxu3 %v5496_v46  ;;  %v5532_v24 = vld [vmem:[%s11518_s5 + $0x12c8] sm:$0xff]  ;;  %v5565_v46 = vld [vmem:[%s11518_s5 + $0x13d0] sm:$0xff] }
 0x31d   :  { %3488 = vmatpush.msra.mxu0 %v5459_v45  ;;  %3508 = vmatpush.msra.mxu1 %v5460_v55  ;;  %v5566_v45 = vld [vmem:[%s11518_s5 + $0x13d8] sm:$0xff]  ;;  %v5529_v55 = vld [vmem:[%s11518_s5 + $0x12b0] sm:$0xff] }
 0x31e   :  { %3569 = vmatpush.msrb.mxu2 %v5493_v27  ;;  %3589 = vmatpush.msrb.mxu3 %v5494_v53  ;;  %v5563_v27 = vld [vmem:[%s11518_s5 + $0x13c0] sm:$0xff]  ;;  %v5564_v53 = vld [vmem:[%s11518_s5 + $0x13c8] sm:$0xff] }
 0x31f   :  { %3489 = vmatpush.msra.mxu0 %v5457_v25  ;;  %3509 = vmatpush.msra.mxu1 %v5458_v63  ;;  %v5527_v25 = vld [vmem:[%s11518_s5 + $0x12a0] sm:$0xff]  ;;  %v5528_v63 = vld [vmem:[%s11518_s5 + $0x12a8] sm:$0xff] }
 0x320   :  { %3570 = vmatpush.msrb.mxu2 %v5491_v52  ;;  %3590 = vmatpush.msrb.mxu3 %v5492_v56  ;;  %v5562_v52 = vld [vmem:[%s11518_s5 + $0x13b8] sm:$0xff]  ;;  %v5525_v56 = vld [vmem:[%s11518_s5 + $0x1290] sm:$0xff] }
 0x321   :  { %3490 = vmatpush.msra.mxu0 %v5455_v47  ;;  %3510 = vmatpush.msra.mxu1 %v5456_v18  ;;  %v5559_v47 = vld [vmem:[%s11518_s5 + $0x13a0] sm:$0xff]  ;;  %v5560_v18 = vld [vmem:[%s11518_s5 + $0x13a8] sm:$0xff] }
 0x322   :  { %3571 = vmatpush.msrb.mxu2 %v5489_v39  ;;  %3591 = vmatpush.msrb.mxu3 %v5490_v57  ;;  %v5524_v39 = vld [vmem:[%s11518_s5 + $0x1288] sm:$0xff]  ;;  %v5557_v57 = vld [vmem:[%s11518_s5 + $0x1390] sm:$0xff] }
 0x323   :  { %3491 = vmatpush.msra.mxu0 %v5453_v6  ;;  %3511 = vmatpush.msra.mxu1 %v5454_v11  ;;  %v5521_v6 = vld [vmem:[%s11518_s5 + $0x1270] sm:$0xff]  ;;  %v5522_v11 = vld [vmem:[%s11518_s5 + $0x1278] sm:$0xff] }
 0x324   :  { %3572 = vmatpush.msrb.mxu2 %v5487_v50  ;;  %3592 = vmatpush.msrb.mxu3 %v5488_v13  ;;  %v5556_v50 = vld [vmem:[%s11518_s5 + $0x1388] sm:$0xff]  ;;  %v5519_v13 = vld [vmem:[%s11518_s5 + $0x1260] sm:$0xff] }
 0x325   :  { %3492 = vmatpush.msra.mxu0 %v5451_v2  ;;  %3512 = vmatpush.msra.mxu1 %v5452_v16  ;;  %v5553_v2 = vld [vmem:[%s11518_s5 + $0x1370] sm:$0xff]  ;;  %v5554_v16 = vld [vmem:[%s11518_s5 + $0x1378] sm:$0xff] }
 0x326   :  { %3573 = vmatpush.msrb.mxu2 %v5485_v37  ;;  %3593 = vmatpush.msrb.mxu3 %v5486_v17  ;;  %v5517_v37 = vld [vmem:[%s11518_s5 + $0x1250] sm:$0xff]  ;;  %v5518_v17 = vld [vmem:[%s11518_s5 + $0x1258] sm:$0xff] }
 0x327   :  { %3493 = vmatpush.msra.mxu0 %v5449_v19  ;;  %3513 = vmatpush.msra.mxu1 %v5450_v20  ;;  %v5552_v19 = vld [vmem:[%s11518_s5 + $0x1368] sm:$0xff]  ;;  %v5515_v20 = vld [vmem:[%s11518_s5 + $0x1240] sm:$0xff] }
 0x328   :  { %3574 = vmatpush.msrb.mxu2 %v5483_v42  ;;  %3594 = vmatpush.msrb.mxu3 %v5484_v26  ;;  %v5549_v42 = vld [vmem:[%s11518_s5 + $0x1350] sm:$0xff]  ;;  %v5550_v26 = vld [vmem:[%s11518_s5 + $0x1358] sm:$0xff] }
 0x329   :  { %3494 = vmatpush.msra.mxu0 %v5447_v40  ;;  %3514 = vmatpush.msra.mxu1 %v5448_v43  ;;  %v5513_v40 = vld [vmem:[%s11518_s5 + $0x1230] sm:$0xff]  ;;  %v5514_v43 = vld [vmem:[%s11518_s5 + $0x1238] sm:$0xff] }
 0x32a   :  { %3575 = vmatpush.msrb.mxu2 %v5481_v23  ;;  %3595 = vmatpush.msrb.mxu3 %v5482_v0  ;;  %v5547_v23 = vld [vmem:[%s11518_s5 + $0x1340] sm:$0xff]  ;;  %v5548_v0 = vld [vmem:[%s11518_s5 + $0x1348] sm:$0xff] }
 0x32b   :  { %3495 = vmatpush.msra.mxu0 %v5445_v29  ;;  %3515 = vmatpush.msra.mxu1 %v5446_v31  ;;  %v5512_v29 = vld [vmem:[%s11518_s5 + $0x1228] sm:$0xff]  ;;  %v5545_v31 = vld [vmem:[%s11518_s5 + $0x1330] sm:$0xff] }
 0x32c   :  { %3576 = vmatpush.msrb.mxu2 %v5479_v1  ;;  %3596 = vmatpush.msrb.mxu3 %v5480_v10  ;;  %v5546_v1 = vld [vmem:[%s11518_s5 + $0x1338] sm:$0xff]  ;;  %v5509_v10 = vld [vmem:[%s11518_s5 + $0x1210] sm:$0xff] }
 0x32d   :  { %3496 = vmatpush.msra.mxu0 %v5443_v12  ;;  %3516 = vmatpush.msra.mxu1 %v5444_v15  ;;  %v5510_v12 = vld [vmem:[%s11518_s5 + $0x1218] sm:$0xff]  ;;  %v5543_v15 = vld [vmem:[%s11518_s5 + $0x1320] sm:$0xff] }
 0x32e   :  { %3577 = vmatpush.msrb.mxu2 %v5477_v49  ;;  %3597 = vmatpush.msrb.mxu3 %v5478_v32  ;;  %v5544_v49 = vld [vmem:[%s11518_s5 + $0x1328] sm:$0xff]  ;;  %v5507_v32 = vld [vmem:[%s11518_s5 + $0x1200] sm:$0xff] }
 0x32f   :  { %3497 = vmatmul.f32.vlgmr.msra.gmra.mxu0 %v9895_v33  ;;  %3517 = vmatmul.f32.vlgmr.msra.gmra.mxu1 %v9895_v33 }
 0x330   :  { %3644 = vmatpush.msrb.mxu0 %v5537_v35  ;;  %3664 = vmatpush.msrb.mxu1 %v5538_v28  ;;  %v5508_v35 = vld [vmem:[%s11518_s5 + $0x1208] sm:$0xff]  ;;  %v5541_v28 = vld [vmem:[%s11518_s5 + $0x1310] sm:$0xff] }
 0x331   :  { %3578 = vmatpush.msrb.mxu2 %v5475_v62  ;;  %3598 = vmatpush.msrb.mxu3 %v5476_v34  ;;  %v5542_v62 = vld [vmem:[%s11518_s5 + $0x1318] sm:$0xff]  ;;  %v3642_v34 = vrot.slane %v9895_v33, 2 }
 0x332   :  { %3579 = vmatmul.f32.vlgmr.msrb.gmra.mxu2 %v3561_v36  ;;  %3599 = vmatmul.f32.vlgmr.msrb.gmra.mxu3 %v3561_v36  ;;  %v5601_v36 = vld [vmem:[%s11518_s5 + $0x14f0] sm:$0xff] }
 0x333   :  { %3645 = vmatpush.msrb.mxu0 %v5535_v9  ;;  %3665 = vmatpush.msrb.mxu1 %v5536_v38  ;;  %v5602_v9 = vld [vmem:[%s11518_s5 + $0x14f8] sm:$0xff]  ;;  %v5539_v38 = vld [vmem:[%s11518_s5 + $0x1300] sm:$0xff] }
 0x334   :  { %3725 = vmatpush.msra.mxu2 %v5569_v41  ;;  %3745 = vmatpush.msra.mxu3 %v5570_v61  ;;  %v5540_v41 = vld [vmem:[%s11518_s5 + $0x1308] sm:$0xff]  ;;  %v3723_v61 = vrot.slane %v9895_v33, 3 }
 0x335   :  { %3646 = vmatpush.msrb.mxu0 %v5533_v4  ;;  %3666 = vmatpush.msrb.mxu1 %v5534_v30  ;;  %v5599_v4 = vld [vmem:[%s11518_s5 + $0x14e0] sm:$0xff]  ;;  %v5600_v30 = vld [vmem:[%s11518_s5 + $0x14e8] sm:$0xff] }
 0x336   :  { %3726 = vmatpush.msra.mxu2 %v5567_v60  ;;  %3746 = vmatpush.msra.mxu3 %v5568_v14  ;;  %v5633_v60 = vld [vmem:[%s11518_s5 + $0x15f0] sm:$0xff]  ;;  %v5634_v14 = vld [vmem:[%s11518_s5 + $0x15f8] sm:$0xff] }
 0x337   :  { %3647 = vmatpush.msrb.mxu0 %v5531_v48  ;;  %3667 = vmatpush.msrb.mxu1 %v5532_v24  ;;  %v5597_v48 = vld [vmem:[%s11518_s5 + $0x14d0] sm:$0xff]  ;;  %v5598_v24 = vld [vmem:[%s11518_s5 + $0x14d8] sm:$0xff] }
 0x338   :  { %3727 = vmatpush.msra.mxu2 %v5565_v46  ;;  %3747 = vmatpush.msra.mxu3 %v5566_v45  ;;  %v5631_v46 = vld [vmem:[%s11518_s5 + $0x15e0] sm:$0xff]  ;;  %v5632_v45 = vld [vmem:[%s11518_s5 + $0x15e8] sm:$0xff] }
 0x339   :  { %3648 = vmatpush.msrb.mxu0 %v5529_v55  ;;  %3668 = vmatpush.msrb.mxu1 %v5530_v7  ;;  %v5595_v55 = vld [vmem:[%s11518_s5 + $0x14c0] sm:$0xff]  ;;  %v5596_v7 = vld [vmem:[%s11518_s5 + $0x14c8] sm:$0xff] }
 0x33a   :  { %3728 = vmatpush.msra.mxu2 %v5563_v27  ;;  %3748 = vmatpush.msra.mxu3 %v5564_v53  ;;  %v5629_v27 = vld [vmem:[%s11518_s5 + $0x15d0] sm:$0xff]  ;;  %v5630_v53 = vld [vmem:[%s11518_s5 + $0x15d8] sm:$0xff] }
 0x33b   :  { %3649 = vmatpush.msrb.mxu0 %v5527_v25  ;;  %3669 = vmatpush.msrb.mxu1 %v5528_v63  ;;  %v5593_v25 = vld [vmem:[%s11518_s5 + $0x14b0] sm:$0xff]  ;;  %v5594_v63 = vld [vmem:[%s11518_s5 + $0x14b8] sm:$0xff] }
 0x33c   :  { %3729 = vmatpush.msra.mxu2 %v5561_v54  ;;  %3749 = vmatpush.msra.mxu3 %v5562_v52  ;;  %v5627_v54 = vld [vmem:[%s11518_s5 + $0x15c0] sm:$0xff]  ;;  %v5628_v52 = vld [vmem:[%s11518_s5 + $0x15c8] sm:$0xff] }
 0x33d   :  { %3650 = vmatpush.msrb.mxu0 %v5525_v56  ;;  %3670 = vmatpush.msrb.mxu1 %v5526_v58  ;;  %v5591_v56 = vld [vmem:[%s11518_s5 + $0x14a0] sm:$0xff]  ;;  %v5592_v58 = vld [vmem:[%s11518_s5 + $0x14a8] sm:$0xff] }
 0x33e   :  { %3730 = vmatpush.msra.mxu2 %v5559_v47  ;;  %3750 = vmatpush.msra.mxu3 %v5560_v18  ;;  %v5625_v47 = vld [vmem:[%s11518_s5 + $0x15b0] sm:$0xff]  ;;  %v5626_v18 = vld [vmem:[%s11518_s5 + $0x15b8] sm:$0xff] }
 0x33f   :  { %3651 = vmatpush.msrb.mxu0 %v5523_v59  ;;  %3671 = vmatpush.msrb.mxu1 %v5524_v39  ;;  %v5589_v59 = vld [vmem:[%s11518_s5 + $0x1490] sm:$0xff]  ;;  %v5590_v39 = vld [vmem:[%s11518_s5 + $0x1498] sm:$0xff] }
 0x340   :  { %3731 = vmatpush.msra.mxu2 %v5557_v57  ;;  %3751 = vmatpush.msra.mxu3 %v5558_v5  ;;  %v5623_v57 = vld [vmem:[%s11518_s5 + $0x15a0] sm:$0xff]  ;;  %v5624_v5 = vld [vmem:[%s11518_s5 + $0x15a8] sm:$0xff] }
 0x341   :  { %3652 = vmatpush.msrb.mxu0 %v5521_v6  ;;  %3672 = vmatpush.msrb.mxu1 %v5522_v11  ;;  %v5587_v6 = vld [vmem:[%s11518_s5 + $0x1480] sm:$0xff]  ;;  %v5588_v11 = vld [vmem:[%s11518_s5 + $0x1488] sm:$0xff] }
 0x342   :  { %3732 = vmatpush.msra.mxu2 %v5555_v3  ;;  %3752 = vmatpush.msra.mxu3 %v5556_v50  ;;  %v5621_v3 = vld [vmem:[%s11518_s5 + $0x1590] sm:$0xff]  ;;  %v5622_v50 = vld [vmem:[%s11518_s5 + $0x1598] sm:$0xff] }
 0x343   :  { %3653 = vmatpush.msrb.mxu0 %v5519_v13  ;;  %3673 = vmatpush.msrb.mxu1 %v5520_v8  ;;  %v5585_v13 = vld [vmem:[%s11518_s5 + $0x1470] sm:$0xff]  ;;  %v5586_v8 = vld [vmem:[%s11518_s5 + $0x1478] sm:$0xff] }
 0x344   :  { %3733 = vmatpush.msra.mxu2 %v5553_v2  ;;  %3753 = vmatpush.msra.mxu3 %v5554_v16  ;;  %v5619_v2 = vld [vmem:[%s11518_s5 + $0x1580] sm:$0xff]  ;;  %v5620_v16 = vld [vmem:[%s11518_s5 + $0x1588] sm:$0xff] }
 0x345   :  { %3654 = vmatpush.msrb.mxu0 %v5517_v37  ;;  %3674 = vmatpush.msrb.mxu1 %v5518_v17  ;;  %v5583_v37 = vld [vmem:[%s11518_s5 + $0x1460] sm:$0xff]  ;;  %v5584_v17 = vld [vmem:[%s11518_s5 + $0x1468] sm:$0xff] }
 0x346   :  { %3734 = vmatpush.msra.mxu2 %v5551_v51  ;;  %3754 = vmatpush.msra.mxu3 %v5552_v19  ;;  %v5617_v51 = vld [vmem:[%s11518_s5 + $0x1570] sm:$0xff]  ;;  %v5618_v19 = vld [vmem:[%s11518_s5 + $0x1578] sm:$0xff] }
 0x347   :  { %3655 = vmatpush.msrb.mxu0 %v5515_v20  ;;  %3675 = vmatpush.msrb.mxu1 %v5516_v21  ;;  %v5581_v20 = vld [vmem:[%s11518_s5 + $0x1450] sm:$0xff]  ;;  %v5582_v21 = vld [vmem:[%s11518_s5 + $0x1458] sm:$0xff] }
 0x348   :  { %3735 = vmatpush.msra.mxu2 %v5549_v42  ;;  %3755 = vmatpush.msra.mxu3 %v5550_v26  ;;  %v5615_v42 = vld [vmem:[%s11518_s5 + $0x1560] sm:$0xff]  ;;  %v5616_v26 = vld [vmem:[%s11518_s5 + $0x1568] sm:$0xff] }
 0x349   :  { %3656 = vmatpush.msrb.mxu0 %v5513_v40  ;;  %3676 = vmatpush.msrb.mxu1 %v5514_v43  ;;  %v5579_v40 = vld [vmem:[%s11518_s5 + $0x1440] sm:$0xff]  ;;  %v5580_v43 = vld [vmem:[%s11518_s5 + $0x1448] sm:$0xff] }
 0x34a   :  { %3736 = vmatpush.msra.mxu2 %v5547_v23  ;;  %3756 = vmatpush.msra.mxu3 %v5548_v0  ;;  %v5613_v23 = vld [vmem:[%s11518_s5 + $0x1550] sm:$0xff]  ;;  %v5614_v0 = vld [vmem:[%s11518_s5 + $0x1558] sm:$0xff] }
 0x34b   :  { %3657 = vmatpush.msrb.mxu0 %v5511_v44  ;;  %3677 = vmatpush.msrb.mxu1 %v5512_v29  ;;  %v5577_v44 = vld [vmem:[%s11518_s5 + $0x1430] sm:$0xff]  ;;  %v5578_v29 = vld [vmem:[%s11518_s5 + $0x1438] sm:$0xff] }
 0x34c   :  { %3737 = vmatpush.msra.mxu2 %v5545_v31  ;;  %3757 = vmatpush.msra.mxu3 %v5546_v1  ;;  %v5611_v31 = vld [vmem:[%s11518_s5 + $0x1540] sm:$0xff]  ;;  %v5612_v1 = vld [vmem:[%s11518_s5 + $0x1548] sm:$0xff] }
 0x34d   :  { %3658 = vmatpush.msrb.mxu0 %v5509_v10  ;;  %3678 = vmatpush.msrb.mxu1 %v5510_v12  ;;  %v5575_v10 = vld [vmem:[%s11518_s5 + $0x1420] sm:$0xff]  ;;  %v5576_v12 = vld [vmem:[%s11518_s5 + $0x1428] sm:$0xff] }
 0x34e   :  { %3738 = vmatpush.msra.mxu2 %v5543_v15  ;;  %3758 = vmatpush.msra.mxu3 %v5544_v49  ;;  %v5609_v15 = vld [vmem:[%s11518_s5 + $0x1530] sm:$0xff]  ;;  %v5610_v49 = vld [vmem:[%s11518_s5 + $0x1538] sm:$0xff] }
 0x34f   :  { %3659 = vmatpush.msrb.mxu0 %v5507_v32  ;;  %3679 = vmatpush.msrb.mxu1 %v5508_v35  ;;  %v5573_v32 = vld [vmem:[%s11518_s5 + $0x1410] sm:$0xff]  ;;  %v5574_v35 = vld [vmem:[%s11518_s5 + $0x1418] sm:$0xff] }
 0x350   :  { %3739 = vmatpush.msra.mxu2 %v5541_v28  ;;  %3759 = vmatpush.msra.mxu3 %v5542_v62  ;;  %v5607_v28 = vld [vmem:[%s11518_s5 + $0x1520] sm:$0xff]  ;;  %v5608_v62 = vld [vmem:[%s11518_s5 + $0x1528] sm:$0xff] }
 0x351   :  { %3660 = vmatmul.f32.vlgmr.msrb.gmra.mxu0 %v3642_v34  ;;  %3680 = vmatmul.f32.vlgmr.msrb.gmra.mxu1 %v3642_v34  ;;  %v5571_v34 = vld [vmem:[%s11518_s5 + $0x1400] sm:$0xff] }
 0x352   :  { %3806 = vmatpush.msra.mxu0 %v5601_v36  ;;  %3826 = vmatpush.msra.mxu1 %v5602_v9  ;;  %v5572_v36 = vld [vmem:[%s11518_s5 + $0x1408] sm:$0xff]  ;;  %v5605_v9 = vld [vmem:[%s11518_s5 + $0x1510] sm:$0xff] }
 0x353   :  { %3740 = vmatpush.msra.mxu2 %v5539_v38  ;;  %3760 = vmatpush.msra.mxu3 %v5540_v41  ;;  %v5606_v38 = vld [vmem:[%s11518_s5 + $0x1518] sm:$0xff]  ;;  %v3804_v41 = vrot.slane %v9895_v33, 4 }
 0x354   :  { %3741 = vmatmul.f32.vlgmr.msra.gmra.mxu2 %v3723_v61  ;;  %3761 = vmatmul.f32.vlgmr.msra.gmra.mxu3 %v3723_v61  ;;  %v5665_v61 = vld [vmem:[%s11518_s5 + $0x16f0] sm:$0xff] }
 0x355   :  { %3807 = vmatpush.msra.mxu0 %v5599_v4  ;;  %3827 = vmatpush.msra.mxu1 %v5600_v30  ;;  %v5666_v4 = vld [vmem:[%s11518_s5 + $0x16f8] sm:$0xff]  ;;  %v5603_v30 = vld [vmem:[%s11518_s5 + $0x1500] sm:$0xff] }
 0x356   :  { %3887 = vmatpush.msrb.mxu2 %v5633_v60  ;;  %3907 = vmatpush.msrb.mxu3 %v5634_v14  ;;  %v5604_v60 = vld [vmem:[%s11518_s5 + $0x1508] sm:$0xff]  ;;  %v3885_v14 = vrot.slane %v9895_v33, 5 }
 0x357   :  { %3808 = vmatpush.msra.mxu0 %v5597_v48  ;;  %3828 = vmatpush.msra.mxu1 %v5598_v24  ;;  %v5663_v48 = vld [vmem:[%s11518_s5 + $0x16e0] sm:$0xff]  ;;  %v5664_v24 = vld [vmem:[%s11518_s5 + $0x16e8] sm:$0xff] }
 0x358   :  { %3888 = vmatpush.msrb.mxu2 %v5631_v46  ;;  %3908 = vmatpush.msrb.mxu3 %v5632_v45  ;;  %v5697_v46 = vld [vmem:[%s11518_s5 + $0x17f0] sm:$0xff]  ;;  %v5698_v45 = vld [vmem:[%s11518_s5 + $0x17f8] sm:$0xff] }
 0x359   :  { %3809 = vmatpush.msra.mxu0 %v5595_v55  ;;  %3829 = vmatpush.msra.mxu1 %v5596_v7  ;;  %v5661_v55 = vld [vmem:[%s11518_s5 + $0x16d0] sm:$0xff]  ;;  %v5662_v7 = vld [vmem:[%s11518_s5 + $0x16d8] sm:$0xff] }
 0x35a   :  { %3889 = vmatpush.msrb.mxu2 %v5629_v27  ;;  %3909 = vmatpush.msrb.mxu3 %v5630_v53  ;;  %v5695_v27 = vld [vmem:[%s11518_s5 + $0x17e0] sm:$0xff]  ;;  %v5696_v53 = vld [vmem:[%s11518_s5 + $0x17e8] sm:$0xff] }
 0x35b   :  { %3810 = vmatpush.msra.mxu0 %v5593_v25  ;;  %3830 = vmatpush.msra.mxu1 %v5594_v63  ;;  %v5659_v25 = vld [vmem:[%s11518_s5 + $0x16c0] sm:$0xff]  ;;  %v5660_v63 = vld [vmem:[%s11518_s5 + $0x16c8] sm:$0xff] }
 0x35c   :  { %3890 = vmatpush.msrb.mxu2 %v5627_v54  ;;  %3910 = vmatpush.msrb.mxu3 %v5628_v52  ;;  %v5693_v54 = vld [vmem:[%s11518_s5 + $0x17d0] sm:$0xff]  ;;  %v5694_v52 = vld [vmem:[%s11518_s5 + $0x17d8] sm:$0xff] }
 0x35d   :  { %3811 = vmatpush.msra.mxu0 %v5591_v56  ;;  %3831 = vmatpush.msra.mxu1 %v5592_v58  ;;  %v5657_v56 = vld [vmem:[%s11518_s5 + $0x16b0] sm:$0xff]  ;;  %v5658_v58 = vld [vmem:[%s11518_s5 + $0x16b8] sm:$0xff] }
 0x35e   :  { %3891 = vmatpush.msrb.mxu2 %v5625_v47  ;;  %3911 = vmatpush.msrb.mxu3 %v5626_v18  ;;  %v5691_v47 = vld [vmem:[%s11518_s5 + $0x17c0] sm:$0xff]  ;;  %v5692_v18 = vld [vmem:[%s11518_s5 + $0x17c8] sm:$0xff] }
 0x35f   :  { %3812 = vmatpush.msra.mxu0 %v5589_v59  ;;  %3832 = vmatpush.msra.mxu1 %v5590_v39  ;;  %v5655_v59 = vld [vmem:[%s11518_s5 + $0x16a0] sm:$0xff]  ;;  %v5656_v39 = vld [vmem:[%s11518_s5 + $0x16a8] sm:$0xff] }
 0x360   :  { %3892 = vmatpush.msrb.mxu2 %v5623_v57  ;;  %3912 = vmatpush.msrb.mxu3 %v5624_v5  ;;  %v5689_v57 = vld [vmem:[%s11518_s5 + $0x17b0] sm:$0xff]  ;;  %v5690_v5 = vld [vmem:[%s11518_s5 + $0x17b8] sm:$0xff] }
 0x361   :  { %3813 = vmatpush.msra.mxu0 %v5587_v6  ;;  %3833 = vmatpush.msra.mxu1 %v5588_v11  ;;  %v5653_v6 = vld [vmem:[%s11518_s5 + $0x1690] sm:$0xff]  ;;  %v5654_v11 = vld [vmem:[%s11518_s5 + $0x1698] sm:$0xff] }
 0x362   :  { %3893 = vmatpush.msrb.mxu2 %v5621_v3  ;;  %3913 = vmatpush.msrb.mxu3 %v5622_v50  ;;  %v5687_v3 = vld [vmem:[%s11518_s5 + $0x17a0] sm:$0xff]  ;;  %v5688_v50 = vld [vmem:[%s11518_s5 + $0x17a8] sm:$0xff] }
 0x363   :  { %3814 = vmatpush.msra.mxu0 %v5585_v13  ;;  %3834 = vmatpush.msra.mxu1 %v5586_v8  ;;  %v5651_v13 = vld [vmem:[%s11518_s5 + $0x1680] sm:$0xff]  ;;  %v5652_v8 = vld [vmem:[%s11518_s5 + $0x1688] sm:$0xff] }
 0x364   :  { %3894 = vmatpush.msrb.mxu2 %v5619_v2  ;;  %3914 = vmatpush.msrb.mxu3 %v5620_v16  ;;  %v5685_v2 = vld [vmem:[%s11518_s5 + $0x1790] sm:$0xff]  ;;  %v5686_v16 = vld [vmem:[%s11518_s5 + $0x1798] sm:$0xff] }
 0x365   :  { %3815 = vmatpush.msra.mxu0 %v5583_v37  ;;  %3835 = vmatpush.msra.mxu1 %v5584_v17  ;;  %v5649_v37 = vld [vmem:[%s11518_s5 + $0x1670] sm:$0xff]  ;;  %v5650_v17 = vld [vmem:[%s11518_s5 + $0x1678] sm:$0xff] }
 0x366   :  { %3895 = vmatpush.msrb.mxu2 %v5617_v51  ;;  %3915 = vmatpush.msrb.mxu3 %v5618_v19  ;;  %v5683_v51 = vld [vmem:[%s11518_s5 + $0x1780] sm:$0xff]  ;;  %v5684_v19 = vld [vmem:[%s11518_s5 + $0x1788] sm:$0xff] }
 0x367   :  { %3816 = vmatpush.msra.mxu0 %v5581_v20  ;;  %3836 = vmatpush.msra.mxu1 %v5582_v21  ;;  %v5647_v20 = vld [vmem:[%s11518_s5 + $0x1660] sm:$0xff]  ;;  %v5648_v21 = vld [vmem:[%s11518_s5 + $0x1668] sm:$0xff] }
 0x368   :  { %3896 = vmatpush.msrb.mxu2 %v5615_v42  ;;  %3916 = vmatpush.msrb.mxu3 %v5616_v26  ;;  %v5681_v42 = vld [vmem:[%s11518_s5 + $0x1770] sm:$0xff]  ;;  %v5682_v26 = vld [vmem:[%s11518_s5 + $0x1778] sm:$0xff] }
 0x369   :  { %3817 = vmatpush.msra.mxu0 %v5579_v40  ;;  %3837 = vmatpush.msra.mxu1 %v5580_v43  ;;  %v5645_v40 = vld [vmem:[%s11518_s5 + $0x1650] sm:$0xff]  ;;  %v5646_v43 = vld [vmem:[%s11518_s5 + $0x1658] sm:$0xff] }
 0x36a   :  { %3897 = vmatpush.msrb.mxu2 %v5613_v23  ;;  %3917 = vmatpush.msrb.mxu3 %v5614_v0  ;;  %v5679_v23 = vld [vmem:[%s11518_s5 + $0x1760] sm:$0xff]  ;;  %v5680_v0 = vld [vmem:[%s11518_s5 + $0x1768] sm:$0xff] }
 0x36b   :  { %3818 = vmatpush.msra.mxu0 %v5577_v44  ;;  %3838 = vmatpush.msra.mxu1 %v5578_v29  ;;  %v5643_v44 = vld [vmem:[%s11518_s5 + $0x1640] sm:$0xff]  ;;  %v5644_v29 = vld [vmem:[%s11518_s5 + $0x1648] sm:$0xff] }
 0x36c   :  { %3898 = vmatpush.msrb.mxu2 %v5611_v31  ;;  %3918 = vmatpush.msrb.mxu3 %v5612_v1  ;;  %v5677_v31 = vld [vmem:[%s11518_s5 + $0x1750] sm:$0xff]  ;;  %v5678_v1 = vld [vmem:[%s11518_s5 + $0x1758] sm:$0xff] }
 0x36d   :  { %3819 = vmatpush.msra.mxu0 %v5575_v10  ;;  %3839 = vmatpush.msra.mxu1 %v5576_v12  ;;  %v5641_v10 = vld [vmem:[%s11518_s5 + $0x1630] sm:$0xff]  ;;  %v5642_v12 = vld [vmem:[%s11518_s5 + $0x1638] sm:$0xff] }
 0x36e   :  { %3899 = vmatpush.msrb.mxu2 %v5609_v15  ;;  %3919 = vmatpush.msrb.mxu3 %v5610_v49  ;;  %v5675_v15 = vld [vmem:[%s11518_s5 + $0x1740] sm:$0xff]  ;;  %v5676_v49 = vld [vmem:[%s11518_s5 + $0x1748] sm:$0xff] }
 0x36f   :  { %3820 = vmatpush.msra.mxu0 %v5573_v32  ;;  %3840 = vmatpush.msra.mxu1 %v5574_v35  ;;  %v5639_v32 = vld [vmem:[%s11518_s5 + $0x1620] sm:$0xff]  ;;  %v5640_v35 = vld [vmem:[%s11518_s5 + $0x1628] sm:$0xff] }
 0x370   :  { %3900 = vmatpush.msrb.mxu2 %v5607_v28  ;;  %3920 = vmatpush.msrb.mxu3 %v5608_v62  ;;  %v5673_v28 = vld [vmem:[%s11518_s5 + $0x1730] sm:$0xff]  ;;  %v5674_v62 = vld [vmem:[%s11518_s5 + $0x1738] sm:$0xff] }
 0x371   :  { %3821 = vmatpush.msra.mxu0 %v5571_v34  ;;  %3841 = vmatpush.msra.mxu1 %v5572_v36  ;;  %v5637_v34 = vld [vmem:[%s11518_s5 + $0x1610] sm:$0xff]  ;;  %v5638_v36 = vld [vmem:[%s11518_s5 + $0x1618] sm:$0xff] }
 0x372   :  { %3901 = vmatpush.msrb.mxu2 %v5605_v9  ;;  %3921 = vmatpush.msrb.mxu3 %v5606_v38  ;;  %v5671_v9 = vld [vmem:[%s11518_s5 + $0x1720] sm:$0xff]  ;;  %v5672_v38 = vld [vmem:[%s11518_s5 + $0x1728] sm:$0xff] }
 0x373   :  { %3822 = vmatmul.f32.vlgmr.msra.gmra.mxu0 %v3804_v41  ;;  %3842 = vmatmul.f32.vlgmr.msra.gmra.mxu1 %v3804_v41  ;;  %v5635_v41 = vld [vmem:[%s11518_s5 + $0x1600] sm:$0xff] }
 0x374   :  { %3968 = vmatpush.msrb.mxu0 %v5665_v61  ;;  %3988 = vmatpush.msrb.mxu1 %v5666_v4  ;;  %v5636_v61 = vld [vmem:[%s11518_s5 + $0x1608] sm:$0xff]  ;;  %v5669_v4 = vld [vmem:[%s11518_s5 + $0x1710] sm:$0xff] }
 0x375   :  { %3902 = vmatpush.msrb.mxu2 %v5603_v30  ;;  %3922 = vmatpush.msrb.mxu3 %v5604_v60  ;;  %v5670_v30 = vld [vmem:[%s11518_s5 + $0x1718] sm:$0xff]  ;;  %v3966_v60 = vrot.slane %v9895_v33, 6 }
 0x376   :  { %3903 = vmatmul.f32.vlgmr.msrb.gmra.mxu2 %v3885_v14  ;;  %3923 = vmatmul.f32.vlgmr.msrb.gmra.mxu3 %v3885_v14  ;;  %v5729_v14 = vld [vmem:[%s11518_s5 + $0x18f0] sm:$0xff] }
 0x377   :  { %3969 = vmatpush.msrb.mxu0 %v5663_v48  ;;  %3989 = vmatpush.msrb.mxu1 %v5664_v24  ;;  %v5730_v48 = vld [vmem:[%s11518_s5 + $0x18f8] sm:$0xff]  ;;  %v5667_v24 = vld [vmem:[%s11518_s5 + $0x1700] sm:$0xff] }
 0x378   :  { %4049 = vmatpush.msra.mxu2 %v5697_v46  ;;  %4069 = vmatpush.msra.mxu3 %v5698_v45  ;;  %v5668_v46 = vld [vmem:[%s11518_s5 + $0x1708] sm:$0xff]  ;;  %v4047_v45 = vrot.slane %v9895_v33, 7  ;;  %v5725_v33 = vld [vmem:[%s11518_s5 + $0x18d0] sm:$0xff] }
 0x379   :  { %3970 = vmatpush.msrb.mxu0 %v5661_v55  ;;  %3990 = vmatpush.msrb.mxu1 %v5662_v7  ;;  %v5727_v55 = vld [vmem:[%s11518_s5 + $0x18e0] sm:$0xff]  ;;  %v5728_v7 = vld [vmem:[%s11518_s5 + $0x18e8] sm:$0xff] }
 0x37a   :  { %4050 = vmatpush.msra.mxu2 %v5695_v27  ;;  %4070 = vmatpush.msra.mxu3 %v5696_v53  ;;  %v5761_v27 = vld [vmem:[%s11518_s5 + $0x19f0] sm:$0xff]  ;;  %v5762_v53 = vld [vmem:[%s11518_s5 + $0x19f8] sm:$0xff] }
 0x37b   :  { %3971 = vmatpush.msrb.mxu0 %v5659_v25  ;;  %3991 = vmatpush.msrb.mxu1 %v5660_v63  ;;  %v5726_v25 = vld [vmem:[%s11518_s5 + $0x18d8] sm:$0xff]  ;;  %v5759_v63 = vld [vmem:[%s11518_s5 + $0x19e0] sm:$0xff] }
 0x37c   :  { %4051 = vmatpush.msra.mxu2 %v5693_v54  ;;  %4071 = vmatpush.msra.mxu3 %v5694_v52  ;;  %v5760_v54 = vld [vmem:[%s11518_s5 + $0x19e8] sm:$0xff]  ;;  %v5723_v52 = vld [vmem:[%s11518_s5 + $0x18c0] sm:$0xff] }
 0x37d   :  { %3972 = vmatpush.msrb.mxu0 %v5657_v56  ;;  %3992 = vmatpush.msrb.mxu1 %v5658_v58  ;;  %v5724_v56 = vld [vmem:[%s11518_s5 + $0x18c8] sm:$0xff]  ;;  %v5757_v58 = vld [vmem:[%s11518_s5 + $0x19d0] sm:$0xff] }
 0x37e   :  { %4052 = vmatpush.msra.mxu2 %v5691_v47  ;;  %4072 = vmatpush.msra.mxu3 %v5692_v18  ;;  %v5758_v47 = vld [vmem:[%s11518_s5 + $0x19d8] sm:$0xff]  ;;  %v5721_v18 = vld [vmem:[%s11518_s5 + $0x18b0] sm:$0xff] }
 0x37f   :  { %3973 = vmatpush.msrb.mxu0 %v5655_v59  ;;  %3993 = vmatpush.msrb.mxu1 %v5656_v39  ;;  %v5722_v59 = vld [vmem:[%s11518_s5 + $0x18b8] sm:$0xff]  ;;  %v5755_v39 = vld [vmem:[%s11518_s5 + $0x19c0] sm:$0xff] }
 0x380   :  { %4053 = vmatpush.msra.mxu2 %v5689_v57  ;;  %4073 = vmatpush.msra.mxu3 %v5690_v5  ;;  %v5756_v57 = vld [vmem:[%s11518_s5 + $0x19c8] sm:$0xff]  ;;  %v5719_v5 = vld [vmem:[%s11518_s5 + $0x18a0] sm:$0xff] }
 0x381   :  { %3974 = vmatpush.msrb.mxu0 %v5653_v6  ;;  %3994 = vmatpush.msrb.mxu1 %v5654_v11  ;;  %v5720_v6 = vld [vmem:[%s11518_s5 + $0x18a8] sm:$0xff]  ;;  %v5753_v11 = vld [vmem:[%s11518_s5 + $0x19b0] sm:$0xff] }
 0x382   :  { %4054 = vmatpush.msra.mxu2 %v5687_v3  ;;  %4074 = vmatpush.msra.mxu3 %v5688_v50  ;;  %v5754_v3 = vld [vmem:[%s11518_s5 + $0x19b8] sm:$0xff]  ;;  %v5717_v50 = vld [vmem:[%s11518_s5 + $0x1890] sm:$0xff] }
 0x383   :  { %3975 = vmatpush.msrb.mxu0 %v5651_v13  ;;  %3995 = vmatpush.msrb.mxu1 %v5652_v8  ;;  %v5718_v13 = vld [vmem:[%s11518_s5 + $0x1898] sm:$0xff]  ;;  %v5751_v8 = vld [vmem:[%s11518_s5 + $0x19a0] sm:$0xff] }
 0x384   :  { %4055 = vmatpush.msra.mxu2 %v5685_v2  ;;  %4075 = vmatpush.msra.mxu3 %v5686_v16  ;;  %v5752_v2 = vld [vmem:[%s11518_s5 + $0x19a8] sm:$0xff]  ;;  %v5715_v16 = vld [vmem:[%s11518_s5 + $0x1880] sm:$0xff] }
 0x385   :  { %3976 = vmatpush.msrb.mxu0 %v5649_v37  ;;  %3996 = vmatpush.msrb.mxu1 %v5650_v17  ;;  %v5716_v37 = vld [vmem:[%s11518_s5 + $0x1888] sm:$0xff]  ;;  %v1964_v17 = vpop.f32.mrf.mxu0 }
 0x386   :  { %4056 = vmatpush.msra.mxu2 %v5683_v51  ;;  %4076 = vmatpush.msra.mxu3 %v5684_v19  ;;  %v5749_v51 = vld [vmem:[%s11518_s5 + $0x1990] sm:$0xff]  ;;  %v5750_v19 = vld [vmem:[%s11518_s5 + $0x1998] sm:$0xff] }
 0x387   :  { %3977 = vmatpush.msrb.mxu0 %v5647_v20  ;;  %3997 = vmatpush.msrb.mxu1 %v5648_v21  ;;  %v5713_v20 = vld [vmem:[%s11518_s5 + $0x1870] sm:$0xff]  ;;  %v5714_v21 = vld [vmem:[%s11518_s5 + $0x1878] sm:$0xff] }
 0x388   :  { %4057 = vmatpush.msra.mxu2 %v5681_v42  ;;  %4077 = vmatpush.msra.mxu3 %v5682_v26  ;;  %v2014_v42 = vpop.f32.mrf.mxu1  ;;  %v5747_v26 = vld [vmem:[%s11518_s5 + $0x1980] sm:$0xff] }
 0x389   :  { %3978 = vmatpush.msrb.mxu0 %v5645_v40  ;;  %3998 = vmatpush.msrb.mxu1 %v5646_v43  ;;  %v5748_v40 = vld [vmem:[%s11518_s5 + $0x1988] sm:$0xff]  ;;  %v1970_v43 = vadd.f32 %v1964_v17, %v8504_v22  ;;  %v5746_v22 = vld [vmem:[%s11518_s5 + $0x1978] sm:$0xff]  ;;  %v5819_v17 = vld [vmem:[%s11518_s5 + $0x1bc0] sm:$0xff] }
 0x38a   :  { %4058 = vmatpush.msra.mxu2 %v5679_v23  ;;  %4078 = vmatpush.msra.mxu3 %v5680_v0  ;;  %v5711_v23 = vld [vmem:[%s11518_s5 + $0x1860] sm:$0xff]  ;;  %v5712_v0 = vld [vmem:[%s11518_s5 + $0x1868] sm:$0xff] }
 0x38b   :  { %3979 = vmatpush.msrb.mxu0 %v5643_v44  ;;  %3999 = vmatpush.msrb.mxu1 %v5644_v29  ;;  %v2064_v44 = vpop.f32.mrf.mxu2  ;;  %v5745_v29 = vld [vmem:[%s11518_s5 + $0x1970] sm:$0xff] }
 0x38c   :  { %4059 = vmatpush.msra.mxu2 %v5677_v31  ;;  %4079 = vmatpush.msra.mxu3 %v5678_v1  ;;  %v2020_v31 = vadd.f32 %v2014_v42, %v1970_v43  ;;  %v5709_v1 = vld [vmem:[%s11518_s5 + $0x1850] sm:$0xff]  ;;  %v5818_v42 = vld [vmem:[%s11518_s5 + $0x1bb8] sm:$0xff]  ;;  %v5815_v43 = vld [vmem:[%s11518_s5 + $0x1ba0] sm:$0xff] }
 0x38d   :  { %3980 = vmatpush.msrb.mxu0 %v5641_v10  ;;  %4000 = vmatpush.msrb.mxu1 %v5642_v12  ;;  %v5710_v10 = vld [vmem:[%s11518_s5 + $0x1858] sm:$0xff]  ;;  %v2114_v12 = vpop.f32.mrf.mxu3 }
 0x38e   :  { %4060 = vmatpush.msra.mxu2 %v5675_v15  ;;  %4080 = vmatpush.msra.mxu3 %v5676_v49  ;;  %v5743_v15 = vld [vmem:[%s11518_s5 + $0x1960] sm:$0xff]  ;;  %v5744_v49 = vld [vmem:[%s11518_s5 + $0x1968] sm:$0xff] }
 0x38f   :  { %3981 = vmatpush.msrb.mxu0 %v5639_v32  ;;  %4001 = vmatpush.msrb.mxu1 %v5640_v35  ;;  %v2070_v32 = vadd.f32 %v2064_v44, %v2020_v31  ;;  %v5707_v35 = vld [vmem:[%s11518_s5 + $0x1840] sm:$0xff]  ;;  %v5780_v44 = vld [vmem:[%s11518_s5 + $0x1a88] sm:$0xff]  ;;  %v5777_v31 = vld [vmem:[%s11518_s5 + $0x1a70] sm:$0xff] }
 0x390   :  { %4061 = vmatpush.msra.mxu2 %v5673_v28  ;;  %4081 = vmatpush.msra.mxu3 %v5674_v62  ;;  %v5708_v28 = vld [vmem:[%s11518_s5 + $0x1848] sm:$0xff]  ;;  %v5741_v62 = vld [vmem:[%s11518_s5 + $0x1950] sm:$0xff] }
 0x391   :  { %3982 = vmatpush.msrb.mxu0 %v5637_v34  ;;  %4002 = vmatpush.msrb.mxu1 %v5638_v36  ;;  %v5742_v34 = vld [vmem:[%s11518_s5 + $0x1958] sm:$0xff]  ;;  %v2120_v36 = vadd.f32 %v2114_v12, %v2070_v32  ;;  %v5812_v12 = vld [vmem:[%s11518_s5 + $0x1b88] sm:$0xff]  ;;  %v5809_v32 = vld [vmem:[%s11518_s5 + $0x1b70] sm:$0xff] }
 0x392   :  { %4062 = vmatpush.msra.mxu2 %v5671_v9  ;;  %4082 = vmatpush.msra.mxu3 %v5672_v38  ;;  %v5705_v9 = vld [vmem:[%s11518_s5 + $0x1830] sm:$0xff]  ;;  %v5706_v38 = vld [vmem:[%s11518_s5 + $0x1838] sm:$0xff] }
 0x393   :  { %3983 = vmatpush.msrb.mxu0 %v5635_v41  ;;  %4003 = vmatpush.msrb.mxu1 %v5636_v61  ;;  %v2143_v41 = vpop.permute.xlu2 %2142  ;;  %v5739_v61 = vld [vmem:[%s11518_s5 + $0x1940] sm:$0xff] }
 0x394   :  { %4063 = vmatpush.msra.mxu2 %v5669_v4  ;;  %4083 = vmatpush.msra.mxu3 %v5670_v30  ;;  %v5740_v4 = vld [vmem:[%s11518_s5 + $0x1948] sm:$0xff]  ;;  %v5703_v30 = vld [vmem:[%s11518_s5 + $0x1820] sm:$0xff] }
 0x395   :  { %3984 = vmatmul.f32.vlgmr.msrb.gmra.mxu0 %v3966_v60  ;;  %4004 = vmatmul.f32.vlgmr.msrb.gmra.mxu1 %v3966_v60  ;;  %v5704_v60 = vld [vmem:[%s11518_s5 + $0x1828] sm:$0xff] }
 0x396   :  { %4128 = vmatpush.msra.mxu0 %v5729_v14  ;;  %4148 = vmatpush.msra.mxu1 %v5730_v48  ;;  %v5737_v14 = vld [vmem:[%s11518_s5 + $0x1930] sm:$0xff]  ;;  %v5738_v48 = vld [vmem:[%s11518_s5 + $0x1938] sm:$0xff] }
 0x397   :  { %4064 = vmatpush.msra.mxu2 %v5667_v24  ;;  %4084 = vmatpush.msra.mxu3 %v5668_v46  ;;  %v2148_v24 = vadd.f32 %v2143_v41, %v2120_v36  ;;  %v5701_v46 = vld [vmem:[%s11518_s5 + $0x1810] sm:$0xff]  ;;  %v5808_v36 = vld [vmem:[%s11518_s5 + $0x1b68] sm:$0xff] }
 0x398   :  { %4065 = vmatmul.f32.vlgmr.msra.gmra.mxu2 %v4047_v45  ;;  %4085 = vmatmul.f32.vlgmr.msra.gmra.mxu3 %v4047_v45  ;;  %v5702_v45 = vld [vmem:[%s11518_s5 + $0x1818] sm:$0xff]  ;;  %v5805_v41 = vld [vmem:[%s11518_s5 + $0x1b50] sm:$0xff] }
 0x399   :  { %4129 = vmatpush.msra.mxu0 %v5727_v55  ;;  %4149 = vmatpush.msra.mxu1 %v5728_v7  ;;  %v5735_v55 = vld [vmem:[%s11518_s5 + $0x1920] sm:$0xff]  ;;  %v5736_v7 = vld [vmem:[%s11518_s5 + $0x1928] sm:$0xff] }
 0x39a   :  { %4210 = vmatpush.msrb.mxu2 %v5761_v27  ;;  %4230 = vmatpush.msrb.mxu3 %v5762_v53  ;;  %v5699_v27 = vld [vmem:[%s11518_s5 + $0x1800] sm:$0xff]  ;;  %v5700_v53 = vld [vmem:[%s11518_s5 + $0x1808] sm:$0xff] }
 0x39b   :  { %4130 = vmatpush.msra.mxu0 %v5725_v33  ;;  %4150 = vmatpush.msra.mxu1 %v5726_v25  ;;  %v5733_v33 = vld [vmem:[%s11518_s5 + $0x1910] sm:$0xff]  ;;  %v5734_v25 = vld [vmem:[%s11518_s5 + $0x1918] sm:$0xff] }
 0x39c   :  { %4211 = vmatpush.msrb.mxu2 %v5759_v63  ;;  %4231 = vmatpush.msrb.mxu3 %v5760_v54  ;;  %v10675_v63 = vmax.f32 %v2148_v24, 0.0  ;;  %v5793_v54 = vld [vmem:[%s11518_s5 + $0x1af0] sm:$0xff]  ;;  %v5768_v24 = vld [vmem:[%s11518_s5 + $0x1a28] sm:$0xff] }
 0x39d   :  { %4131 = vmatpush.msra.mxu0 %v5723_v52  ;;  %4151 = vmatpush.msra.mxu1 %v5724_v56  ;;  %v5794_v52 = vld [vmem:[%s11518_s5 + $0x1af8] sm:$0xff]  ;;  %v5731_v56 = vld [vmem:[%s11518_s5 + $0x1900] sm:$0xff] }
 0x39e   :  { %4212 = vmatpush.msrb.mxu2 %v5757_v58  ;;  %4232 = vmatpush.msrb.mxu3 %v5758_v47  ;;  %v5732_v58 = vld [vmem:[%s11518_s5 + $0x1908] sm:$0xff]  ;;  %v4208_v47 = vrot.slane %v10675_v63, 1 }
 0x39f   :  { %4132 = vmatpush.msra.mxu0 %v5721_v18  ;;  %4152 = vmatpush.msra.mxu1 %v5722_v59  ;;  %v5791_v18 = vld [vmem:[%s11518_s5 + $0x1ae0] sm:$0xff]  ;;  %v5792_v59 = vld [vmem:[%s11518_s5 + $0x1ae8] sm:$0xff] }
 0x3a0   :  { %4213 = vmatpush.msrb.mxu2 %v5755_v39  ;;  %4233 = vmatpush.msrb.mxu3 %v5756_v57  ;;  %v5825_v39 = vld [vmem:[%s11518_s5 + $0x1bf0] sm:$0xff]  ;;  %v5826_v57 = vld [vmem:[%s11518_s5 + $0x1bf8] sm:$0xff] }
 0x3a1   :  { %4133 = vmatpush.msra.mxu0 %v5719_v5  ;;  %4153 = vmatpush.msra.mxu1 %v5720_v6  ;;  %v5789_v5 = vld [vmem:[%s11518_s5 + $0x1ad0] sm:$0xff]  ;;  %v5790_v6 = vld [vmem:[%s11518_s5 + $0x1ad8] sm:$0xff] }
 0x3a2   :  { %4214 = vmatpush.msrb.mxu2 %v5753_v11  ;;  %4234 = vmatpush.msrb.mxu3 %v5754_v3  ;;  %v5823_v11 = vld [vmem:[%s11518_s5 + $0x1be0] sm:$0xff]  ;;  %v5824_v3 = vld [vmem:[%s11518_s5 + $0x1be8] sm:$0xff] }
 0x3a3   :  { %4134 = vmatpush.msra.mxu0 %v5717_v50  ;;  %4154 = vmatpush.msra.mxu1 %v5718_v13  ;;  %v5787_v50 = vld [vmem:[%s11518_s5 + $0x1ac0] sm:$0xff]  ;;  %v5788_v13 = vld [vmem:[%s11518_s5 + $0x1ac8] sm:$0xff] }
 0x3a4   :  { %4215 = vmatpush.msrb.mxu2 %v5751_v8  ;;  %4235 = vmatpush.msrb.mxu3 %v5752_v2  ;;  %v5821_v8 = vld [vmem:[%s11518_s5 + $0x1bd0] sm:$0xff]  ;;  %v5822_v2 = vld [vmem:[%s11518_s5 + $0x1bd8] sm:$0xff] }
 0x3a5   :  { %4135 = vmatpush.msra.mxu0 %v5715_v16  ;;  %4155 = vmatpush.msra.mxu1 %v5716_v37  ;;  %v5785_v16 = vld [vmem:[%s11518_s5 + $0x1ab0] sm:$0xff]  ;;  %v5786_v37 = vld [vmem:[%s11518_s5 + $0x1ab8] sm:$0xff] }
 0x3a6   :  { %4216 = vmatpush.msrb.mxu2 %v5749_v51  ;;  %4236 = vmatpush.msrb.mxu3 %v5750_v19  ;;  %v5820_v51 = vld [vmem:[%s11518_s5 + $0x1bc8] sm:$0xff]  ;;  %v5783_v19 = vld [vmem:[%s11518_s5 + $0x1aa0] sm:$0xff] }
 0x3a7   :  { %4136 = vmatpush.msra.mxu0 %v5713_v20  ;;  %4156 = vmatpush.msra.mxu1 %v5714_v21  ;;  %v5784_v20 = vld [vmem:[%s11518_s5 + $0x1aa8] sm:$0xff]  ;;  %v5817_v21 = vld [vmem:[%s11518_s5 + $0x1bb0] sm:$0xff] }
 0x3a8   :  { %4217 = vmatpush.msrb.mxu2 %v5747_v26  ;;  %4237 = vmatpush.msrb.mxu3 %v5748_v40  ;;  %v5781_v26 = vld [vmem:[%s11518_s5 + $0x1a90] sm:$0xff]  ;;  %v5782_v40 = vld [vmem:[%s11518_s5 + $0x1a98] sm:$0xff] }
 0x3a9   :  { %4137 = vmatpush.msra.mxu0 %v5711_v23  ;;  %4157 = vmatpush.msra.mxu1 %v5712_v0  ;;  %v5816_v23 = vld [vmem:[%s11518_s5 + $0x1ba8] sm:$0xff]  ;;  %v5779_v0 = vld [vmem:[%s11518_s5 + $0x1a80] sm:$0xff] }
 0x3aa   :  { %4218 = vmatpush.msrb.mxu2 %v5745_v29  ;;  %4238 = vmatpush.msrb.mxu3 %v5746_v22  ;;  %v5813_v29 = vld [vmem:[%s11518_s5 + $0x1b90] sm:$0xff]  ;;  %v5814_v22 = vld [vmem:[%s11518_s5 + $0x1b98] sm:$0xff] }
 0x3ab   :  { %4138 = vmatpush.msra.mxu0 %v5709_v1  ;;  %4158 = vmatpush.msra.mxu1 %v5710_v10  ;;  %v5778_v1 = vld [vmem:[%s11518_s5 + $0x1a78] sm:$0xff]  ;;  %v5811_v10 = vld [vmem:[%s11518_s5 + $0x1b80] sm:$0xff] }
 0x3ac   :  { %4219 = vmatpush.msrb.mxu2 %v5743_v15  ;;  %4239 = vmatpush.msrb.mxu3 %v5744_v49  ;;  %v5775_v15 = vld [vmem:[%s11518_s5 + $0x1a60] sm:$0xff]  ;;  %v5776_v49 = vld [vmem:[%s11518_s5 + $0x1a68] sm:$0xff] }
 0x3ad   :  { %4139 = vmatpush.msra.mxu0 %v5707_v35  ;;  %4159 = vmatpush.msra.mxu1 %v5708_v28  ;;  %v5810_v35 = vld [vmem:[%s11518_s5 + $0x1b78] sm:$0xff]  ;;  %v5773_v28 = vld [vmem:[%s11518_s5 + $0x1a50] sm:$0xff] }
 0x3ae   :  { %4220 = vmatpush.msrb.mxu2 %v5741_v62  ;;  %4240 = vmatpush.msrb.mxu3 %v5742_v34  ;;  %v5774_v62 = vld [vmem:[%s11518_s5 + $0x1a58] sm:$0xff]  ;;  %v5807_v34 = vld [vmem:[%s11518_s5 + $0x1b60] sm:$0xff] }
 0x3af   :  { %4140 = vmatpush.msra.mxu0 %v5705_v9  ;;  %4160 = vmatpush.msra.mxu1 %v5706_v38  ;;  %v5771_v9 = vld [vmem:[%s11518_s5 + $0x1a40] sm:$0xff]  ;;  %v5772_v38 = vld [vmem:[%s11518_s5 + $0x1a48] sm:$0xff] }
 0x3b0   :  { %4221 = vmatpush.msrb.mxu2 %v5739_v61  ;;  %4241 = vmatpush.msrb.mxu3 %v5740_v4  ;;  %v5806_v61 = vld [vmem:[%s11518_s5 + $0x1b58] sm:$0xff]  ;;  %v5769_v4 = vld [vmem:[%s11518_s5 + $0x1a30] sm:$0xff] }
 0x3b1   :  { %4141 = vmatpush.msra.mxu0 %v5703_v30  ;;  %4161 = vmatpush.msra.mxu1 %v5704_v60  ;;  %v5770_v30 = vld [vmem:[%s11518_s5 + $0x1a38] sm:$0xff]  ;;  %v5803_v60 = vld [vmem:[%s11518_s5 + $0x1b40] sm:$0xff] }
 0x3b2   :  { %4222 = vmatpush.msrb.mxu2 %v5737_v14  ;;  %4242 = vmatpush.msrb.mxu3 %v5738_v48  ;;  %v5804_v14 = vld [vmem:[%s11518_s5 + $0x1b48] sm:$0xff]  ;;  %v5767_v48 = vld [vmem:[%s11518_s5 + $0x1a20] sm:$0xff] }
 0x3b3   :  { %4142 = vmatpush.msra.mxu0 %v5701_v46  ;;  %4162 = vmatpush.msra.mxu1 %v5702_v45  ;;  %v5801_v46 = vld [vmem:[%s11518_s5 + $0x1b30] sm:$0xff]  ;;  %v5802_v45 = vld [vmem:[%s11518_s5 + $0x1b38] sm:$0xff] }
 0x3b4   :  { %4223 = vmatpush.msrb.mxu2 %v5735_v55  ;;  %4243 = vmatpush.msrb.mxu3 %v5736_v7  ;;  %v5765_v55 = vld [vmem:[%s11518_s5 + $0x1a10] sm:$0xff]  ;;  %v5766_v7 = vld [vmem:[%s11518_s5 + $0x1a18] sm:$0xff] }
 0x3b5   :  { %4143 = vmatpush.msra.mxu0 %v5699_v27  ;;  %4163 = vmatpush.msra.mxu1 %v5700_v53  ;;  %v5799_v27 = vld [vmem:[%s11518_s5 + $0x1b20] sm:$0xff]  ;;  %v5800_v53 = vld [vmem:[%s11518_s5 + $0x1b28] sm:$0xff] }
 0x3b6   :  { %4224 = vmatpush.msrb.mxu2 %v5733_v33  ;;  %4244 = vmatpush.msrb.mxu3 %v5734_v25  ;;  %v5763_v33 = vld [vmem:[%s11518_s5 + $0x1a00] sm:$0xff]  ;;  %v5764_v25 = vld [vmem:[%s11518_s5 + $0x1a08] sm:$0xff] }
 0x3b7   :  { %4144 = vmatmul.f32.vlgmr.msra.gmra.mxu0 %v10675_v63  ;;  %4164 = vmatmul.f32.vlgmr.msra.gmra.mxu1 %v10675_v63 }
 0x3b8   :  { %4291 = vmatpush.msrb.mxu0 %v5793_v54  ;;  %4311 = vmatpush.msrb.mxu1 %v5794_v52  ;;  %v5797_v54 = vld [vmem:[%s11518_s5 + $0x1b10] sm:$0xff]  ;;  %v5798_v52 = vld [vmem:[%s11518_s5 + $0x1b18] sm:$0xff] }
 0x3b9   :  { %4225 = vmatpush.msrb.mxu2 %v5731_v56  ;;  %4245 = vmatpush.msrb.mxu3 %v5732_v58  ;;  %v4289_v56 = vrot.slane %v10675_v63, 2  ;;  %v5857_v58 = vld [vmem:[%s11518_s5 + $0x1cf0] sm:$0xff] }
 0x3ba   :  { %4226 = vmatmul.f32.vlgmr.msrb.gmra.mxu2 %v4208_v47  ;;  %4246 = vmatmul.f32.vlgmr.msrb.gmra.mxu3 %v4208_v47  ;;  %v5858_v47 = vld [vmem:[%s11518_s5 + $0x1cf8] sm:$0xff] }
 0x3bb   :  { %4292 = vmatpush.msrb.mxu0 %v5791_v18  ;;  %4312 = vmatpush.msrb.mxu1 %v5792_v59  ;;  %v5795_v18 = vld [vmem:[%s11518_s5 + $0x1b00] sm:$0xff]  ;;  %v5796_v59 = vld [vmem:[%s11518_s5 + $0x1b08] sm:$0xff] }
 0x3bc   :  { %4372 = vmatpush.msra.mxu2 %v5825_v39  ;;  %4392 = vmatpush.msra.mxu3 %v5826_v57  ;;  %v4370_v39 = vrot.slane %v10675_v63, 3  ;;  %v5855_v57 = vld [vmem:[%s11518_s5 + $0x1ce0] sm:$0xff] }
 0x3bd   :  { %4293 = vmatpush.msrb.mxu0 %v5789_v5  ;;  %4313 = vmatpush.msrb.mxu1 %v5790_v6  ;;  %v5856_v5 = vld [vmem:[%s11518_s5 + $0x1ce8] sm:$0xff]  ;;  %v5889_v6 = vld [vmem:[%s11518_s5 + $0x1df0] sm:$0xff] }
 0x3be   :  { %4373 = vmatpush.msra.mxu2 %v5823_v11  ;;  %4393 = vmatpush.msra.mxu3 %v5824_v3  ;;  %v5890_v11 = vld [vmem:[%s11518_s5 + $0x1df8] sm:$0xff]  ;;  %v5853_v3 = vld [vmem:[%s11518_s5 + $0x1cd0] sm:$0xff] }
 0x3bf   :  { %4294 = vmatpush.msrb.mxu0 %v5787_v50  ;;  %4314 = vmatpush.msrb.mxu1 %v5788_v13  ;;  %v5854_v50 = vld [vmem:[%s11518_s5 + $0x1cd8] sm:$0xff]  ;;  %v5887_v13 = vld [vmem:[%s11518_s5 + $0x1de0] sm:$0xff] }
 0x3c0   :  { %4374 = vmatpush.msra.mxu2 %v5821_v8  ;;  %4394 = vmatpush.msra.mxu3 %v5822_v2  ;;  %v5888_v8 = vld [vmem:[%s11518_s5 + $0x1de8] sm:$0xff]  ;;  %v5851_v2 = vld [vmem:[%s11518_s5 + $0x1cc0] sm:$0xff] }
 0x3c1   :  { %4295 = vmatpush.msrb.mxu0 %v5785_v16  ;;  %4315 = vmatpush.msrb.mxu1 %v5786_v37  ;;  %v5852_v16 = vld [vmem:[%s11518_s5 + $0x1cc8] sm:$0xff]  ;;  %v5885_v37 = vld [vmem:[%s11518_s5 + $0x1dd0] sm:$0xff] }
 0x3c2   :  { %4375 = vmatpush.msra.mxu2 %v5819_v17  ;;  %4395 = vmatpush.msra.mxu3 %v5820_v51  ;;  %v5886_v17 = vld [vmem:[%s11518_s5 + $0x1dd8] sm:$0xff]  ;;  %v5849_v51 = vld [vmem:[%s11518_s5 + $0x1cb0] sm:$0xff] }
 0x3c3   :  { %4296 = vmatpush.msrb.mxu0 %v5783_v19  ;;  %4316 = vmatpush.msrb.mxu1 %v5784_v20  ;;  %v5850_v19 = vld [vmem:[%s11518_s5 + $0x1cb8] sm:$0xff]  ;;  %v5883_v20 = vld [vmem:[%s11518_s5 + $0x1dc0] sm:$0xff] }
 0x3c4   :  { %4376 = vmatpush.msra.mxu2 %v5817_v21  ;;  %4396 = vmatpush.msra.mxu3 %v5818_v42  ;;  %v5884_v21 = vld [vmem:[%s11518_s5 + $0x1dc8] sm:$0xff]  ;;  %v5847_v42 = vld [vmem:[%s11518_s5 + $0x1ca0] sm:$0xff] }
 0x3c5   :  { %4297 = vmatpush.msrb.mxu0 %v5781_v26  ;;  %4317 = vmatpush.msrb.mxu1 %v5782_v40  ;;  %v5848_v26 = vld [vmem:[%s11518_s5 + $0x1ca8] sm:$0xff]  ;;  %v5881_v40 = vld [vmem:[%s11518_s5 + $0x1db0] sm:$0xff] }
 0x3c6   :  { %4377 = vmatpush.msra.mxu2 %v5815_v43  ;;  %4397 = vmatpush.msra.mxu3 %v5816_v23  ;;  %v5882_v43 = vld [vmem:[%s11518_s5 + $0x1db8] sm:$0xff]  ;;  %v5845_v23 = vld [vmem:[%s11518_s5 + $0x1c90] sm:$0xff] }
 0x3c7   :  { %4298 = vmatpush.msrb.mxu0 %v5779_v0  ;;  %4318 = vmatpush.msrb.mxu1 %v5780_v44  ;;  %v5846_v0 = vld [vmem:[%s11518_s5 + $0x1c98] sm:$0xff]  ;;  %v5879_v44 = vld [vmem:[%s11518_s5 + $0x1da0] sm:$0xff] }
 0x3c8   :  { %4378 = vmatpush.msra.mxu2 %v5813_v29  ;;  %4398 = vmatpush.msra.mxu3 %v5814_v22  ;;  %v5880_v29 = vld [vmem:[%s11518_s5 + $0x1da8] sm:$0xff]  ;;  %v5843_v22 = vld [vmem:[%s11518_s5 + $0x1c80] sm:$0xff] }
 0x3c9   :  { %4299 = vmatpush.msrb.mxu0 %v5777_v31  ;;  %4319 = vmatpush.msrb.mxu1 %v5778_v1  ;;  %v5844_v31 = vld [vmem:[%s11518_s5 + $0x1c88] sm:$0xff]  ;;  %v5877_v1 = vld [vmem:[%s11518_s5 + $0x1d90] sm:$0xff] }
 0x3ca   :  { %4379 = vmatpush.msra.mxu2 %v5811_v10  ;;  %4399 = vmatpush.msra.mxu3 %v5812_v12  ;;  %v5878_v10 = vld [vmem:[%s11518_s5 + $0x1d98] sm:$0xff]  ;;  %v5841_v12 = vld [vmem:[%s11518_s5 + $0x1c70] sm:$0xff] }
 0x3cb   :  { %4300 = vmatpush.msrb.mxu0 %v5775_v15  ;;  %4320 = vmatpush.msrb.mxu1 %v5776_v49  ;;  %v5842_v15 = vld [vmem:[%s11518_s5 + $0x1c78] sm:$0xff]  ;;  %v5875_v49 = vld [vmem:[%s11518_s5 + $0x1d80] sm:$0xff] }
 0x3cc   :  { %4380 = vmatpush.msra.mxu2 %v5809_v32  ;;  %4400 = vmatpush.msra.mxu3 %v5810_v35  ;;  %v5876_v32 = vld [vmem:[%s11518_s5 + $0x1d88] sm:$0xff]  ;;  %v5839_v35 = vld [vmem:[%s11518_s5 + $0x1c60] sm:$0xff] }
 0x3cd   :  { %4301 = vmatpush.msrb.mxu0 %v5773_v28  ;;  %4321 = vmatpush.msrb.mxu1 %v5774_v62  ;;  %v5840_v28 = vld [vmem:[%s11518_s5 + $0x1c68] sm:$0xff]  ;;  %v5873_v62 = vld [vmem:[%s11518_s5 + $0x1d70] sm:$0xff] }
 0x3ce   :  { %4381 = vmatpush.msra.mxu2 %v5807_v34  ;;  %4401 = vmatpush.msra.mxu3 %v5808_v36  ;;  %v5874_v34 = vld [vmem:[%s11518_s5 + $0x1d78] sm:$0xff]  ;;  %v5837_v36 = vld [vmem:[%s11518_s5 + $0x1c50] sm:$0xff] }
 0x3cf   :  { %4302 = vmatpush.msrb.mxu0 %v5771_v9  ;;  %4322 = vmatpush.msrb.mxu1 %v5772_v38  ;;  %v5838_v9 = vld [vmem:[%s11518_s5 + $0x1c58] sm:$0xff]  ;;  %v5871_v38 = vld [vmem:[%s11518_s5 + $0x1d60] sm:$0xff] }
 0x3d0   :  { %4382 = vmatpush.msra.mxu2 %v5805_v41  ;;  %4402 = vmatpush.msra.mxu3 %v5806_v61  ;;  %v5872_v41 = vld [vmem:[%s11518_s5 + $0x1d68] sm:$0xff]  ;;  %v5835_v61 = vld [vmem:[%s11518_s5 + $0x1c40] sm:$0xff] }
 0x3d1   :  { %4303 = vmatpush.msrb.mxu0 %v5769_v4  ;;  %4323 = vmatpush.msrb.mxu1 %v5770_v30  ;;  %v5836_v4 = vld [vmem:[%s11518_s5 + $0x1c48] sm:$0xff]  ;;  %v5869_v30 = vld [vmem:[%s11518_s5 + $0x1d50] sm:$0xff] }
 0x3d2   :  { %4383 = vmatpush.msra.mxu2 %v5803_v60  ;;  %4403 = vmatpush.msra.mxu3 %v5804_v14  ;;  %v5870_v60 = vld [vmem:[%s11518_s5 + $0x1d58] sm:$0xff]  ;;  %v5833_v14 = vld [vmem:[%s11518_s5 + $0x1c30] sm:$0xff] }
 0x3d3   :  { %4304 = vmatpush.msrb.mxu0 %v5767_v48  ;;  %4324 = vmatpush.msrb.mxu1 %v5768_v24  ;;  %v5834_v48 = vld [vmem:[%s11518_s5 + $0x1c38] sm:$0xff]  ;;  %v5867_v24 = vld [vmem:[%s11518_s5 + $0x1d40] sm:$0xff] }
 0x3d4   :  { %4384 = vmatpush.msra.mxu2 %v5801_v46  ;;  %4404 = vmatpush.msra.mxu3 %v5802_v45  ;;  %v5868_v46 = vld [vmem:[%s11518_s5 + $0x1d48] sm:$0xff]  ;;  %v5831_v45 = vld [vmem:[%s11518_s5 + $0x1c20] sm:$0xff] }
 0x3d5   :  { %4305 = vmatpush.msrb.mxu0 %v5765_v55  ;;  %4325 = vmatpush.msrb.mxu1 %v5766_v7  ;;  %v5832_v55 = vld [vmem:[%s11518_s5 + $0x1c28] sm:$0xff]  ;;  %v5865_v7 = vld [vmem:[%s11518_s5 + $0x1d30] sm:$0xff] }
 0x3d6   :  { %4385 = vmatpush.msra.mxu2 %v5799_v27  ;;  %4405 = vmatpush.msra.mxu3 %v5800_v53  ;;  %v5866_v27 = vld [vmem:[%s11518_s5 + $0x1d38] sm:$0xff]  ;;  %v5829_v53 = vld [vmem:[%s11518_s5 + $0x1c10] sm:$0xff] }
 0x3d7   :  { %4306 = vmatpush.msrb.mxu0 %v5763_v33  ;;  %4326 = vmatpush.msrb.mxu1 %v5764_v25  ;;  %v5830_v33 = vld [vmem:[%s11518_s5 + $0x1c18] sm:$0xff]  ;;  %v5863_v25 = vld [vmem:[%s11518_s5 + $0x1d20] sm:$0xff] }
 0x3d8   :  { %4386 = vmatpush.msra.mxu2 %v5797_v54  ;;  %4406 = vmatpush.msra.mxu3 %v5798_v52  ;;  %v5864_v54 = vld [vmem:[%s11518_s5 + $0x1d28] sm:$0xff]  ;;  %v5827_v52 = vld [vmem:[%s11518_s5 + $0x1c00] sm:$0xff] }
 0x3d9   :  { %4307 = vmatmul.f32.vlgmr.msrb.gmra.mxu0 %v4289_v56  ;;  %4327 = vmatmul.f32.vlgmr.msrb.gmra.mxu1 %v4289_v56  ;;  %v5828_v56 = vld [vmem:[%s11518_s5 + $0x1c08] sm:$0xff] }
 0x3da   :  { %4453 = vmatpush.msra.mxu0 %v5857_v58  ;;  %4473 = vmatpush.msra.mxu1 %v5858_v47  ;;  %v5861_v58 = vld [vmem:[%s11518_s5 + $0x1d10] sm:$0xff]  ;;  %v5862_v47 = vld [vmem:[%s11518_s5 + $0x1d18] sm:$0xff] }
 0x3db   :  { %4387 = vmatpush.msra.mxu2 %v5795_v18  ;;  %4407 = vmatpush.msra.mxu3 %v5796_v59  ;;  %v4451_v18 = vrot.slane %v10675_v63, 4  ;;  %v5921_v59 = vld [vmem:[%s11518_s5 + $0x1ef0] sm:$0xff] }
 0x3dc   :  { %4388 = vmatmul.f32.vlgmr.msra.gmra.mxu2 %v4370_v39  ;;  %4408 = vmatmul.f32.vlgmr.msra.gmra.mxu3 %v4370_v39  ;;  %v5922_v39 = vld [vmem:[%s11518_s5 + $0x1ef8] sm:$0xff] }
 0x3dd   :  { %4454 = vmatpush.msra.mxu0 %v5855_v57  ;;  %4474 = vmatpush.msra.mxu1 %v5856_v5  ;;  %v5859_v57 = vld [vmem:[%s11518_s5 + $0x1d00] sm:$0xff]  ;;  %v5860_v5 = vld [vmem:[%s11518_s5 + $0x1d08] sm:$0xff] }
 0x3de   :  { %4534 = vmatpush.msrb.mxu2 %v5889_v6  ;;  %4554 = vmatpush.msrb.mxu3 %v5890_v11  ;;  %v4532_v6 = vrot.slane %v10675_v63, 5  ;;  %v5919_v11 = vld [vmem:[%s11518_s5 + $0x1ee0] sm:$0xff] }
 0x3df   :  { %4455 = vmatpush.msra.mxu0 %v5853_v3  ;;  %4475 = vmatpush.msra.mxu1 %v5854_v50  ;;  %v5920_v3 = vld [vmem:[%s11518_s5 + $0x1ee8] sm:$0xff]  ;;  %v5953_v50 = vld [vmem:[%s11518_s5 + $0x1ff0] sm:$0xff] }
 0x3e0   :  { %4535 = vmatpush.msrb.mxu2 %v5887_v13  ;;  %4555 = vmatpush.msrb.mxu3 %v5888_v8  ;;  %v5954_v13 = vld [vmem:[%s11518_s5 + $0x1ff8] sm:$0xff]  ;;  %v5917_v8 = vld [vmem:[%s11518_s5 + $0x1ed0] sm:$0xff] }
 0x3e1   :  { %4456 = vmatpush.msra.mxu0 %v5851_v2  ;;  %4476 = vmatpush.msra.mxu1 %v5852_v16  ;;  %v5918_v2 = vld [vmem:[%s11518_s5 + $0x1ed8] sm:$0xff]  ;;  %v5951_v16 = vld [vmem:[%s11518_s5 + $0x1fe0] sm:$0xff] }
 0x3e2   :  { %4536 = vmatpush.msrb.mxu2 %v5885_v37  ;;  %4556 = vmatpush.msrb.mxu3 %v5886_v17  ;;  %v5952_v37 = vld [vmem:[%s11518_s5 + $0x1fe8] sm:$0xff]  ;;  %v5915_v17 = vld [vmem:[%s11518_s5 + $0x1ec0] sm:$0xff] }
 0x3e3   :  { %4457 = vmatpush.msra.mxu0 %v5849_v51  ;;  %4477 = vmatpush.msra.mxu1 %v5850_v19  ;;  %v5916_v51 = vld [vmem:[%s11518_s5 + $0x1ec8] sm:$0xff]  ;;  %v5949_v19 = vld [vmem:[%s11518_s5 + $0x1fd0] sm:$0xff] }
 0x3e4   :  { %4537 = vmatpush.msrb.mxu2 %v5883_v20  ;;  %4557 = vmatpush.msrb.mxu3 %v5884_v21  ;;  %v5950_v20 = vld [vmem:[%s11518_s5 + $0x1fd8] sm:$0xff]  ;;  %v5913_v21 = vld [vmem:[%s11518_s5 + $0x1eb0] sm:$0xff] }
 0x3e5   :  { %4458 = vmatpush.msra.mxu0 %v5847_v42  ;;  %4478 = vmatpush.msra.mxu1 %v5848_v26  ;;  %v5914_v42 = vld [vmem:[%s11518_s5 + $0x1eb8] sm:$0xff]  ;;  %v5947_v26 = vld [vmem:[%s11518_s5 + $0x1fc0] sm:$0xff] }
 0x3e6   :  { %4538 = vmatpush.msrb.mxu2 %v5881_v40  ;;  %4558 = vmatpush.msrb.mxu3 %v5882_v43  ;;  %v5948_v40 = vld [vmem:[%s11518_s5 + $0x1fc8] sm:$0xff]  ;;  %v5911_v43 = vld [vmem:[%s11518_s5 + $0x1ea0] sm:$0xff] }
 0x3e7   :  { %4459 = vmatpush.msra.mxu0 %v5845_v23  ;;  %4479 = vmatpush.msra.mxu1 %v5846_v0  ;;  %v5912_v23 = vld [vmem:[%s11518_s5 + $0x1ea8] sm:$0xff]  ;;  %v5945_v0 = vld [vmem:[%s11518_s5 + $0x1fb0] sm:$0xff] }
 0x3e8   :  { %4539 = vmatpush.msrb.mxu2 %v5879_v44  ;;  %4559 = vmatpush.msrb.mxu3 %v5880_v29  ;;  %v5946_v44 = vld [vmem:[%s11518_s5 + $0x1fb8] sm:$0xff]  ;;  %v5909_v29 = vld [vmem:[%s11518_s5 + $0x1e90] sm:$0xff] }
 0x3e9   :  { %4460 = vmatpush.msra.mxu0 %v5843_v22  ;;  %4480 = vmatpush.msra.mxu1 %v5844_v31  ;;  %v5910_v22 = vld [vmem:[%s11518_s5 + $0x1e98] sm:$0xff]  ;;  %v5943_v31 = vld [vmem:[%s11518_s5 + $0x1fa0] sm:$0xff] }
 0x3ea   :  { %4540 = vmatpush.msrb.mxu2 %v5877_v1  ;;  %4560 = vmatpush.msrb.mxu3 %v5878_v10  ;;  %v5944_v1 = vld [vmem:[%s11518_s5 + $0x1fa8] sm:$0xff]  ;;  %v5907_v10 = vld [vmem:[%s11518_s5 + $0x1e80] sm:$0xff] }
 0x3eb   :  { %4461 = vmatpush.msra.mxu0 %v5841_v12  ;;  %4481 = vmatpush.msra.mxu1 %v5842_v15  ;;  %v5908_v12 = vld [vmem:[%s11518_s5 + $0x1e88] sm:$0xff]  ;;  %v5941_v15 = vld [vmem:[%s11518_s5 + $0x1f90] sm:$0xff] }
 0x3ec   :  { %4541 = vmatpush.msrb.mxu2 %v5875_v49  ;;  %4561 = vmatpush.msrb.mxu3 %v5876_v32  ;;  %v5942_v49 = vld [vmem:[%s11518_s5 + $0x1f98] sm:$0xff]  ;;  %v5905_v32 = vld [vmem:[%s11518_s5 + $0x1e70] sm:$0xff] }
 0x3ed   :  { %4462 = vmatpush.msra.mxu0 %v5839_v35  ;;  %4482 = vmatpush.msra.mxu1 %v5840_v28  ;;  %v5906_v35 = vld [vmem:[%s11518_s5 + $0x1e78] sm:$0xff]  ;;  %v5939_v28 = vld [vmem:[%s11518_s5 + $0x1f80] sm:$0xff] }
 0x3ee   :  { %4542 = vmatpush.msrb.mxu2 %v5873_v62  ;;  %4562 = vmatpush.msrb.mxu3 %v5874_v34  ;;  %v5940_v62 = vld [vmem:[%s11518_s5 + $0x1f88] sm:$0xff]  ;;  %v5903_v34 = vld [vmem:[%s11518_s5 + $0x1e60] sm:$0xff] }
 0x3ef   :  { %4463 = vmatpush.msra.mxu0 %v5837_v36  ;;  %4483 = vmatpush.msra.mxu1 %v5838_v9  ;;  %v5904_v36 = vld [vmem:[%s11518_s5 + $0x1e68] sm:$0xff]  ;;  %v5937_v9 = vld [vmem:[%s11518_s5 + $0x1f70] sm:$0xff] }
 0x3f0   :  { %4543 = vmatpush.msrb.mxu2 %v5871_v38  ;;  %4563 = vmatpush.msrb.mxu3 %v5872_v41  ;;  %v5938_v38 = vld [vmem:[%s11518_s5 + $0x1f78] sm:$0xff]  ;;  %v5901_v41 = vld [vmem:[%s11518_s5 + $0x1e50] sm:$0xff] }
 0x3f1   :  { %4464 = vmatpush.msra.mxu0 %v5835_v61  ;;  %4484 = vmatpush.msra.mxu1 %v5836_v4  ;;  %v5902_v61 = vld [vmem:[%s11518_s5 + $0x1e58] sm:$0xff]  ;;  %v5935_v4 = vld [vmem:[%s11518_s5 + $0x1f60] sm:$0xff] }
 0x3f2   :  { %4544 = vmatpush.msrb.mxu2 %v5869_v30  ;;  %4564 = vmatpush.msrb.mxu3 %v5870_v60  ;;  %v5936_v30 = vld [vmem:[%s11518_s5 + $0x1f68] sm:$0xff]  ;;  %v5899_v60 = vld [vmem:[%s11518_s5 + $0x1e40] sm:$0xff] }
 0x3f3   :  { %4465 = vmatpush.msra.mxu0 %v5833_v14  ;;  %4485 = vmatpush.msra.mxu1 %v5834_v48  ;;  %v5900_v14 = vld [vmem:[%s11518_s5 + $0x1e48] sm:$0xff]  ;;  %v5933_v48 = vld [vmem:[%s11518_s5 + $0x1f50] sm:$0xff] }
 0x3f4   :  { %4545 = vmatpush.msrb.mxu2 %v5867_v24  ;;  %4565 = vmatpush.msrb.mxu3 %v5868_v46  ;;  %v5934_v24 = vld [vmem:[%s11518_s5 + $0x1f58] sm:$0xff]  ;;  %v5897_v46 = vld [vmem:[%s11518_s5 + $0x1e30] sm:$0xff] }
 0x3f5   :  { %4466 = vmatpush.msra.mxu0 %v5831_v45  ;;  %4486 = vmatpush.msra.mxu1 %v5832_v55  ;;  %v5898_v45 = vld [vmem:[%s11518_s5 + $0x1e38] sm:$0xff]  ;;  %v5931_v55 = vld [vmem:[%s11518_s5 + $0x1f40] sm:$0xff] }
 0x3f6   :  { %4546 = vmatpush.msrb.mxu2 %v5865_v7  ;;  %4566 = vmatpush.msrb.mxu3 %v5866_v27  ;;  %v5932_v7 = vld [vmem:[%s11518_s5 + $0x1f48] sm:$0xff]  ;;  %v5895_v27 = vld [vmem:[%s11518_s5 + $0x1e20] sm:$0xff] }
 0x3f7   :  { %4467 = vmatpush.msra.mxu0 %v5829_v53  ;;  %4487 = vmatpush.msra.mxu1 %v5830_v33  ;;  %v5896_v53 = vld [vmem:[%s11518_s5 + $0x1e28] sm:$0xff]  ;;  %v5929_v33 = vld [vmem:[%s11518_s5 + $0x1f30] sm:$0xff] }
 0x3f8   :  { %4547 = vmatpush.msrb.mxu2 %v5863_v25  ;;  %4567 = vmatpush.msrb.mxu3 %v5864_v54  ;;  %v5930_v25 = vld [vmem:[%s11518_s5 + $0x1f38] sm:$0xff]  ;;  %v5893_v54 = vld [vmem:[%s11518_s5 + $0x1e10] sm:$0xff] }
 0x3f9   :  { %4468 = vmatpush.msra.mxu0 %v5827_v52  ;;  %4488 = vmatpush.msra.mxu1 %v5828_v56  ;;  %v5894_v52 = vld [vmem:[%s11518_s5 + $0x1e18] sm:$0xff]  ;;  %v5927_v56 = vld [vmem:[%s11518_s5 + $0x1f20] sm:$0xff] }
 0x3fa   :  { %4548 = vmatpush.msrb.mxu2 %v5861_v58  ;;  %4568 = vmatpush.msrb.mxu3 %v5862_v47  ;;  %v5928_v58 = vld [vmem:[%s11518_s5 + $0x1f28] sm:$0xff]  ;;  %v5891_v47 = vld [vmem:[%s11518_s5 + $0x1e00] sm:$0xff] }
 0x3fb   :  { %4469 = vmatmul.f32.vlgmr.msra.gmra.mxu0 %v4451_v18  ;;  %4489 = vmatmul.f32.vlgmr.msra.gmra.mxu1 %v4451_v18  ;;  %v5892_v18 = vld [vmem:[%s11518_s5 + $0x1e08] sm:$0xff] }
 0x3fc   :  { %4615 = vmatpush.msrb.mxu0 %v5921_v59  ;;  %4635 = vmatpush.msrb.mxu1 %v5922_v39  ;;  %v5925_v59 = vld [vmem:[%s11518_s5 + $0x1f10] sm:$0xff]  ;;  %v5926_v39 = vld [vmem:[%s11518_s5 + $0x1f18] sm:$0xff] }
 0x3fd   :  { %4549 = vmatpush.msrb.mxu2 %v5859_v57  ;;  %4569 = vmatpush.msrb.mxu3 %v5860_v5  ;;  %v4613_v57 = vrot.slane %v10675_v63, 6  ;;  %v5923_v5 = vld [vmem:[%s11518_s5 + $0x1f00] sm:$0xff] }
 0x3fe   :  { %4550 = vmatmul.f32.vlgmr.msrb.gmra.mxu2 %v4532_v6  ;;  %4570 = vmatmul.f32.vlgmr.msrb.gmra.mxu3 %v4532_v6  ;;  %v5924_v6 = vld [vmem:[%s11518_s5 + $0x1f08] sm:$0xff] }
 0x3ff   :  { %4616 = vmatpush.msrb.mxu0 %v5919_v11  ;;  %4636 = vmatpush.msrb.mxu1 %v5920_v3  ;;  %v4694_v11 = vrot.slane %v10675_v63, 7  ;;  %v2223_v3 = vpop.f32.mrf.mxu1 }
 0x400   :  { %4696 = vmatpush.msra.mxu2 %v5953_v50  ;;  %4716 = vmatpush.msra.mxu3 %v5954_v13  ;;  %v2203_v50 = vpop.f32.mrf.mxu0  ;;  %v2306_v13 = vpop.f32.mrf.mxu3 }
 0x401   :  { %4617 = vmatpush.msrb.mxu0 %v5917_v8  ;;  %4637 = vmatpush.msrb.mxu1 %v5918_v2  ;;  %v2286_v8 = vpop.f32.mrf.mxu2 }
 0x402   :  { %4697 = vmatpush.msra.mxu2 %v5951_v16  ;;  %4717 = vmatpush.msra.mxu3 %v5952_v37 }
 0x403   :  { %4618 = vmatpush.msrb.mxu0 %v5915_v17  ;;  %4638 = vmatpush.msrb.mxu1 %v5916_v51 }
 0x404   :  { %4698 = vmatpush.msra.mxu2 %v5949_v19  ;;  %4718 = vmatpush.msra.mxu3 %v5950_v20 }
 0x405   :  { %4619 = vmatpush.msrb.mxu0 %v5913_v21  ;;  %4639 = vmatpush.msrb.mxu1 %v5914_v42 }
 0x406   :  { %4699 = vmatpush.msra.mxu2 %v5947_v26  ;;  %4719 = vmatpush.msra.mxu3 %v5948_v40 }
 0x407   :  { %4620 = vmatpush.msrb.mxu0 %v5911_v43  ;;  %4640 = vmatpush.msrb.mxu1 %v5912_v23  ;;  %v2387_v2 = vpop.f32.mrf.mxu1 }
 0x408   :  { %4700 = vmatpush.msra.mxu2 %v5945_v0  ;;  %4720 = vmatpush.msra.mxu3 %v5946_v44  ;;  %v2367_v16 = vpop.f32.mrf.mxu0  ;;  %v2468_v37 = vpop.f32.mrf.mxu3 }
 0x409   :  { %4621 = vmatpush.msrb.mxu0 %v5909_v29  ;;  %4641 = vmatpush.msrb.mxu1 %v5910_v22  ;;  %v2448_v51 = vpop.f32.mrf.mxu2 }
 0x40a   :  { %4701 = vmatpush.msra.mxu2 %v5943_v31  ;;  %4721 = vmatpush.msra.mxu3 %v5944_v1 }
 0x40b   :  { %4622 = vmatpush.msrb.mxu0 %v5907_v10  ;;  %4642 = vmatpush.msrb.mxu1 %v5908_v12 }
 0x40c   :  { %4702 = vmatpush.msra.mxu2 %v5941_v15  ;;  %4722 = vmatpush.msra.mxu3 %v5942_v49 }
 0x40d   :  { %4623 = vmatpush.msrb.mxu0 %v5905_v32  ;;  %4643 = vmatpush.msrb.mxu1 %v5906_v35  ;;  %v2228_v35 = vrot.slane %v2223_v3, 7  ;;  %v4769_v3 = vld [vmem:[%s11520_s7 + $0xd0] sm:$0xff] }
 0x40e   :  { %4703 = vmatpush.msra.mxu2 %v5939_v28  ;;  %4723 = vmatpush.msra.mxu3 %v5940_v62 }
 0x40f   :  { %4624 = vmatpush.msrb.mxu0 %v5903_v34  ;;  %4644 = vmatpush.msrb.mxu1 %v5904_v36  ;;  %v11268_v17 = vpop.f32.mrf.mxu1  ;;  %v2311_v34 = vrot.slane %v2306_v13, 7 }
 0x410   :  { %4704 = vmatpush.msra.mxu2 %v5937_v9  ;;  %4724 = vmatpush.msra.mxu3 %v5938_v38  ;;  %v2529_v19 = vpop.f32.mrf.mxu0  ;;  %v11270_v20 = vpop.f32.mrf.mxu3  ;;  %v2153_v9 = vld [vmem:[%s11519_s6] sm:$0x3]  ;;  %v2230_v38 = vsel %vm2229_vm1, %v2203_v50, %v2228_v35 }
 0x411   :  { %4625 = vmatpush.msrb.mxu0 %v5901_v41  ;;  %4645 = vmatpush.msrb.mxu1 %v5902_v61  ;;  %v11274_v63 = vpop.f32.mrf.mxu2  ;;  %v2312_v61 = vsel %vm2229_vm1, %v2286_v8, %v2311_v34 }
 0x412   :  { %4705 = vmatpush.msra.mxu2 %v5935_v4  ;;  %4725 = vmatpush.msra.mxu3 %v5936_v30  ;;  %v4758_v4 = vld [vmem:[%s11520_s7 + $0x78] sm:$0xff] }
 0x413   :  { %4626 = vmatpush.msrb.mxu0 %v5899_v60  ;;  %4646 = vmatpush.msrb.mxu1 %v5900_v14  ;;  %v4774_v30 = vld [vmem:[%s11520_s7 + $0xf8] sm:$0xff]  ;;  %v4757_v60 = vld [vmem:[%s11520_s7 + $0x70] sm:$0xff]  ;;  %v2232_v14 = vadd.f32 %v2230_v38, %v2153_v9 }
 0x414   :  { %4706 = vmatpush.msra.mxu2 %v5933_v48  ;;  %4726 = vmatpush.msra.mxu3 %v5934_v24  ;;  %v4773_v48 = vld [vmem:[%s11520_s7 + $0xf0] sm:$0xff]  ;;  %v2392_v24 = vrot.slane %v2387_v2, 7  ;;  %v4752_v2 = vld [vmem:[%s11520_s7 + $0x48] sm:$0xff] }
 0x415   :  { %4627 = vmatpush.msrb.mxu0 %v5897_v46  ;;  %4647 = vmatpush.msrb.mxu1 %v5898_v45  ;;  %v2473_v46 = vrot.slane %v2468_v37, 7  ;;  %v4756_v45 = vld [vmem:[%s11520_s7 + $0x68] sm:$0xff] }
 0x416   :  { %4707 = vmatpush.msra.mxu2 %v5931_v55  ;;  %4727 = vmatpush.msra.mxu3 %v5932_v7  ;;  %v4772_v55 = vld [vmem:[%s11520_s7 + $0xe8] sm:$0xff]  ;;  %v2314_v7 = vadd.f32 %v2312_v61, %v2232_v14 }
 0x417   :  { %4628 = vmatpush.msrb.mxu0 %v5895_v27  ;;  %4648 = vmatpush.msrb.mxu1 %v5896_v53  ;;  %v11272_v21 = vpop.f32.mrf.mxu1 }
 0x418   :  { %4708 = vmatpush.msra.mxu2 %v5929_v33  ;;  %4728 = vmatpush.msra.mxu3 %v5930_v25  ;;  %v11276_v42 = vpop.f32.mrf.mxu0  ;;  %v11278_v26 = vpop.f32.mrf.mxu3  ;;  %v2554_v33 = vrot.slane %v11268_v17, 7  ;;  %v4755_v25 = vld [vmem:[%s11520_s7 + $0x60] sm:$0xff] }
 0x419   :  { %4629 = vmatpush.msrb.mxu0 %v5893_v54  ;;  %4649 = vmatpush.msrb.mxu1 %v5894_v52  ;;  %v11282_v43 = vpop.f32.mrf.mxu2  ;;  %v4771_v54 = vld [vmem:[%s11520_s7 + $0xe0] sm:$0xff]  ;;  %v2797_v8 = vrot.slane %v11278_v26, 7 }
 0x41a   :  { %4709 = vmatpush.msra.mxu2 %v5927_v56  ;;  %4729 = vmatpush.msra.mxu3 %v5928_v58  ;;  %v2393_v56 = vsel %vm2229_vm1, %v2367_v16, %v2392_v24  ;;  %v2474_v58 = vsel %vm2229_vm1, %v2448_v51, %v2473_v46  ;;  %v4768_v16 = vld [vmem:[%s11520_s7 + $0xc8] sm:$0xff]  ;;  %v4750_v46 = vld [vmem:[%s11520_s7 + $0x38] sm:$0xff] }
 0x41b   :  { %4630 = vmatpush.msrb.mxu0 %v5891_v47  ;;  %4650 = vmatpush.msrb.mxu1 %v5892_v18  ;;  %v2635_v47 = vrot.slane %v11270_v20, 7  ;;  %v4754_v18 = vld [vmem:[%s11520_s7 + $0x58] sm:$0xff]  ;;  %v2798_v26 = vsel %vm2229_vm1, %v11282_v43, %v2797_v8 }
 0x41c   :  { %4710 = vmatpush.msra.mxu2 %v5925_v59  ;;  %4730 = vmatpush.msra.mxu3 %v5926_v39  ;;  %v4770_v59 = vld [vmem:[%s11520_s7 + $0xd8] sm:$0xff]  ;;  %v2395_v39 = vadd.f32 %v2393_v56, %v2314_v7  ;;  %v4749_v7 = vld [vmem:[%s11520_s7 + $0x30] sm:$0xff] }
 0x41d   :  { %4631 = vmatmul.f32.vlgmr.msrb.gmra.mxu0 %v4613_v57  ;;  %4651 = vmatmul.f32.vlgmr.msrb.gmra.mxu1 %v4613_v57  ;;  %v2636_v13 = vsel %vm2229_vm1, %v11274_v63, %v2635_v47 }
 0x41e   :  { %4711 = vmatpush.msra.mxu2 %v5923_v5  ;;  %4731 = vmatpush.msra.mxu3 %v5924_v6  ;;  %v2555_v5 = vsel %vm2229_vm1, %v2529_v19, %v2554_v33  ;;  %v2716_v6 = vrot.slane %v11272_v21, 7  ;;  %v2476_v50 = vadd.f32 %v2474_v58, %v2395_v39  ;;  %v4765_v33 = vld [vmem:[%s11520_s7 + $0xb0] sm:$0xff] }
 0x41f   :  { %4712 = vmatmul.f32.vlgmr.msra.gmra.mxu2 %v4694_v11  ;;  %4732 = vmatmul.f32.vlgmr.msra.gmra.mxu3 %v4694_v11  ;;  %v11280_v40 = vpop.f32.mrf.mxu1  ;;  %v4753_v11 = vld [vmem:[%s11520_s7 + $0x50] sm:$0xff] }
 0x420   :  { %v11284_v23 = vpop.f32.mrf.mxu0  ;;  %v11286_v0 = vpop.f32.mrf.mxu3  ;;  %4781 = vmatpush.msra.mxu0 %v4758_v4  ;;  %4801 = vmatpush.msra.mxu1 %v4774_v30  ;;  %v2557_v37 = vadd.f32 %v2555_v5, %v2476_v50  ;;  %v2717_v19 = vsel %vm2229_vm1, %v11276_v42, %v2716_v6  ;;  %v2876_v20 = vrot.slane %v11280_v40, 7  ;;  %v4763_v5 = vld [vmem:[%s11520_s7 + $0xa0] sm:$0xff]  ;;  %v4762_v50 = vld [vmem:[%s11520_s7 + $0x98] sm:$0xff] }
 0x421   :  { %v11290_v29 = vpop.f32.mrf.mxu2  ;;  %v2958_v35 = vrot.slane %v11286_v0, 7 }
 0x422   :  { %4782 = vmatpush.msra.mxu0 %v4757_v60  ;;  %4802 = vmatpush.msra.mxu1 %v4773_v48  ;;  %v2638_v21 = vadd.f32 %v2636_v13, %v2557_v37  ;;  %v2877_v38 = vsel %vm2229_vm1, %v11284_v23, %v2876_v20  ;;  %v4744_v20 = vld [vmem:[%s11520_s7 + $0x8] sm:$0xff] }
 0x423   :  { %v2959_v40 = vsel %vm2229_vm1, %v11290_v29, %v2958_v35  ;;  %v4767_v29 = vld [vmem:[%s11520_s7 + $0xc0] sm:$0xff] }
 0x424   :  { %4783 = vmatpush.msra.mxu0 %v4756_v45  ;;  %4803 = vmatpush.msra.mxu1 %v4772_v55  ;;  %v2719_v34 = vadd.f32 %v2717_v19, %v2638_v21  ;;  %v4766_v45 = vld [vmem:[%s11520_s7 + $0xb8] sm:$0xff]  ;;  %v4760_v21 = vld [vmem:[%s11520_s7 + $0x88] sm:$0xff] }
 0x426   :  { %4784 = vmatpush.msra.mxu0 %v4755_v25  ;;  %4804 = vmatpush.msra.mxu1 %v4771_v54  ;;  %v2800_v61 = vadd.f32 %v2798_v26, %v2719_v34  ;;  %v4748_v25 = vld [vmem:[%s11520_s7 + $0x28] sm:$0xff]  ;;  %v4743_v34 = vld [vmem:[%s11520_s7] sm:$0xff] }
 0x427   :  { %v11288_v44 = vpop.f32.mrf.mxu1  ;;  %v4764_v54 = vld [vmem:[%s11520_s7 + $0xa8] sm:$0xff] }
 0x428   :  { %v11292_v22 = vpop.f32.mrf.mxu0  ;;  %v11294_v31 = vpop.f32.mrf.mxu3  ;;  %4785 = vmatpush.msra.mxu0 %v4754_v18  ;;  %4805 = vmatpush.msra.mxu1 %v4770_v59  ;;  %v3039_v42 = vrot.slane %v11288_v44, 7  ;;  %v2879_v30 = vadd.f32 %v2877_v38, %v2800_v61  ;;  %v4751_v44 = vld [vmem:[%s11520_s7 + $0x40] sm:$0xff] }
 0x429   :  { %v11298_v10 = vpop.f32.mrf.mxu2  ;;  %v3120_v4 = vrot.slane %v11294_v31, 7  ;;  %v4759_v38 = vld [vmem:[%s11520_s7 + $0x80] sm:$0xff] }
 0x42a   :  { %4786 = vmatpush.msra.mxu0 %v4753_v11  ;;  %4806 = vmatpush.msra.mxu1 %v4769_v3  ;;  %v3040_v0 = vsel %vm2229_vm1, %v11292_v22, %v3039_v42  ;;  %v2961_v48 = vadd.f32 %v2959_v40, %v2879_v30  ;;  %v4746_v3 = vld [vmem:[%s11520_s7 + $0x18] sm:$0xff] }
 0x42b   :  { %v3121_v31 = vsel %vm2229_vm1, %v11298_v10, %v3120_v4 }
 0x42c   :  { %4787 = vmatpush.msra.mxu0 %v4752_v2  ;;  %4807 = vmatpush.msra.mxu1 %v4768_v16  ;;  %v3042_v22 = vadd.f32 %v3040_v0, %v2961_v48  ;;  %v4761_v2 = vld [vmem:[%s11520_s7 + $0x90] sm:$0xff] }
 0x42e   :  { %4788 = vmatpush.msra.mxu0 %v4751_v44  ;;  %4808 = vmatpush.msra.mxu1 %v4767_v29 }
 0x42f   :  { %v11296_v1 = vpop.f32.mrf.mxu1 }
 0x430   :  { %v11300_v12 = vpop.f32.mrf.mxu0  ;;  %v11302_v15 = vpop.f32.mrf.mxu3  ;;  %v3201_v14 = vrot.slane %v11296_v1, 7  ;;  %4789 = vmatpush.msra.mxu0 %v4750_v46  ;;  %4809 = vmatpush.msra.mxu1 %v4766_v45 }
 0x431   :  { %v11306_v32 = vpop.f32.mrf.mxu2  ;;  %v3282_v24 = vrot.slane %v11302_v15, 7  ;;  %v3123_v15 = vadd.f32 %v3121_v31, %v3042_v22 }
 0x432   :  { %v3202_v55 = vsel %vm2229_vm1, %v11300_v12, %v3201_v14  ;;  %4790 = vmatpush.msra.mxu0 %v4749_v7  ;;  %4810 = vmatpush.msra.mxu1 %v4765_v33 }
 0x433   :  { %v3283_v12 = vsel %vm2229_vm1, %v11306_v32, %v3282_v24  ;;  %v3204_v56 = vadd.f32 %v3202_v55, %v3123_v15 }
 0x434   :  { %4791 = vmatpush.msra.mxu0 %v4748_v25  ;;  %4811 = vmatpush.msra.mxu1 %v4764_v54 }
 0x435   :  { %v3285_v39 = vadd.f32 %v3283_v12, %v3204_v56 }
 0x436   :  { %4812 = vmatpush.msra.mxu1 %v4763_v5 }
 0x437   :  { %v11304_v49 = vpop.f32.mrf.mxu1 }
 0x438   :  { %v11308_v28 = vpop.f32.mrf.mxu0  ;;  %v11310_v62 = vpop.f32.mrf.mxu3  ;;  %v3363_v10 = vrot.slane %v11304_v49, 7  ;;  %4813 = vmatpush.msra.mxu1 %v4762_v50 }
 0x439   :  { %v11318_v41 = vpop.f32.mrf.mxu2  ;;  %v3444_v49 = vrot.slane %v11310_v62, 7  ;;  %v4747_v62 = vld [vmem:[%s11520_s7 + $0x20] sm:$0xff] }
 0x43a   :  { %v3364_v18 = vsel %vm2229_vm1, %v11308_v28, %v3363_v10  ;;  %4792 = vmatpush.msra.mxu0 %v4747_v62  ;;  %4814 = vmatpush.msra.mxu1 %v4761_v2 }
 0x43b   :  { %v3445_v6 = vsel %vm2229_vm1, %v11318_v41, %v3444_v49  ;;  %v3366_v28 = vadd.f32 %v3364_v18, %v3285_v39 }
 0x43c   :  { %4793 = vmatpush.msra.mxu0 %v4746_v3  ;;  %4815 = vmatpush.msra.mxu1 %v4760_v21 }
 0x43d   :  { %v3447_v41 = vadd.f32 %v3445_v6, %v3366_v28 }
 0x43e   :  { %4816 = vmatpush.msra.mxu1 %v4759_v38 }
 0x43f   :  { %v11312_v36 = vpop.f32.mrf.mxu1 }
 0x440   :  { %v11339_v27 = vpop.f32.mrf.mxu0  ;;  %v11341_v53 = vpop.f32.mrf.mxu3  ;;  %v3523_v59 = vrot.slane %v11312_v36, 7 }
 0x441   :  { %v11361_v57 = vpop.f32.mrf.mxu2  ;;  %v3605_v11 = vrot.slane %v11341_v53, 7  ;;  %v4745_v53 = vld [vmem:[%s11520_s7 + $0x10] sm:$0xff] }
 0x442   :  { %v3524_v13 = vsel %vm2229_vm1, %v11339_v27, %v3523_v59  ;;  %4794 = vmatpush.msra.mxu0 %v4745_v53 }
 0x443   :  { %v3606_v16 = vsel %vm2229_vm1, %v11361_v57, %v3605_v11  ;;  %v3526_v27 = vadd.f32 %v3524_v13, %v3447_v41 }
 0x444   :  { %4795 = vmatpush.msra.mxu0 %v4744_v20 }
 0x446   :  { %4796 = vmatpush.msra.mxu0 %v4743_v34 }
 0x447   :  { %v11350_v52 = vpop.f32.mrf.mxu1 }
 0x448   :  { %v11380_v17 = vpop.f32.mrf.mxu0  ;;  %v11382_v51 = vpop.f32.mrf.mxu3  ;;  %v3686_v8 = vrot.slane %v11350_v52, 7 }
 0x449   :  { %v11392_v9 = vpop.f32.mrf.mxu2  ;;  %v3767_v37 = vrot.slane %v11382_v51, 7  ;;  %v3608_v51 = vadd.f32 %v3606_v16, %v3526_v27  ;;  %v4775_v27 = vld [vmem:[%s11521_s8] sm:$0x1] }
 0x44a   :  { %v3687_v26 = vsel %vm2229_vm1, %v11380_v17, %v3686_v8 }
 0x44b   :  { %v3768_v42 = vsel %vm2229_vm1, %v11392_v9, %v3767_v37  ;;  %v3689_v17 = vadd.f32 %v3687_v26, %v3608_v51 }
 0x44d   :  { %v3770_v30 = vadd.f32 %v3768_v42, %v3689_v17 }
 0x44f   :  { %v11387_v63 = vpop.f32.mrf.mxu1 }
 0x450   :  { %v11400_v60 = vpop.f32.mrf.mxu0  ;;  %v11402_v43 = vpop.f32.mrf.mxu3  ;;  %v3848_v57 = vrot.slane %v11387_v63, 7 }
 0x451   :  { %v11418_v1 = vpop.f32.mrf.mxu2  ;;  %v3929_v61 = vrot.slane %v11402_v43, 7 }
 0x452   :  { %v3849_v40 = vsel %vm2229_vm1, %v11400_v60, %v3848_v57 }
 0x453   :  { %v3930_v0 = vsel %vm2229_vm1, %v11418_v1, %v3929_v61  ;;  %v3851_v48 = vadd.f32 %v3849_v40, %v3770_v30 }
 0x455   :  { %v3932_v31 = vadd.f32 %v3930_v0, %v3851_v48 }
 0x457   :  { %v11407_v23 = vpop.f32.mrf.mxu1 }
 0x458   :  { %v3985_v58 = vpop.f32.mrf.mxu0  ;;  %v4086_v47 = vpop.f32.mrf.mxu3  ;;  %v4010_v4 = vrot.slane %v11407_v23, 7 }
 0x459   :  { %v4066_v36 = vpop.f32.mrf.mxu2  ;;  %v4091_v14 = vrot.slane %v4086_v47, 7 }
 0x45a   :  { %v4011_v9 = vsel %vm2229_vm1, %v3985_v58, %v4010_v4 }
 0x45b   :  { %v4092_v22 = vsel %vm2229_vm1, %v4066_v36, %v4091_v14  ;;  %v4013_v45 = vadd.f32 %v4011_v9, %v3932_v31 }
 0x45d   :  { %v4094_v10 = vadd.f32 %v4092_v22, %v4013_v45 }
 0x45f   :  { %v4165_v32 = vpop.f32.mrf.mxu1 }
 0x460   :  { %v4145_v52 = vpop.f32.mrf.mxu0  ;;  %v4247_v19 = vpop.f32.mrf.mxu3  ;;  %v4170_v43 = vrot.slane %v4165_v32, 7 }
 0x461   :  { %v4227_v63 = vpop.f32.mrf.mxu2  ;;  %v4252_v46 = vrot.slane %v4247_v19, 7 }
 0x462   :  { %v4171_v23 = vsel %vm2229_vm1, %v4145_v52, %v4170_v43 }
 0x463   :  { %v4253_v1 = vsel %vm2229_vm1, %v4227_v63, %v4252_v46  ;;  %v4173_v7 = vadd.f32 %v4171_v23, %v4094_v10 }
 0x465   :  { %v4255_v54 = vadd.f32 %v4253_v1, %v4173_v7 }
 0x467   :  { %v4328_v35 = vpop.f32.mrf.mxu1 }
 0x468   :  { %v4308_v44 = vpop.f32.mrf.mxu0  ;;  %v4409_v29 = vpop.f32.mrf.mxu3  ;;  %v4333_v55 = vrot.slane %v4328_v35, 7 }
 0x469   :  { %v4389_v60 = vpop.f32.mrf.mxu2  ;;  %v4414_v15 = vrot.slane %v4409_v29, 7 }
 0x46a   :  { %v4334_v12 = vsel %vm2229_vm1, %v4308_v44, %v4333_v55 }
 0x46b   :  { %v4415_v58 = vsel %vm2229_vm1, %v4389_v60, %v4414_v15  ;;  %v4336_v18 = vadd.f32 %v4334_v12, %v4255_v54 }
 0x46d   :  { %v4417_v62 = vadd.f32 %v4415_v58, %v4336_v18 }
 0x478   :  { %v4490_v24 = vpop.f32.mrf.mxu1  ;;  %v4470_v33 = vpop.f32.mrf.mxu0 }
 0x479   :  { %v4495_v49 = vrot.slane %v4490_v24, 7 }
 0x47b   :  { %v4496_v39 = vsel %vm2229_vm1, %v4470_v33, %v4495_v49 }
 0x47c   :  { %v4498_v6 = vadd.f32 %v4496_v39, %v4417_v62 }
 0x481   :  { %v4571_v25 = vpop.f32.mrf.mxu3  ;;  %v4551_v59 = vpop.f32.mrf.mxu2 }
 0x482   :  { %v4576_v47 = vrot.slane %v4571_v25, 7 }
 0x484   :  { %v4577_v5 = vsel %vm2229_vm1, %v4551_v59, %v4576_v47 }
 0x485   :  { %v4579_v36 = vadd.f32 %v4577_v5, %v4498_v6 }
 0x49a   :  { %v4652_v56 = vpop.f32.mrf.mxu1  ;;  %v4632_v11 = vpop.f32.mrf.mxu0 }
 0x49b   :  { %v4657_v32 = vrot.slane %v4652_v56, 7 }
 0x49d   :  { %v4658_v28 = vsel %vm2229_vm1, %v4632_v11, %v4657_v32 }
 0x49e   :  { %v4660_v13 = vadd.f32 %v4658_v28, %v4579_v36 }
 0x4a2   :  { %v4733_v3 = vpop.f32.mrf.mxu3  ;;  %v4713_v8 = vpop.f32.mrf.mxu2 }
 0x4a3   :  { %v4738_v50 = vrot.slane %v4733_v3, 7 }
 0x4a5   :  { %v4739_v41 = vsel %vm2229_vm1, %v4713_v8, %v4738_v50 }
 0x4a6   :  { %v4741_v53 = vadd.f32 %v4739_v41, %v4660_v13 }
 0x4a8   :  { %v4742_v2 = vmax.f32 %v4741_v53, 0.0 }
 0x4aa   :  { %v4777_v16 = vperm.slane %v4742_v2, 0  ;;  %v4778_v37 = vperm.slane %v4742_v2, 1 }
 0x4ac   :  { %4797 = vmatmul.f32.vlgmr.msra.gmra.mxu0 %v4777_v16  ;;  %4817 = vmatmul.f32.vlgmr.msra.gmra.mxu1 %v4778_v37 }
 0x529   :  { %v4798_v52 = vpop.f32.mrf.mxu0  ;;  %v4818_v20 = vpop.f32.mrf.mxu1 }
 0x52a   :  { %v4799_v19 = vadd.f32 %v4798_v52, %v4775_v27 }
 0x52c   :  { %v4819_v21 = vadd.f32 %v4818_v20, %v4799_v19 }
 0x52e   :  { %4822 = vst.msk [vmem:[#allocation2] sm:$0x1] %vm4821_vm2, %v4819_v21 }
 0x52f   :  { %4833 = dma.vmem_to_hbm [thread:$0]  %s4829_s4, 16, %s4831_s27, [#allocation3]  }
 0x530   :  { %5992 = dma.done.wait [#allocation3], 16  }
 0x531   :  { %5993 = vsyncadd [#allocation3], 4294967280 }
 0x532   :  { %4838 = vsyncpa [#allocation3], 1 }

</bundles_post_ra>
